<compile_context>
chip_gen: v6e
topology: v6e:2x2x1
jax: 0.10.0
libtpu: 0.0.40
codegen_flags: <defaults>
</compile_context>

<pallas_src>
import jax
import jax.numpy as jnp
from jax.experimental import pallas as pl
from jax.experimental.pallas import tpu as pltpu


# ----------------------------- config ---------------------------------------
class Config:
    title_dim = 16          # embed size E
    max_title_len = 10      # words per title L
    num_titles = 10         # titles per day T
    window_len_titles = 5   # days per window W (== LSTM seq_len)
    n_filters_title = 32
    filter_sz_title = 3
    n_filters_day = 32
    filter_sz_day = 3
    tech_dim = 7
    n_hidden_LSTM = 32
    num_LSTM_layers = 1
    n_outputs = 2
    input_dim_LSTM = n_filters_day + tech_dim   # 39

# NOTE: num_titles == max_title_len and filter_sz_day == filter_sz_title so the
# module's (buggy) reuse of max_pool_title on the day-conv output still reduces
# the temporal dim to exactly 1 (a full-length max), as its .view(..., 1)
# assumes.  The kernel below relies on that full-length pool.


def _tree_max(vals):
    """Pairwise max-reduce a list of equal-shaped arrays (keeps dots independent)."""
    vals = list(vals)
    while len(vals) > 1:
        nxt = [jnp.maximum(vals[i], vals[i + 1]) for i in range(0, len(vals) - 1, 2)]
        if len(vals) % 2 == 1:
            nxt.append(vals[-1])
        vals = nxt
    return vals[0]


# ------------------------- fused forward kernel ------------------------------
def make_fused_kernel(cfg, B):
    E, L = cfg.title_dim, cfg.max_title_len
    T, W = cfg.num_titles, cfg.window_len_titles
    Ft, K1 = cfg.n_filters_title, cfg.filter_sz_title
    Fd, K2 = cfg.n_filters_day, cfg.filter_sz_day
    H = cfg.n_hidden_LSTM
    P1 = L - K1 + 1            # title-conv output length (fully max-pooled)
    P2 = T - K2 + 1            # day-conv output length (fully max-pooled)
    NT = T * W * B             # title samples, row order (t, w, b), b fastest
    NG = W * B                 # day groups, row order (w, b), b fastest
    f32 = jnp.float32

    def kernel(titles_ref, tech_ref, w1_ref, b1_ref, w2_ref, b2_ref,
               wihd_ref, wiht_ref, whh_ref, blstm_ref,
               wmdh_ref, wmdc_ref, bmd_ref, wout_ref, bout_ref, out_ref):
        # -------- title conv (valid, bias after pool) + max-pool + ReLU ------
        # titles_ref[j]: (NT, E) = embedding of word-position j of every title.
        # conv at output position p = sum_k X_{p+k} @ W1_k ; all partial
        # products are independent -> issued first so the MXU streams them.
        prod1 = {}
        for j in range(L):
            xj = titles_ref[j]                                    # (NT, E)
            for k in range(K1):
                if 0 <= j - k < P1:
                    prod1[(j, k)] = jnp.dot(xj, w1_ref[k],
                                            preferred_element_type=f32)
        conv1 = [sum(prod1[(p + k, k)] for k in range(K1)) for p in range(P1)]
        # per-filter bias commutes with the full-length max; ReLU after pool.
        title_feat = jnp.maximum(_tree_max(conv1) + b1_ref[...], 0.0)   # (NT, Ft)

        # -------- day conv + (reused title) max-pool + ReLU ------------------
        # rows of title_feat are (t, w, b)-ordered, so the per-title-position
        # channel slab for ALL day groups is a contiguous leading-axis slice.
        d_slices = [title_feat[t * NG:(t + 1) * NG, :] for t in range(T)]  # (NG, Ft)
        prod2 = {}
        for t in range(T):
            for k in range(K2):
                if 0 <= t - k < P2:
                    prod2[(t, k)] = jnp.dot(d_slices[t], w2_ref[k],
                                            preferred_element_type=f32)
        conv2 = [sum(prod2[(p + k, k)] for k in range(K2)) for p in range(P2)]
        day_feat = jnp.maximum(_tree_max(conv2) + b2_ref[...], 0.0)      # (NG, Fd)

        # -------- LSTM (unrolled; gate order i, f, g, o; h0 = c0 = 0) --------
        # Input-to-gate contributions are independent of the recurrence:
        # compute them for every step first (MXU streams), then run the
        # recurrent chain with only the small h @ W_hh dots on the serial path.
        xgate = []
        for w in range(W):
            xd = day_feat[w * B:(w + 1) * B, :]     # (B, Fd)  rows = batch
            xt = tech_ref[w]                        # (B, tech_dim)
            xgate.append([
                jnp.dot(xd, wihd_ref[g], preferred_element_type=f32)
                + jnp.dot(xt, wiht_ref[g], preferred_element_type=f32)
                + blstm_ref[g]
                for g in range(4)])
        h = jnp.zeros((B, H), f32)
        c = jnp.zeros((B, H), f32)
        for w in range(W):
            pre = [xgate[w][g] + jnp.dot(h, whh_ref[g], preferred_element_type=f32)
                   for g in range(4)]
            i_g = jax.nn.sigmoid(pre[0])
            f_g = jax.nn.sigmoid(pre[1])
            g_g = jnp.tanh(pre[2])
            o_g = jax.nn.sigmoid(pre[3])
            c = f_g * c + i_g * g_g
            h = o_g * jnp.tanh(c)

        # -------- head: map_down -> ReLU -> map_to_out -> log_softmax --------
        # concat(last_hidden, last_cell) realized by splitting map_down's
        # weight into a hidden block and a cell block (no concat needed).
        mapped = jnp.maximum(
            jnp.dot(h, wmdh_ref[...], preferred_element_type=f32)
            + jnp.dot(c, wmdc_ref[...], preferred_element_type=f32)
            + bmd_ref[...], 0.0)                                        # (B, 64)
        logits = (jnp.dot(mapped, wout_ref[...], preferred_element_type=f32)
                  + bout_ref[...])                                      # (B, n_out)
        m = jnp.max(logits, axis=1, keepdims=True)
        s = logits - m
        lse = jnp.log(jnp.sum(jnp.exp(s), axis=1, keepdims=True))
        out_ref[...] = s - lse                                          # log_softmax(dim=1)

    return kernel


# ------------------------------- parameters ----------------------------------
def init_params(key, cfg):
    H, D = cfg.n_hidden_LSTM, cfg.input_dim_LSTM
    shapes = {
        "conv_title_w": (cfg.n_filters_title, cfg.title_dim, cfg.filter_sz_title),
        "conv_title_b": (cfg.n_filters_title,),
        "conv_day_w": (cfg.n_filters_day, cfg.n_filters_title, cfg.filter_sz_day),
        "conv_day_b": (cfg.n_filters_day,),
        "map_down_w": (64, 2 * cfg.num_LSTM_layers * H),
        "map_down_b": (64,),
        "map_to_out_w": (cfg.n_outputs, 64),
        "map_to_out_b": (cfg.n_outputs,),
    }
    for l in range(cfg.num_LSTM_layers):
        in_dim = D if l == 0 else H
        shapes[f"lstm_w_ih_l{l}"] = (4 * H, in_dim)
        shapes[f"lstm_w_hh_l{l}"] = (4 * H, H)
        shapes[f"lstm_b_ih_l{l}"] = (4 * H,)
        shapes[f"lstm_b_hh_l{l}"] = (4 * H,)
    keys = jax.random.split(key, len(shapes))
    return {name: 0.1 * jax.random.normal(k, shp, dtype=jnp.float32)
            for (name, shp), k in zip(shapes.items(), keys)}


# ------------------------------- forward pass ---------------------------------
def rcnn_seq_forward(params, titles, tech_indicators, cfg):
    B, W, T, E, L = titles.shape
    Ft, Fd = cfg.n_filters_title, cfg.n_filters_day
    H = cfg.n_hidden_LSTM
    assert cfg.num_LSTM_layers == 1  # see TODO(synk) at top of file

    # ---- host-side layout plumbing only (no im2col / data expansion) ----
    # word-position major, then (title t, day w, batch b) with b fastest, so
    # every in-kernel window/group is a contiguous leading-axis slice.
    titles_t = jnp.transpose(titles, (4, 2, 1, 0, 3)).reshape(L, T * W * B, E)

    # conv weights as per-tap (in_ch, out_ch) slabs.
    w1 = jnp.transpose(params["conv_title_w"], (2, 1, 0))        # (K1, E, Ft)
    b1 = params["conv_title_b"].reshape(1, Ft)
    w2 = jnp.transpose(params["conv_day_w"], (2, 1, 0))          # (K2, Ft, Fd)
    b2 = params["conv_day_b"].reshape(1, Fd)

    # LSTM weights split per gate (PyTorch order i, f, g, o) and per input part
    # (day features vs. tech indicators), biases combined (b_ih + b_hh).
    w_ih = params["lstm_w_ih_l0"]                                # (4H, Fd+tech)
    w_hh = params["lstm_w_hh_l0"]                                # (4H, H)
    b_l = params["lstm_b_ih_l0"] + params["lstm_b_hh_l0"]        # (4H,)
    wihd = jnp.stack([w_ih[g * H:(g + 1) * H, :Fd].T for g in range(4)])   # (4, Fd, H)
    wiht = jnp.stack([w_ih[g * H:(g + 1) * H, Fd:].T for g in range(4)])   # (4, td, H)
    whh = jnp.stack([w_hh[g * H:(g + 1) * H, :].T for g in range(4)])      # (4, H, H)
    blstm = jnp.stack([b_l[g * H:(g + 1) * H].reshape(1, H) for g in range(4)])  # (4,1,H)

    # head weights; map_down split into hidden / cell blocks.
    wmd = params["map_down_w"]                                   # (64, 2H)
    wmdh = wmd[:, :H].T                                          # (H, 64)
    wmdc = wmd[:, H:].T                                          # (H, 64)
    bmd = params["map_down_b"].reshape(1, -1)
    wout = params["map_to_out_w"].T                              # (64, n_outputs)
    bout = params["map_to_out_b"].reshape(1, -1)

    kernel = make_fused_kernel(cfg, B)
    vmem_spec = pl.BlockSpec(memory_space=pltpu.MemorySpace.VMEM)
    out = pl.pallas_call(
        kernel,
        out_shape=jax.ShapeDtypeStruct((B, cfg.n_outputs), jnp.float32),
        in_specs=[vmem_spec] * 15,
        out_specs=vmem_spec,
    )(titles_t, tech_indicators, w1, b1, w2, b2,
      wihd, wiht, whh, blstm, wmdh, wmdc, bmd, wout, bout)
    return out


# ----------------------------------- main --------------------------------------
if __name__ == "__main__":
    cfg = Config()
    B = 2
    key = jax.random.PRNGKey(0)
    k_titles, k_tech, k_params = jax.random.split(key, 3)

    titles = jax.random.normal(
        k_titles,
        (B, cfg.window_len_titles, cfg.num_titles, cfg.title_dim, cfg.max_title_len),
        dtype=jnp.float32)
    tech_indicators = jax.random.normal(
        k_tech, (cfg.window_len_titles, B, cfg.tech_dim), dtype=jnp.float32)

    params = init_params(k_params, cfg)

    fwd = jax.jit(lambda p, t, ti: rcnn_seq_forward(p, t, ti, cfg))
    out = jax.block_until_ready(fwd(params, titles, tech_indicators))

    assert out.shape == (B, cfg.n_outputs)
    assert bool(jnp.all(jnp.isfinite(out)))
    # log_softmax rows should exponentiate-sum to ~1
    assert bool(jnp.all(jnp.abs(jnp.sum(jnp.exp(out), axis=1) - 1.0) < 1e-4))
    print("KERNEL_OK")
</pallas_src>

<mosaic_0001>
module attributes {stable_mosaic.version = 11 : i64} {
  func.func @kernel(%arg0: memref<10x100x16xf32, #tpu.memory_space<vmem>>, %arg1: memref<5x2x7xf32, #tpu.memory_space<vmem>>, %arg2: memref<3x16x32xf32, #tpu.memory_space<vmem>>, %arg3: memref<1x32xf32, #tpu.memory_space<vmem>>, %arg4: memref<3x32x32xf32, #tpu.memory_space<vmem>>, %arg5: memref<1x32xf32, #tpu.memory_space<vmem>>, %arg6: memref<4x32x32xf32, #tpu.memory_space<vmem>>, %arg7: memref<4x7x32xf32, #tpu.memory_space<vmem>>, %arg8: memref<4x32x32xf32, #tpu.memory_space<vmem>>, %arg9: memref<4x1x32xf32, #tpu.memory_space<vmem>>, %arg10: memref<32x64xf32, #tpu.memory_space<vmem>>, %arg11: memref<32x64xf32, #tpu.memory_space<vmem>>, %arg12: memref<1x64xf32, #tpu.memory_space<vmem>>, %arg13: memref<64x2xf32, #tpu.memory_space<vmem>>, %arg14: memref<1x2xf32, #tpu.memory_space<vmem>>, %arg15: memref<2x2xf32, #tpu.memory_space<vmem>>) attributes {dimension_semantics = [], scalar_prefetch = 0 : i64, scratch_operands = 0 : i64, tpu.core_type = #tpu.core_type<tc>} {
    %c0 = arith.constant 0 : index
    %c0_0 = arith.constant 0 : index
    %c0_1 = arith.constant 0 : index
    %0 = vector.load %arg0[%c0, %c0_0, %c0_1] : memref<10x100x16xf32, #tpu.memory_space<vmem>>, vector<1x100x16xf32>
    %1 = vector.shape_cast %0 : vector<1x100x16xf32> to vector<100x16xf32>
    %c0_2 = arith.constant 0 : index
    %c0_3 = arith.constant 0 : index
    %c0_4 = arith.constant 0 : index
    %2 = vector.load %arg2[%c0_2, %c0_3, %c0_4] : memref<3x16x32xf32, #tpu.memory_space<vmem>>, vector<1x16x32xf32>
    %3 = vector.shape_cast %2 : vector<1x16x32xf32> to vector<16x32xf32>
    %cst = arith.constant dense<0.000000e+00> : vector<100x32xf32>
    %4 = tpu.matmul %1, %3, %cst {dimension_numbers = #tpu.dot_dimension_numbers<[1], [0], [0], [1], [0, 0, 1, 1], [], []>} : vector<100x16xf32>, vector<16x32xf32>, vector<100x32xf32> -> vector<100x32xf32>
    %c1 = arith.constant 1 : index
    %c0_5 = arith.constant 0 : index
    %c0_6 = arith.constant 0 : index
    %5 = vector.load %arg0[%c1, %c0_5, %c0_6] : memref<10x100x16xf32, #tpu.memory_space<vmem>>, vector<1x100x16xf32>
    %6 = vector.shape_cast %5 : vector<1x100x16xf32> to vector<100x16xf32>
    %c0_7 = arith.constant 0 : index
    %c0_8 = arith.constant 0 : index
    %c0_9 = arith.constant 0 : index
    %7 = vector.load %arg2[%c0_7, %c0_8, %c0_9] : memref<3x16x32xf32, #tpu.memory_space<vmem>>, vector<1x16x32xf32>
    %8 = vector.shape_cast %7 : vector<1x16x32xf32> to vector<16x32xf32>
    %cst_10 = arith.constant dense<0.000000e+00> : vector<100x32xf32>
    %9 = tpu.matmul %6, %8, %cst_10 {dimension_numbers = #tpu.dot_dimension_numbers<[1], [0], [0], [1], [0, 0, 1, 1], [], []>} : vector<100x16xf32>, vector<16x32xf32>, vector<100x32xf32> -> vector<100x32xf32>
    %c1_11 = arith.constant 1 : index
    %c0_12 = arith.constant 0 : index
    %c0_13 = arith.constant 0 : index
    %10 = vector.load %arg2[%c1_11, %c0_12, %c0_13] : memref<3x16x32xf32, #tpu.memory_space<vmem>>, vector<1x16x32xf32>
    %11 = vector.shape_cast %10 : vector<1x16x32xf32> to vector<16x32xf32>
    %cst_14 = arith.constant dense<0.000000e+00> : vector<100x32xf32>
    %12 = tpu.matmul %6, %11, %cst_14 {dimension_numbers = #tpu.dot_dimension_numbers<[1], [0], [0], [1], [0, 0, 1, 1], [], []>} : vector<100x16xf32>, vector<16x32xf32>, vector<100x32xf32> -> vector<100x32xf32>
    %c2 = arith.constant 2 : index
    %c0_15 = arith.constant 0 : index
    %c0_16 = arith.constant 0 : index
    %13 = vector.load %arg0[%c2, %c0_15, %c0_16] : memref<10x100x16xf32, #tpu.memory_space<vmem>>, vector<1x100x16xf32>
    %14 = vector.shape_cast %13 : vector<1x100x16xf32> to vector<100x16xf32>
    %c0_17 = arith.constant 0 : index
    %c0_18 = arith.constant 0 : index
    %c0_19 = arith.constant 0 : index
    %15 = vector.load %arg2[%c0_17, %c0_18, %c0_19] : memref<3x16x32xf32, #tpu.memory_space<vmem>>, vector<1x16x32xf32>
    %16 = vector.shape_cast %15 : vector<1x16x32xf32> to vector<16x32xf32>
    %cst_20 = arith.constant dense<0.000000e+00> : vector<100x32xf32>
    %17 = tpu.matmul %14, %16, %cst_20 {dimension_numbers = #tpu.dot_dimension_numbers<[1], [0], [0], [1], [0, 0, 1, 1], [], []>} : vector<100x16xf32>, vector<16x32xf32>, vector<100x32xf32> -> vector<100x32xf32>
    %c1_21 = arith.constant 1 : index
    %c0_22 = arith.constant 0 : index
    %c0_23 = arith.constant 0 : index
    %18 = vector.load %arg2[%c1_21, %c0_22, %c0_23] : memref<3x16x32xf32, #tpu.memory_space<vmem>>, vector<1x16x32xf32>
    %19 = vector.shape_cast %18 : vector<1x16x32xf32> to vector<16x32xf32>
    %cst_24 = arith.constant dense<0.000000e+00> : vector<100x32xf32>
    %20 = tpu.matmul %14, %19, %cst_24 {dimension_numbers = #tpu.dot_dimension_numbers<[1], [0], [0], [1], [0, 0, 1, 1], [], []>} : vector<100x16xf32>, vector<16x32xf32>, vector<100x32xf32> -> vector<100x32xf32>
    %c2_25 = arith.constant 2 : index
    %c0_26 = arith.constant 0 : index
    %c0_27 = arith.constant 0 : index
    %21 = vector.load %arg2[%c2_25, %c0_26, %c0_27] : memref<3x16x32xf32, #tpu.memory_space<vmem>>, vector<1x16x32xf32>
    %22 = vector.shape_cast %21 : vector<1x16x32xf32> to vector<16x32xf32>
    %cst_28 = arith.constant dense<0.000000e+00> : vector<100x32xf32>
    %23 = tpu.matmul %14, %22, %cst_28 {dimension_numbers = #tpu.dot_dimension_numbers<[1], [0], [0], [1], [0, 0, 1, 1], [], []>} : vector<100x16xf32>, vector<16x32xf32>, vector<100x32xf32> -> vector<100x32xf32>
    %c3 = arith.constant 3 : index
    %c0_29 = arith.constant 0 : index
    %c0_30 = arith.constant 0 : index
    %24 = vector.load %arg0[%c3, %c0_29, %c0_30] : memref<10x100x16xf32, #tpu.memory_space<vmem>>, vector<1x100x16xf32>
    %25 = vector.shape_cast %24 : vector<1x100x16xf32> to vector<100x16xf32>
    %c0_31 = arith.constant 0 : index
    %c0_32 = arith.constant 0 : index
    %c0_33 = arith.constant 0 : index
    %26 = vector.load %arg2[%c0_31, %c0_32, %c0_33] : memref<3x16x32xf32, #tpu.memory_space<vmem>>, vector<1x16x32xf32>
    %27 = vector.shape_cast %26 : vector<1x16x32xf32> to vector<16x32xf32>
    %cst_34 = arith.constant dense<0.000000e+00> : vector<100x32xf32>
    %28 = tpu.matmul %25, %27, %cst_34 {dimension_numbers = #tpu.dot_dimension_numbers<[1], [0], [0], [1], [0, 0, 1, 1], [], []>} : vector<100x16xf32>, vector<16x32xf32>, vector<100x32xf32> -> vector<100x32xf32>
    %c1_35 = arith.constant 1 : index
    %c0_36 = arith.constant 0 : index
    %c0_37 = arith.constant 0 : index
    %29 = vector.load %arg2[%c1_35, %c0_36, %c0_37] : memref<3x16x32xf32, #tpu.memory_space<vmem>>, vector<1x16x32xf32>
    %30 = vector.shape_cast %29 : vector<1x16x32xf32> to vector<16x32xf32>
    %cst_38 = arith.constant dense<0.000000e+00> : vector<100x32xf32>
    %31 = tpu.matmul %25, %30, %cst_38 {dimension_numbers = #tpu.dot_dimension_numbers<[1], [0], [0], [1], [0, 0, 1, 1], [], []>} : vector<100x16xf32>, vector<16x32xf32>, vector<100x32xf32> -> vector<100x32xf32>
    %c2_39 = arith.constant 2 : index
    %c0_40 = arith.constant 0 : index
    %c0_41 = arith.constant 0 : index
    %32 = vector.load %arg2[%c2_39, %c0_40, %c0_41] : memref<3x16x32xf32, #tpu.memory_space<vmem>>, vector<1x16x32xf32>
    %33 = vector.shape_cast %32 : vector<1x16x32xf32> to vector<16x32xf32>
    %cst_42 = arith.constant dense<0.000000e+00> : vector<100x32xf32>
    %34 = tpu.matmul %25, %33, %cst_42 {dimension_numbers = #tpu.dot_dimension_numbers<[1], [0], [0], [1], [0, 0, 1, 1], [], []>} : vector<100x16xf32>, vector<16x32xf32>, vector<100x32xf32> -> vector<100x32xf32>
    %c4 = arith.constant 4 : index
    %c0_43 = arith.constant 0 : index
    %c0_44 = arith.constant 0 : index
    %35 = vector.load %arg0[%c4, %c0_43, %c0_44] : memref<10x100x16xf32, #tpu.memory_space<vmem>>, vector<1x100x16xf32>
    %36 = vector.shape_cast %35 : vector<1x100x16xf32> to vector<100x16xf32>
    %c0_45 = arith.constant 0 : index
    %c0_46 = arith.constant 0 : index
    %c0_47 = arith.constant 0 : index
    %37 = vector.load %arg2[%c0_45, %c0_46, %c0_47] : memref<3x16x32xf32, #tpu.memory_space<vmem>>, vector<1x16x32xf32>
    %38 = vector.shape_cast %37 : vector<1x16x32xf32> to vector<16x32xf32>
    %cst_48 = arith.constant dense<0.000000e+00> : vector<100x32xf32>
    %39 = tpu.matmul %36, %38, %cst_48 {dimension_numbers = #tpu.dot_dimension_numbers<[1], [0], [0], [1], [0, 0, 1, 1], [], []>} : vector<100x16xf32>, vector<16x32xf32>, vector<100x32xf32> -> vector<100x32xf32>
    %c1_49 = arith.constant 1 : index
    %c0_50 = arith.constant 0 : index
    %c0_51 = arith.constant 0 : index
    %40 = vector.load %arg2[%c1_49, %c0_50, %c0_51] : memref<3x16x32xf32, #tpu.memory_space<vmem>>, vector<1x16x32xf32>
    %41 = vector.shape_cast %40 : vector<1x16x32xf32> to vector<16x32xf32>
    %cst_52 = arith.constant dense<0.000000e+00> : vector<100x32xf32>
    %42 = tpu.matmul %36, %41, %cst_52 {dimension_numbers = #tpu.dot_dimension_numbers<[1], [0], [0], [1], [0, 0, 1, 1], [], []>} : vector<100x16xf32>, vector<16x32xf32>, vector<100x32xf32> -> vector<100x32xf32>
    %c2_53 = arith.constant 2 : index
    %c0_54 = arith.constant 0 : index
    %c0_55 = arith.constant 0 : index
    %43 = vector.load %arg2[%c2_53, %c0_54, %c0_55] : memref<3x16x32xf32, #tpu.memory_space<vmem>>, vector<1x16x32xf32>
    %44 = vector.shape_cast %43 : vector<1x16x32xf32> to vector<16x32xf32>
    %cst_56 = arith.constant dense<0.000000e+00> : vector<100x32xf32>
    %45 = tpu.matmul %36, %44, %cst_56 {dimension_numbers = #tpu.dot_dimension_numbers<[1], [0], [0], [1], [0, 0, 1, 1], [], []>} : vector<100x16xf32>, vector<16x32xf32>, vector<100x32xf32> -> vector<100x32xf32>
    %c5 = arith.constant 5 : index
    %c0_57 = arith.constant 0 : index
    %c0_58 = arith.constant 0 : index
    %46 = vector.load %arg0[%c5, %c0_57, %c0_58] : memref<10x100x16xf32, #tpu.memory_space<vmem>>, vector<1x100x16xf32>
    %47 = vector.shape_cast %46 : vector<1x100x16xf32> to vector<100x16xf32>
    %c0_59 = arith.constant 0 : index
    %c0_60 = arith.constant 0 : index
    %c0_61 = arith.constant 0 : index
    %48 = vector.load %arg2[%c0_59, %c0_60, %c0_61] : memref<3x16x32xf32, #tpu.memory_space<vmem>>, vector<1x16x32xf32>
    %49 = vector.shape_cast %48 : vector<1x16x32xf32> to vector<16x32xf32>
    %cst_62 = arith.constant dense<0.000000e+00> : vector<100x32xf32>
    %50 = tpu.matmul %47, %49, %cst_62 {dimension_numbers = #tpu.dot_dimension_numbers<[1], [0], [0], [1], [0, 0, 1, 1], [], []>} : vector<100x16xf32>, vector<16x32xf32>, vector<100x32xf32> -> vector<100x32xf32>
    %c1_63 = arith.constant 1 : index
    %c0_64 = arith.constant 0 : index
    %c0_65 = arith.constant 0 : index
    %51 = vector.load %arg2[%c1_63, %c0_64, %c0_65] : memref<3x16x32xf32, #tpu.memory_space<vmem>>, vector<1x16x32xf32>
    %52 = vector.shape_cast %51 : vector<1x16x32xf32> to vector<16x32xf32>
    %cst_66 = arith.constant dense<0.000000e+00> : vector<100x32xf32>
    %53 = tpu.matmul %47, %52, %cst_66 {dimension_numbers = #tpu.dot_dimension_numbers<[1], [0], [0], [1], [0, 0, 1, 1], [], []>} : vector<100x16xf32>, vector<16x32xf32>, vector<100x32xf32> -> vector<100x32xf32>
    %c2_67 = arith.constant 2 : index
    %c0_68 = arith.constant 0 : index
    %c0_69 = arith.constant 0 : index
    %54 = vector.load %arg2[%c2_67, %c0_68, %c0_69] : memref<3x16x32xf32, #tpu.memory_space<vmem>>, vector<1x16x32xf32>
    %55 = vector.shape_cast %54 : vector<1x16x32xf32> to vector<16x32xf32>
    %cst_70 = arith.constant dense<0.000000e+00> : vector<100x32xf32>
    %56 = tpu.matmul %47, %55, %cst_70 {dimension_numbers = #tpu.dot_dimension_numbers<[1], [0], [0], [1], [0, 0, 1, 1], [], []>} : vector<100x16xf32>, vector<16x32xf32>, vector<100x32xf32> -> vector<100x32xf32>
    %c6 = arith.constant 6 : index
    %c0_71 = arith.constant 0 : index
    %c0_72 = arith.constant 0 : index
    %57 = vector.load %arg0[%c6, %c0_71, %c0_72] : memref<10x100x16xf32, #tpu.memory_space<vmem>>, vector<1x100x16xf32>
    %58 = vector.shape_cast %57 : vector<1x100x16xf32> to vector<100x16xf32>
    %c0_73 = arith.constant 0 : index
    %c0_74 = arith.constant 0 : index
    %c0_75 = arith.constant 0 : index
    %59 = vector.load %arg2[%c0_73, %c0_74, %c0_75] : memref<3x16x32xf32, #tpu.memory_space<vmem>>, vector<1x16x32xf32>
    %60 = vector.shape_cast %59 : vector<1x16x32xf32> to vector<16x32xf32>
    %cst_76 = arith.constant dense<0.000000e+00> : vector<100x32xf32>
    %61 = tpu.matmul %58, %60, %cst_76 {dimension_numbers = #tpu.dot_dimension_numbers<[1], [0], [0], [1], [0, 0, 1, 1], [], []>} : vector<100x16xf32>, vector<16x32xf32>, vector<100x32xf32> -> vector<100x32xf32>
    %c1_77 = arith.constant 1 : index
    %c0_78 = arith.constant 0 : index
    %c0_79 = arith.constant 0 : index
    %62 = vector.load %arg2[%c1_77, %c0_78, %c0_79] : memref<3x16x32xf32, #tpu.memory_space<vmem>>, vector<1x16x32xf32>
    %63 = vector.shape_cast %62 : vector<1x16x32xf32> to vector<16x32xf32>
    %cst_80 = arith.constant dense<0.000000e+00> : vector<100x32xf32>
    %64 = tpu.matmul %58, %63, %cst_80 {dimension_numbers = #tpu.dot_dimension_numbers<[1], [0], [0], [1], [0, 0, 1, 1], [], []>} : vector<100x16xf32>, vector<16x32xf32>, vector<100x32xf32> -> vector<100x32xf32>
    %c2_81 = arith.constant 2 : index
    %c0_82 = arith.constant 0 : index
    %c0_83 = arith.constant 0 : index
    %65 = vector.load %arg2[%c2_81, %c0_82, %c0_83] : memref<3x16x32xf32, #tpu.memory_space<vmem>>, vector<1x16x32xf32>
    %66 = vector.shape_cast %65 : vector<1x16x32xf32> to vector<16x32xf32>
    %cst_84 = arith.constant dense<0.000000e+00> : vector<100x32xf32>
    %67 = tpu.matmul %58, %66, %cst_84 {dimension_numbers = #tpu.dot_dimension_numbers<[1], [0], [0], [1], [0, 0, 1, 1], [], []>} : vector<100x16xf32>, vector<16x32xf32>, vector<100x32xf32> -> vector<100x32xf32>
    %c7 = arith.constant 7 : index
    %c0_85 = arith.constant 0 : index
    %c0_86 = arith.constant 0 : index
    %68 = vector.load %arg0[%c7, %c0_85, %c0_86] : memref<10x100x16xf32, #tpu.memory_space<vmem>>, vector<1x100x16xf32>
    %69 = vector.shape_cast %68 : vector<1x100x16xf32> to vector<100x16xf32>
    %c0_87 = arith.constant 0 : index
    %c0_88 = arith.constant 0 : index
    %c0_89 = arith.constant 0 : index
    %70 = vector.load %arg2[%c0_87, %c0_88, %c0_89] : memref<3x16x32xf32, #tpu.memory_space<vmem>>, vector<1x16x32xf32>
    %71 = vector.shape_cast %70 : vector<1x16x32xf32> to vector<16x32xf32>
    %cst_90 = arith.constant dense<0.000000e+00> : vector<100x32xf32>
    %72 = tpu.matmul %69, %71, %cst_90 {dimension_numbers = #tpu.dot_dimension_numbers<[1], [0], [0], [1], [0, 0, 1, 1], [], []>} : vector<100x16xf32>, vector<16x32xf32>, vector<100x32xf32> -> vector<100x32xf32>
    %c1_91 = arith.constant 1 : index
    %c0_92 = arith.constant 0 : index
    %c0_93 = arith.constant 0 : index
    %73 = vector.load %arg2[%c1_91, %c0_92, %c0_93] : memref<3x16x32xf32, #tpu.memory_space<vmem>>, vector<1x16x32xf32>
    %74 = vector.shape_cast %73 : vector<1x16x32xf32> to vector<16x32xf32>
    %cst_94 = arith.constant dense<0.000000e+00> : vector<100x32xf32>
    %75 = tpu.matmul %69, %74, %cst_94 {dimension_numbers = #tpu.dot_dimension_numbers<[1], [0], [0], [1], [0, 0, 1, 1], [], []>} : vector<100x16xf32>, vector<16x32xf32>, vector<100x32xf32> -> vector<100x32xf32>
    %c2_95 = arith.constant 2 : index
    %c0_96 = arith.constant 0 : index
    %c0_97 = arith.constant 0 : index
    %76 = vector.load %arg2[%c2_95, %c0_96, %c0_97] : memref<3x16x32xf32, #tpu.memory_space<vmem>>, vector<1x16x32xf32>
    %77 = vector.shape_cast %76 : vector<1x16x32xf32> to vector<16x32xf32>
    %cst_98 = arith.constant dense<0.000000e+00> : vector<100x32xf32>
    %78 = tpu.matmul %69, %77, %cst_98 {dimension_numbers = #tpu.dot_dimension_numbers<[1], [0], [0], [1], [0, 0, 1, 1], [], []>} : vector<100x16xf32>, vector<16x32xf32>, vector<100x32xf32> -> vector<100x32xf32>
    %c8 = arith.constant 8 : index
    %c0_99 = arith.constant 0 : index
    %c0_100 = arith.constant 0 : index
    %79 = vector.load %arg0[%c8, %c0_99, %c0_100] : memref<10x100x16xf32, #tpu.memory_space<vmem>>, vector<1x100x16xf32>
    %80 = vector.shape_cast %79 : vector<1x100x16xf32> to vector<100x16xf32>
    %c1_101 = arith.constant 1 : index
    %c0_102 = arith.constant 0 : index
    %c0_103 = arith.constant 0 : index
    %81 = vector.load %arg2[%c1_101, %c0_102, %c0_103] : memref<3x16x32xf32, #tpu.memory_space<vmem>>, vector<1x16x32xf32>
    %82 = vector.shape_cast %81 : vector<1x16x32xf32> to vector<16x32xf32>
    %cst_104 = arith.constant dense<0.000000e+00> : vector<100x32xf32>
    %83 = tpu.matmul %80, %82, %cst_104 {dimension_numbers = #tpu.dot_dimension_numbers<[1], [0], [0], [1], [0, 0, 1, 1], [], []>} : vector<100x16xf32>, vector<16x32xf32>, vector<100x32xf32> -> vector<100x32xf32>
    %c2_105 = arith.constant 2 : index
    %c0_106 = arith.constant 0 : index
    %c0_107 = arith.constant 0 : index
    %84 = vector.load %arg2[%c2_105, %c0_106, %c0_107] : memref<3x16x32xf32, #tpu.memory_space<vmem>>, vector<1x16x32xf32>
    %85 = vector.shape_cast %84 : vector<1x16x32xf32> to vector<16x32xf32>
    %cst_108 = arith.constant dense<0.000000e+00> : vector<100x32xf32>
    %86 = tpu.matmul %80, %85, %cst_108 {dimension_numbers = #tpu.dot_dimension_numbers<[1], [0], [0], [1], [0, 0, 1, 1], [], []>} : vector<100x16xf32>, vector<16x32xf32>, vector<100x32xf32> -> vector<100x32xf32>
    %c9 = arith.constant 9 : index
    %c0_109 = arith.constant 0 : index
    %c0_110 = arith.constant 0 : index
    %87 = vector.load %arg0[%c9, %c0_109, %c0_110] : memref<10x100x16xf32, #tpu.memory_space<vmem>>, vector<1x100x16xf32>
    %88 = vector.shape_cast %87 : vector<1x100x16xf32> to vector<100x16xf32>
    %c2_111 = arith.constant 2 : index
    %c0_112 = arith.constant 0 : index
    %c0_113 = arith.constant 0 : index
    %89 = vector.load %arg2[%c2_111, %c0_112, %c0_113] : memref<3x16x32xf32, #tpu.memory_space<vmem>>, vector<1x16x32xf32>
    %90 = vector.shape_cast %89 : vector<1x16x32xf32> to vector<16x32xf32>
    %cst_114 = arith.constant dense<0.000000e+00> : vector<100x32xf32>
    %91 = tpu.matmul %88, %90, %cst_114 {dimension_numbers = #tpu.dot_dimension_numbers<[1], [0], [0], [1], [0, 0, 1, 1], [], []>} : vector<100x16xf32>, vector<16x32xf32>, vector<100x32xf32> -> vector<100x32xf32>
    %cst_115 = arith.constant 0.000000e+00 : f32
    %92 = vector.broadcast %cst_115 : f32 to vector<100x32xf32>
    %93 = arith.addf %92, %4 : vector<100x32xf32>
    %94 = arith.addf %93, %12 : vector<100x32xf32>
    %95 = arith.addf %94, %23 : vector<100x32xf32>
    %cst_116 = arith.constant 0.000000e+00 : f32
    %96 = vector.broadcast %cst_116 : f32 to vector<100x32xf32>
    %97 = arith.addf %96, %9 : vector<100x32xf32>
    %98 = arith.addf %97, %20 : vector<100x32xf32>
    %99 = arith.addf %98, %34 : vector<100x32xf32>
    %cst_117 = arith.constant 0.000000e+00 : f32
    %100 = vector.broadcast %cst_117 : f32 to vector<100x32xf32>
    %101 = arith.addf %100, %17 : vector<100x32xf32>
    %102 = arith.addf %101, %31 : vector<100x32xf32>
    %103 = arith.addf %102, %45 : vector<100x32xf32>
    %cst_118 = arith.constant 0.000000e+00 : f32
    %104 = vector.broadcast %cst_118 : f32 to vector<100x32xf32>
    %105 = arith.addf %104, %28 : vector<100x32xf32>
    %106 = arith.addf %105, %42 : vector<100x32xf32>
    %107 = arith.addf %106, %56 : vector<100x32xf32>
    %cst_119 = arith.constant 0.000000e+00 : f32
    %108 = vector.broadcast %cst_119 : f32 to vector<100x32xf32>
    %109 = arith.addf %108, %39 : vector<100x32xf32>
    %110 = arith.addf %109, %53 : vector<100x32xf32>
    %111 = arith.addf %110, %67 : vector<100x32xf32>
    %cst_120 = arith.constant 0.000000e+00 : f32
    %112 = vector.broadcast %cst_120 : f32 to vector<100x32xf32>
    %113 = arith.addf %112, %50 : vector<100x32xf32>
    %114 = arith.addf %113, %64 : vector<100x32xf32>
    %115 = arith.addf %114, %78 : vector<100x32xf32>
    %cst_121 = arith.constant 0.000000e+00 : f32
    %116 = vector.broadcast %cst_121 : f32 to vector<100x32xf32>
    %117 = arith.addf %116, %61 : vector<100x32xf32>
    %118 = arith.addf %117, %75 : vector<100x32xf32>
    %119 = arith.addf %118, %86 : vector<100x32xf32>
    %cst_122 = arith.constant 0.000000e+00 : f32
    %120 = vector.broadcast %cst_122 : f32 to vector<100x32xf32>
    %121 = arith.addf %120, %72 : vector<100x32xf32>
    %122 = arith.addf %121, %83 : vector<100x32xf32>
    %123 = arith.addf %122, %91 : vector<100x32xf32>
    %124 = arith.maximumf %95, %99 : vector<100x32xf32>
    %125 = arith.maximumf %103, %107 : vector<100x32xf32>
    %126 = arith.maximumf %111, %115 : vector<100x32xf32>
    %127 = arith.maximumf %119, %123 : vector<100x32xf32>
    %128 = arith.maximumf %124, %125 : vector<100x32xf32>
    %129 = arith.maximumf %126, %127 : vector<100x32xf32>
    %130 = arith.maximumf %128, %129 : vector<100x32xf32>
    %c0_123 = arith.constant 0 : index
    %c0_124 = arith.constant 0 : index
    %131 = vector.load %arg3[%c0_123, %c0_124] : memref<1x32xf32, #tpu.memory_space<vmem>>, vector<1x32xf32>
    %132 = vector.broadcast %131 : vector<1x32xf32> to vector<100x32xf32>
    %133 = arith.addf %130, %132 : vector<100x32xf32>
    %cst_125 = arith.constant 0.000000e+00 : f32
    %134 = vector.broadcast %cst_125 : f32 to vector<100x32xf32>
    %135 = arith.maximumf %133, %134 : vector<100x32xf32>
    %136 = vector.extract_strided_slice %135 {offsets = [0, 0], sizes = [10, 32], strides = [1, 1]} : vector<100x32xf32> to vector<10x32xf32>
    %137 = vector.extract_strided_slice %135 {offsets = [10, 0], sizes = [10, 32], strides = [1, 1]} : vector<100x32xf32> to vector<10x32xf32>
    %138 = vector.extract_strided_slice %135 {offsets = [20, 0], sizes = [10, 32], strides = [1, 1]} : vector<100x32xf32> to vector<10x32xf32>
    %139 = vector.extract_strided_slice %135 {offsets = [30, 0], sizes = [10, 32], strides = [1, 1]} : vector<100x32xf32> to vector<10x32xf32>
    %140 = vector.extract_strided_slice %135 {offsets = [40, 0], sizes = [10, 32], strides = [1, 1]} : vector<100x32xf32> to vector<10x32xf32>
    %141 = vector.extract_strided_slice %135 {offsets = [50, 0], sizes = [10, 32], strides = [1, 1]} : vector<100x32xf32> to vector<10x32xf32>
    %142 = vector.extract_strided_slice %135 {offsets = [60, 0], sizes = [10, 32], strides = [1, 1]} : vector<100x32xf32> to vector<10x32xf32>
    %143 = vector.extract_strided_slice %135 {offsets = [70, 0], sizes = [10, 32], strides = [1, 1]} : vector<100x32xf32> to vector<10x32xf32>
    %144 = vector.extract_strided_slice %135 {offsets = [80, 0], sizes = [10, 32], strides = [1, 1]} : vector<100x32xf32> to vector<10x32xf32>
    %145 = vector.extract_strided_slice %135 {offsets = [90, 0], sizes = [10, 32], strides = [1, 1]} : vector<100x32xf32> to vector<10x32xf32>
    %c0_126 = arith.constant 0 : index
    %c0_127 = arith.constant 0 : index
    %c0_128 = arith.constant 0 : index
    %146 = vector.load %arg4[%c0_126, %c0_127, %c0_128] : memref<3x32x32xf32, #tpu.memory_space<vmem>>, vector<1x32x32xf32>
    %147 = vector.shape_cast %146 : vector<1x32x32xf32> to vector<32x32xf32>
    %cst_129 = arith.constant dense<0.000000e+00> : vector<10x32xf32>
    %148 = tpu.matmul %136, %147, %cst_129 {dimension_numbers = #tpu.dot_dimension_numbers<[1], [0], [0], [1], [0, 0, 1, 1], [], []>} : vector<10x32xf32>, vector<32x32xf32>, vector<10x32xf32> -> vector<10x32xf32>
    %c0_130 = arith.constant 0 : index
    %c0_131 = arith.constant 0 : index
    %c0_132 = arith.constant 0 : index
    %149 = vector.load %arg4[%c0_130, %c0_131, %c0_132] : memref<3x32x32xf32, #tpu.memory_space<vmem>>, vector<1x32x32xf32>
    %150 = vector.shape_cast %149 : vector<1x32x32xf32> to vector<32x32xf32>
    %cst_133 = arith.constant dense<0.000000e+00> : vector<10x32xf32>
    %151 = tpu.matmul %137, %150, %cst_133 {dimension_numbers = #tpu.dot_dimension_numbers<[1], [0], [0], [1], [0, 0, 1, 1], [], []>} : vector<10x32xf32>, vector<32x32xf32>, vector<10x32xf32> -> vector<10x32xf32>
    %c1_134 = arith.constant 1 : index
    %c0_135 = arith.constant 0 : index
    %c0_136 = arith.constant 0 : index
    %152 = vector.load %arg4[%c1_134, %c0_135, %c0_136] : memref<3x32x32xf32, #tpu.memory_space<vmem>>, vector<1x32x32xf32>
    %153 = vector.shape_cast %152 : vector<1x32x32xf32> to vector<32x32xf32>
    %cst_137 = arith.constant dense<0.000000e+00> : vector<10x32xf32>
    %154 = tpu.matmul %137, %153, %cst_137 {dimension_numbers = #tpu.dot_dimension_numbers<[1], [0], [0], [1], [0, 0, 1, 1], [], []>} : vector<10x32xf32>, vector<32x32xf32>, vector<10x32xf32> -> vector<10x32xf32>
    %c0_138 = arith.constant 0 : index
    %c0_139 = arith.constant 0 : index
    %c0_140 = arith.constant 0 : index
    %155 = vector.load %arg4[%c0_138, %c0_139, %c0_140] : memref<3x32x32xf32, #tpu.memory_space<vmem>>, vector<1x32x32xf32>
    %156 = vector.shape_cast %155 : vector<1x32x32xf32> to vector<32x32xf32>
    %cst_141 = arith.constant dense<0.000000e+00> : vector<10x32xf32>
    %157 = tpu.matmul %138, %156, %cst_141 {dimension_numbers = #tpu.dot_dimension_numbers<[1], [0], [0], [1], [0, 0, 1, 1], [], []>} : vector<10x32xf32>, vector<32x32xf32>, vector<10x32xf32> -> vector<10x32xf32>
    %c1_142 = arith.constant 1 : index
    %c0_143 = arith.constant 0 : index
    %c0_144 = arith.constant 0 : index
    %158 = vector.load %arg4[%c1_142, %c0_143, %c0_144] : memref<3x32x32xf32, #tpu.memory_space<vmem>>, vector<1x32x32xf32>
    %159 = vector.shape_cast %158 : vector<1x32x32xf32> to vector<32x32xf32>
    %cst_145 = arith.constant dense<0.000000e+00> : vector<10x32xf32>
    %160 = tpu.matmul %138, %159, %cst_145 {dimension_numbers = #tpu.dot_dimension_numbers<[1], [0], [0], [1], [0, 0, 1, 1], [], []>} : vector<10x32xf32>, vector<32x32xf32>, vector<10x32xf32> -> vector<10x32xf32>
    %c2_146 = arith.constant 2 : index
    %c0_147 = arith.constant 0 : index
    %c0_148 = arith.constant 0 : index
    %161 = vector.load %arg4[%c2_146, %c0_147, %c0_148] : memref<3x32x32xf32, #tpu.memory_space<vmem>>, vector<1x32x32xf32>
    %162 = vector.shape_cast %161 : vector<1x32x32xf32> to vector<32x32xf32>
    %cst_149 = arith.constant dense<0.000000e+00> : vector<10x32xf32>
    %163 = tpu.matmul %138, %162, %cst_149 {dimension_numbers = #tpu.dot_dimension_numbers<[1], [0], [0], [1], [0, 0, 1, 1], [], []>} : vector<10x32xf32>, vector<32x32xf32>, vector<10x32xf32> -> vector<10x32xf32>
    %c0_150 = arith.constant 0 : index
    %c0_151 = arith.constant 0 : index
    %c0_152 = arith.constant 0 : index
    %164 = vector.load %arg4[%c0_150, %c0_151, %c0_152] : memref<3x32x32xf32, #tpu.memory_space<vmem>>, vector<1x32x32xf32>
    %165 = vector.shape_cast %164 : vector<1x32x32xf32> to vector<32x32xf32>
    %cst_153 = arith.constant dense<0.000000e+00> : vector<10x32xf32>
    %166 = tpu.matmul %139, %165, %cst_153 {dimension_numbers = #tpu.dot_dimension_numbers<[1], [0], [0], [1], [0, 0, 1, 1], [], []>} : vector<10x32xf32>, vector<32x32xf32>, vector<10x32xf32> -> vector<10x32xf32>
    %c1_154 = arith.constant 1 : index
    %c0_155 = arith.constant 0 : index
    %c0_156 = arith.constant 0 : index
    %167 = vector.load %arg4[%c1_154, %c0_155, %c0_156] : memref<3x32x32xf32, #tpu.memory_space<vmem>>, vector<1x32x32xf32>
    %168 = vector.shape_cast %167 : vector<1x32x32xf32> to vector<32x32xf32>
    %cst_157 = arith.constant dense<0.000000e+00> : vector<10x32xf32>
    %169 = tpu.matmul %139, %168, %cst_157 {dimension_numbers = #tpu.dot_dimension_numbers<[1], [0], [0], [1], [0, 0, 1, 1], [], []>} : vector<10x32xf32>, vector<32x32xf32>, vector<10x32xf32> -> vector<10x32xf32>
    %c2_158 = arith.constant 2 : index
    %c0_159 = arith.constant 0 : index
    %c0_160 = arith.constant 0 : index
    %170 = vector.load %arg4[%c2_158, %c0_159, %c0_160] : memref<3x32x32xf32, #tpu.memory_space<vmem>>, vector<1x32x32xf32>
    %171 = vector.shape_cast %170 : vector<1x32x32xf32> to vector<32x32xf32>
    %cst_161 = arith.constant dense<0.000000e+00> : vector<10x32xf32>
    %172 = tpu.matmul %139, %171, %cst_161 {dimension_numbers = #tpu.dot_dimension_numbers<[1], [0], [0], [1], [0, 0, 1, 1], [], []>} : vector<10x32xf32>, vector<32x32xf32>, vector<10x32xf32> -> vector<10x32xf32>
    %c0_162 = arith.constant 0 : index
    %c0_163 = arith.constant 0 : index
    %c0_164 = arith.constant 0 : index
    %173 = vector.load %arg4[%c0_162, %c0_163, %c0_164] : memref<3x32x32xf32, #tpu.memory_space<vmem>>, vector<1x32x32xf32>
    %174 = vector.shape_cast %173 : vector<1x32x32xf32> to vector<32x32xf32>
    %cst_165 = arith.constant dense<0.000000e+00> : vector<10x32xf32>
    %175 = tpu.matmul %140, %174, %cst_165 {dimension_numbers = #tpu.dot_dimension_numbers<[1], [0], [0], [1], [0, 0, 1, 1], [], []>} : vector<10x32xf32>, vector<32x32xf32>, vector<10x32xf32> -> vector<10x32xf32>
    %c1_166 = arith.constant 1 : index
    %c0_167 = arith.constant 0 : index
    %c0_168 = arith.constant 0 : index
    %176 = vector.load %arg4[%c1_166, %c0_167, %c0_168] : memref<3x32x32xf32, #tpu.memory_space<vmem>>, vector<1x32x32xf32>
    %177 = vector.shape_cast %176 : vector<1x32x32xf32> to vector<32x32xf32>
    %cst_169 = arith.constant dense<0.000000e+00> : vector<10x32xf32>
    %178 = tpu.matmul %140, %177, %cst_169 {dimension_numbers = #tpu.dot_dimension_numbers<[1], [0], [0], [1], [0, 0, 1, 1], [], []>} : vector<10x32xf32>, vector<32x32xf32>, vector<10x32xf32> -> vector<10x32xf32>
    %c2_170 = arith.constant 2 : index
    %c0_171 = arith.constant 0 : index
    %c0_172 = arith.constant 0 : index
    %179 = vector.load %arg4[%c2_170, %c0_171, %c0_172] : memref<3x32x32xf32, #tpu.memory_space<vmem>>, vector<1x32x32xf32>
    %180 = vector.shape_cast %179 : vector<1x32x32xf32> to vector<32x32xf32>
    %cst_173 = arith.constant dense<0.000000e+00> : vector<10x32xf32>
    %181 = tpu.matmul %140, %180, %cst_173 {dimension_numbers = #tpu.dot_dimension_numbers<[1], [0], [0], [1], [0, 0, 1, 1], [], []>} : vector<10x32xf32>, vector<32x32xf32>, vector<10x32xf32> -> vector<10x32xf32>
    %c0_174 = arith.constant 0 : index
    %c0_175 = arith.constant 0 : index
    %c0_176 = arith.constant 0 : index
    %182 = vector.load %arg4[%c0_174, %c0_175, %c0_176] : memref<3x32x32xf32, #tpu.memory_space<vmem>>, vector<1x32x32xf32>
    %183 = vector.shape_cast %182 : vector<1x32x32xf32> to vector<32x32xf32>
    %cst_177 = arith.constant dense<0.000000e+00> : vector<10x32xf32>
    %184 = tpu.matmul %141, %183, %cst_177 {dimension_numbers = #tpu.dot_dimension_numbers<[1], [0], [0], [1], [0, 0, 1, 1], [], []>} : vector<10x32xf32>, vector<32x32xf32>, vector<10x32xf32> -> vector<10x32xf32>
    %c1_178 = arith.constant 1 : index
    %c0_179 = arith.constant 0 : index
    %c0_180 = arith.constant 0 : index
    %185 = vector.load %arg4[%c1_178, %c0_179, %c0_180] : memref<3x32x32xf32, #tpu.memory_space<vmem>>, vector<1x32x32xf32>
    %186 = vector.shape_cast %185 : vector<1x32x32xf32> to vector<32x32xf32>
    %cst_181 = arith.constant dense<0.000000e+00> : vector<10x32xf32>
    %187 = tpu.matmul %141, %186, %cst_181 {dimension_numbers = #tpu.dot_dimension_numbers<[1], [0], [0], [1], [0, 0, 1, 1], [], []>} : vector<10x32xf32>, vector<32x32xf32>, vector<10x32xf32> -> vector<10x32xf32>
    %c2_182 = arith.constant 2 : index
    %c0_183 = arith.constant 0 : index
    %c0_184 = arith.constant 0 : index
    %188 = vector.load %arg4[%c2_182, %c0_183, %c0_184] : memref<3x32x32xf32, #tpu.memory_space<vmem>>, vector<1x32x32xf32>
    %189 = vector.shape_cast %188 : vector<1x32x32xf32> to vector<32x32xf32>
    %cst_185 = arith.constant dense<0.000000e+00> : vector<10x32xf32>
    %190 = tpu.matmul %141, %189, %cst_185 {dimension_numbers = #tpu.dot_dimension_numbers<[1], [0], [0], [1], [0, 0, 1, 1], [], []>} : vector<10x32xf32>, vector<32x32xf32>, vector<10x32xf32> -> vector<10x32xf32>
    %c0_186 = arith.constant 0 : index
    %c0_187 = arith.constant 0 : index
    %c0_188 = arith.constant 0 : index
    %191 = vector.load %arg4[%c0_186, %c0_187, %c0_188] : memref<3x32x32xf32, #tpu.memory_space<vmem>>, vector<1x32x32xf32>
    %192 = vector.shape_cast %191 : vector<1x32x32xf32> to vector<32x32xf32>
    %cst_189 = arith.constant dense<0.000000e+00> : vector<10x32xf32>
    %193 = tpu.matmul %142, %192, %cst_189 {dimension_numbers = #tpu.dot_dimension_numbers<[1], [0], [0], [1], [0, 0, 1, 1], [], []>} : vector<10x32xf32>, vector<32x32xf32>, vector<10x32xf32> -> vector<10x32xf32>
    %c1_190 = arith.constant 1 : index
    %c0_191 = arith.constant 0 : index
    %c0_192 = arith.constant 0 : index
    %194 = vector.load %arg4[%c1_190, %c0_191, %c0_192] : memref<3x32x32xf32, #tpu.memory_space<vmem>>, vector<1x32x32xf32>
    %195 = vector.shape_cast %194 : vector<1x32x32xf32> to vector<32x32xf32>
    %cst_193 = arith.constant dense<0.000000e+00> : vector<10x32xf32>
    %196 = tpu.matmul %142, %195, %cst_193 {dimension_numbers = #tpu.dot_dimension_numbers<[1], [0], [0], [1], [0, 0, 1, 1], [], []>} : vector<10x32xf32>, vector<32x32xf32>, vector<10x32xf32> -> vector<10x32xf32>
    %c2_194 = arith.constant 2 : index
    %c0_195 = arith.constant 0 : index
    %c0_196 = arith.constant 0 : index
    %197 = vector.load %arg4[%c2_194, %c0_195, %c0_196] : memref<3x32x32xf32, #tpu.memory_space<vmem>>, vector<1x32x32xf32>
    %198 = vector.shape_cast %197 : vector<1x32x32xf32> to vector<32x32xf32>
    %cst_197 = arith.constant dense<0.000000e+00> : vector<10x32xf32>
    %199 = tpu.matmul %142, %198, %cst_197 {dimension_numbers = #tpu.dot_dimension_numbers<[1], [0], [0], [1], [0, 0, 1, 1], [], []>} : vector<10x32xf32>, vector<32x32xf32>, vector<10x32xf32> -> vector<10x32xf32>
    %c0_198 = arith.constant 0 : index
    %c0_199 = arith.constant 0 : index
    %c0_200 = arith.constant 0 : index
    %200 = vector.load %arg4[%c0_198, %c0_199, %c0_200] : memref<3x32x32xf32, #tpu.memory_space<vmem>>, vector<1x32x32xf32>
    %201 = vector.shape_cast %200 : vector<1x32x32xf32> to vector<32x32xf32>
    %cst_201 = arith.constant dense<0.000000e+00> : vector<10x32xf32>
    %202 = tpu.matmul %143, %201, %cst_201 {dimension_numbers = #tpu.dot_dimension_numbers<[1], [0], [0], [1], [0, 0, 1, 1], [], []>} : vector<10x32xf32>, vector<32x32xf32>, vector<10x32xf32> -> vector<10x32xf32>
    %c1_202 = arith.constant 1 : index
    %c0_203 = arith.constant 0 : index
    %c0_204 = arith.constant 0 : index
    %203 = vector.load %arg4[%c1_202, %c0_203, %c0_204] : memref<3x32x32xf32, #tpu.memory_space<vmem>>, vector<1x32x32xf32>
    %204 = vector.shape_cast %203 : vector<1x32x32xf32> to vector<32x32xf32>
    %cst_205 = arith.constant dense<0.000000e+00> : vector<10x32xf32>
    %205 = tpu.matmul %143, %204, %cst_205 {dimension_numbers = #tpu.dot_dimension_numbers<[1], [0], [0], [1], [0, 0, 1, 1], [], []>} : vector<10x32xf32>, vector<32x32xf32>, vector<10x32xf32> -> vector<10x32xf32>
    %c2_206 = arith.constant 2 : index
    %c0_207 = arith.constant 0 : index
    %c0_208 = arith.constant 0 : index
    %206 = vector.load %arg4[%c2_206, %c0_207, %c0_208] : memref<3x32x32xf32, #tpu.memory_space<vmem>>, vector<1x32x32xf32>
    %207 = vector.shape_cast %206 : vector<1x32x32xf32> to vector<32x32xf32>
    %cst_209 = arith.constant dense<0.000000e+00> : vector<10x32xf32>
    %208 = tpu.matmul %143, %207, %cst_209 {dimension_numbers = #tpu.dot_dimension_numbers<[1], [0], [0], [1], [0, 0, 1, 1], [], []>} : vector<10x32xf32>, vector<32x32xf32>, vector<10x32xf32> -> vector<10x32xf32>
    %c1_210 = arith.constant 1 : index
    %c0_211 = arith.constant 0 : index
    %c0_212 = arith.constant 0 : index
    %209 = vector.load %arg4[%c1_210, %c0_211, %c0_212] : memref<3x32x32xf32, #tpu.memory_space<vmem>>, vector<1x32x32xf32>
    %210 = vector.shape_cast %209 : vector<1x32x32xf32> to vector<32x32xf32>
    %cst_213 = arith.constant dense<0.000000e+00> : vector<10x32xf32>
    %211 = tpu.matmul %144, %210, %cst_213 {dimension_numbers = #tpu.dot_dimension_numbers<[1], [0], [0], [1], [0, 0, 1, 1], [], []>} : vector<10x32xf32>, vector<32x32xf32>, vector<10x32xf32> -> vector<10x32xf32>
    %c2_214 = arith.constant 2 : index
    %c0_215 = arith.constant 0 : index
    %c0_216 = arith.constant 0 : index
    %212 = vector.load %arg4[%c2_214, %c0_215, %c0_216] : memref<3x32x32xf32, #tpu.memory_space<vmem>>, vector<1x32x32xf32>
    %213 = vector.shape_cast %212 : vector<1x32x32xf32> to vector<32x32xf32>
    %cst_217 = arith.constant dense<0.000000e+00> : vector<10x32xf32>
    %214 = tpu.matmul %144, %213, %cst_217 {dimension_numbers = #tpu.dot_dimension_numbers<[1], [0], [0], [1], [0, 0, 1, 1], [], []>} : vector<10x32xf32>, vector<32x32xf32>, vector<10x32xf32> -> vector<10x32xf32>
    %c2_218 = arith.constant 2 : index
    %c0_219 = arith.constant 0 : index
    %c0_220 = arith.constant 0 : index
    %215 = vector.load %arg4[%c2_218, %c0_219, %c0_220] : memref<3x32x32xf32, #tpu.memory_space<vmem>>, vector<1x32x32xf32>
    %216 = vector.shape_cast %215 : vector<1x32x32xf32> to vector<32x32xf32>
    %cst_221 = arith.constant dense<0.000000e+00> : vector<10x32xf32>
    %217 = tpu.matmul %145, %216, %cst_221 {dimension_numbers = #tpu.dot_dimension_numbers<[1], [0], [0], [1], [0, 0, 1, 1], [], []>} : vector<10x32xf32>, vector<32x32xf32>, vector<10x32xf32> -> vector<10x32xf32>
    %cst_222 = arith.constant 0.000000e+00 : f32
    %218 = vector.broadcast %cst_222 : f32 to vector<10x32xf32>
    %219 = arith.addf %218, %148 : vector<10x32xf32>
    %220 = arith.addf %219, %154 : vector<10x32xf32>
    %221 = arith.addf %220, %163 : vector<10x32xf32>
    %cst_223 = arith.constant 0.000000e+00 : f32
    %222 = vector.broadcast %cst_223 : f32 to vector<10x32xf32>
    %223 = arith.addf %222, %151 : vector<10x32xf32>
    %224 = arith.addf %223, %160 : vector<10x32xf32>
    %225 = arith.addf %224, %172 : vector<10x32xf32>
    %cst_224 = arith.constant 0.000000e+00 : f32
    %226 = vector.broadcast %cst_224 : f32 to vector<10x32xf32>
    %227 = arith.addf %226, %157 : vector<10x32xf32>
    %228 = arith.addf %227, %169 : vector<10x32xf32>
    %229 = arith.addf %228, %181 : vector<10x32xf32>
    %cst_225 = arith.constant 0.000000e+00 : f32
    %230 = vector.broadcast %cst_225 : f32 to vector<10x32xf32>
    %231 = arith.addf %230, %166 : vector<10x32xf32>
    %232 = arith.addf %231, %178 : vector<10x32xf32>
    %233 = arith.addf %232, %190 : vector<10x32xf32>
    %cst_226 = arith.constant 0.000000e+00 : f32
    %234 = vector.broadcast %cst_226 : f32 to vector<10x32xf32>
    %235 = arith.addf %234, %175 : vector<10x32xf32>
    %236 = arith.addf %235, %187 : vector<10x32xf32>
    %237 = arith.addf %236, %199 : vector<10x32xf32>
    %cst_227 = arith.constant 0.000000e+00 : f32
    %238 = vector.broadcast %cst_227 : f32 to vector<10x32xf32>
    %239 = arith.addf %238, %184 : vector<10x32xf32>
    %240 = arith.addf %239, %196 : vector<10x32xf32>
    %241 = arith.addf %240, %208 : vector<10x32xf32>
    %cst_228 = arith.constant 0.000000e+00 : f32
    %242 = vector.broadcast %cst_228 : f32 to vector<10x32xf32>
    %243 = arith.addf %242, %193 : vector<10x32xf32>
    %244 = arith.addf %243, %205 : vector<10x32xf32>
    %245 = arith.addf %244, %214 : vector<10x32xf32>
    %cst_229 = arith.constant 0.000000e+00 : f32
    %246 = vector.broadcast %cst_229 : f32 to vector<10x32xf32>
    %247 = arith.addf %246, %202 : vector<10x32xf32>
    %248 = arith.addf %247, %211 : vector<10x32xf32>
    %249 = arith.addf %248, %217 : vector<10x32xf32>
    %250 = arith.maximumf %221, %225 : vector<10x32xf32>
    %251 = arith.maximumf %229, %233 : vector<10x32xf32>
    %252 = arith.maximumf %237, %241 : vector<10x32xf32>
    %253 = arith.maximumf %245, %249 : vector<10x32xf32>
    %254 = arith.maximumf %250, %251 : vector<10x32xf32>
    %255 = arith.maximumf %252, %253 : vector<10x32xf32>
    %256 = arith.maximumf %254, %255 : vector<10x32xf32>
    %c0_230 = arith.constant 0 : index
    %c0_231 = arith.constant 0 : index
    %257 = vector.load %arg5[%c0_230, %c0_231] : memref<1x32xf32, #tpu.memory_space<vmem>>, vector<1x32xf32>
    %258 = vector.broadcast %257 : vector<1x32xf32> to vector<10x32xf32>
    %259 = arith.addf %256, %258 : vector<10x32xf32>
    %cst_232 = arith.constant 0.000000e+00 : f32
    %260 = vector.broadcast %cst_232 : f32 to vector<10x32xf32>
    %261 = arith.maximumf %259, %260 : vector<10x32xf32>
    %262 = vector.extract_strided_slice %261 {offsets = [0, 0], sizes = [2, 32], strides = [1, 1]} : vector<10x32xf32> to vector<2x32xf32>
    %c0_233 = arith.constant 0 : index
    %c0_234 = arith.constant 0 : index
    %c0_235 = arith.constant 0 : index
    %263 = vector.load %arg1[%c0_233, %c0_234, %c0_235] : memref<5x2x7xf32, #tpu.memory_space<vmem>>, vector<1x2x7xf32>
    %264 = vector.shape_cast %263 : vector<1x2x7xf32> to vector<2x7xf32>
    %c0_236 = arith.constant 0 : index
    %c0_237 = arith.constant 0 : index
    %c0_238 = arith.constant 0 : index
    %265 = vector.load %arg6[%c0_236, %c0_237, %c0_238] : memref<4x32x32xf32, #tpu.memory_space<vmem>>, vector<1x32x32xf32>
    %266 = vector.shape_cast %265 : vector<1x32x32xf32> to vector<32x32xf32>
    %cst_239 = arith.constant dense<0.000000e+00> : vector<2x32xf32>
    %267 = tpu.matmul %262, %266, %cst_239 {dimension_numbers = #tpu.dot_dimension_numbers<[1], [0], [0], [1], [0, 0, 1, 1], [], []>} : vector<2x32xf32>, vector<32x32xf32>, vector<2x32xf32> -> vector<2x32xf32>
    %c0_240 = arith.constant 0 : index
    %c0_241 = arith.constant 0 : index
    %c0_242 = arith.constant 0 : index
    %268 = vector.load %arg7[%c0_240, %c0_241, %c0_242] : memref<4x7x32xf32, #tpu.memory_space<vmem>>, vector<1x7x32xf32>
    %269 = vector.shape_cast %268 : vector<1x7x32xf32> to vector<7x32xf32>
    %cst_243 = arith.constant dense<0.000000e+00> : vector<2x32xf32>
    %270 = tpu.matmul %264, %269, %cst_243 {dimension_numbers = #tpu.dot_dimension_numbers<[1], [0], [0], [1], [0, 0, 1, 1], [], []>} : vector<2x7xf32>, vector<7x32xf32>, vector<2x32xf32> -> vector<2x32xf32>
    %271 = arith.addf %267, %270 : vector<2x32xf32>
    %c0_244 = arith.constant 0 : index
    %c0_245 = arith.constant 0 : index
    %c0_246 = arith.constant 0 : index
    %272 = vector.load %arg9[%c0_244, %c0_245, %c0_246] : memref<4x1x32xf32, #tpu.memory_space<vmem>>, vector<1x1x32xf32>
    %273 = vector.shape_cast %272 : vector<1x1x32xf32> to vector<1x32xf32>
    %274 = vector.broadcast %273 : vector<1x32xf32> to vector<2x32xf32>
    %275 = arith.addf %271, %274 : vector<2x32xf32>
    %c1_247 = arith.constant 1 : index
    %c0_248 = arith.constant 0 : index
    %c0_249 = arith.constant 0 : index
    %276 = vector.load %arg6[%c1_247, %c0_248, %c0_249] : memref<4x32x32xf32, #tpu.memory_space<vmem>>, vector<1x32x32xf32>
    %277 = vector.shape_cast %276 : vector<1x32x32xf32> to vector<32x32xf32>
    %cst_250 = arith.constant dense<0.000000e+00> : vector<2x32xf32>
    %278 = tpu.matmul %262, %277, %cst_250 {dimension_numbers = #tpu.dot_dimension_numbers<[1], [0], [0], [1], [0, 0, 1, 1], [], []>} : vector<2x32xf32>, vector<32x32xf32>, vector<2x32xf32> -> vector<2x32xf32>
    %c1_251 = arith.constant 1 : index
    %c0_252 = arith.constant 0 : index
    %c0_253 = arith.constant 0 : index
    %279 = vector.load %arg7[%c1_251, %c0_252, %c0_253] : memref<4x7x32xf32, #tpu.memory_space<vmem>>, vector<1x7x32xf32>
    %280 = vector.shape_cast %279 : vector<1x7x32xf32> to vector<7x32xf32>
    %cst_254 = arith.constant dense<0.000000e+00> : vector<2x32xf32>
    %281 = tpu.matmul %264, %280, %cst_254 {dimension_numbers = #tpu.dot_dimension_numbers<[1], [0], [0], [1], [0, 0, 1, 1], [], []>} : vector<2x7xf32>, vector<7x32xf32>, vector<2x32xf32> -> vector<2x32xf32>
    %282 = arith.addf %278, %281 : vector<2x32xf32>
    %c1_255 = arith.constant 1 : index
    %c0_256 = arith.constant 0 : index
    %c0_257 = arith.constant 0 : index
    %283 = vector.load %arg9[%c1_255, %c0_256, %c0_257] : memref<4x1x32xf32, #tpu.memory_space<vmem>>, vector<1x1x32xf32>
    %284 = vector.shape_cast %283 : vector<1x1x32xf32> to vector<1x32xf32>
    %285 = vector.broadcast %284 : vector<1x32xf32> to vector<2x32xf32>
    %286 = arith.addf %282, %285 : vector<2x32xf32>
    %c2_258 = arith.constant 2 : index
    %c0_259 = arith.constant 0 : index
    %c0_260 = arith.constant 0 : index
    %287 = vector.load %arg6[%c2_258, %c0_259, %c0_260] : memref<4x32x32xf32, #tpu.memory_space<vmem>>, vector<1x32x32xf32>
    %288 = vector.shape_cast %287 : vector<1x32x32xf32> to vector<32x32xf32>
    %cst_261 = arith.constant dense<0.000000e+00> : vector<2x32xf32>
    %289 = tpu.matmul %262, %288, %cst_261 {dimension_numbers = #tpu.dot_dimension_numbers<[1], [0], [0], [1], [0, 0, 1, 1], [], []>} : vector<2x32xf32>, vector<32x32xf32>, vector<2x32xf32> -> vector<2x32xf32>
    %c2_262 = arith.constant 2 : index
    %c0_263 = arith.constant 0 : index
    %c0_264 = arith.constant 0 : index
    %290 = vector.load %arg7[%c2_262, %c0_263, %c0_264] : memref<4x7x32xf32, #tpu.memory_space<vmem>>, vector<1x7x32xf32>
    %291 = vector.shape_cast %290 : vector<1x7x32xf32> to vector<7x32xf32>
    %cst_265 = arith.constant dense<0.000000e+00> : vector<2x32xf32>
    %292 = tpu.matmul %264, %291, %cst_265 {dimension_numbers = #tpu.dot_dimension_numbers<[1], [0], [0], [1], [0, 0, 1, 1], [], []>} : vector<2x7xf32>, vector<7x32xf32>, vector<2x32xf32> -> vector<2x32xf32>
    %293 = arith.addf %289, %292 : vector<2x32xf32>
    %c2_266 = arith.constant 2 : index
    %c0_267 = arith.constant 0 : index
    %c0_268 = arith.constant 0 : index
    %294 = vector.load %arg9[%c2_266, %c0_267, %c0_268] : memref<4x1x32xf32, #tpu.memory_space<vmem>>, vector<1x1x32xf32>
    %295 = vector.shape_cast %294 : vector<1x1x32xf32> to vector<1x32xf32>
    %296 = vector.broadcast %295 : vector<1x32xf32> to vector<2x32xf32>
    %297 = arith.addf %293, %296 : vector<2x32xf32>
    %c3_269 = arith.constant 3 : index
    %c0_270 = arith.constant 0 : index
    %c0_271 = arith.constant 0 : index
    %298 = vector.load %arg6[%c3_269, %c0_270, %c0_271] : memref<4x32x32xf32, #tpu.memory_space<vmem>>, vector<1x32x32xf32>
    %299 = vector.shape_cast %298 : vector<1x32x32xf32> to vector<32x32xf32>
    %cst_272 = arith.constant dense<0.000000e+00> : vector<2x32xf32>
    %300 = tpu.matmul %262, %299, %cst_272 {dimension_numbers = #tpu.dot_dimension_numbers<[1], [0], [0], [1], [0, 0, 1, 1], [], []>} : vector<2x32xf32>, vector<32x32xf32>, vector<2x32xf32> -> vector<2x32xf32>
    %c3_273 = arith.constant 3 : index
    %c0_274 = arith.constant 0 : index
    %c0_275 = arith.constant 0 : index
    %301 = vector.load %arg7[%c3_273, %c0_274, %c0_275] : memref<4x7x32xf32, #tpu.memory_space<vmem>>, vector<1x7x32xf32>
    %302 = vector.shape_cast %301 : vector<1x7x32xf32> to vector<7x32xf32>
    %cst_276 = arith.constant dense<0.000000e+00> : vector<2x32xf32>
    %303 = tpu.matmul %264, %302, %cst_276 {dimension_numbers = #tpu.dot_dimension_numbers<[1], [0], [0], [1], [0, 0, 1, 1], [], []>} : vector<2x7xf32>, vector<7x32xf32>, vector<2x32xf32> -> vector<2x32xf32>
    %304 = arith.addf %300, %303 : vector<2x32xf32>
    %c3_277 = arith.constant 3 : index
    %c0_278 = arith.constant 0 : index
    %c0_279 = arith.constant 0 : index
    %305 = vector.load %arg9[%c3_277, %c0_278, %c0_279] : memref<4x1x32xf32, #tpu.memory_space<vmem>>, vector<1x1x32xf32>
    %306 = vector.shape_cast %305 : vector<1x1x32xf32> to vector<1x32xf32>
    %307 = vector.broadcast %306 : vector<1x32xf32> to vector<2x32xf32>
    %308 = arith.addf %304, %307 : vector<2x32xf32>
    %309 = vector.extract_strided_slice %261 {offsets = [2, 0], sizes = [2, 32], strides = [1, 1]} : vector<10x32xf32> to vector<2x32xf32>
    %c1_280 = arith.constant 1 : index
    %c0_281 = arith.constant 0 : index
    %c0_282 = arith.constant 0 : index
    %310 = vector.load %arg1[%c1_280, %c0_281, %c0_282] : memref<5x2x7xf32, #tpu.memory_space<vmem>>, vector<1x2x7xf32>
    %311 = vector.shape_cast %310 : vector<1x2x7xf32> to vector<2x7xf32>
    %c0_283 = arith.constant 0 : index
    %c0_284 = arith.constant 0 : index
    %c0_285 = arith.constant 0 : index
    %312 = vector.load %arg6[%c0_283, %c0_284, %c0_285] : memref<4x32x32xf32, #tpu.memory_space<vmem>>, vector<1x32x32xf32>
    %313 = vector.shape_cast %312 : vector<1x32x32xf32> to vector<32x32xf32>
    %cst_286 = arith.constant dense<0.000000e+00> : vector<2x32xf32>
    %314 = tpu.matmul %309, %313, %cst_286 {dimension_numbers = #tpu.dot_dimension_numbers<[1], [0], [0], [1], [0, 0, 1, 1], [], []>} : vector<2x32xf32>, vector<32x32xf32>, vector<2x32xf32> -> vector<2x32xf32>
    %c0_287 = arith.constant 0 : index
    %c0_288 = arith.constant 0 : index
    %c0_289 = arith.constant 0 : index
    %315 = vector.load %arg7[%c0_287, %c0_288, %c0_289] : memref<4x7x32xf32, #tpu.memory_space<vmem>>, vector<1x7x32xf32>
    %316 = vector.shape_cast %315 : vector<1x7x32xf32> to vector<7x32xf32>
    %cst_290 = arith.constant dense<0.000000e+00> : vector<2x32xf32>
    %317 = tpu.matmul %311, %316, %cst_290 {dimension_numbers = #tpu.dot_dimension_numbers<[1], [0], [0], [1], [0, 0, 1, 1], [], []>} : vector<2x7xf32>, vector<7x32xf32>, vector<2x32xf32> -> vector<2x32xf32>
    %318 = arith.addf %314, %317 : vector<2x32xf32>
    %c0_291 = arith.constant 0 : index
    %c0_292 = arith.constant 0 : index
    %c0_293 = arith.constant 0 : index
    %319 = vector.load %arg9[%c0_291, %c0_292, %c0_293] : memref<4x1x32xf32, #tpu.memory_space<vmem>>, vector<1x1x32xf32>
    %320 = vector.shape_cast %319 : vector<1x1x32xf32> to vector<1x32xf32>
    %321 = vector.broadcast %320 : vector<1x32xf32> to vector<2x32xf32>
    %322 = arith.addf %318, %321 : vector<2x32xf32>
    %c1_294 = arith.constant 1 : index
    %c0_295 = arith.constant 0 : index
    %c0_296 = arith.constant 0 : index
    %323 = vector.load %arg6[%c1_294, %c0_295, %c0_296] : memref<4x32x32xf32, #tpu.memory_space<vmem>>, vector<1x32x32xf32>
    %324 = vector.shape_cast %323 : vector<1x32x32xf32> to vector<32x32xf32>
    %cst_297 = arith.constant dense<0.000000e+00> : vector<2x32xf32>
    %325 = tpu.matmul %309, %324, %cst_297 {dimension_numbers = #tpu.dot_dimension_numbers<[1], [0], [0], [1], [0, 0, 1, 1], [], []>} : vector<2x32xf32>, vector<32x32xf32>, vector<2x32xf32> -> vector<2x32xf32>
    %c1_298 = arith.constant 1 : index
    %c0_299 = arith.constant 0 : index
    %c0_300 = arith.constant 0 : index
    %326 = vector.load %arg7[%c1_298, %c0_299, %c0_300] : memref<4x7x32xf32, #tpu.memory_space<vmem>>, vector<1x7x32xf32>
    %327 = vector.shape_cast %326 : vector<1x7x32xf32> to vector<7x32xf32>
    %cst_301 = arith.constant dense<0.000000e+00> : vector<2x32xf32>
    %328 = tpu.matmul %311, %327, %cst_301 {dimension_numbers = #tpu.dot_dimension_numbers<[1], [0], [0], [1], [0, 0, 1, 1], [], []>} : vector<2x7xf32>, vector<7x32xf32>, vector<2x32xf32> -> vector<2x32xf32>
    %329 = arith.addf %325, %328 : vector<2x32xf32>
    %c1_302 = arith.constant 1 : index
    %c0_303 = arith.constant 0 : index
    %c0_304 = arith.constant 0 : index
    %330 = vector.load %arg9[%c1_302, %c0_303, %c0_304] : memref<4x1x32xf32, #tpu.memory_space<vmem>>, vector<1x1x32xf32>
    %331 = vector.shape_cast %330 : vector<1x1x32xf32> to vector<1x32xf32>
    %332 = vector.broadcast %331 : vector<1x32xf32> to vector<2x32xf32>
    %333 = arith.addf %329, %332 : vector<2x32xf32>
    %c2_305 = arith.constant 2 : index
    %c0_306 = arith.constant 0 : index
    %c0_307 = arith.constant 0 : index
    %334 = vector.load %arg6[%c2_305, %c0_306, %c0_307] : memref<4x32x32xf32, #tpu.memory_space<vmem>>, vector<1x32x32xf32>
    %335 = vector.shape_cast %334 : vector<1x32x32xf32> to vector<32x32xf32>
    %cst_308 = arith.constant dense<0.000000e+00> : vector<2x32xf32>
    %336 = tpu.matmul %309, %335, %cst_308 {dimension_numbers = #tpu.dot_dimension_numbers<[1], [0], [0], [1], [0, 0, 1, 1], [], []>} : vector<2x32xf32>, vector<32x32xf32>, vector<2x32xf32> -> vector<2x32xf32>
    %c2_309 = arith.constant 2 : index
    %c0_310 = arith.constant 0 : index
    %c0_311 = arith.constant 0 : index
    %337 = vector.load %arg7[%c2_309, %c0_310, %c0_311] : memref<4x7x32xf32, #tpu.memory_space<vmem>>, vector<1x7x32xf32>
    %338 = vector.shape_cast %337 : vector<1x7x32xf32> to vector<7x32xf32>
    %cst_312 = arith.constant dense<0.000000e+00> : vector<2x32xf32>
    %339 = tpu.matmul %311, %338, %cst_312 {dimension_numbers = #tpu.dot_dimension_numbers<[1], [0], [0], [1], [0, 0, 1, 1], [], []>} : vector<2x7xf32>, vector<7x32xf32>, vector<2x32xf32> -> vector<2x32xf32>
    %340 = arith.addf %336, %339 : vector<2x32xf32>
    %c2_313 = arith.constant 2 : index
    %c0_314 = arith.constant 0 : index
    %c0_315 = arith.constant 0 : index
    %341 = vector.load %arg9[%c2_313, %c0_314, %c0_315] : memref<4x1x32xf32, #tpu.memory_space<vmem>>, vector<1x1x32xf32>
    %342 = vector.shape_cast %341 : vector<1x1x32xf32> to vector<1x32xf32>
    %343 = vector.broadcast %342 : vector<1x32xf32> to vector<2x32xf32>
    %344 = arith.addf %340, %343 : vector<2x32xf32>
    %c3_316 = arith.constant 3 : index
    %c0_317 = arith.constant 0 : index
    %c0_318 = arith.constant 0 : index
    %345 = vector.load %arg6[%c3_316, %c0_317, %c0_318] : memref<4x32x32xf32, #tpu.memory_space<vmem>>, vector<1x32x32xf32>
    %346 = vector.shape_cast %345 : vector<1x32x32xf32> to vector<32x32xf32>
    %cst_319 = arith.constant dense<0.000000e+00> : vector<2x32xf32>
    %347 = tpu.matmul %309, %346, %cst_319 {dimension_numbers = #tpu.dot_dimension_numbers<[1], [0], [0], [1], [0, 0, 1, 1], [], []>} : vector<2x32xf32>, vector<32x32xf32>, vector<2x32xf32> -> vector<2x32xf32>
    %c3_320 = arith.constant 3 : index
    %c0_321 = arith.constant 0 : index
    %c0_322 = arith.constant 0 : index
    %348 = vector.load %arg7[%c3_320, %c0_321, %c0_322] : memref<4x7x32xf32, #tpu.memory_space<vmem>>, vector<1x7x32xf32>
    %349 = vector.shape_cast %348 : vector<1x7x32xf32> to vector<7x32xf32>
    %cst_323 = arith.constant dense<0.000000e+00> : vector<2x32xf32>
    %350 = tpu.matmul %311, %349, %cst_323 {dimension_numbers = #tpu.dot_dimension_numbers<[1], [0], [0], [1], [0, 0, 1, 1], [], []>} : vector<2x7xf32>, vector<7x32xf32>, vector<2x32xf32> -> vector<2x32xf32>
    %351 = arith.addf %347, %350 : vector<2x32xf32>
    %c3_324 = arith.constant 3 : index
    %c0_325 = arith.constant 0 : index
    %c0_326 = arith.constant 0 : index
    %352 = vector.load %arg9[%c3_324, %c0_325, %c0_326] : memref<4x1x32xf32, #tpu.memory_space<vmem>>, vector<1x1x32xf32>
    %353 = vector.shape_cast %352 : vector<1x1x32xf32> to vector<1x32xf32>
    %354 = vector.broadcast %353 : vector<1x32xf32> to vector<2x32xf32>
    %355 = arith.addf %351, %354 : vector<2x32xf32>
    %356 = vector.extract_strided_slice %261 {offsets = [4, 0], sizes = [2, 32], strides = [1, 1]} : vector<10x32xf32> to vector<2x32xf32>
    %c2_327 = arith.constant 2 : index
    %c0_328 = arith.constant 0 : index
    %c0_329 = arith.constant 0 : index
    %357 = vector.load %arg1[%c2_327, %c0_328, %c0_329] : memref<5x2x7xf32, #tpu.memory_space<vmem>>, vector<1x2x7xf32>
    %358 = vector.shape_cast %357 : vector<1x2x7xf32> to vector<2x7xf32>
    %c0_330 = arith.constant 0 : index
    %c0_331 = arith.constant 0 : index
    %c0_332 = arith.constant 0 : index
    %359 = vector.load %arg6[%c0_330, %c0_331, %c0_332] : memref<4x32x32xf32, #tpu.memory_space<vmem>>, vector<1x32x32xf32>
    %360 = vector.shape_cast %359 : vector<1x32x32xf32> to vector<32x32xf32>
    %cst_333 = arith.constant dense<0.000000e+00> : vector<2x32xf32>
    %361 = tpu.matmul %356, %360, %cst_333 {dimension_numbers = #tpu.dot_dimension_numbers<[1], [0], [0], [1], [0, 0, 1, 1], [], []>} : vector<2x32xf32>, vector<32x32xf32>, vector<2x32xf32> -> vector<2x32xf32>
    %c0_334 = arith.constant 0 : index
    %c0_335 = arith.constant 0 : index
    %c0_336 = arith.constant 0 : index
    %362 = vector.load %arg7[%c0_334, %c0_335, %c0_336] : memref<4x7x32xf32, #tpu.memory_space<vmem>>, vector<1x7x32xf32>
    %363 = vector.shape_cast %362 : vector<1x7x32xf32> to vector<7x32xf32>
    %cst_337 = arith.constant dense<0.000000e+00> : vector<2x32xf32>
    %364 = tpu.matmul %358, %363, %cst_337 {dimension_numbers = #tpu.dot_dimension_numbers<[1], [0], [0], [1], [0, 0, 1, 1], [], []>} : vector<2x7xf32>, vector<7x32xf32>, vector<2x32xf32> -> vector<2x32xf32>
    %365 = arith.addf %361, %364 : vector<2x32xf32>
    %c0_338 = arith.constant 0 : index
    %c0_339 = arith.constant 0 : index
    %c0_340 = arith.constant 0 : index
    %366 = vector.load %arg9[%c0_338, %c0_339, %c0_340] : memref<4x1x32xf32, #tpu.memory_space<vmem>>, vector<1x1x32xf32>
    %367 = vector.shape_cast %366 : vector<1x1x32xf32> to vector<1x32xf32>
    %368 = vector.broadcast %367 : vector<1x32xf32> to vector<2x32xf32>
    %369 = arith.addf %365, %368 : vector<2x32xf32>
    %c1_341 = arith.constant 1 : index
    %c0_342 = arith.constant 0 : index
    %c0_343 = arith.constant 0 : index
    %370 = vector.load %arg6[%c1_341, %c0_342, %c0_343] : memref<4x32x32xf32, #tpu.memory_space<vmem>>, vector<1x32x32xf32>
    %371 = vector.shape_cast %370 : vector<1x32x32xf32> to vector<32x32xf32>
    %cst_344 = arith.constant dense<0.000000e+00> : vector<2x32xf32>
    %372 = tpu.matmul %356, %371, %cst_344 {dimension_numbers = #tpu.dot_dimension_numbers<[1], [0], [0], [1], [0, 0, 1, 1], [], []>} : vector<2x32xf32>, vector<32x32xf32>, vector<2x32xf32> -> vector<2x32xf32>
    %c1_345 = arith.constant 1 : index
    %c0_346 = arith.constant 0 : index
    %c0_347 = arith.constant 0 : index
    %373 = vector.load %arg7[%c1_345, %c0_346, %c0_347] : memref<4x7x32xf32, #tpu.memory_space<vmem>>, vector<1x7x32xf32>
    %374 = vector.shape_cast %373 : vector<1x7x32xf32> to vector<7x32xf32>
    %cst_348 = arith.constant dense<0.000000e+00> : vector<2x32xf32>
    %375 = tpu.matmul %358, %374, %cst_348 {dimension_numbers = #tpu.dot_dimension_numbers<[1], [0], [0], [1], [0, 0, 1, 1], [], []>} : vector<2x7xf32>, vector<7x32xf32>, vector<2x32xf32> -> vector<2x32xf32>
    %376 = arith.addf %372, %375 : vector<2x32xf32>
    %c1_349 = arith.constant 1 : index
    %c0_350 = arith.constant 0 : index
    %c0_351 = arith.constant 0 : index
    %377 = vector.load %arg9[%c1_349, %c0_350, %c0_351] : memref<4x1x32xf32, #tpu.memory_space<vmem>>, vector<1x1x32xf32>
    %378 = vector.shape_cast %377 : vector<1x1x32xf32> to vector<1x32xf32>
    %379 = vector.broadcast %378 : vector<1x32xf32> to vector<2x32xf32>
    %380 = arith.addf %376, %379 : vector<2x32xf32>
    %c2_352 = arith.constant 2 : index
    %c0_353 = arith.constant 0 : index
    %c0_354 = arith.constant 0 : index
    %381 = vector.load %arg6[%c2_352, %c0_353, %c0_354] : memref<4x32x32xf32, #tpu.memory_space<vmem>>, vector<1x32x32xf32>
    %382 = vector.shape_cast %381 : vector<1x32x32xf32> to vector<32x32xf32>
    %cst_355 = arith.constant dense<0.000000e+00> : vector<2x32xf32>
    %383 = tpu.matmul %356, %382, %cst_355 {dimension_numbers = #tpu.dot_dimension_numbers<[1], [0], [0], [1], [0, 0, 1, 1], [], []>} : vector<2x32xf32>, vector<32x32xf32>, vector<2x32xf32> -> vector<2x32xf32>
    %c2_356 = arith.constant 2 : index
    %c0_357 = arith.constant 0 : index
    %c0_358 = arith.constant 0 : index
    %384 = vector.load %arg7[%c2_356, %c0_357, %c0_358] : memref<4x7x32xf32, #tpu.memory_space<vmem>>, vector<1x7x32xf32>
    %385 = vector.shape_cast %384 : vector<1x7x32xf32> to vector<7x32xf32>
    %cst_359 = arith.constant dense<0.000000e+00> : vector<2x32xf32>
    %386 = tpu.matmul %358, %385, %cst_359 {dimension_numbers = #tpu.dot_dimension_numbers<[1], [0], [0], [1], [0, 0, 1, 1], [], []>} : vector<2x7xf32>, vector<7x32xf32>, vector<2x32xf32> -> vector<2x32xf32>
    %387 = arith.addf %383, %386 : vector<2x32xf32>
    %c2_360 = arith.constant 2 : index
    %c0_361 = arith.constant 0 : index
    %c0_362 = arith.constant 0 : index
    %388 = vector.load %arg9[%c2_360, %c0_361, %c0_362] : memref<4x1x32xf32, #tpu.memory_space<vmem>>, vector<1x1x32xf32>
    %389 = vector.shape_cast %388 : vector<1x1x32xf32> to vector<1x32xf32>
    %390 = vector.broadcast %389 : vector<1x32xf32> to vector<2x32xf32>
    %391 = arith.addf %387, %390 : vector<2x32xf32>
    %c3_363 = arith.constant 3 : index
    %c0_364 = arith.constant 0 : index
    %c0_365 = arith.constant 0 : index
    %392 = vector.load %arg6[%c3_363, %c0_364, %c0_365] : memref<4x32x32xf32, #tpu.memory_space<vmem>>, vector<1x32x32xf32>
    %393 = vector.shape_cast %392 : vector<1x32x32xf32> to vector<32x32xf32>
    %cst_366 = arith.constant dense<0.000000e+00> : vector<2x32xf32>
    %394 = tpu.matmul %356, %393, %cst_366 {dimension_numbers = #tpu.dot_dimension_numbers<[1], [0], [0], [1], [0, 0, 1, 1], [], []>} : vector<2x32xf32>, vector<32x32xf32>, vector<2x32xf32> -> vector<2x32xf32>
    %c3_367 = arith.constant 3 : index
    %c0_368 = arith.constant 0 : index
    %c0_369 = arith.constant 0 : index
    %395 = vector.load %arg7[%c3_367, %c0_368, %c0_369] : memref<4x7x32xf32, #tpu.memory_space<vmem>>, vector<1x7x32xf32>
    %396 = vector.shape_cast %395 : vector<1x7x32xf32> to vector<7x32xf32>
    %cst_370 = arith.constant dense<0.000000e+00> : vector<2x32xf32>
    %397 = tpu.matmul %358, %396, %cst_370 {dimension_numbers = #tpu.dot_dimension_numbers<[1], [0], [0], [1], [0, 0, 1, 1], [], []>} : vector<2x7xf32>, vector<7x32xf32>, vector<2x32xf32> -> vector<2x32xf32>
    %398 = arith.addf %394, %397 : vector<2x32xf32>
    %c3_371 = arith.constant 3 : index
    %c0_372 = arith.constant 0 : index
    %c0_373 = arith.constant 0 : index
    %399 = vector.load %arg9[%c3_371, %c0_372, %c0_373] : memref<4x1x32xf32, #tpu.memory_space<vmem>>, vector<1x1x32xf32>
    %400 = vector.shape_cast %399 : vector<1x1x32xf32> to vector<1x32xf32>
    %401 = vector.broadcast %400 : vector<1x32xf32> to vector<2x32xf32>
    %402 = arith.addf %398, %401 : vector<2x32xf32>
    %403 = vector.extract_strided_slice %261 {offsets = [6, 0], sizes = [2, 32], strides = [1, 1]} : vector<10x32xf32> to vector<2x32xf32>
    %c3_374 = arith.constant 3 : index
    %c0_375 = arith.constant 0 : index
    %c0_376 = arith.constant 0 : index
    %404 = vector.load %arg1[%c3_374, %c0_375, %c0_376] : memref<5x2x7xf32, #tpu.memory_space<vmem>>, vector<1x2x7xf32>
    %405 = vector.shape_cast %404 : vector<1x2x7xf32> to vector<2x7xf32>
    %c0_377 = arith.constant 0 : index
    %c0_378 = arith.constant 0 : index
    %c0_379 = arith.constant 0 : index
    %406 = vector.load %arg6[%c0_377, %c0_378, %c0_379] : memref<4x32x32xf32, #tpu.memory_space<vmem>>, vector<1x32x32xf32>
    %407 = vector.shape_cast %406 : vector<1x32x32xf32> to vector<32x32xf32>
    %cst_380 = arith.constant dense<0.000000e+00> : vector<2x32xf32>
    %408 = tpu.matmul %403, %407, %cst_380 {dimension_numbers = #tpu.dot_dimension_numbers<[1], [0], [0], [1], [0, 0, 1, 1], [], []>} : vector<2x32xf32>, vector<32x32xf32>, vector<2x32xf32> -> vector<2x32xf32>
    %c0_381 = arith.constant 0 : index
    %c0_382 = arith.constant 0 : index
    %c0_383 = arith.constant 0 : index
    %409 = vector.load %arg7[%c0_381, %c0_382, %c0_383] : memref<4x7x32xf32, #tpu.memory_space<vmem>>, vector<1x7x32xf32>
    %410 = vector.shape_cast %409 : vector<1x7x32xf32> to vector<7x32xf32>
    %cst_384 = arith.constant dense<0.000000e+00> : vector<2x32xf32>
    %411 = tpu.matmul %405, %410, %cst_384 {dimension_numbers = #tpu.dot_dimension_numbers<[1], [0], [0], [1], [0, 0, 1, 1], [], []>} : vector<2x7xf32>, vector<7x32xf32>, vector<2x32xf32> -> vector<2x32xf32>
    %412 = arith.addf %408, %411 : vector<2x32xf32>
    %c0_385 = arith.constant 0 : index
    %c0_386 = arith.constant 0 : index
    %c0_387 = arith.constant 0 : index
    %413 = vector.load %arg9[%c0_385, %c0_386, %c0_387] : memref<4x1x32xf32, #tpu.memory_space<vmem>>, vector<1x1x32xf32>
    %414 = vector.shape_cast %413 : vector<1x1x32xf32> to vector<1x32xf32>
    %415 = vector.broadcast %414 : vector<1x32xf32> to vector<2x32xf32>
    %416 = arith.addf %412, %415 : vector<2x32xf32>
    %c1_388 = arith.constant 1 : index
    %c0_389 = arith.constant 0 : index
    %c0_390 = arith.constant 0 : index
    %417 = vector.load %arg6[%c1_388, %c0_389, %c0_390] : memref<4x32x32xf32, #tpu.memory_space<vmem>>, vector<1x32x32xf32>
    %418 = vector.shape_cast %417 : vector<1x32x32xf32> to vector<32x32xf32>
    %cst_391 = arith.constant dense<0.000000e+00> : vector<2x32xf32>
    %419 = tpu.matmul %403, %418, %cst_391 {dimension_numbers = #tpu.dot_dimension_numbers<[1], [0], [0], [1], [0, 0, 1, 1], [], []>} : vector<2x32xf32>, vector<32x32xf32>, vector<2x32xf32> -> vector<2x32xf32>
    %c1_392 = arith.constant 1 : index
    %c0_393 = arith.constant 0 : index
    %c0_394 = arith.constant 0 : index
    %420 = vector.load %arg7[%c1_392, %c0_393, %c0_394] : memref<4x7x32xf32, #tpu.memory_space<vmem>>, vector<1x7x32xf32>
    %421 = vector.shape_cast %420 : vector<1x7x32xf32> to vector<7x32xf32>
    %cst_395 = arith.constant dense<0.000000e+00> : vector<2x32xf32>
    %422 = tpu.matmul %405, %421, %cst_395 {dimension_numbers = #tpu.dot_dimension_numbers<[1], [0], [0], [1], [0, 0, 1, 1], [], []>} : vector<2x7xf32>, vector<7x32xf32>, vector<2x32xf32> -> vector<2x32xf32>
    %423 = arith.addf %419, %422 : vector<2x32xf32>
    %c1_396 = arith.constant 1 : index
    %c0_397 = arith.constant 0 : index
    %c0_398 = arith.constant 0 : index
    %424 = vector.load %arg9[%c1_396, %c0_397, %c0_398] : memref<4x1x32xf32, #tpu.memory_space<vmem>>, vector<1x1x32xf32>
    %425 = vector.shape_cast %424 : vector<1x1x32xf32> to vector<1x32xf32>
    %426 = vector.broadcast %425 : vector<1x32xf32> to vector<2x32xf32>
    %427 = arith.addf %423, %426 : vector<2x32xf32>
    %c2_399 = arith.constant 2 : index
    %c0_400 = arith.constant 0 : index
    %c0_401 = arith.constant 0 : index
    %428 = vector.load %arg6[%c2_399, %c0_400, %c0_401] : memref<4x32x32xf32, #tpu.memory_space<vmem>>, vector<1x32x32xf32>
    %429 = vector.shape_cast %428 : vector<1x32x32xf32> to vector<32x32xf32>
    %cst_402 = arith.constant dense<0.000000e+00> : vector<2x32xf32>
    %430 = tpu.matmul %403, %429, %cst_402 {dimension_numbers = #tpu.dot_dimension_numbers<[1], [0], [0], [1], [0, 0, 1, 1], [], []>} : vector<2x32xf32>, vector<32x32xf32>, vector<2x32xf32> -> vector<2x32xf32>
    %c2_403 = arith.constant 2 : index
    %c0_404 = arith.constant 0 : index
    %c0_405 = arith.constant 0 : index
    %431 = vector.load %arg7[%c2_403, %c0_404, %c0_405] : memref<4x7x32xf32, #tpu.memory_space<vmem>>, vector<1x7x32xf32>
    %432 = vector.shape_cast %431 : vector<1x7x32xf32> to vector<7x32xf32>
    %cst_406 = arith.constant dense<0.000000e+00> : vector<2x32xf32>
    %433 = tpu.matmul %405, %432, %cst_406 {dimension_numbers = #tpu.dot_dimension_numbers<[1], [0], [0], [1], [0, 0, 1, 1], [], []>} : vector<2x7xf32>, vector<7x32xf32>, vector<2x32xf32> -> vector<2x32xf32>
    %434 = arith.addf %430, %433 : vector<2x32xf32>
    %c2_407 = arith.constant 2 : index
    %c0_408 = arith.constant 0 : index
    %c0_409 = arith.constant 0 : index
    %435 = vector.load %arg9[%c2_407, %c0_408, %c0_409] : memref<4x1x32xf32, #tpu.memory_space<vmem>>, vector<1x1x32xf32>
    %436 = vector.shape_cast %435 : vector<1x1x32xf32> to vector<1x32xf32>
    %437 = vector.broadcast %436 : vector<1x32xf32> to vector<2x32xf32>
    %438 = arith.addf %434, %437 : vector<2x32xf32>
    %c3_410 = arith.constant 3 : index
    %c0_411 = arith.constant 0 : index
    %c0_412 = arith.constant 0 : index
    %439 = vector.load %arg6[%c3_410, %c0_411, %c0_412] : memref<4x32x32xf32, #tpu.memory_space<vmem>>, vector<1x32x32xf32>
    %440 = vector.shape_cast %439 : vector<1x32x32xf32> to vector<32x32xf32>
    %cst_413 = arith.constant dense<0.000000e+00> : vector<2x32xf32>
    %441 = tpu.matmul %403, %440, %cst_413 {dimension_numbers = #tpu.dot_dimension_numbers<[1], [0], [0], [1], [0, 0, 1, 1], [], []>} : vector<2x32xf32>, vector<32x32xf32>, vector<2x32xf32> -> vector<2x32xf32>
    %c3_414 = arith.constant 3 : index
    %c0_415 = arith.constant 0 : index
    %c0_416 = arith.constant 0 : index
    %442 = vector.load %arg7[%c3_414, %c0_415, %c0_416] : memref<4x7x32xf32, #tpu.memory_space<vmem>>, vector<1x7x32xf32>
    %443 = vector.shape_cast %442 : vector<1x7x32xf32> to vector<7x32xf32>
    %cst_417 = arith.constant dense<0.000000e+00> : vector<2x32xf32>
    %444 = tpu.matmul %405, %443, %cst_417 {dimension_numbers = #tpu.dot_dimension_numbers<[1], [0], [0], [1], [0, 0, 1, 1], [], []>} : vector<2x7xf32>, vector<7x32xf32>, vector<2x32xf32> -> vector<2x32xf32>
    %445 = arith.addf %441, %444 : vector<2x32xf32>
    %c3_418 = arith.constant 3 : index
    %c0_419 = arith.constant 0 : index
    %c0_420 = arith.constant 0 : index
    %446 = vector.load %arg9[%c3_418, %c0_419, %c0_420] : memref<4x1x32xf32, #tpu.memory_space<vmem>>, vector<1x1x32xf32>
    %447 = vector.shape_cast %446 : vector<1x1x32xf32> to vector<1x32xf32>
    %448 = vector.broadcast %447 : vector<1x32xf32> to vector<2x32xf32>
    %449 = arith.addf %445, %448 : vector<2x32xf32>
    %450 = vector.extract_strided_slice %261 {offsets = [8, 0], sizes = [2, 32], strides = [1, 1]} : vector<10x32xf32> to vector<2x32xf32>
    %c4_421 = arith.constant 4 : index
    %c0_422 = arith.constant 0 : index
    %c0_423 = arith.constant 0 : index
    %451 = vector.load %arg1[%c4_421, %c0_422, %c0_423] : memref<5x2x7xf32, #tpu.memory_space<vmem>>, vector<1x2x7xf32>
    %452 = vector.shape_cast %451 : vector<1x2x7xf32> to vector<2x7xf32>
    %c0_424 = arith.constant 0 : index
    %c0_425 = arith.constant 0 : index
    %c0_426 = arith.constant 0 : index
    %453 = vector.load %arg6[%c0_424, %c0_425, %c0_426] : memref<4x32x32xf32, #tpu.memory_space<vmem>>, vector<1x32x32xf32>
    %454 = vector.shape_cast %453 : vector<1x32x32xf32> to vector<32x32xf32>
    %cst_427 = arith.constant dense<0.000000e+00> : vector<2x32xf32>
    %455 = tpu.matmul %450, %454, %cst_427 {dimension_numbers = #tpu.dot_dimension_numbers<[1], [0], [0], [1], [0, 0, 1, 1], [], []>} : vector<2x32xf32>, vector<32x32xf32>, vector<2x32xf32> -> vector<2x32xf32>
    %c0_428 = arith.constant 0 : index
    %c0_429 = arith.constant 0 : index
    %c0_430 = arith.constant 0 : index
    %456 = vector.load %arg7[%c0_428, %c0_429, %c0_430] : memref<4x7x32xf32, #tpu.memory_space<vmem>>, vector<1x7x32xf32>
    %457 = vector.shape_cast %456 : vector<1x7x32xf32> to vector<7x32xf32>
    %cst_431 = arith.constant dense<0.000000e+00> : vector<2x32xf32>
    %458 = tpu.matmul %452, %457, %cst_431 {dimension_numbers = #tpu.dot_dimension_numbers<[1], [0], [0], [1], [0, 0, 1, 1], [], []>} : vector<2x7xf32>, vector<7x32xf32>, vector<2x32xf32> -> vector<2x32xf32>
    %459 = arith.addf %455, %458 : vector<2x32xf32>
    %c0_432 = arith.constant 0 : index
    %c0_433 = arith.constant 0 : index
    %c0_434 = arith.constant 0 : index
    %460 = vector.load %arg9[%c0_432, %c0_433, %c0_434] : memref<4x1x32xf32, #tpu.memory_space<vmem>>, vector<1x1x32xf32>
    %461 = vector.shape_cast %460 : vector<1x1x32xf32> to vector<1x32xf32>
    %462 = vector.broadcast %461 : vector<1x32xf32> to vector<2x32xf32>
    %463 = arith.addf %459, %462 : vector<2x32xf32>
    %c1_435 = arith.constant 1 : index
    %c0_436 = arith.constant 0 : index
    %c0_437 = arith.constant 0 : index
    %464 = vector.load %arg6[%c1_435, %c0_436, %c0_437] : memref<4x32x32xf32, #tpu.memory_space<vmem>>, vector<1x32x32xf32>
    %465 = vector.shape_cast %464 : vector<1x32x32xf32> to vector<32x32xf32>
    %cst_438 = arith.constant dense<0.000000e+00> : vector<2x32xf32>
    %466 = tpu.matmul %450, %465, %cst_438 {dimension_numbers = #tpu.dot_dimension_numbers<[1], [0], [0], [1], [0, 0, 1, 1], [], []>} : vector<2x32xf32>, vector<32x32xf32>, vector<2x32xf32> -> vector<2x32xf32>
    %c1_439 = arith.constant 1 : index
    %c0_440 = arith.constant 0 : index
    %c0_441 = arith.constant 0 : index
    %467 = vector.load %arg7[%c1_439, %c0_440, %c0_441] : memref<4x7x32xf32, #tpu.memory_space<vmem>>, vector<1x7x32xf32>
    %468 = vector.shape_cast %467 : vector<1x7x32xf32> to vector<7x32xf32>
    %cst_442 = arith.constant dense<0.000000e+00> : vector<2x32xf32>
    %469 = tpu.matmul %452, %468, %cst_442 {dimension_numbers = #tpu.dot_dimension_numbers<[1], [0], [0], [1], [0, 0, 1, 1], [], []>} : vector<2x7xf32>, vector<7x32xf32>, vector<2x32xf32> -> vector<2x32xf32>
    %470 = arith.addf %466, %469 : vector<2x32xf32>
    %c1_443 = arith.constant 1 : index
    %c0_444 = arith.constant 0 : index
    %c0_445 = arith.constant 0 : index
    %471 = vector.load %arg9[%c1_443, %c0_444, %c0_445] : memref<4x1x32xf32, #tpu.memory_space<vmem>>, vector<1x1x32xf32>
    %472 = vector.shape_cast %471 : vector<1x1x32xf32> to vector<1x32xf32>
    %473 = vector.broadcast %472 : vector<1x32xf32> to vector<2x32xf32>
    %474 = arith.addf %470, %473 : vector<2x32xf32>
    %c2_446 = arith.constant 2 : index
    %c0_447 = arith.constant 0 : index
    %c0_448 = arith.constant 0 : index
    %475 = vector.load %arg6[%c2_446, %c0_447, %c0_448] : memref<4x32x32xf32, #tpu.memory_space<vmem>>, vector<1x32x32xf32>
    %476 = vector.shape_cast %475 : vector<1x32x32xf32> to vector<32x32xf32>
    %cst_449 = arith.constant dense<0.000000e+00> : vector<2x32xf32>
    %477 = tpu.matmul %450, %476, %cst_449 {dimension_numbers = #tpu.dot_dimension_numbers<[1], [0], [0], [1], [0, 0, 1, 1], [], []>} : vector<2x32xf32>, vector<32x32xf32>, vector<2x32xf32> -> vector<2x32xf32>
    %c2_450 = arith.constant 2 : index
    %c0_451 = arith.constant 0 : index
    %c0_452 = arith.constant 0 : index
    %478 = vector.load %arg7[%c2_450, %c0_451, %c0_452] : memref<4x7x32xf32, #tpu.memory_space<vmem>>, vector<1x7x32xf32>
    %479 = vector.shape_cast %478 : vector<1x7x32xf32> to vector<7x32xf32>
    %cst_453 = arith.constant dense<0.000000e+00> : vector<2x32xf32>
    %480 = tpu.matmul %452, %479, %cst_453 {dimension_numbers = #tpu.dot_dimension_numbers<[1], [0], [0], [1], [0, 0, 1, 1], [], []>} : vector<2x7xf32>, vector<7x32xf32>, vector<2x32xf32> -> vector<2x32xf32>
    %481 = arith.addf %477, %480 : vector<2x32xf32>
    %c2_454 = arith.constant 2 : index
    %c0_455 = arith.constant 0 : index
    %c0_456 = arith.constant 0 : index
    %482 = vector.load %arg9[%c2_454, %c0_455, %c0_456] : memref<4x1x32xf32, #tpu.memory_space<vmem>>, vector<1x1x32xf32>
    %483 = vector.shape_cast %482 : vector<1x1x32xf32> to vector<1x32xf32>
    %484 = vector.broadcast %483 : vector<1x32xf32> to vector<2x32xf32>
    %485 = arith.addf %481, %484 : vector<2x32xf32>
    %c3_457 = arith.constant 3 : index
    %c0_458 = arith.constant 0 : index
    %c0_459 = arith.constant 0 : index
    %486 = vector.load %arg6[%c3_457, %c0_458, %c0_459] : memref<4x32x32xf32, #tpu.memory_space<vmem>>, vector<1x32x32xf32>
    %487 = vector.shape_cast %486 : vector<1x32x32xf32> to vector<32x32xf32>
    %cst_460 = arith.constant dense<0.000000e+00> : vector<2x32xf32>
    %488 = tpu.matmul %450, %487, %cst_460 {dimension_numbers = #tpu.dot_dimension_numbers<[1], [0], [0], [1], [0, 0, 1, 1], [], []>} : vector<2x32xf32>, vector<32x32xf32>, vector<2x32xf32> -> vector<2x32xf32>
    %c3_461 = arith.constant 3 : index
    %c0_462 = arith.constant 0 : index
    %c0_463 = arith.constant 0 : index
    %489 = vector.load %arg7[%c3_461, %c0_462, %c0_463] : memref<4x7x32xf32, #tpu.memory_space<vmem>>, vector<1x7x32xf32>
    %490 = vector.shape_cast %489 : vector<1x7x32xf32> to vector<7x32xf32>
    %cst_464 = arith.constant dense<0.000000e+00> : vector<2x32xf32>
    %491 = tpu.matmul %452, %490, %cst_464 {dimension_numbers = #tpu.dot_dimension_numbers<[1], [0], [0], [1], [0, 0, 1, 1], [], []>} : vector<2x7xf32>, vector<7x32xf32>, vector<2x32xf32> -> vector<2x32xf32>
    %492 = arith.addf %488, %491 : vector<2x32xf32>
    %c3_465 = arith.constant 3 : index
    %c0_466 = arith.constant 0 : index
    %c0_467 = arith.constant 0 : index
    %493 = vector.load %arg9[%c3_465, %c0_466, %c0_467] : memref<4x1x32xf32, #tpu.memory_space<vmem>>, vector<1x1x32xf32>
    %494 = vector.shape_cast %493 : vector<1x1x32xf32> to vector<1x32xf32>
    %495 = vector.broadcast %494 : vector<1x32xf32> to vector<2x32xf32>
    %496 = arith.addf %492, %495 : vector<2x32xf32>
    %cst_468 = arith.constant 0.000000e+00 : f32
    %497 = vector.broadcast %cst_468 : f32 to vector<2x32xf32>
    %cst_469 = arith.constant 0.000000e+00 : f32
    %498 = vector.broadcast %cst_469 : f32 to vector<2x32xf32>
    %c0_470 = arith.constant 0 : index
    %c0_471 = arith.constant 0 : index
    %c0_472 = arith.constant 0 : index
    %499 = vector.load %arg8[%c0_470, %c0_471, %c0_472] : memref<4x32x32xf32, #tpu.memory_space<vmem>>, vector<1x32x32xf32>
    %500 = vector.shape_cast %499 : vector<1x32x32xf32> to vector<32x32xf32>
    %cst_473 = arith.constant dense<0.000000e+00> : vector<2x32xf32>
    %501 = tpu.matmul %497, %500, %cst_473 {dimension_numbers = #tpu.dot_dimension_numbers<[1], [0], [0], [1], [0, 0, 1, 1], [], []>} : vector<2x32xf32>, vector<32x32xf32>, vector<2x32xf32> -> vector<2x32xf32>
    %502 = arith.addf %275, %501 : vector<2x32xf32>
    %c1_474 = arith.constant 1 : index
    %c0_475 = arith.constant 0 : index
    %c0_476 = arith.constant 0 : index
    %503 = vector.load %arg8[%c1_474, %c0_475, %c0_476] : memref<4x32x32xf32, #tpu.memory_space<vmem>>, vector<1x32x32xf32>
    %504 = vector.shape_cast %503 : vector<1x32x32xf32> to vector<32x32xf32>
    %cst_477 = arith.constant dense<0.000000e+00> : vector<2x32xf32>
    %505 = tpu.matmul %497, %504, %cst_477 {dimension_numbers = #tpu.dot_dimension_numbers<[1], [0], [0], [1], [0, 0, 1, 1], [], []>} : vector<2x32xf32>, vector<32x32xf32>, vector<2x32xf32> -> vector<2x32xf32>
    %506 = arith.addf %286, %505 : vector<2x32xf32>
    %c2_478 = arith.constant 2 : index
    %c0_479 = arith.constant 0 : index
    %c0_480 = arith.constant 0 : index
    %507 = vector.load %arg8[%c2_478, %c0_479, %c0_480] : memref<4x32x32xf32, #tpu.memory_space<vmem>>, vector<1x32x32xf32>
    %508 = vector.shape_cast %507 : vector<1x32x32xf32> to vector<32x32xf32>
    %cst_481 = arith.constant dense<0.000000e+00> : vector<2x32xf32>
    %509 = tpu.matmul %497, %508, %cst_481 {dimension_numbers = #tpu.dot_dimension_numbers<[1], [0], [0], [1], [0, 0, 1, 1], [], []>} : vector<2x32xf32>, vector<32x32xf32>, vector<2x32xf32> -> vector<2x32xf32>
    %510 = arith.addf %297, %509 : vector<2x32xf32>
    %c3_482 = arith.constant 3 : index
    %c0_483 = arith.constant 0 : index
    %c0_484 = arith.constant 0 : index
    %511 = vector.load %arg8[%c3_482, %c0_483, %c0_484] : memref<4x32x32xf32, #tpu.memory_space<vmem>>, vector<1x32x32xf32>
    %512 = vector.shape_cast %511 : vector<1x32x32xf32> to vector<32x32xf32>
    %cst_485 = arith.constant dense<0.000000e+00> : vector<2x32xf32>
    %513 = tpu.matmul %497, %512, %cst_485 {dimension_numbers = #tpu.dot_dimension_numbers<[1], [0], [0], [1], [0, 0, 1, 1], [], []>} : vector<2x32xf32>, vector<32x32xf32>, vector<2x32xf32> -> vector<2x32xf32>
    %514 = arith.addf %308, %513 : vector<2x32xf32>
    %515 = arith.negf %502 : vector<2x32xf32>
    %516 = math.exp %515 : vector<2x32xf32>
    %cst_486 = arith.constant 1.000000e+00 : f32
    %517 = vector.broadcast %cst_486 : f32 to vector<2x32xf32>
    %518 = arith.addf %517, %516 : vector<2x32xf32>
    %519 = arith.divf %517, %518 : vector<2x32xf32>
    %520 = arith.negf %506 : vector<2x32xf32>
    %521 = math.exp %520 : vector<2x32xf32>
    %cst_487 = arith.constant 1.000000e+00 : f32
    %522 = vector.broadcast %cst_487 : f32 to vector<2x32xf32>
    %523 = arith.addf %522, %521 : vector<2x32xf32>
    %524 = arith.divf %522, %523 : vector<2x32xf32>
    %525 = math.tanh %510 : vector<2x32xf32>
    %526 = arith.negf %514 : vector<2x32xf32>
    %527 = math.exp %526 : vector<2x32xf32>
    %cst_488 = arith.constant 1.000000e+00 : f32
    %528 = vector.broadcast %cst_488 : f32 to vector<2x32xf32>
    %529 = arith.addf %528, %527 : vector<2x32xf32>
    %530 = arith.divf %528, %529 : vector<2x32xf32>
    %531 = arith.mulf %524, %498 : vector<2x32xf32>
    %532 = arith.mulf %519, %525 : vector<2x32xf32>
    %533 = arith.addf %531, %532 : vector<2x32xf32>
    %534 = math.tanh %533 : vector<2x32xf32>
    %535 = arith.mulf %530, %534 : vector<2x32xf32>
    %c0_489 = arith.constant 0 : index
    %c0_490 = arith.constant 0 : index
    %c0_491 = arith.constant 0 : index
    %536 = vector.load %arg8[%c0_489, %c0_490, %c0_491] : memref<4x32x32xf32, #tpu.memory_space<vmem>>, vector<1x32x32xf32>
    %537 = vector.shape_cast %536 : vector<1x32x32xf32> to vector<32x32xf32>
    %cst_492 = arith.constant dense<0.000000e+00> : vector<2x32xf32>
    %538 = tpu.matmul %535, %537, %cst_492 {dimension_numbers = #tpu.dot_dimension_numbers<[1], [0], [0], [1], [0, 0, 1, 1], [], []>} : vector<2x32xf32>, vector<32x32xf32>, vector<2x32xf32> -> vector<2x32xf32>
    %539 = arith.addf %322, %538 : vector<2x32xf32>
    %c1_493 = arith.constant 1 : index
    %c0_494 = arith.constant 0 : index
    %c0_495 = arith.constant 0 : index
    %540 = vector.load %arg8[%c1_493, %c0_494, %c0_495] : memref<4x32x32xf32, #tpu.memory_space<vmem>>, vector<1x32x32xf32>
    %541 = vector.shape_cast %540 : vector<1x32x32xf32> to vector<32x32xf32>
    %cst_496 = arith.constant dense<0.000000e+00> : vector<2x32xf32>
    %542 = tpu.matmul %535, %541, %cst_496 {dimension_numbers = #tpu.dot_dimension_numbers<[1], [0], [0], [1], [0, 0, 1, 1], [], []>} : vector<2x32xf32>, vector<32x32xf32>, vector<2x32xf32> -> vector<2x32xf32>
    %543 = arith.addf %333, %542 : vector<2x32xf32>
    %c2_497 = arith.constant 2 : index
    %c0_498 = arith.constant 0 : index
    %c0_499 = arith.constant 0 : index
    %544 = vector.load %arg8[%c2_497, %c0_498, %c0_499] : memref<4x32x32xf32, #tpu.memory_space<vmem>>, vector<1x32x32xf32>
    %545 = vector.shape_cast %544 : vector<1x32x32xf32> to vector<32x32xf32>
    %cst_500 = arith.constant dense<0.000000e+00> : vector<2x32xf32>
    %546 = tpu.matmul %535, %545, %cst_500 {dimension_numbers = #tpu.dot_dimension_numbers<[1], [0], [0], [1], [0, 0, 1, 1], [], []>} : vector<2x32xf32>, vector<32x32xf32>, vector<2x32xf32> -> vector<2x32xf32>
    %547 = arith.addf %344, %546 : vector<2x32xf32>
    %c3_501 = arith.constant 3 : index
    %c0_502 = arith.constant 0 : index
    %c0_503 = arith.constant 0 : index
    %548 = vector.load %arg8[%c3_501, %c0_502, %c0_503] : memref<4x32x32xf32, #tpu.memory_space<vmem>>, vector<1x32x32xf32>
    %549 = vector.shape_cast %548 : vector<1x32x32xf32> to vector<32x32xf32>
    %cst_504 = arith.constant dense<0.000000e+00> : vector<2x32xf32>
    %550 = tpu.matmul %535, %549, %cst_504 {dimension_numbers = #tpu.dot_dimension_numbers<[1], [0], [0], [1], [0, 0, 1, 1], [], []>} : vector<2x32xf32>, vector<32x32xf32>, vector<2x32xf32> -> vector<2x32xf32>
    %551 = arith.addf %355, %550 : vector<2x32xf32>
    %552 = arith.negf %539 : vector<2x32xf32>
    %553 = math.exp %552 : vector<2x32xf32>
    %cst_505 = arith.constant 1.000000e+00 : f32
    %554 = vector.broadcast %cst_505 : f32 to vector<2x32xf32>
    %555 = arith.addf %554, %553 : vector<2x32xf32>
    %556 = arith.divf %554, %555 : vector<2x32xf32>
    %557 = arith.negf %543 : vector<2x32xf32>
    %558 = math.exp %557 : vector<2x32xf32>
    %cst_506 = arith.constant 1.000000e+00 : f32
    %559 = vector.broadcast %cst_506 : f32 to vector<2x32xf32>
    %560 = arith.addf %559, %558 : vector<2x32xf32>
    %561 = arith.divf %559, %560 : vector<2x32xf32>
    %562 = math.tanh %547 : vector<2x32xf32>
    %563 = arith.negf %551 : vector<2x32xf32>
    %564 = math.exp %563 : vector<2x32xf32>
    %cst_507 = arith.constant 1.000000e+00 : f32
    %565 = vector.broadcast %cst_507 : f32 to vector<2x32xf32>
    %566 = arith.addf %565, %564 : vector<2x32xf32>
    %567 = arith.divf %565, %566 : vector<2x32xf32>
    %568 = arith.mulf %561, %533 : vector<2x32xf32>
    %569 = arith.mulf %556, %562 : vector<2x32xf32>
    %570 = arith.addf %568, %569 : vector<2x32xf32>
    %571 = math.tanh %570 : vector<2x32xf32>
    %572 = arith.mulf %567, %571 : vector<2x32xf32>
    %c0_508 = arith.constant 0 : index
    %c0_509 = arith.constant 0 : index
    %c0_510 = arith.constant 0 : index
    %573 = vector.load %arg8[%c0_508, %c0_509, %c0_510] : memref<4x32x32xf32, #tpu.memory_space<vmem>>, vector<1x32x32xf32>
    %574 = vector.shape_cast %573 : vector<1x32x32xf32> to vector<32x32xf32>
    %cst_511 = arith.constant dense<0.000000e+00> : vector<2x32xf32>
    %575 = tpu.matmul %572, %574, %cst_511 {dimension_numbers = #tpu.dot_dimension_numbers<[1], [0], [0], [1], [0, 0, 1, 1], [], []>} : vector<2x32xf32>, vector<32x32xf32>, vector<2x32xf32> -> vector<2x32xf32>
    %576 = arith.addf %369, %575 : vector<2x32xf32>
    %c1_512 = arith.constant 1 : index
    %c0_513 = arith.constant 0 : index
    %c0_514 = arith.constant 0 : index
    %577 = vector.load %arg8[%c1_512, %c0_513, %c0_514] : memref<4x32x32xf32, #tpu.memory_space<vmem>>, vector<1x32x32xf32>
    %578 = vector.shape_cast %577 : vector<1x32x32xf32> to vector<32x32xf32>
    %cst_515 = arith.constant dense<0.000000e+00> : vector<2x32xf32>
    %579 = tpu.matmul %572, %578, %cst_515 {dimension_numbers = #tpu.dot_dimension_numbers<[1], [0], [0], [1], [0, 0, 1, 1], [], []>} : vector<2x32xf32>, vector<32x32xf32>, vector<2x32xf32> -> vector<2x32xf32>
    %580 = arith.addf %380, %579 : vector<2x32xf32>
    %c2_516 = arith.constant 2 : index
    %c0_517 = arith.constant 0 : index
    %c0_518 = arith.constant 0 : index
    %581 = vector.load %arg8[%c2_516, %c0_517, %c0_518] : memref<4x32x32xf32, #tpu.memory_space<vmem>>, vector<1x32x32xf32>
    %582 = vector.shape_cast %581 : vector<1x32x32xf32> to vector<32x32xf32>
    %cst_519 = arith.constant dense<0.000000e+00> : vector<2x32xf32>
    %583 = tpu.matmul %572, %582, %cst_519 {dimension_numbers = #tpu.dot_dimension_numbers<[1], [0], [0], [1], [0, 0, 1, 1], [], []>} : vector<2x32xf32>, vector<32x32xf32>, vector<2x32xf32> -> vector<2x32xf32>
    %584 = arith.addf %391, %583 : vector<2x32xf32>
    %c3_520 = arith.constant 3 : index
    %c0_521 = arith.constant 0 : index
    %c0_522 = arith.constant 0 : index
    %585 = vector.load %arg8[%c3_520, %c0_521, %c0_522] : memref<4x32x32xf32, #tpu.memory_space<vmem>>, vector<1x32x32xf32>
    %586 = vector.shape_cast %585 : vector<1x32x32xf32> to vector<32x32xf32>
    %cst_523 = arith.constant dense<0.000000e+00> : vector<2x32xf32>
    %587 = tpu.matmul %572, %586, %cst_523 {dimension_numbers = #tpu.dot_dimension_numbers<[1], [0], [0], [1], [0, 0, 1, 1], [], []>} : vector<2x32xf32>, vector<32x32xf32>, vector<2x32xf32> -> vector<2x32xf32>
    %588 = arith.addf %402, %587 : vector<2x32xf32>
    %589 = arith.negf %576 : vector<2x32xf32>
    %590 = math.exp %589 : vector<2x32xf32>
    %cst_524 = arith.constant 1.000000e+00 : f32
    %591 = vector.broadcast %cst_524 : f32 to vector<2x32xf32>
    %592 = arith.addf %591, %590 : vector<2x32xf32>
    %593 = arith.divf %591, %592 : vector<2x32xf32>
    %594 = arith.negf %580 : vector<2x32xf32>
    %595 = math.exp %594 : vector<2x32xf32>
    %cst_525 = arith.constant 1.000000e+00 : f32
    %596 = vector.broadcast %cst_525 : f32 to vector<2x32xf32>
    %597 = arith.addf %596, %595 : vector<2x32xf32>
    %598 = arith.divf %596, %597 : vector<2x32xf32>
    %599 = math.tanh %584 : vector<2x32xf32>
    %600 = arith.negf %588 : vector<2x32xf32>
    %601 = math.exp %600 : vector<2x32xf32>
    %cst_526 = arith.constant 1.000000e+00 : f32
    %602 = vector.broadcast %cst_526 : f32 to vector<2x32xf32>
    %603 = arith.addf %602, %601 : vector<2x32xf32>
    %604 = arith.divf %602, %603 : vector<2x32xf32>
    %605 = arith.mulf %598, %570 : vector<2x32xf32>
    %606 = arith.mulf %593, %599 : vector<2x32xf32>
    %607 = arith.addf %605, %606 : vector<2x32xf32>
    %608 = math.tanh %607 : vector<2x32xf32>
    %609 = arith.mulf %604, %608 : vector<2x32xf32>
    %c0_527 = arith.constant 0 : index
    %c0_528 = arith.constant 0 : index
    %c0_529 = arith.constant 0 : index
    %610 = vector.load %arg8[%c0_527, %c0_528, %c0_529] : memref<4x32x32xf32, #tpu.memory_space<vmem>>, vector<1x32x32xf32>
    %611 = vector.shape_cast %610 : vector<1x32x32xf32> to vector<32x32xf32>
    %cst_530 = arith.constant dense<0.000000e+00> : vector<2x32xf32>
    %612 = tpu.matmul %609, %611, %cst_530 {dimension_numbers = #tpu.dot_dimension_numbers<[1], [0], [0], [1], [0, 0, 1, 1], [], []>} : vector<2x32xf32>, vector<32x32xf32>, vector<2x32xf32> -> vector<2x32xf32>
    %613 = arith.addf %416, %612 : vector<2x32xf32>
    %c1_531 = arith.constant 1 : index
    %c0_532 = arith.constant 0 : index
    %c0_533 = arith.constant 0 : index
    %614 = vector.load %arg8[%c1_531, %c0_532, %c0_533] : memref<4x32x32xf32, #tpu.memory_space<vmem>>, vector<1x32x32xf32>
    %615 = vector.shape_cast %614 : vector<1x32x32xf32> to vector<32x32xf32>
    %cst_534 = arith.constant dense<0.000000e+00> : vector<2x32xf32>
    %616 = tpu.matmul %609, %615, %cst_534 {dimension_numbers = #tpu.dot_dimension_numbers<[1], [0], [0], [1], [0, 0, 1, 1], [], []>} : vector<2x32xf32>, vector<32x32xf32>, vector<2x32xf32> -> vector<2x32xf32>
    %617 = arith.addf %427, %616 : vector<2x32xf32>
    %c2_535 = arith.constant 2 : index
    %c0_536 = arith.constant 0 : index
    %c0_537 = arith.constant 0 : index
    %618 = vector.load %arg8[%c2_535, %c0_536, %c0_537] : memref<4x32x32xf32, #tpu.memory_space<vmem>>, vector<1x32x32xf32>
    %619 = vector.shape_cast %618 : vector<1x32x32xf32> to vector<32x32xf32>
    %cst_538 = arith.constant dense<0.000000e+00> : vector<2x32xf32>
    %620 = tpu.matmul %609, %619, %cst_538 {dimension_numbers = #tpu.dot_dimension_numbers<[1], [0], [0], [1], [0, 0, 1, 1], [], []>} : vector<2x32xf32>, vector<32x32xf32>, vector<2x32xf32> -> vector<2x32xf32>
    %621 = arith.addf %438, %620 : vector<2x32xf32>
    %c3_539 = arith.constant 3 : index
    %c0_540 = arith.constant 0 : index
    %c0_541 = arith.constant 0 : index
    %622 = vector.load %arg8[%c3_539, %c0_540, %c0_541] : memref<4x32x32xf32, #tpu.memory_space<vmem>>, vector<1x32x32xf32>
    %623 = vector.shape_cast %622 : vector<1x32x32xf32> to vector<32x32xf32>
    %cst_542 = arith.constant dense<0.000000e+00> : vector<2x32xf32>
    %624 = tpu.matmul %609, %623, %cst_542 {dimension_numbers = #tpu.dot_dimension_numbers<[1], [0], [0], [1], [0, 0, 1, 1], [], []>} : vector<2x32xf32>, vector<32x32xf32>, vector<2x32xf32> -> vector<2x32xf32>
    %625 = arith.addf %449, %624 : vector<2x32xf32>
    %626 = arith.negf %613 : vector<2x32xf32>
    %627 = math.exp %626 : vector<2x32xf32>
    %cst_543 = arith.constant 1.000000e+00 : f32
    %628 = vector.broadcast %cst_543 : f32 to vector<2x32xf32>
    %629 = arith.addf %628, %627 : vector<2x32xf32>
    %630 = arith.divf %628, %629 : vector<2x32xf32>
    %631 = arith.negf %617 : vector<2x32xf32>
    %632 = math.exp %631 : vector<2x32xf32>
    %cst_544 = arith.constant 1.000000e+00 : f32
    %633 = vector.broadcast %cst_544 : f32 to vector<2x32xf32>
    %634 = arith.addf %633, %632 : vector<2x32xf32>
    %635 = arith.divf %633, %634 : vector<2x32xf32>
    %636 = math.tanh %621 : vector<2x32xf32>
    %637 = arith.negf %625 : vector<2x32xf32>
    %638 = math.exp %637 : vector<2x32xf32>
    %cst_545 = arith.constant 1.000000e+00 : f32
    %639 = vector.broadcast %cst_545 : f32 to vector<2x32xf32>
    %640 = arith.addf %639, %638 : vector<2x32xf32>
    %641 = arith.divf %639, %640 : vector<2x32xf32>
    %642 = arith.mulf %635, %607 : vector<2x32xf32>
    %643 = arith.mulf %630, %636 : vector<2x32xf32>
    %644 = arith.addf %642, %643 : vector<2x32xf32>
    %645 = math.tanh %644 : vector<2x32xf32>
    %646 = arith.mulf %641, %645 : vector<2x32xf32>
    %c0_546 = arith.constant 0 : index
    %c0_547 = arith.constant 0 : index
    %c0_548 = arith.constant 0 : index
    %647 = vector.load %arg8[%c0_546, %c0_547, %c0_548] : memref<4x32x32xf32, #tpu.memory_space<vmem>>, vector<1x32x32xf32>
    %648 = vector.shape_cast %647 : vector<1x32x32xf32> to vector<32x32xf32>
    %cst_549 = arith.constant dense<0.000000e+00> : vector<2x32xf32>
    %649 = tpu.matmul %646, %648, %cst_549 {dimension_numbers = #tpu.dot_dimension_numbers<[1], [0], [0], [1], [0, 0, 1, 1], [], []>} : vector<2x32xf32>, vector<32x32xf32>, vector<2x32xf32> -> vector<2x32xf32>
    %650 = arith.addf %463, %649 : vector<2x32xf32>
    %c1_550 = arith.constant 1 : index
    %c0_551 = arith.constant 0 : index
    %c0_552 = arith.constant 0 : index
    %651 = vector.load %arg8[%c1_550, %c0_551, %c0_552] : memref<4x32x32xf32, #tpu.memory_space<vmem>>, vector<1x32x32xf32>
    %652 = vector.shape_cast %651 : vector<1x32x32xf32> to vector<32x32xf32>
    %cst_553 = arith.constant dense<0.000000e+00> : vector<2x32xf32>
    %653 = tpu.matmul %646, %652, %cst_553 {dimension_numbers = #tpu.dot_dimension_numbers<[1], [0], [0], [1], [0, 0, 1, 1], [], []>} : vector<2x32xf32>, vector<32x32xf32>, vector<2x32xf32> -> vector<2x32xf32>
    %654 = arith.addf %474, %653 : vector<2x32xf32>
    %c2_554 = arith.constant 2 : index
    %c0_555 = arith.constant 0 : index
    %c0_556 = arith.constant 0 : index
    %655 = vector.load %arg8[%c2_554, %c0_555, %c0_556] : memref<4x32x32xf32, #tpu.memory_space<vmem>>, vector<1x32x32xf32>
    %656 = vector.shape_cast %655 : vector<1x32x32xf32> to vector<32x32xf32>
    %cst_557 = arith.constant dense<0.000000e+00> : vector<2x32xf32>
    %657 = tpu.matmul %646, %656, %cst_557 {dimension_numbers = #tpu.dot_dimension_numbers<[1], [0], [0], [1], [0, 0, 1, 1], [], []>} : vector<2x32xf32>, vector<32x32xf32>, vector<2x32xf32> -> vector<2x32xf32>
    %658 = arith.addf %485, %657 : vector<2x32xf32>
    %c3_558 = arith.constant 3 : index
    %c0_559 = arith.constant 0 : index
    %c0_560 = arith.constant 0 : index
    %659 = vector.load %arg8[%c3_558, %c0_559, %c0_560] : memref<4x32x32xf32, #tpu.memory_space<vmem>>, vector<1x32x32xf32>
    %660 = vector.shape_cast %659 : vector<1x32x32xf32> to vector<32x32xf32>
    %cst_561 = arith.constant dense<0.000000e+00> : vector<2x32xf32>
    %661 = tpu.matmul %646, %660, %cst_561 {dimension_numbers = #tpu.dot_dimension_numbers<[1], [0], [0], [1], [0, 0, 1, 1], [], []>} : vector<2x32xf32>, vector<32x32xf32>, vector<2x32xf32> -> vector<2x32xf32>
    %662 = arith.addf %496, %661 : vector<2x32xf32>
    %663 = arith.negf %650 : vector<2x32xf32>
    %664 = math.exp %663 : vector<2x32xf32>
    %cst_562 = arith.constant 1.000000e+00 : f32
    %665 = vector.broadcast %cst_562 : f32 to vector<2x32xf32>
    %666 = arith.addf %665, %664 : vector<2x32xf32>
    %667 = arith.divf %665, %666 : vector<2x32xf32>
    %668 = arith.negf %654 : vector<2x32xf32>
    %669 = math.exp %668 : vector<2x32xf32>
    %cst_563 = arith.constant 1.000000e+00 : f32
    %670 = vector.broadcast %cst_563 : f32 to vector<2x32xf32>
    %671 = arith.addf %670, %669 : vector<2x32xf32>
    %672 = arith.divf %670, %671 : vector<2x32xf32>
    %673 = math.tanh %658 : vector<2x32xf32>
    %674 = arith.negf %662 : vector<2x32xf32>
    %675 = math.exp %674 : vector<2x32xf32>
    %cst_564 = arith.constant 1.000000e+00 : f32
    %676 = vector.broadcast %cst_564 : f32 to vector<2x32xf32>
    %677 = arith.addf %676, %675 : vector<2x32xf32>
    %678 = arith.divf %676, %677 : vector<2x32xf32>
    %679 = arith.mulf %672, %644 : vector<2x32xf32>
    %680 = arith.mulf %667, %673 : vector<2x32xf32>
    %681 = arith.addf %679, %680 : vector<2x32xf32>
    %682 = math.tanh %681 : vector<2x32xf32>
    %683 = arith.mulf %678, %682 : vector<2x32xf32>
    %c0_565 = arith.constant 0 : index
    %c0_566 = arith.constant 0 : index
    %684 = vector.load %arg10[%c0_565, %c0_566] : memref<32x64xf32, #tpu.memory_space<vmem>>, vector<32x64xf32>
    %cst_567 = arith.constant dense<0.000000e+00> : vector<2x64xf32>
    %685 = tpu.matmul %683, %684, %cst_567 {dimension_numbers = #tpu.dot_dimension_numbers<[1], [0], [0], [1], [0, 0, 1, 1], [], []>} : vector<2x32xf32>, vector<32x64xf32>, vector<2x64xf32> -> vector<2x64xf32>
    %c0_568 = arith.constant 0 : index
    %c0_569 = arith.constant 0 : index
    %686 = vector.load %arg11[%c0_568, %c0_569] : memref<32x64xf32, #tpu.memory_space<vmem>>, vector<32x64xf32>
    %cst_570 = arith.constant dense<0.000000e+00> : vector<2x64xf32>
    %687 = tpu.matmul %681, %686, %cst_570 {dimension_numbers = #tpu.dot_dimension_numbers<[1], [0], [0], [1], [0, 0, 1, 1], [], []>} : vector<2x32xf32>, vector<32x64xf32>, vector<2x64xf32> -> vector<2x64xf32>
    %688 = arith.addf %685, %687 : vector<2x64xf32>
    %c0_571 = arith.constant 0 : index
    %c0_572 = arith.constant 0 : index
    %689 = vector.load %arg12[%c0_571, %c0_572] : memref<1x64xf32, #tpu.memory_space<vmem>>, vector<1x64xf32>
    %690 = vector.broadcast %689 : vector<1x64xf32> to vector<2x64xf32>
    %691 = arith.addf %688, %690 : vector<2x64xf32>
    %cst_573 = arith.constant 0.000000e+00 : f32
    %692 = vector.broadcast %cst_573 : f32 to vector<2x64xf32>
    %693 = arith.maximumf %691, %692 : vector<2x64xf32>
    %c0_574 = arith.constant 0 : index
    %c0_575 = arith.constant 0 : index
    %694 = vector.load %arg13[%c0_574, %c0_575] : memref<64x2xf32, #tpu.memory_space<vmem>>, vector<64x2xf32>
    %cst_576 = arith.constant dense<0.000000e+00> : vector<2x2xf32>
    %695 = tpu.matmul %693, %694, %cst_576 {dimension_numbers = #tpu.dot_dimension_numbers<[1], [0], [0], [1], [0, 0, 1, 1], [], []>} : vector<2x64xf32>, vector<64x2xf32>, vector<2x2xf32> -> vector<2x2xf32>
    %c0_577 = arith.constant 0 : index
    %c0_578 = arith.constant 0 : index
    %696 = vector.load %arg14[%c0_577, %c0_578] : memref<1x2xf32, #tpu.memory_space<vmem>>, vector<1x2xf32>
    %697 = vector.broadcast %696 : vector<1x2xf32> to vector<2x2xf32>
    %698 = arith.addf %695, %697 : vector<2x2xf32>
    %cst_579 = arith.constant dense<0xFF800000> : vector<2xf32>
    %699 = vector.multi_reduction <maximumf>, %698, %cst_579 [1] : vector<2x2xf32> to vector<2xf32>
    %700 = vector.shape_cast %699 : vector<2xf32> to vector<2x1xf32>
    %701 = vector.broadcast %700 : vector<2x1xf32> to vector<2x2xf32>
    %702 = arith.subf %698, %701 : vector<2x2xf32>
    %703 = math.exp %702 : vector<2x2xf32>
    %cst_580 = arith.constant dense<0.000000e+00> : vector<2xf32>
    %704 = vector.multi_reduction <add>, %703, %cst_580 [1] : vector<2x2xf32> to vector<2xf32>
    %705 = vector.shape_cast %704 : vector<2xf32> to vector<2x1xf32>
    %706 = math.log %705 : vector<2x1xf32>
    %707 = vector.broadcast %706 : vector<2x1xf32> to vector<2x2xf32>
    %708 = arith.subf %702, %707 : vector<2x2xf32>
    %c0_581 = arith.constant 0 : index
    %c0_582 = arith.constant 0 : index
    %709 = vector.load %arg15[%c0_581, %c0_582] : memref<2x2xf32, #tpu.memory_space<vmem>>, vector<2x2xf32>
    tpu.vector_store %arg15[%c0_581, %c0_582], %708 {strides = array<i32>} : memref<2x2xf32, #tpu.memory_space<vmem>>, vector<2x2xf32>,
    return
  }
}

</mosaic_0001>

<bundles_post_ra>
// kernel: _lambda_.1
= control target key start
LH: loop header
LB: loop body
LE: loop exit
PB: predicated region body
PF: predicated region fallthrough
CT: control target
= control target key end

     0   :  { %v18644_v1 = vmov 0.0   ;;  %vm83_vm0 = vcmask 130048   ;;  %vm14130_vm1 = vmmov 0   ;;  %s18628_s0 = inlined_call_operand.vmem [shape: f32[10,100,16], index: 0, kind: input, shape index: {}]   ;;  %s18629_s1 = inlined_call_operand.vmem [shape: f32[5,2,7], index: 1, kind: input, shape index: {}]   ;;  %s18630_s2 = inlined_call_operand.vmem [shape: f32[3,16,32], index: 2, kind: input, shape index: {}]   ;;  %s18631_s3 = inlined_call_operand.vmem [shape: f32[1,32], index: 3, kind: input, shape index: {}]   ;;  %s18632_s4 = inlined_call_operand.vmem [shape: f32[3,32,32], index: 4, kind: input, shape index: {}]   ;;  %s18633_s5 = inlined_call_operand.vmem [shape: f32[1,32], index: 5, kind: input, shape index: {}]   ;;  %s18634_s6 = inlined_call_operand.vmem [shape: f32[4,32,32], index: 6, kind: input, shape index: {}]   ;;  %s18635_s7 = inlined_call_operand.vmem [shape: f32[4,7,32], index: 7, kind: input, shape index: {}]   ;;  %s18636_s8 = inlined_call_operand.vmem [shape: f32[4,32,32], index: 8, kind: input, shape index: {}]   ;;  %s18637_s9 = inlined_call_operand.vmem [shape: f32[4,1,32], index: 9, kind: input, shape index: {}]   ;;  %s18638_s10 = inlined_call_operand.vmem [shape: f32[32,64], index: 10, kind: input, shape index: {}]   ;;  %s18639_s11 = inlined_call_operand.vmem [shape: f32[32,64], index: 11, kind: input, shape index: {}]   ;;  %s18640_s12 = inlined_call_operand.vmem [shape: f32[1,64], index: 12, kind: input, shape index: {}]   ;;  %s18641_s13 = inlined_call_operand.vmem [shape: f32[64,2], index: 13, kind: input, shape index: {}]   ;;  %s18642_s14 = inlined_call_operand.vmem [shape: f32[1,2], index: 14, kind: input, shape index: {}]   ;;  %s18643_s15 = inlined_call_operand.hbm [shape: f32[2,2], index: 15, kind: output, shape index: {}]  }
   0x1   :  { %v14215_v0 = vld [vmem:[%s18630_s2 + $0x18] sm:$0xff]  ;;  %12042 = vmatprep.subr.mxu0 %v18644_v1  ;;  %13919 = vmatprep.subr.mxu1 %v18644_v1  ;;  %v14222_v2 = vld [vmem:[%s18630_s2 + $0x10] sm:$0xff]  ;;  %v10654_v3 = vld [vmem:[%s18628_s0 + $0x68] sm:$0xff] }
   0x2   :  { %12043 = vmatpush3.msra.mxu0 %v14215_v0  ;;  %13921 = vmatpush3.msra.mxu1 %v14215_v0  ;;  %v14237_v4 = vld [vmem:[%s18628_s0 + $0xd8] sm:$0xff]  ;;  %v10655_v5 = vld [vmem:[%s18628_s0 + $0x70] sm:$0xff]  ;;  %v14257_v6 = vld [vmem:[%s18628_s0 + $0xe0] sm:$0xff] }
   0x3   :  { %12044 = vmatprep.subr.mxu0 %v18644_v1  ;;  %13920 = vmatprep.subr.mxu1 %v18644_v1  ;;  %v10656_v7 = vld [vmem:[%s18628_s0 + $0x78] sm:$0xff]  ;;  %v14275_v8 = vld [vmem:[%s18628_s0 + $0xe8] sm:$0xff]  ;;  %v10657_v9 = vld [vmem:[%s18628_s0 + $0x80] sm:$0xff] }
   0x4   :  { %12045 = vmatpush3.msra.mxu0 %v14222_v2  ;;  %12046 = vmatprep.mubr.msk.f32.mxu0 %vm14130_vm1, %v18644_v1  ;;  %v14294_v10 = vld [vmem:[%s18628_s0 + $0xf0] sm:$0xff] }
   0x5   :  { %13922 = vmatpush3.msra.mxu1 %v14222_v2  ;;  %12092 = vmatprep.mubr.msk.f32.mxu1 %vm14130_vm1, %v18644_v1 }
   0x6   :  { %12047 = vmatmul.mubr.msk.f32.vlgmr.msra.gmra.mxu0 %vm83_vm0, %v10654_v3  ;;  %12085 = vmatprep.subr.mxu0 %v18644_v1 }
   0x7   :  { %12093 = vmatmul.mubr.msk.f32.vlgmr.msra.gmra.mxu1 %vm83_vm0, %v14237_v4  ;;  %12086 = vmatpush3.msra.mxu0 %v14215_v0 }
   0x8   :  { %12049 = vmatprep.mubr.msk.f32.mxu0 %vm14130_vm1, %v18644_v1  ;;  %12095 = vmatprep.mubr.msk.f32.mxu1 %vm14130_vm1, %v18644_v1 }
   0x9   :  { %12171 = vmatprep.subr.mxu1 %v18644_v1  ;;  %12087 = vmatprep.subr.mxu0 %v18644_v1 }
   0xa   :  { %12050 = vmatmul.mubr.msk.f32.gmra.mxu0 %vm83_vm0, %v10655_v5  ;;  %12172 = vmatpush3.msra.mxu1 %v14215_v0 }
   0xb   :  { %12096 = vmatmul.mubr.msk.f32.gmra.mxu1 %vm83_vm0, %v14257_v6  ;;  %12052 = vmatprep.mubr.msk.f32.mxu0 %vm14130_vm1, %v18644_v1 }
   0xc   :  { %12098 = vmatprep.mubr.msk.f32.mxu1 %vm14130_vm1, %v18644_v1  ;;  %12088 = vmatpush3.msra.mxu0 %v14222_v2 }
   0xd   :  { %12173 = vmatprep.subr.mxu1 %v18644_v1  ;;  %12128 = vmatprep.subr.mxu0 %v18644_v1 }
   0xe   :  { %12053 = vmatmul.mubr.msk.f32.gmra.mxu0 %vm83_vm0, %v10656_v7  ;;  %12174 = vmatpush3.msra.mxu1 %v14222_v2 }
   0xf   :  { %12099 = vmatmul.mubr.msk.f32.gmra.mxu1 %vm83_vm0, %v14275_v8  ;;  %12055 = vmatprep.mubr.msk.f32.mxu0 %vm14130_vm1, %v18644_v1 }
  0x10   :  { %12101 = vmatprep.mubr.msk.f32.mxu1 %vm14130_vm1, %v18644_v1  ;;  %12257 = vmatprep.subr.mxu1 %v18644_v1 }
  0x11   :  { %20 = vsyncpa [#allocation3], 0  ;;  %v10658_v11 = vld [vmem:[%s18628_s0 + $0x88] sm:$0xff]  ;;  %v14310_v12 = vld [vmem:[%s18628_s0 + $0xf8] sm:$0xff]  ;;  %vm3948_vm2 = vcmask 1045504   ;;  %vm3952_vm3 = vcmask 261120  }
  0x12   :  { %12056 = vmatmul.mubr.msk.f32.gmra.mxu0 %vm83_vm0, %v10657_v9  ;;  %v10659_v13 = vld [vmem:[%s18628_s0 + $0x90] sm:$0xff]  ;;  %v14325_v14 = vld [vmem:[%s18628_s0 + $0x100] sm:$0xff]  ;;  %v10660_v15 = vld [vmem:[%s18628_s0 + $0x98] sm:$0xff]  ;;  %vm4033_vm4 = vcmask 1043456   ;;  %vm4197_vm5 = vcmask 1041408   ;;  %vm5880_vm6 = vcmask 1046528  }
  0x13   :  { %12102 = vmatmul.mubr.msk.f32.gmra.mxu1 %vm83_vm0, %v14294_v10  ;;  %12058 = vmatprep.mubr.msk.f32.mxu0 %vm14130_vm1, %v18644_v1  ;;  %v14340_v16 = vld [vmem:[%s18628_s0 + $0x108] sm:$0xff]  ;;  %v10661_v17 = vld [vmem:[%s18628_s0 + $0xa0] sm:$0xff]  ;;  %v14355_v18 = vld [vmem:[%s18628_s0 + $0x110] sm:$0xff]  ;;  %vm5876_vm7 = vcmask 56320   ;;  %vm10552_vm8 = vcmask 523264   ;;  %vm10626_vm9 = vcmask 9216  }
  0x14   :  { %12104 = vmatprep.mubr.msk.f32.mxu1 %vm14130_vm1, %v18644_v1  ;;  %v10662_v19 = vld [vmem:[%s18628_s0 + $0xa8] sm:$0xff]  ;;  %v14370_v20 = vld [vmem:[%s18628_s0 + $0x118] sm:$0xff]  ;;  %v10663_v21 = vld [vmem:[%s18628_s0 + $0xb0] sm:$0xff] }
  0x15   :  { %v14385_v22 = vld [vmem:[%s18628_s0 + $0x120] sm:$0xff]  ;;  %v10664_v23 = vld [vmem:[%s18628_s0 + $0xb8] sm:$0xff]  ;;  %v14400_v24 = vld [vmem:[%s18628_s0 + $0x128] sm:$0xff] }
  0x16   :  { %12059 = vmatmul.mubr.msk.f32.gmra.mxu0 %vm83_vm0, %v10658_v11  ;;  %v10665_v25 = vld [vmem:[%s18628_s0 + $0xc0] sm:$0xff]  ;;  %v14415_v26 = vld [vmem:[%s18628_s0 + $0x130] sm:$0xf]  ;;  %v10666_v27 = vld [vmem:[%s18628_s0 + $0xc8] sm:$0xf] }
  0x17   :  { %12105 = vmatmul.mubr.msk.f32.gmra.mxu1 %vm83_vm0, %v14310_v12  ;;  %12061 = vmatprep.mubr.msk.f32.mxu0 %vm14130_vm1, %v18644_v1  ;;  %v14430_v28 = vld [vmem:[%s18628_s0 + $0x138] sm:$0xff]  ;;  %v10682_v29 = vld [vmem:[%s18628_s0 + $0xd0] sm:$0xff]  ;;  %v14445_v30 = vld [vmem:[%s18628_s0 + $0x140] sm:$0xff] }
  0x18   :  { %12107 = vmatprep.mubr.msk.f32.mxu1 %vm14130_vm1, %v18644_v1  ;;  %v14450_v31 = vld [vmem:[%s18630_s2 + $0x28] sm:$0xff]  ;;  %v14458_v32 = vld [vmem:[%s18630_s2 + $0x20] sm:$0xff]  ;;  %v14487_v34 = vld [vmem:[%s18628_s0 + $0x150] sm:$0xff] }
  0x19   :  { %v14470_v33 = vld [vmem:[%s18628_s0 + $0x148] sm:$0xff]  ;;  %v14502_v35 = vld [vmem:[%s18628_s0 + $0x158] sm:$0xff]  ;;  %v14517_v36 = vld [vmem:[%s18628_s0 + $0x160] sm:$0xff] }
  0x1a   :  { %12062 = vmatmul.mubr.msk.f32.gmra.mxu0 %vm83_vm0, %v10659_v13  ;;  %v14530_v37 = vld [vmem:[%s18628_s0 + $0x168] sm:$0xff]  ;;  %v14543_v38 = vld [vmem:[%s18628_s0 + $0x170] sm:$0xff]  ;;  %v14556_v39 = vld [vmem:[%s18628_s0 + $0x178] sm:$0xff] }
  0x1b   :  { %12108 = vmatmul.mubr.msk.f32.gmra.mxu1 %vm83_vm0, %v14325_v14  ;;  %12064 = vmatprep.mubr.msk.f32.mxu0 %vm14130_vm1, %v18644_v1  ;;  %v14569_v40 = vld [vmem:[%s18628_s0 + $0x180] sm:$0xff]  ;;  %v14582_v41 = vld [vmem:[%s18628_s0 + $0x188] sm:$0xff]  ;;  %v14595_v42 = vld [vmem:[%s18628_s0 + $0x190] sm:$0xff] }
  0x1c   :  { %12110 = vmatprep.mubr.msk.f32.mxu1 %vm14130_vm1, %v18644_v1  ;;  %v14608_v43 = vld [vmem:[%s18628_s0 + $0x198] sm:$0xf]  ;;  %v14621_v44 = vld [vmem:[%s18628_s0 + $0x1a0] sm:$0xff]  ;;  %v14634_v45 = vld [vmem:[%s18628_s0 + $0x1a8] sm:$0xff] }
  0x1d   :  { %v14650_v46 = vld [vmem:[%s18628_s0 + $0x1b0] sm:$0xff]  ;;  %v14665_v47 = vld [vmem:[%s18628_s0 + $0x1b8] sm:$0xff]  ;;  %v14679_v48 = vld [vmem:[%s18628_s0 + $0x1c0] sm:$0xff] }
  0x1e   :  { %12065 = vmatmul.mubr.msk.f32.gmra.mxu0 %vm83_vm0, %v10660_v15  ;;  %v14694_v49 = vld [vmem:[%s18628_s0 + $0x1c8] sm:$0xff]  ;;  %v14707_v50 = vld [vmem:[%s18628_s0 + $0x1d0] sm:$0xff]  ;;  %v14720_v51 = vld [vmem:[%s18628_s0 + $0x1d8] sm:$0xff] }
  0x1f   :  { %12111 = vmatmul.mubr.msk.f32.gmra.mxu1 %vm83_vm0, %v14340_v16  ;;  %12067 = vmatprep.mubr.msk.f32.mxu0 %vm14130_vm1, %v18644_v1  ;;  %v14733_v52 = vld [vmem:[%s18628_s0 + $0x1e0] sm:$0xff]  ;;  %v14746_v53 = vld [vmem:[%s18628_s0 + $0x1e8] sm:$0xff]  ;;  %v14759_v54 = vld [vmem:[%s18628_s0 + $0x1f0] sm:$0xff] }
  0x20   :  { %12113 = vmatprep.mubr.msk.f32.mxu1 %vm14130_vm1, %v18644_v1  ;;  %v14772_v55 = vld [vmem:[%s18628_s0 + $0x1f8] sm:$0xff]  ;;  %v14785_v56 = vld [vmem:[%s18628_s0 + $0x200] sm:$0xf]  ;;  %v14798_v57 = vld [vmem:[%s18628_s0 + $0x208] sm:$0xff] }
  0x21   :  { %v14811_v58 = vld [vmem:[%s18628_s0 + $0x210] sm:$0xff]  ;;  %v14827_v59 = vld [vmem:[%s18628_s0 + $0x218] sm:$0xff]  ;;  %v14842_v60 = vld [vmem:[%s18628_s0 + $0x220] sm:$0xff] }
  0x22   :  { %12068 = vmatmul.mubr.msk.f32.gmra.mxu0 %vm83_vm0, %v10661_v17  ;;  %v14856_v61 = vld [vmem:[%s18628_s0 + $0x228] sm:$0xff]  ;;  %v14871_v62 = vld [vmem:[%s18628_s0 + $0x230] sm:$0xff]  ;;  %v14884_v63 = vld [vmem:[%s18628_s0 + $0x238] sm:$0xff] }
  0x23   :  { %12114 = vmatmul.mubr.msk.f32.gmra.mxu1 %vm83_vm0, %v14355_v18  ;;  %12070 = vmatprep.mubr.msk.f32.mxu0 %vm14130_vm1, %v18644_v1  ;;  %v14897_v3 = vld [vmem:[%s18628_s0 + $0x240] sm:$0xff]  ;;  %v14923_v5 = vld [vmem:[%s18628_s0 + $0x250] sm:$0xff]  ;;  %v14970_v15 = vld [vmem:[%s18628_s0 + $0x268] sm:$0xf] }
  0x24   :  { %12116 = vmatprep.mubr.msk.f32.mxu1 %vm14130_vm1, %v18644_v1 }
  0x26   :  { %12071 = vmatmul.mubr.msk.f32.gmra.mxu0 %vm83_vm0, %v10662_v19 }
  0x27   :  { %12117 = vmatmul.mubr.msk.f32.gmra.mxu1 %vm83_vm0, %v14370_v20  ;;  %12073 = vmatprep.mubr.msk.f32.mxu0 %vm14130_vm1, %v18644_v1 }
  0x28   :  { %12119 = vmatprep.mubr.msk.f32.mxu1 %vm14130_vm1, %v18644_v1 }
  0x2a   :  { %12074 = vmatmul.mubr.msk.f32.gmra.mxu0 %vm83_vm0, %v10663_v21 }
  0x2b   :  { %12120 = vmatmul.mubr.msk.f32.gmra.mxu1 %vm83_vm0, %v14385_v22  ;;  %12076 = vmatprep.mubr.msk.f32.mxu0 %vm14130_vm1, %v18644_v1 }
  0x2c   :  { %12122 = vmatprep.mubr.msk.f32.mxu1 %vm14130_vm1, %v18644_v1 }
  0x2e   :  { %12077 = vmatmul.mubr.msk.f32.gmra.mxu0 %vm83_vm0, %v10664_v23 }
  0x2f   :  { %12123 = vmatmul.mubr.msk.f32.gmra.mxu1 %vm83_vm0, %v14400_v24  ;;  %12079 = vmatprep.mubr.msk.f32.mxu0 %vm14130_vm1, %v18644_v1 }
  0x30   :  { %12125 = vmatprep.mubr.msk.f32.mxu1 %vm14130_vm1, %v18644_v1 }
  0x32   :  { %12080 = vmatmul.mubr.msk.f32.gmra.mxu0 %vm83_vm0, %v10665_v25  ;;  %v15004_v25 = vld [vmem:[%s18628_s0 + $0x278] sm:$0xff] }
  0x33   :  { %12126 = vmatmul.mubr.msk.f32.gmra.mxu1 %vm83_vm0, %v14415_v26  ;;  %12082 = vmatprep.mubr.msk.f32.mxu0 %vm14130_vm1, %v18644_v1 }
  0x34   :  { %12175 = vmatprep.mubr.msk.f32.mxu1 %vm14130_vm1, %v18644_v1 }
  0x36   :  { %12083 = vmatmul.mubr.msk.f32.gmra.mxu0 %vm83_vm0, %v10666_v27 }
  0x37   :  { %12176 = vmatmul.mubr.msk.f32.vlgmr.msra.gmra.mxu1 %vm83_vm0, %v14430_v28  ;;  %12089 = vmatprep.mubr.msk.f32.mxu0 %vm14130_vm1, %v18644_v1 }
  0x38   :  { %12178 = vmatprep.mubr.msk.f32.mxu1 %vm14130_vm1, %v18644_v1  ;;  %12258 = vmatpush3.msra.mxu1 %v14215_v0 }
  0x39   :  { %12259 = vmatprep.subr.mxu1 %v18644_v1 }
  0x3a   :  { %12090 = vmatmul.mubr.msk.f32.vlgmr.msra.gmra.mxu0 %vm83_vm0, %v10682_v29  ;;  %12260 = vmatpush3.msra.mxu1 %v14222_v2 }
  0x3b   :  { %12179 = vmatmul.mubr.msk.f32.gmra.mxu1 %vm83_vm0, %v14445_v30  ;;  %12129 = vmatpush3.msra.mxu0 %v14450_v31 }
  0x3c   :  { %12130 = vmatprep.subr.mxu0 %v18644_v1  ;;  %12132 = vmatprep.mubr.msk.f32.mxu0 %vm14130_vm1, %v18644_v1 }
  0x3d   :  { %12131 = vmatpush3.msra.mxu0 %v14458_v32  ;;  %12181 = vmatprep.mubr.msk.f32.mxu1 %vm14130_vm1, %v18644_v1 }
  0x3e   :  { %12133 = vmatmul.mubr.msk.f32.vlgmr.msra.gmra.mxu0 %vm83_vm0, %v10682_v29  ;;  %12214 = vmatprep.subr.mxu0 %v18644_v1 }
  0x3f   :  { %12182 = vmatmul.mubr.msk.f32.gmra.mxu1 %vm83_vm0, %v14470_v33  ;;  %12215 = vmatpush3.msra.mxu0 %v14450_v31 }
  0x40   :  { %12135 = vmatprep.mubr.msk.f32.mxu0 %vm14130_vm1, %v18644_v1  ;;  %12184 = vmatprep.mubr.msk.f32.mxu1 %vm14130_vm1, %v18644_v1 }
  0x41   :  { %12216 = vmatprep.subr.mxu0 %v18644_v1  ;;  %12343 = vmatprep.subr.mxu1 %v18644_v1 }
  0x42   :  { %12136 = vmatmul.mubr.msk.f32.gmra.mxu0 %vm83_vm0, %v14237_v4  ;;  %v14910_v4 = vld [vmem:[%s18628_s0 + $0x248] sm:$0xff] }
  0x43   :  { %12185 = vmatmul.mubr.msk.f32.gmra.mxu1 %vm83_vm0, %v14487_v34  ;;  %12138 = vmatprep.mubr.msk.f32.mxu0 %vm14130_vm1, %v18644_v1 }
  0x44   :  { %12187 = vmatprep.mubr.msk.f32.mxu1 %vm14130_vm1, %v18644_v1  ;;  %12217 = vmatpush3.msra.mxu0 %v14458_v32 }
  0x45   :  { %12300 = vmatprep.subr.mxu0 %v18644_v1 }
  0x46   :  { %12139 = vmatmul.mubr.msk.f32.gmra.mxu0 %vm83_vm0, %v14257_v6  ;;  %v14936_v6 = vld [vmem:[%s18628_s0 + $0x258] sm:$0xff] }
  0x47   :  { %12188 = vmatmul.mubr.msk.f32.gmra.mxu1 %vm83_vm0, %v14502_v35  ;;  %12141 = vmatprep.mubr.msk.f32.mxu0 %vm14130_vm1, %v18644_v1 }
  0x48   :  { %12190 = vmatprep.mubr.msk.f32.mxu1 %vm14130_vm1, %v18644_v1 }
  0x4a   :  { %12142 = vmatmul.mubr.msk.f32.gmra.mxu0 %vm83_vm0, %v14275_v8 }
  0x4b   :  { %12191 = vmatmul.mubr.msk.f32.gmra.mxu1 %vm83_vm0, %v14517_v36  ;;  %12144 = vmatprep.mubr.msk.f32.mxu0 %vm14130_vm1, %v18644_v1 }
  0x4c   :  { %12193 = vmatprep.mubr.msk.f32.mxu1 %vm14130_vm1, %v18644_v1 }
  0x4e   :  { %12145 = vmatmul.mubr.msk.f32.gmra.mxu0 %vm83_vm0, %v14294_v10  ;;  %v14953_v10 = vld [vmem:[%s18628_s0 + $0x260] sm:$0xff] }
  0x4f   :  { %12194 = vmatmul.mubr.msk.f32.gmra.mxu1 %vm83_vm0, %v14530_v37  ;;  %12147 = vmatprep.mubr.msk.f32.mxu0 %vm14130_vm1, %v18644_v1 }
  0x50   :  { %12196 = vmatprep.mubr.msk.f32.mxu1 %vm14130_vm1, %v18644_v1 }
  0x52   :  { %12148 = vmatmul.mubr.msk.f32.gmra.mxu0 %vm83_vm0, %v14310_v12 }
  0x53   :  { %12197 = vmatmul.mubr.msk.f32.gmra.mxu1 %vm83_vm0, %v14543_v38  ;;  %12150 = vmatprep.mubr.msk.f32.mxu0 %vm14130_vm1, %v18644_v1 }
  0x54   :  { %12199 = vmatprep.mubr.msk.f32.mxu1 %vm14130_vm1, %v18644_v1 }
  0x56   :  { %12151 = vmatmul.mubr.msk.f32.gmra.mxu0 %vm83_vm0, %v14325_v14 }
  0x57   :  { %12200 = vmatmul.mubr.msk.f32.gmra.mxu1 %vm83_vm0, %v14556_v39  ;;  %12153 = vmatprep.mubr.msk.f32.mxu0 %vm14130_vm1, %v18644_v1 }
  0x58   :  { %12202 = vmatprep.mubr.msk.f32.mxu1 %vm14130_vm1, %v18644_v1 }
  0x5a   :  { %12154 = vmatmul.mubr.msk.f32.gmra.mxu0 %vm83_vm0, %v14340_v16 }
  0x5b   :  { %12203 = vmatmul.mubr.msk.f32.gmra.mxu1 %vm83_vm0, %v14569_v40  ;;  %12156 = vmatprep.mubr.msk.f32.mxu0 %vm14130_vm1, %v18644_v1 }
  0x5c   :  { %12205 = vmatprep.mubr.msk.f32.mxu1 %vm14130_vm1, %v18644_v1 }
  0x5e   :  { %12157 = vmatmul.mubr.msk.f32.gmra.mxu0 %vm83_vm0, %v14355_v18 }
  0x5f   :  { %12206 = vmatmul.mubr.msk.f32.gmra.mxu1 %vm83_vm0, %v14582_v41  ;;  %12159 = vmatprep.mubr.msk.f32.mxu0 %vm14130_vm1, %v18644_v1 }
  0x60   :  { %12208 = vmatprep.mubr.msk.f32.mxu1 %vm14130_vm1, %v18644_v1 }
  0x62   :  { %12160 = vmatmul.mubr.msk.f32.gmra.mxu0 %vm83_vm0, %v14370_v20  ;;  %v14987_v20 = vld [vmem:[%s18628_s0 + $0x270] sm:$0xff] }
  0x63   :  { %12209 = vmatmul.mubr.msk.f32.gmra.mxu1 %vm83_vm0, %v14595_v42  ;;  %12162 = vmatprep.mubr.msk.f32.mxu0 %vm14130_vm1, %v18644_v1 }
  0x64   :  { %12211 = vmatprep.mubr.msk.f32.mxu1 %vm14130_vm1, %v18644_v1 }
  0x66   :  { %12163 = vmatmul.mubr.msk.f32.gmra.mxu0 %vm83_vm0, %v14385_v22 }
  0x67   :  { %12212 = vmatmul.mubr.msk.f32.gmra.mxu1 %vm83_vm0, %v14608_v43  ;;  %12165 = vmatprep.mubr.msk.f32.mxu0 %vm14130_vm1, %v18644_v1 }
  0x68   :  { %12261 = vmatprep.mubr.msk.f32.mxu1 %vm14130_vm1, %v18644_v1 }
  0x6a   :  { %12166 = vmatmul.mubr.msk.f32.gmra.mxu0 %vm83_vm0, %v14400_v24 }
  0x6b   :  { %12262 = vmatmul.mubr.msk.f32.vlgmr.msra.gmra.mxu1 %vm83_vm0, %v14621_v44  ;;  %12168 = vmatprep.mubr.msk.f32.mxu0 %vm14130_vm1, %v18644_v1 }
  0x6c   :  { %12264 = vmatprep.mubr.msk.f32.mxu1 %vm14130_vm1, %v18644_v1  ;;  %12344 = vmatpush3.msra.mxu1 %v14215_v0 }
  0x6d   :  { %12345 = vmatprep.subr.mxu1 %v18644_v1 }
  0x6e   :  { %12169 = vmatmul.mubr.msk.f32.gmra.mxu0 %vm83_vm0, %v14415_v26  ;;  %12346 = vmatpush3.msra.mxu1 %v14222_v2 }
  0x6f   :  { %12265 = vmatmul.mubr.msk.f32.gmra.mxu1 %vm83_vm0, %v14634_v45  ;;  %12218 = vmatprep.mubr.msk.f32.mxu0 %vm14130_vm1, %v18644_v1 }
  0x70   :  { %12267 = vmatprep.mubr.msk.f32.mxu1 %vm14130_vm1, %v18644_v1  ;;  %12429 = vmatprep.subr.mxu1 %v18644_v1 }
  0x72   :  { %12219 = vmatmul.mubr.msk.f32.vlgmr.msra.gmra.mxu0 %vm83_vm0, %v14430_v28 }
  0x73   :  { %12268 = vmatmul.mubr.msk.f32.gmra.mxu1 %vm83_vm0, %v14650_v46  ;;  %12301 = vmatpush3.msra.mxu0 %v14450_v31 }
  0x74   :  { %12221 = vmatprep.mubr.msk.f32.mxu0 %vm14130_vm1, %v18644_v1  ;;  %12270 = vmatprep.mubr.msk.f32.mxu1 %vm14130_vm1, %v18644_v1 }
  0x75   :  { %12302 = vmatprep.subr.mxu0 %v18644_v1 }
  0x76   :  { %12222 = vmatmul.mubr.msk.f32.gmra.mxu0 %vm83_vm0, %v14445_v30  ;;  %v15024_v30 = vld [vmem:[%s18628_s0 + $0x280] sm:$0xff] }
  0x77   :  { %12271 = vmatmul.mubr.msk.f32.gmra.mxu1 %vm83_vm0, %v14665_v47  ;;  %12224 = vmatprep.mubr.msk.f32.mxu0 %vm14130_vm1, %v18644_v1 }
  0x78   :  { %12273 = vmatprep.mubr.msk.f32.mxu1 %vm14130_vm1, %v18644_v1  ;;  %12303 = vmatpush3.msra.mxu0 %v14458_v32 }
  0x79   :  { %12386 = vmatprep.subr.mxu0 %v18644_v1 }
  0x7a   :  { %12225 = vmatmul.mubr.msk.f32.gmra.mxu0 %vm83_vm0, %v14470_v33 }
  0x7b   :  { %12274 = vmatmul.mubr.msk.f32.gmra.mxu1 %vm83_vm0, %v14679_v48  ;;  %12227 = vmatprep.mubr.msk.f32.mxu0 %vm14130_vm1, %v18644_v1 }
  0x7c   :  { %12276 = vmatprep.mubr.msk.f32.mxu1 %vm14130_vm1, %v18644_v1 }
  0x7e   :  { %12228 = vmatmul.mubr.msk.f32.gmra.mxu0 %vm83_vm0, %v14487_v34 }
  0x7f   :  { %12277 = vmatmul.mubr.msk.f32.gmra.mxu1 %vm83_vm0, %v14694_v49  ;;  %12230 = vmatprep.mubr.msk.f32.mxu0 %vm14130_vm1, %v18644_v1 }
  0x80   :  { %12279 = vmatprep.mubr.msk.f32.mxu1 %vm14130_vm1, %v18644_v1 }
  0x82   :  { %12231 = vmatmul.mubr.msk.f32.gmra.mxu0 %vm83_vm0, %v14502_v35 }
  0x83   :  { %12280 = vmatmul.mubr.msk.f32.gmra.mxu1 %vm83_vm0, %v14707_v50  ;;  %12233 = vmatprep.mubr.msk.f32.mxu0 %vm14130_vm1, %v18644_v1 }
  0x84   :  { %12282 = vmatprep.mubr.msk.f32.mxu1 %vm14130_vm1, %v18644_v1 }
  0x86   :  { %12234 = vmatmul.mubr.msk.f32.gmra.mxu0 %vm83_vm0, %v14517_v36 }
  0x87   :  { %12283 = vmatmul.mubr.msk.f32.gmra.mxu1 %vm83_vm0, %v14720_v51  ;;  %12236 = vmatprep.mubr.msk.f32.mxu0 %vm14130_vm1, %v18644_v1 }
  0x88   :  { %12285 = vmatprep.mubr.msk.f32.mxu1 %vm14130_vm1, %v18644_v1 }
  0x8a   :  { %12237 = vmatmul.mubr.msk.f32.gmra.mxu0 %vm83_vm0, %v14530_v37  ;;  %v15043_v37 = vld [vmem:[%s18628_s0 + $0x288] sm:$0xff] }
  0x8b   :  { %12286 = vmatmul.mubr.msk.f32.gmra.mxu1 %vm83_vm0, %v14733_v52  ;;  %12239 = vmatprep.mubr.msk.f32.mxu0 %vm14130_vm1, %v18644_v1 }
  0x8c   :  { %12288 = vmatprep.mubr.msk.f32.mxu1 %vm14130_vm1, %v18644_v1 }
  0x8e   :  { %12240 = vmatmul.mubr.msk.f32.gmra.mxu0 %vm83_vm0, %v14543_v38 }
  0x8f   :  { %12289 = vmatmul.mubr.msk.f32.gmra.mxu1 %vm83_vm0, %v14746_v53  ;;  %12242 = vmatprep.mubr.msk.f32.mxu0 %vm14130_vm1, %v18644_v1 }
  0x90   :  { %12291 = vmatprep.mubr.msk.f32.mxu1 %vm14130_vm1, %v18644_v1 }
  0x92   :  { %12243 = vmatmul.mubr.msk.f32.gmra.mxu0 %vm83_vm0, %v14556_v39 }
  0x93   :  { %12292 = vmatmul.mubr.msk.f32.gmra.mxu1 %vm83_vm0, %v14759_v54  ;;  %12245 = vmatprep.mubr.msk.f32.mxu0 %vm14130_vm1, %v18644_v1 }
  0x94   :  { %12294 = vmatprep.mubr.msk.f32.mxu1 %vm14130_vm1, %v18644_v1 }
  0x96   :  { %12246 = vmatmul.mubr.msk.f32.gmra.mxu0 %vm83_vm0, %v14569_v40 }
  0x97   :  { %12295 = vmatmul.mubr.msk.f32.gmra.mxu1 %vm83_vm0, %v14772_v55  ;;  %12248 = vmatprep.mubr.msk.f32.mxu0 %vm14130_vm1, %v18644_v1 }
  0x98   :  { %12297 = vmatprep.mubr.msk.f32.mxu1 %vm14130_vm1, %v18644_v1 }
  0x9a   :  { %12249 = vmatmul.mubr.msk.f32.gmra.mxu0 %vm83_vm0, %v14582_v41 }
  0x9b   :  { %12298 = vmatmul.mubr.msk.f32.gmra.mxu1 %vm83_vm0, %v14785_v56  ;;  %12251 = vmatprep.mubr.msk.f32.mxu0 %vm14130_vm1, %v18644_v1 }
  0x9c   :  { %12347 = vmatprep.mubr.msk.f32.mxu1 %vm14130_vm1, %v18644_v1 }
  0x9e   :  { %12252 = vmatmul.mubr.msk.f32.gmra.mxu0 %vm83_vm0, %v14595_v42  ;;  %v15061_v42 = vld [vmem:[%s18628_s0 + $0x290] sm:$0xff] }
  0x9f   :  { %12348 = vmatmul.mubr.msk.f32.vlgmr.msra.gmra.mxu1 %vm83_vm0, %v14798_v57  ;;  %12254 = vmatprep.mubr.msk.f32.mxu0 %vm14130_vm1, %v18644_v1 }
  0xa0   :  { %12350 = vmatprep.mubr.msk.f32.mxu1 %vm14130_vm1, %v18644_v1  ;;  %12430 = vmatpush3.msra.mxu1 %v14215_v0 }
  0xa1   :  { %12431 = vmatprep.subr.mxu1 %v18644_v1 }
  0xa2   :  { %12255 = vmatmul.mubr.msk.f32.gmra.mxu0 %vm83_vm0, %v14608_v43  ;;  %12432 = vmatpush3.msra.mxu1 %v14222_v2 }
  0xa3   :  { %12351 = vmatmul.mubr.msk.f32.gmra.mxu1 %vm83_vm0, %v14811_v58  ;;  %12304 = vmatprep.mubr.msk.f32.mxu0 %vm14130_vm1, %v18644_v1 }
  0xa4   :  { %12353 = vmatprep.mubr.msk.f32.mxu1 %vm14130_vm1, %v18644_v1  ;;  %12515 = vmatprep.subr.mxu1 %v18644_v1 }
  0xa6   :  { %12305 = vmatmul.mubr.msk.f32.vlgmr.msra.gmra.mxu0 %vm83_vm0, %v14621_v44 }
  0xa7   :  { %12354 = vmatmul.mubr.msk.f32.gmra.mxu1 %vm83_vm0, %v14827_v59  ;;  %12387 = vmatpush3.msra.mxu0 %v14450_v31 }
  0xa8   :  { %12307 = vmatprep.mubr.msk.f32.mxu0 %vm14130_vm1, %v18644_v1  ;;  %12356 = vmatprep.mubr.msk.f32.mxu1 %vm14130_vm1, %v18644_v1 }
  0xa9   :  { %12388 = vmatprep.subr.mxu0 %v18644_v1 }
  0xaa   :  { %12308 = vmatmul.mubr.msk.f32.gmra.mxu0 %vm83_vm0, %v14634_v45 }
  0xab   :  { %12357 = vmatmul.mubr.msk.f32.gmra.mxu1 %vm83_vm0, %v14842_v60  ;;  %12310 = vmatprep.mubr.msk.f32.mxu0 %vm14130_vm1, %v18644_v1 }
  0xac   :  { %12359 = vmatprep.mubr.msk.f32.mxu1 %vm14130_vm1, %v18644_v1  ;;  %12389 = vmatpush3.msra.mxu0 %v14458_v32 }
  0xad   :  { %12472 = vmatprep.subr.mxu0 %v18644_v1 }
  0xae   :  { %12311 = vmatmul.mubr.msk.f32.gmra.mxu0 %vm83_vm0, %v14650_v46 }
  0xaf   :  { %12360 = vmatmul.mubr.msk.f32.gmra.mxu1 %vm83_vm0, %v14856_v61  ;;  %12313 = vmatprep.mubr.msk.f32.mxu0 %vm14130_vm1, %v18644_v1 }
  0xb0   :  { %12362 = vmatprep.mubr.msk.f32.mxu1 %vm14130_vm1, %v18644_v1 }
  0xb2   :  { %12314 = vmatmul.mubr.msk.f32.gmra.mxu0 %vm83_vm0, %v14665_v47  ;;  %v15080_v47 = vld [vmem:[%s18628_s0 + $0x298] sm:$0xff] }
  0xb3   :  { %12363 = vmatmul.mubr.msk.f32.gmra.mxu1 %vm83_vm0, %v14871_v62  ;;  %12316 = vmatprep.mubr.msk.f32.mxu0 %vm14130_vm1, %v18644_v1 }
  0xb4   :  { %12365 = vmatprep.mubr.msk.f32.mxu1 %vm14130_vm1, %v18644_v1 }
  0xb6   :  { %12317 = vmatmul.mubr.msk.f32.gmra.mxu0 %vm83_vm0, %v14679_v48 }
  0xb7   :  { %12366 = vmatmul.mubr.msk.f32.gmra.mxu1 %vm83_vm0, %v14884_v63  ;;  %12319 = vmatprep.mubr.msk.f32.mxu0 %vm14130_vm1, %v18644_v1 }
  0xb8   :  { %12368 = vmatprep.mubr.msk.f32.mxu1 %vm14130_vm1, %v18644_v1 }
  0xba   :  { %12320 = vmatmul.mubr.msk.f32.gmra.mxu0 %vm83_vm0, %v14694_v49 }
  0xbb   :  { %12369 = vmatmul.mubr.msk.f32.gmra.mxu1 %vm83_vm0, %v14897_v3  ;;  %12322 = vmatprep.mubr.msk.f32.mxu0 %vm14130_vm1, %v18644_v1 }
  0xbc   :  { %12371 = vmatprep.mubr.msk.f32.mxu1 %vm14130_vm1, %v18644_v1 }
  0xbe   :  { %12323 = vmatmul.mubr.msk.f32.gmra.mxu0 %vm83_vm0, %v14707_v50 }
  0xbf   :  { %12372 = vmatmul.mubr.msk.f32.gmra.mxu1 %vm83_vm0, %v14910_v4  ;;  %12325 = vmatprep.mubr.msk.f32.mxu0 %vm14130_vm1, %v18644_v1 }
  0xc0   :  { %12374 = vmatprep.mubr.msk.f32.mxu1 %vm14130_vm1, %v18644_v1 }
  0xc2   :  { %12326 = vmatmul.mubr.msk.f32.gmra.mxu0 %vm83_vm0, %v14720_v51 }
  0xc3   :  { %12375 = vmatmul.mubr.msk.f32.gmra.mxu1 %vm83_vm0, %v14923_v5  ;;  %12328 = vmatprep.mubr.msk.f32.mxu0 %vm14130_vm1, %v18644_v1 }
  0xc4   :  { %12377 = vmatprep.mubr.msk.f32.mxu1 %vm14130_vm1, %v18644_v1 }
  0xc6   :  { %v14938_v7 = vpop.f32.mrf.mxu0  ;;  %12329 = vmatmul.mubr.msk.f32.gmra.mxu0 %vm83_vm0, %v14733_v52  ;;  %v15097_v52 = vld [vmem:[%s18628_s0 + $0x2a0] sm:$0xff] }
  0xc7   :  { %v14942_v8 = vpop.f32.mrf.mxu1  ;;  %12378 = vmatmul.mubr.msk.f32.gmra.mxu1 %vm83_vm0, %v14936_v6  ;;  %12331 = vmatprep.mubr.msk.f32.mxu0 %vm14130_vm1, %v18644_v1 }
  0xc8   :  { %v12048_v9 = vpop.f32.mrf.mxu0  ;;  %12380 = vmatprep.mubr.msk.f32.mxu1 %vm14130_vm1, %v18644_v1 }
  0xc9   :  { %v12094_v11 = vpop.f32.mrf.mxu1  ;;  %v15131_v9 = vld [vmem:[%s18628_s0 + $0x2b0] sm:$0xff] }
  0xca   :  { %v14955_v12 = vpop.f32.mrf.mxu0  ;;  %12332 = vmatmul.mubr.msk.f32.gmra.mxu0 %vm83_vm0, %v14746_v53 }
  0xcb   :  { %v14959_v13 = vpop.f32.mrf.mxu1  ;;  %12381 = vmatmul.mubr.msk.f32.gmra.mxu1 %vm83_vm0, %v14953_v10  ;;  %12334 = vmatprep.mubr.msk.f32.mxu0 %vm14130_vm1, %v18644_v1 }
  0xcc   :  { %v12051_v14 = vpop.f32.mrf.mxu0  ;;  %12383 = vmatprep.mubr.msk.f32.mxu1 %vm14130_vm1, %v18644_v1 }
  0xcd   :  { %v12097_v16 = vpop.f32.mrf.mxu1 }
  0xce   :  { %v14972_v17 = vpop.f32.mrf.mxu0  ;;  %12335 = vmatmul.mubr.msk.f32.gmra.mxu0 %vm83_vm0, %v14759_v54 }
  0xcf   :  { %v14976_v18 = vpop.f32.mrf.mxu1  ;;  %12384 = vmatmul.mubr.msk.f32.gmra.mxu1 %vm83_vm0, %v14970_v15  ;;  %12337 = vmatprep.mubr.msk.f32.mxu0 %vm14130_vm1, %v18644_v1 }
  0xd0   :  { %v12054_v19 = vpop.f32.mrf.mxu0  ;;  %12433 = vmatprep.mubr.msk.f32.mxu1 %vm14130_vm1, %v18644_v1 }
  0xd1   :  { %v12100_v21 = vpop.f32.mrf.mxu1  ;;  %v15148_v19 = vld [vmem:[%s18628_s0 + $0x2b8] sm:$0xff] }
  0xd2   :  { %v14989_v22 = vpop.f32.mrf.mxu0  ;;  %12338 = vmatmul.mubr.msk.f32.gmra.mxu0 %vm83_vm0, %v14772_v55 }
  0xd3   :  { %v14993_v23 = vpop.f32.mrf.mxu1  ;;  %12434 = vmatmul.mubr.msk.f32.vlgmr.msra.gmra.mxu1 %vm83_vm0, %v14987_v20  ;;  %12340 = vmatprep.mubr.msk.f32.mxu0 %vm14130_vm1, %v18644_v1 }
  0xd4   :  { %v12057_v24 = vpop.f32.mrf.mxu0  ;;  %12436 = vmatprep.mubr.msk.f32.mxu1 %vm14130_vm1, %v18644_v1  ;;  %12516 = vmatpush3.msra.mxu1 %v14215_v0 }
  0xd5   :  { %v12103_v26 = vpop.f32.mrf.mxu1  ;;  %12517 = vmatprep.subr.mxu1 %v18644_v1 }
  0xd6   :  { %v15008_v27 = vpop.f32.mrf.mxu0  ;;  %12341 = vmatmul.mubr.msk.f32.gmra.mxu0 %vm83_vm0, %v14785_v56  ;;  %12518 = vmatpush3.msra.mxu1 %v14222_v2 }
  0xd7   :  { %v15013_v28 = vpop.f32.mrf.mxu1  ;;  %12437 = vmatmul.mubr.msk.f32.gmra.mxu1 %vm83_vm0, %v15004_v25  ;;  %12390 = vmatprep.mubr.msk.f32.mxu0 %vm14130_vm1, %v18644_v1 }
  0xd8   :  { %v12060_v29 = vpop.f32.mrf.mxu0  ;;  %12439 = vmatprep.mubr.msk.f32.mxu1 %vm14130_vm1, %v18644_v1  ;;  %12601 = vmatprep.subr.mxu1 %v18644_v1 }
  0xd9   :  { %v12106_v33 = vpop.f32.mrf.mxu1  ;;  %v15165_v29 = vld [vmem:[%s18628_s0 + $0x2c0] sm:$0xff] }
  0xda   :  { %v15027_v34 = vpop.f32.mrf.mxu0  ;;  %12391 = vmatmul.mubr.msk.f32.vlgmr.msra.gmra.mxu0 %vm83_vm0, %v14798_v57  ;;  %v15114_v57 = vld [vmem:[%s18628_s0 + $0x2a8] sm:$0xff] }
  0xdb   :  { %v15031_v35 = vpop.f32.mrf.mxu1  ;;  %12440 = vmatmul.mubr.msk.f32.gmra.mxu1 %vm83_vm0, %v15024_v30  ;;  %12473 = vmatpush3.msra.mxu0 %v14450_v31 }
  0xdc   :  { %v12063_v36 = vpop.f32.mrf.mxu0  ;;  %12393 = vmatprep.mubr.msk.f32.mxu0 %vm14130_vm1, %v18644_v1  ;;  %12442 = vmatprep.mubr.msk.f32.mxu1 %vm14130_vm1, %v18644_v1 }
  0xdd   :  { %v12109_v38 = vpop.f32.mrf.mxu1  ;;  %12474 = vmatprep.subr.mxu0 %v18644_v1 }
  0xde   :  { %v15046_v39 = vpop.f32.mrf.mxu0  ;;  %12394 = vmatmul.mubr.msk.f32.gmra.mxu0 %vm83_vm0, %v14811_v58 }
  0xdf   :  { %v15050_v40 = vpop.f32.mrf.mxu1  ;;  %12443 = vmatmul.mubr.msk.f32.gmra.mxu1 %vm83_vm0, %v15043_v37  ;;  %12396 = vmatprep.mubr.msk.f32.mxu0 %vm14130_vm1, %v18644_v1 }
  0xe0   :  { %v12066_v41 = vpop.f32.mrf.mxu0  ;;  %12445 = vmatprep.mubr.msk.f32.mxu1 %vm14130_vm1, %v18644_v1  ;;  %12475 = vmatpush3.msra.mxu0 %v14458_v32 }
  0xe1   :  { %v12112_v43 = vpop.f32.mrf.mxu1  ;;  %12558 = vmatprep.subr.mxu0 %v18644_v1  ;;  %v15182_v41 = vld [vmem:[%s18628_s0 + $0x2c8] sm:$0xff] }
  0xe2   :  { %v15065_v44 = vpop.f32.mrf.mxu0  ;;  %12397 = vmatmul.mubr.msk.f32.gmra.mxu0 %vm83_vm0, %v14827_v59 }
  0xe3   :  { %v15069_v45 = vpop.f32.mrf.mxu1  ;;  %12446 = vmatmul.mubr.msk.f32.gmra.mxu1 %vm83_vm0, %v15061_v42  ;;  %12399 = vmatprep.mubr.msk.f32.mxu0 %vm14130_vm1, %v18644_v1 }
  0xe4   :  { %v12069_v46 = vpop.f32.mrf.mxu0  ;;  %12448 = vmatprep.mubr.msk.f32.mxu1 %vm14130_vm1, %v18644_v1 }
  0xe5   :  { %v12115_v48 = vpop.f32.mrf.mxu1 }
  0xe6   :  { %v15082_v49 = vpop.f32.mrf.mxu0  ;;  %12400 = vmatmul.mubr.msk.f32.gmra.mxu0 %vm83_vm0, %v14842_v60 }
  0xe7   :  { %v15086_v50 = vpop.f32.mrf.mxu1  ;;  %12449 = vmatmul.mubr.msk.f32.gmra.mxu1 %vm83_vm0, %v15080_v47  ;;  %12402 = vmatprep.mubr.msk.f32.mxu0 %vm14130_vm1, %v18644_v1 }
  0xe8   :  { %v12072_v51 = vpop.f32.mrf.mxu0  ;;  %12451 = vmatprep.mubr.msk.f32.mxu1 %vm14130_vm1, %v18644_v1 }
  0xe9   :  { %v12118_v53 = vpop.f32.mrf.mxu1  ;;  %v15199_v51 = vld [vmem:[%s18628_s0 + $0x2d0] sm:$0xf] }
  0xea   :  { %v15099_v54 = vpop.f32.mrf.mxu0  ;;  %12403 = vmatmul.mubr.msk.f32.gmra.mxu0 %vm83_vm0, %v14856_v61 }
  0xeb   :  { %v15103_v55 = vpop.f32.mrf.mxu1  ;;  %12452 = vmatmul.mubr.msk.f32.gmra.mxu1 %vm83_vm0, %v15097_v52  ;;  %12405 = vmatprep.mubr.msk.f32.mxu0 %vm14130_vm1, %v18644_v1 }
  0xec   :  { %v12075_v56 = vpop.f32.mrf.mxu0  ;;  %12454 = vmatprep.mubr.msk.f32.mxu1 %vm14130_vm1, %v18644_v1 }
  0xed   :  { %v12121_v58 = vpop.f32.mrf.mxu1 }
  0xee   :  { %v15116_v59 = vpop.f32.mrf.mxu0  ;;  %12406 = vmatmul.mubr.msk.f32.gmra.mxu0 %vm83_vm0, %v14871_v62 }
  0xef   :  { %v15120_v60 = vpop.f32.mrf.mxu1  ;;  %12455 = vmatmul.mubr.msk.f32.gmra.mxu1 %vm83_vm0, %v15114_v57  ;;  %12408 = vmatprep.mubr.msk.f32.mxu0 %vm14130_vm1, %v18644_v1 }
  0xf0   :  { %18651 = vst [vmem:[#allocation5_spill] sm:$0xff] %v15120_v60  ;;  %v12078_v61 = vpop.f32.mrf.mxu0  ;;  %12457 = vmatprep.mubr.msk.f32.mxu1 %vm14130_vm1, %v18644_v1 }
  0xf1   :  { %v12124_v11 = vpop.f32.mrf.mxu1  ;;  %v15216_v61 = vld [vmem:[%s18628_s0 + $0x2d8] sm:$0xff] }
  0xf2   :  { %v15133_v14 = vpop.f32.mrf.mxu0  ;;  %12409 = vmatmul.mubr.msk.f32.gmra.mxu0 %vm83_vm0, %v14884_v63 }
  0xf3   :  { %18652 = vst [vmem:[#allocation6_spill] sm:$0xff] %v15133_v14  ;;  %v15137_v62 = vpop.f32.mrf.mxu1  ;;  %12458 = vmatmul.mubr.msk.f32.gmra.mxu1 %vm83_vm0, %v15131_v9  ;;  %12411 = vmatprep.mubr.msk.f32.mxu0 %vm14130_vm1, %v18644_v1 }
  0xf4   :  { %18653 = vst [vmem:[#allocation7_spill] sm:$0xff] %v15137_v62  ;;  %v12081_v16 = vpop.f32.mrf.mxu0  ;;  %12460 = vmatprep.mubr.msk.f32.mxu1 %vm14130_vm1, %v18644_v1 }
  0xf5   :  { %v12127_v21 = vpop.f32.mrf.mxu1 }
  0xf6   :  { %v15150_v24 = vpop.f32.mrf.mxu0  ;;  %12412 = vmatmul.mubr.msk.f32.gmra.mxu0 %vm83_vm0, %v14897_v3 }
  0xf7   :  { %18654 = vst [vmem:[#allocation8_spill] sm:$0xff] %v15150_v24  ;;  %v15154_v63 = vpop.f32.mrf.mxu1  ;;  %12461 = vmatmul.mubr.msk.f32.gmra.mxu1 %vm83_vm0, %v15148_v19  ;;  %12414 = vmatprep.mubr.msk.f32.mxu0 %vm14130_vm1, %v18644_v1 }
  0xf8   :  { %18655 = vst [vmem:[#allocation9_spill] sm:$0xff] %v15154_v63  ;;  %v12084_v26 = vpop.f32.mrf.mxu0  ;;  %12463 = vmatprep.mubr.msk.f32.mxu1 %vm14130_vm1, %v18644_v1 }
  0xf9   :  { %v12177_v33 = vpop.f32.mrf.mxu1  ;;  %v15233_v26 = vld [vmem:[%s18628_s0 + $0x2e0] sm:$0xff] }
  0xfa   :  { %v15167_v36 = vpop.f32.mrf.mxu0  ;;  %12415 = vmatmul.mubr.msk.f32.gmra.mxu0 %vm83_vm0, %v14910_v4 }
  0xfb   :  { %v15171_v3 = vpop.f32.mrf.mxu1  ;;  %12464 = vmatmul.mubr.msk.f32.gmra.mxu1 %vm83_vm0, %v15165_v29  ;;  %12417 = vmatprep.mubr.msk.f32.mxu0 %vm14130_vm1, %v18644_v1 }
  0xfc   :  { %18656 = vst [vmem:[#allocation10_spill] sm:$0xff] %v15171_v3  ;;  %v12091_v38 = vpop.f32.mrf.mxu0  ;;  %12466 = vmatprep.mubr.msk.f32.mxu1 %vm14130_vm1, %v18644_v1 }
  0xfd   :  { %v12180_v43 = vpop.f32.mrf.mxu1 }
  0xfe   :  { %v15184_v46 = vpop.f32.mrf.mxu0  ;;  %12418 = vmatmul.mubr.msk.f32.gmra.mxu0 %vm83_vm0, %v14923_v5 }
  0xff   :  { %v15188_v4 = vpop.f32.mrf.mxu1  ;;  %12467 = vmatmul.mubr.msk.f32.gmra.mxu1 %vm83_vm0, %v15182_v41  ;;  %12420 = vmatprep.mubr.msk.f32.mxu0 %vm14130_vm1, %v18644_v1 }
 0x100   :  { %18657 = vst [vmem:[#allocation11_spill] sm:$0xff] %v15188_v4  ;;  %v12134_v48 = vpop.f32.mrf.mxu0  ;;  %12469 = vmatprep.mubr.msk.f32.mxu1 %vm14130_vm1, %v18644_v1 }
 0x101   :  { %v12183_v53 = vpop.f32.mrf.mxu1 }
 0x102   :  { %v15201_v56 = vpop.f32.mrf.mxu0  ;;  %12421 = vmatmul.mubr.msk.f32.gmra.mxu0 %vm83_vm0, %v14936_v6 }
 0x103   :  { %v15205_v5 = vpop.f32.mrf.mxu1  ;;  %12470 = vmatmul.mubr.msk.f32.gmra.mxu1 %vm83_vm0, %v15199_v51  ;;  %12423 = vmatprep.mubr.msk.f32.mxu0 %vm14130_vm1, %v18644_v1 }
 0x104   :  { %18658 = vst [vmem:[#allocation12_spill] sm:$0xff] %v15205_v5  ;;  %v12137_v58 = vpop.f32.mrf.mxu0  ;;  %12519 = vmatprep.mubr.msk.f32.mxu1 %vm14130_vm1, %v18644_v1 }
 0x105   :  { %v12186_v11 = vpop.f32.mrf.mxu1  ;;  %v15272_v58 = vld [vmem:[%s18628_s0 + $0x2f0] sm:$0xff] }
 0x106   :  { %v15218_v16 = vpop.f32.mrf.mxu0  ;;  %12424 = vmatmul.mubr.msk.f32.gmra.mxu0 %vm83_vm0, %v14953_v10 }
 0x107   :  { %v15222_v6 = vpop.f32.mrf.mxu1  ;;  %12520 = vmatmul.mubr.msk.f32.vlgmr.msra.gmra.mxu1 %vm83_vm0, %v15216_v61  ;;  %12426 = vmatprep.mubr.msk.f32.mxu0 %vm14130_vm1, %v18644_v1 }
 0x108   :  { %18659 = vst [vmem:[#allocation13_spill] sm:$0xff] %v15222_v6  ;;  %v12140_v21 = vpop.f32.mrf.mxu0  ;;  %12522 = vmatprep.mubr.msk.f32.mxu1 %vm14130_vm1, %v18644_v1  ;;  %12602 = vmatpush3.msra.mxu1 %v14215_v0  ;;  %v15253_v0 = vld [vmem:[%s18628_s0 + $0x2e8] sm:$0xff] }
 0x109   :  { %v12189_v10 = vpop.f32.mrf.mxu1  ;;  %12603 = vmatprep.subr.mxu1 %v18644_v1 }
 0x10a   :  { %v15237_v33 = vpop.f32.mrf.mxu0  ;;  %12427 = vmatmul.mubr.msk.f32.gmra.mxu0 %vm83_vm0, %v14970_v15  ;;  %12604 = vmatpush3.msra.mxu1 %v14222_v2 }
 0x10b   :  { %v15242_v38 = vpop.f32.mrf.mxu1  ;;  %12523 = vmatmul.mubr.msk.f32.gmra.mxu1 %vm83_vm0, %v15233_v26  ;;  %12476 = vmatprep.mubr.msk.f32.mxu0 %vm14130_vm1, %v18644_v1 }
 0x10c   :  { %18660 = vst [vmem:[#allocation14_spill] sm:$0xff] %v15242_v38  ;;  %v12143_v43 = vpop.f32.mrf.mxu0  ;;  %12525 = vmatprep.mubr.msk.f32.mxu1 %vm14130_vm1, %v18644_v1  ;;  %12687 = vmatprep.subr.mxu1 %v18644_v1 }
 0x10d   :  { %v12192_v2 = vpop.f32.mrf.mxu1  ;;  %v15290_v43 = vld [vmem:[%s18628_s0 + $0x2f8] sm:$0xff] }
 0x10e   :  { %v15256_v15 = vpop.f32.mrf.mxu0  ;;  %12477 = vmatmul.mubr.msk.f32.vlgmr.msra.gmra.mxu0 %vm83_vm0, %v14987_v20 }
 0x10f   :  { %v15260_v48 = vpop.f32.mrf.mxu1  ;;  %12526 = vmatmul.mubr.msk.f32.gmra.mxu1 %vm83_vm0, %v15253_v0  ;;  %12559 = vmatpush3.msra.mxu0 %v14450_v31 }
 0x110   :  { %18661 = vst [vmem:[#allocation15_spill] sm:$0xff] %v15260_v48  ;;  %v12146_v53 = vpop.f32.mrf.mxu0  ;;  %12479 = vmatprep.mubr.msk.f32.mxu0 %vm14130_vm1, %v18644_v1  ;;  %12528 = vmatprep.mubr.msk.f32.mxu1 %vm14130_vm1, %v18644_v1 }
 0x111   :  { %v12195_v20 = vpop.f32.mrf.mxu1  ;;  %12560 = vmatprep.subr.mxu0 %v18644_v1 }
 0x112   :  { %v15275_v11 = vpop.f32.mrf.mxu0  ;;  %12480 = vmatmul.mubr.msk.f32.gmra.mxu0 %vm83_vm0, %v15004_v25 }
 0x113   :  { %v15279_v21 = vpop.f32.mrf.mxu1  ;;  %12529 = vmatmul.mubr.msk.f32.gmra.mxu1 %vm83_vm0, %v15272_v58  ;;  %12482 = vmatprep.mubr.msk.f32.mxu0 %vm14130_vm1, %v18644_v1 }
 0x114   :  { %18662 = vst [vmem:[#allocation16_spill] sm:$0xff] %v15279_v21  ;;  %v12149_v10 = vpop.f32.mrf.mxu0  ;;  %12531 = vmatprep.mubr.msk.f32.mxu1 %vm14130_vm1, %v18644_v1  ;;  %12561 = vmatpush3.msra.mxu0 %v14458_v32 }
 0x115   :  { %v12198_v25 = vpop.f32.mrf.mxu1  ;;  %12644 = vmatprep.subr.mxu0 %v18644_v1  ;;  %v15309_v10 = vld [vmem:[%s18628_s0 + $0x300] sm:$0xff] }
 0x116   :  { %v15294_v2 = vpop.f32.mrf.mxu0  ;;  %12483 = vmatmul.mubr.msk.f32.gmra.mxu0 %vm83_vm0, %v15024_v30 }
 0x117   :  { %v15298_v53 = vpop.f32.mrf.mxu1  ;;  %12532 = vmatmul.mubr.msk.f32.gmra.mxu1 %vm83_vm0, %v15290_v43  ;;  %12485 = vmatprep.mubr.msk.f32.mxu0 %vm14130_vm1, %v18644_v1 }
 0x118   :  { %18663 = vst [vmem:[#allocation17_spill] sm:$0xff] %v15298_v53  ;;  %v12152_v20 = vpop.f32.mrf.mxu0  ;;  %12534 = vmatprep.mubr.msk.f32.mxu1 %vm14130_vm1, %v18644_v1 }
 0x119   :  { %v12201_v25 = vpop.f32.mrf.mxu1 }
 0x11a   :  { %v15311_v21 = vpop.f32.mrf.mxu0  ;;  %12486 = vmatmul.mubr.msk.f32.gmra.mxu0 %vm83_vm0, %v15043_v37  ;;  %v15326_v25 = vld [vmem:[%s18628_s0 + $0x308] sm:$0xff] }
 0x11b   :  { %v15315_v30 = vpop.f32.mrf.mxu1  ;;  %12535 = vmatmul.mubr.msk.f32.gmra.mxu1 %vm83_vm0, %v15309_v10  ;;  %12488 = vmatprep.mubr.msk.f32.mxu0 %vm14130_vm1, %v18644_v1 }
 0x11c   :  { %18664 = vst [vmem:[#allocation18_spill] sm:$0xff] %v15315_v30  ;;  %v12155_v20 = vpop.f32.mrf.mxu0  ;;  %12537 = vmatprep.mubr.msk.f32.mxu1 %vm14130_vm1, %v18644_v1 }
 0x11d   :  { %v12204_v53 = vpop.f32.mrf.mxu1 }
 0x11e   :  { %v15328_v48 = vpop.f32.mrf.mxu0  ;;  %12489 = vmatmul.mubr.msk.f32.gmra.mxu0 %vm83_vm0, %v15061_v42  ;;  %v15343_v53 = vld [vmem:[%s18628_s0 + $0x310] sm:$0xff] }
 0x11f   :  { %v15332_v37 = vpop.f32.mrf.mxu1  ;;  %12538 = vmatmul.mubr.msk.f32.gmra.mxu1 %vm83_vm0, %v15326_v25  ;;  %12491 = vmatprep.mubr.msk.f32.mxu0 %vm14130_vm1, %v18644_v1 }
 0x120   :  { %18665 = vst [vmem:[#allocation19_spill] sm:$0xff] %v15332_v37  ;;  %v12158_v20 = vpop.f32.mrf.mxu0  ;;  %12540 = vmatprep.mubr.msk.f32.mxu1 %vm14130_vm1, %v18644_v1 }
 0x121   :  { %v12207_v30 = vpop.f32.mrf.mxu1 }
 0x122   :  { %v15345_v38 = vpop.f32.mrf.mxu0  ;;  %12492 = vmatmul.mubr.msk.f32.gmra.mxu0 %vm83_vm0, %v15080_v47  ;;  %v15360_v30 = vld [vmem:[%s18628_s0 + $0x318] sm:$0xff] }
 0x123   :  { %v15349_v42 = vpop.f32.mrf.mxu1  ;;  %12541 = vmatmul.mubr.msk.f32.gmra.mxu1 %vm83_vm0, %v15343_v53  ;;  %12494 = vmatprep.mubr.msk.f32.mxu0 %vm14130_vm1, %v18644_v1 }
 0x124   :  { %18666 = vst [vmem:[#allocation20_spill] sm:$0xff] %v15349_v42  ;;  %v12161_v20 = vpop.f32.mrf.mxu0  ;;  %12543 = vmatprep.mubr.msk.f32.mxu1 %vm14130_vm1, %v18644_v1 }
 0x125   :  { %v12210_v37 = vpop.f32.mrf.mxu1 }
 0x126   :  { %v15362_v6 = vpop.f32.mrf.mxu0  ;;  %12495 = vmatmul.mubr.msk.f32.gmra.mxu0 %vm83_vm0, %v15097_v52  ;;  %v15377_v37 = vld [vmem:[%s18628_s0 + $0x320] sm:$0xff] }
 0x127   :  { %18667 = vst [vmem:[#allocation21_spill] sm:$0xff] %v15362_v6  ;;  %v15366_v47 = vpop.f32.mrf.mxu1  ;;  %12544 = vmatmul.mubr.msk.f32.gmra.mxu1 %vm83_vm0, %v15360_v30  ;;  %12497 = vmatprep.mubr.msk.f32.mxu0 %vm14130_vm1, %v18644_v1 }
 0x128   :  { %18668 = vst [vmem:[#allocation22_spill] sm:$0xff] %v15366_v47  ;;  %v12164_v20 = vpop.f32.mrf.mxu0  ;;  %12546 = vmatprep.mubr.msk.f32.mxu1 %vm14130_vm1, %v18644_v1 }
 0x129   :  { %v12213_v42 = vpop.f32.mrf.mxu1 }
 0x12a   :  { %v15379_v5 = vpop.f32.mrf.mxu0  ;;  %12498 = vmatmul.mubr.msk.f32.gmra.mxu0 %vm83_vm0, %v15114_v57  ;;  %v15394_v42 = vld [vmem:[%s18628_s0 + $0x328] sm:$0xff] }
 0x12b   :  { %18669 = vst [vmem:[#allocation23_spill] sm:$0xff] %v15379_v5  ;;  %v15383_v52 = vpop.f32.mrf.mxu1  ;;  %12547 = vmatmul.mubr.msk.f32.gmra.mxu1 %vm83_vm0, %v15377_v37  ;;  %12500 = vmatprep.mubr.msk.f32.mxu0 %vm14130_vm1, %v18644_v1 }
 0x12c   :  { %18670 = vst [vmem:[#allocation24_spill] sm:$0xff] %v15383_v52  ;;  %v12167_v20 = vpop.f32.mrf.mxu0  ;;  %12549 = vmatprep.mubr.msk.f32.mxu1 %vm14130_vm1, %v18644_v1 }
 0x12d   :  { %v12263_v47 = vpop.f32.mrf.mxu1 }
 0x12e   :  { %v15396_v4 = vpop.f32.mrf.mxu0  ;;  %12501 = vmatmul.mubr.msk.f32.gmra.mxu0 %vm83_vm0, %v15131_v9  ;;  %v15411_v47 = vld [vmem:[%s18628_s0 + $0x330] sm:$0xff] }
 0x12f   :  { %18671 = vst [vmem:[#allocation25_spill] sm:$0xff] %v15396_v4  ;;  %v15400_v57 = vpop.f32.mrf.mxu1  ;;  %12550 = vmatmul.mubr.msk.f32.gmra.mxu1 %vm83_vm0, %v15394_v42  ;;  %12503 = vmatprep.mubr.msk.f32.mxu0 %vm14130_vm1, %v18644_v1 }
 0x130   :  { %18672 = vst [vmem:[#allocation26_spill] sm:$0xff] %v15400_v57  ;;  %v12170_v20 = vpop.f32.mrf.mxu0  ;;  %12552 = vmatprep.mubr.msk.f32.mxu1 %vm14130_vm1, %v18644_v1 }
 0x131   :  { %v12266_v3 = vpop.f32.mrf.mxu1 }
 0x132   :  { %v15413_v63 = vpop.f32.mrf.mxu0  ;;  %12504 = vmatmul.mubr.msk.f32.gmra.mxu0 %vm83_vm0, %v15148_v19  ;;  %v15428_v3 = vld [vmem:[%s18628_s0 + $0x338] sm:$0xf] }
 0x133   :  { %v15417_v9 = vpop.f32.mrf.mxu1  ;;  %12553 = vmatmul.mubr.msk.f32.gmra.mxu1 %vm83_vm0, %v15411_v47  ;;  %12506 = vmatprep.mubr.msk.f32.mxu0 %vm14130_vm1, %v18644_v1 }
 0x134   :  { %18673 = vst [vmem:[#allocation27_spill] sm:$0xff] %v15417_v9  ;;  %v12220_v20 = vpop.f32.mrf.mxu0  ;;  %12555 = vmatprep.mubr.msk.f32.mxu1 %vm14130_vm1, %v18644_v1 }
 0x135   :  { %v12269_v57 = vpop.f32.mrf.mxu1 }
 0x136   :  { %v15430_v4 = vpop.f32.mrf.mxu0  ;;  %12507 = vmatmul.mubr.msk.f32.gmra.mxu0 %vm83_vm0, %v15165_v29  ;;  %v15445_v57 = vld [vmem:[%s18628_s0 + $0x340] sm:$0xff] }
 0x137   :  { %v15434_v19 = vpop.f32.mrf.mxu1  ;;  %12556 = vmatmul.mubr.msk.f32.gmra.mxu1 %vm83_vm0, %v15428_v3  ;;  %12509 = vmatprep.mubr.msk.f32.mxu0 %vm14130_vm1, %v18644_v1 }
 0x138   :  { %18674 = vst [vmem:[#allocation28_spill] sm:$0xff] %v15434_v19  ;;  %v12223_v20 = vpop.f32.mrf.mxu0  ;;  %12605 = vmatprep.mubr.msk.f32.mxu1 %vm14130_vm1, %v18644_v1 }
 0x139   :  { %v12272_v9 = vpop.f32.mrf.mxu1 }
 0x13a   :  { %v15447_v52 = vpop.f32.mrf.mxu0  ;;  %12510 = vmatmul.mubr.msk.f32.gmra.mxu0 %vm83_vm0, %v15182_v41  ;;  %v15462_v9 = vld [vmem:[%s18628_s0 + $0x348] sm:$0xff] }
 0x13b   :  { %v15451_v29 = vpop.f32.mrf.mxu1  ;;  %12606 = vmatmul.mubr.msk.f32.vlgmr.msra.gmra.mxu1 %vm83_vm0, %v15445_v57  ;;  %12512 = vmatprep.mubr.msk.f32.mxu0 %vm14130_vm1, %v18644_v1 }
 0x13c   :  { %18675 = vst [vmem:[#allocation29_spill] sm:$0xff] %v15451_v29  ;;  %v12226_v20 = vpop.f32.mrf.mxu0  ;;  %12608 = vmatprep.mubr.msk.f32.mxu1 %vm14130_vm1, %v18644_v1  ;;  %12688 = vmatpush3.msra.mxu1 %v14450_v31 }
 0x13d   :  { %v12275_v41 = vpop.f32.mrf.mxu1  ;;  %12689 = vmatprep.subr.mxu1 %v18644_v1 }
 0x13e   :  { %v15466_v29 = vpop.f32.mrf.mxu0  ;;  %12513 = vmatmul.mubr.msk.f32.gmra.mxu0 %vm83_vm0, %v15199_v51  ;;  %12690 = vmatpush3.msra.mxu1 %v14458_v32  ;;  %v15482_v41 = vld [vmem:[%s18628_s0 + $0x350] sm:$0xff] }
 0x13f   :  { %v15471_v20 = vpop.f32.mrf.mxu1  ;;  %12609 = vmatmul.mubr.msk.f32.gmra.mxu1 %vm83_vm0, %v15462_v9  ;;  %12562 = vmatprep.mubr.msk.f32.mxu0 %vm14130_vm1, %v18644_v1 }
 0x140   :  { %18676 = vst [vmem:[#allocation30_spill] sm:$0xff] %v15471_v20  ;;  %v12229_v19 = vpop.f32.mrf.mxu0  ;;  %12611 = vmatprep.mubr.msk.f32.mxu1 %vm14130_vm1, %v18644_v1  ;;  %12773 = vmatprep.subr.mxu1 %v18644_v1 }
 0x141   :  { %v12278_v32 = vpop.f32.mrf.mxu1 }
 0x142   :  { %v15485_v51 = vpop.f32.mrf.mxu0  ;;  %12563 = vmatmul.mubr.msk.f32.vlgmr.msra.gmra.mxu0 %vm83_vm0, %v15216_v61  ;;  %v15501_v32 = vld [vmem:[%s18628_s0 + $0x358] sm:$0xff] }
 0x143   :  { %v15489_v20 = vpop.f32.mrf.mxu1  ;;  %12612 = vmatmul.mubr.msk.f32.gmra.mxu1 %vm83_vm0, %v15482_v41  ;;  %12645 = vmatpush3.msra.mxu0 %v14450_v31 }
 0x144   :  { %18677 = vst [vmem:[#allocation31_spill] sm:$0xff] %v15489_v20  ;;  %v12232_v19 = vpop.f32.mrf.mxu0  ;;  %12565 = vmatprep.mubr.msk.f32.mxu0 %vm14130_vm1, %v18644_v1  ;;  %12614 = vmatprep.mubr.msk.f32.mxu1 %vm14130_vm1, %v18644_v1 }
 0x145   :  { %v12281_v61 = vpop.f32.mrf.mxu1  ;;  %12646 = vmatprep.subr.mxu0 %v18644_v1 }
 0x146   :  { %v15504_v20 = vpop.f32.mrf.mxu0  ;;  %12566 = vmatmul.mubr.msk.f32.gmra.mxu0 %vm83_vm0, %v15233_v26  ;;  %v15519_v61 = vld [vmem:[%s18628_s0 + $0x360] sm:$0xff] }
 0x147   :  { %v15508_v31 = vpop.f32.mrf.mxu1  ;;  %12615 = vmatmul.mubr.msk.f32.gmra.mxu1 %vm83_vm0, %v15501_v32  ;;  %12568 = vmatprep.mubr.msk.f32.mxu0 %vm14130_vm1, %v18644_v1  ;;  %v14010_v26 = vld [vmem:[%s18630_s2 + $0x20] sm:$0xff] }
 0x148   :  { %18678 = vst [vmem:[#allocation32_spill] sm:$0xff] %v15508_v31  ;;  %v12235_v19 = vpop.f32.mrf.mxu0  ;;  %12617 = vmatprep.mubr.msk.f32.mxu1 %vm14130_vm1, %v18644_v1  ;;  %12647 = vmatpush3.msra.mxu0 %v14010_v26 }
 0x149   :  { %v12284_v31 = vpop.f32.mrf.mxu1  ;;  %12730 = vmatprep.subr.mxu0 %v18644_v1 }
 0x14a   :  { %v15525_v24 = vpop.f32.mrf.mxu0  ;;  %12569 = vmatmul.mubr.msk.f32.gmra.mxu0 %vm83_vm0, %v15253_v0  ;;  %v15540_v31 = vld [vmem:[%s18628_s0 + $0x368] sm:$0xff] }
 0x14b   :  { %v15529_v19 = vpop.f32.mrf.mxu1  ;;  %12618 = vmatmul.mubr.msk.f32.gmra.mxu1 %vm83_vm0, %v15519_v61  ;;  %12571 = vmatprep.mubr.msk.f32.mxu0 %vm14130_vm1, %v18644_v1 }
 0x14c   :  { %18679 = vst [vmem:[#allocation33_spill] sm:$0xff] %v15529_v19  ;;  %v12238_v5 = vpop.f32.mrf.mxu0  ;;  %12620 = vmatprep.mubr.msk.f32.mxu1 %vm14130_vm1, %v18644_v1 }
 0x14d   :  { %v12287_v26 = vpop.f32.mrf.mxu1 }
 0x14e   :  { %v15542_v62 = vpop.f32.mrf.mxu0  ;;  %12572 = vmatmul.mubr.msk.f32.gmra.mxu0 %vm83_vm0, %v15272_v58  ;;  %v15557_v26 = vld [vmem:[%s18628_s0 + $0x370] sm:$0xff] }
 0x14f   :  { %v15546_v0 = vpop.f32.mrf.mxu1  ;;  %12621 = vmatmul.mubr.msk.f32.gmra.mxu1 %vm83_vm0, %v15540_v31  ;;  %12574 = vmatprep.mubr.msk.f32.mxu0 %vm14130_vm1, %v18644_v1 }
 0x150   :  { %18680 = vst [vmem:[#allocation34_spill] sm:$0xff] %v15546_v0  ;;  %v12241_v5 = vpop.f32.mrf.mxu0  ;;  %12623 = vmatprep.mubr.msk.f32.mxu1 %vm14130_vm1, %v18644_v1 }
 0x151   :  { %v12290_v19 = vpop.f32.mrf.mxu1 }
 0x152   :  { %v15559_v14 = vpop.f32.mrf.mxu0  ;;  %12575 = vmatmul.mubr.msk.f32.gmra.mxu0 %vm83_vm0, %v15290_v43  ;;  %v15574_v19 = vld [vmem:[%s18628_s0 + $0x378] sm:$0xff] }
 0x153   :  { %v15563_v58 = vpop.f32.mrf.mxu1  ;;  %12624 = vmatmul.mubr.msk.f32.gmra.mxu1 %vm83_vm0, %v15557_v26  ;;  %12577 = vmatprep.mubr.msk.f32.mxu0 %vm14130_vm1, %v18644_v1 }
 0x154   :  { %18681 = vst [vmem:[#allocation35_spill] sm:$0xff] %v15563_v58  ;;  %v12244_v5 = vpop.f32.mrf.mxu0  ;;  %12626 = vmatprep.mubr.msk.f32.mxu1 %vm14130_vm1, %v18644_v1 }
 0x155   :  { %v12293_v0 = vpop.f32.mrf.mxu1 }
 0x156   :  { %v15576_v6 = vpop.f32.mrf.mxu0  ;;  %12578 = vmatmul.mubr.msk.f32.gmra.mxu0 %vm83_vm0, %v15309_v10  ;;  %v15591_v0 = vld [vmem:[%s18628_s0 + $0x380] sm:$0xff] }
 0x157   :  { %v15580_v43 = vpop.f32.mrf.mxu1  ;;  %12627 = vmatmul.mubr.msk.f32.gmra.mxu1 %vm83_vm0, %v15574_v19  ;;  %12580 = vmatprep.mubr.msk.f32.mxu0 %vm14130_vm1, %v18644_v1 }
 0x158   :  { %18682 = vst [vmem:[#allocation36_spill] sm:$0xff] %v15580_v43  ;;  %v12247_v5 = vpop.f32.mrf.mxu0  ;;  %12629 = vmatprep.mubr.msk.f32.mxu1 %vm14130_vm1, %v18644_v1 }
 0x159   :  { %v12296_v58 = vpop.f32.mrf.mxu1 }
 0x15a   :  { %v15593_v60 = vpop.f32.mrf.mxu0  ;;  %12581 = vmatmul.mubr.msk.f32.gmra.mxu0 %vm83_vm0, %v15326_v25  ;;  %v15608_v58 = vld [vmem:[%s18628_s0 + $0x388] sm:$0xff] }
 0x15b   :  { %18683 = vst [vmem:[#allocation37_spill] sm:$0xff] %v15593_v60  ;;  %v15597_v10 = vpop.f32.mrf.mxu1  ;;  %12630 = vmatmul.mubr.msk.f32.gmra.mxu1 %vm83_vm0, %v15591_v0  ;;  %12583 = vmatprep.mubr.msk.f32.mxu0 %vm14130_vm1, %v18644_v1 }
 0x15c   :  { %18684 = vst [vmem:[#allocation38_spill] sm:$0xff] %v15597_v10  ;;  %v12250_v5 = vpop.f32.mrf.mxu0  ;;  %12632 = vmatprep.mubr.msk.f32.mxu1 %vm14130_vm1, %v18644_v1 }
 0x15d   :  { %v12299_v43 = vpop.f32.mrf.mxu1 }
 0x15e   :  { %v15610_v60 = vpop.f32.mrf.mxu0  ;;  %12584 = vmatmul.mubr.msk.f32.gmra.mxu0 %vm83_vm0, %v15343_v53  ;;  %v15625_v43 = vld [vmem:[%s18628_s0 + $0x390] sm:$0xff] }
 0x15f   :  { %18685 = vst [vmem:[#allocation39_spill] sm:$0xff] %v15610_v60  ;;  %v15614_v25 = vpop.f32.mrf.mxu1  ;;  %12633 = vmatmul.mubr.msk.f32.gmra.mxu1 %vm83_vm0, %v15608_v58  ;;  %12586 = vmatprep.mubr.msk.f32.mxu0 %vm14130_vm1, %v18644_v1 }
 0x160   :  { %18686 = vst [vmem:[#allocation40_spill] sm:$0xff] %v15614_v25  ;;  %v12253_v5 = vpop.f32.mrf.mxu0  ;;  %12635 = vmatprep.mubr.msk.f32.mxu1 %vm14130_vm1, %v18644_v1 }
 0x161   :  { %v12349_v10 = vpop.f32.mrf.mxu1 }
 0x162   :  { %v15627_v60 = vpop.f32.mrf.mxu0  ;;  %12587 = vmatmul.mubr.msk.f32.gmra.mxu0 %vm83_vm0, %v15360_v30  ;;  %v15642_v10 = vld [vmem:[%s18628_s0 + $0x398] sm:$0xff] }
 0x163   :  { %18687 = vst [vmem:[#allocation41_spill] sm:$0xff] %v15627_v60  ;;  %v15631_v53 = vpop.f32.mrf.mxu1  ;;  %12636 = vmatmul.mubr.msk.f32.gmra.mxu1 %vm83_vm0, %v15625_v43  ;;  %12589 = vmatprep.mubr.msk.f32.mxu0 %vm14130_vm1, %v18644_v1 }
 0x164   :  { %18688 = vst [vmem:[#allocation42_spill] sm:$0xff] %v15631_v53  ;;  %v12256_v5 = vpop.f32.mrf.mxu0  ;;  %12638 = vmatprep.mubr.msk.f32.mxu1 %vm14130_vm1, %v18644_v1 }
 0x165   :  { %v12352_v25 = vpop.f32.mrf.mxu1 }
 0x166   :  { %v15644_v60 = vpop.f32.mrf.mxu0  ;;  %12590 = vmatmul.mubr.msk.f32.gmra.mxu0 %vm83_vm0, %v15377_v37  ;;  %v15659_v25 = vld [vmem:[%s18628_s0 + $0x3a0] sm:$0xf] }
 0x167   :  { %18689 = vst [vmem:[#allocation43_spill] sm:$0xff] %v15644_v60  ;;  %v15648_v30 = vpop.f32.mrf.mxu1  ;;  %12639 = vmatmul.mubr.msk.f32.gmra.mxu1 %vm83_vm0, %v15642_v10  ;;  %12592 = vmatprep.mubr.msk.f32.mxu0 %vm14130_vm1, %v18644_v1 }
 0x168   :  { %18690 = vst [vmem:[#allocation44_spill] sm:$0xff] %v15648_v30  ;;  %v12306_v5 = vpop.f32.mrf.mxu0  ;;  %12641 = vmatprep.mubr.msk.f32.mxu1 %vm14130_vm1, %v18644_v1 }
 0x169   :  { %v12355_v53 = vpop.f32.mrf.mxu1 }
 0x16a   :  { %v15661_v60 = vpop.f32.mrf.mxu0  ;;  %12593 = vmatmul.mubr.msk.f32.gmra.mxu0 %vm83_vm0, %v15394_v42  ;;  %v10957_v53 = vld [vmem:[%s18628_s0 + $0x3a8] sm:$0xff] }
 0x16b   :  { %18691 = vst [vmem:[#allocation45_spill] sm:$0xff] %v15661_v60  ;;  %v15665_v37 = vpop.f32.mrf.mxu1  ;;  %12642 = vmatmul.mubr.msk.f32.gmra.mxu1 %vm83_vm0, %v15659_v25  ;;  %12595 = vmatprep.mubr.msk.f32.mxu0 %vm14130_vm1, %v18644_v1  ;;  %v15679_v42 = vld [vmem:[%s18630_s2 + $0x8] sm:$0xff] }
 0x16c   :  { %18692 = vst [vmem:[#allocation46_spill] sm:$0xff] %v15665_v37  ;;  %v12309_v5 = vpop.f32.mrf.mxu0  ;;  %12691 = vmatprep.mubr.msk.f32.mxu1 %vm14130_vm1, %v18644_v1 }
 0x16d   :  { %v12358_v30 = vpop.f32.mrf.mxu1 }
 0x16e   :  { %v15681_v37 = vpop.f32.mrf.mxu0  ;;  %12596 = vmatmul.mubr.msk.f32.gmra.mxu0 %vm83_vm0, %v15411_v47  ;;  %v15693_v30 = vld [vmem:[%s18630_s2] sm:$0xff]  ;;  %v10958_v47 = vld [vmem:[%s18628_s0 + $0x3b0] sm:$0xff] }
 0x16f   :  { %18693 = vst [vmem:[#allocation47_spill] sm:$0xff] %v15681_v37  ;;  %v15685_v60 = vpop.f32.mrf.mxu1  ;;  %12692 = vmatmul.mubr.msk.f32.vlgmr.msra.gmra.mxu1 %vm83_vm0, %v10957_v53  ;;  %12598 = vmatprep.mubr.msk.f32.mxu0 %vm14130_vm1, %v18644_v1 }
 0x170   :  { %18694 = vst [vmem:[#allocation48_spill] sm:$0xff] %v15685_v60  ;;  %v12312_v5 = vpop.f32.mrf.mxu0  ;;  %12694 = vmatprep.mubr.msk.f32.mxu1 %vm14130_vm1, %v18644_v1  ;;  %12774 = vmatpush3.msra.mxu1 %v15679_v42 }
 0x171   :  { %v12361_v60 = vpop.f32.mrf.mxu1  ;;  %12775 = vmatprep.subr.mxu1 %v18644_v1 }
 0x172   :  { %v15702_v53 = vpop.f32.mrf.mxu0  ;;  %12599 = vmatmul.mubr.msk.f32.gmra.mxu0 %vm83_vm0, %v15428_v3  ;;  %12776 = vmatpush3.msra.mxu1 %v15693_v30  ;;  %v10959_v60 = vld [vmem:[%s18628_s0 + $0x3b8] sm:$0xff] }
 0x173   :  { %18695 = vst [vmem:[#allocation49_spill] sm:$0xff] %v15702_v53  ;;  %v15707_v5 = vpop.f32.mrf.mxu1  ;;  %12695 = vmatmul.mubr.msk.f32.gmra.mxu1 %vm83_vm0, %v10958_v47  ;;  %12648 = vmatprep.mubr.msk.f32.mxu0 %vm14130_vm1, %v18644_v1 }
 0x174   :  { %18696 = vst [vmem:[#allocation50_spill] sm:$0xff] %v15707_v5  ;;  %v12315_v37 = vpop.f32.mrf.mxu0  ;;  %12697 = vmatprep.mubr.msk.f32.mxu1 %vm14130_vm1, %v18644_v1  ;;  %12859 = vmatprep.subr.mxu1 %v18644_v1 }
 0x175   :  { %v12364_v3 = vpop.f32.mrf.mxu1 }
 0x176   :  { %v15718_v53 = vpop.f32.mrf.mxu0  ;;  %12649 = vmatmul.mubr.msk.f32.vlgmr.msra.gmra.mxu0 %vm83_vm0, %v15445_v57  ;;  %v10960_v3 = vld [vmem:[%s18628_s0 + $0x3c0] sm:$0xff] }
 0x177   :  { %v15722_v47 = vpop.f32.mrf.mxu1  ;;  %12698 = vmatmul.mubr.msk.f32.gmra.mxu1 %vm83_vm0, %v10959_v60  ;;  %12731 = vmatpush3.msra.mxu0 %v15679_v42 }
 0x178   :  { %18697 = vst [vmem:[#allocation51_spill] sm:$0xff] %v15722_v47  ;;  %v12318_v37 = vpop.f32.mrf.mxu0  ;;  %12651 = vmatprep.mubr.msk.f32.mxu0 %vm14130_vm1, %v18644_v1  ;;  %12700 = vmatprep.mubr.msk.f32.mxu1 %vm14130_vm1, %v18644_v1 }
 0x179   :  { %v12367_v5 = vpop.f32.mrf.mxu1  ;;  %12732 = vmatprep.subr.mxu0 %v18644_v1 }
 0x17a   :  { %v15734_v57 = vpop.f32.mrf.mxu0  ;;  %12652 = vmatmul.mubr.msk.f32.gmra.mxu0 %vm83_vm0, %v15462_v9  ;;  %v10961_v5 = vld [vmem:[%s18628_s0 + $0x3c8] sm:$0xff] }
 0x17b   :  { %v15738_v60 = vpop.f32.mrf.mxu1  ;;  %12701 = vmatmul.mubr.msk.f32.gmra.mxu1 %vm83_vm0, %v10960_v3  ;;  %12654 = vmatprep.mubr.msk.f32.mxu0 %vm14130_vm1, %v18644_v1 }
 0x17c   :  { %18698 = vst [vmem:[#allocation52_spill] sm:$0xff] %v15738_v60  ;;  %v12321_v37 = vpop.f32.mrf.mxu0  ;;  %12703 = vmatprep.mubr.msk.f32.mxu1 %vm14130_vm1, %v18644_v1  ;;  %12733 = vmatpush3.msra.mxu0 %v15693_v30 }
 0x17d   :  { %v12370_v47 = vpop.f32.mrf.mxu1  ;;  %12816 = vmatprep.subr.mxu0 %v18644_v1 }
 0x17e   :  { %v15750_v9 = vpop.f32.mrf.mxu0  ;;  %12655 = vmatmul.mubr.msk.f32.gmra.mxu0 %vm83_vm0, %v15482_v41  ;;  %v10962_v47 = vld [vmem:[%s18628_s0 + $0x3d0] sm:$0xff] }
 0x17f   :  { %18699 = vst [vmem:[#allocation53_spill] sm:$0xff] %v15750_v9  ;;  %v15754_v3 = vpop.f32.mrf.mxu1  ;;  %12704 = vmatmul.mubr.msk.f32.gmra.mxu1 %vm83_vm0, %v10961_v5  ;;  %12657 = vmatprep.mubr.msk.f32.mxu0 %vm14130_vm1, %v18644_v1 }
 0x180   :  { %18700 = vst [vmem:[#allocation54_spill] sm:$0xff] %v15754_v3  ;;  %v12324_v37 = vpop.f32.mrf.mxu0  ;;  %12706 = vmatprep.mubr.msk.f32.mxu1 %vm14130_vm1, %v18644_v1 }
 0x181   :  { %v12373_v60 = vpop.f32.mrf.mxu1 }
 0x182   :  { %v15764_v9 = vpop.f32.mrf.mxu0  ;;  %12658 = vmatmul.mubr.msk.f32.gmra.mxu0 %vm83_vm0, %v15501_v32  ;;  %v10963_v60 = vld [vmem:[%s18628_s0 + $0x3d8] sm:$0xff] }
 0x183   :  { %v15768_v41 = vpop.f32.mrf.mxu1  ;;  %12707 = vmatmul.mubr.msk.f32.gmra.mxu1 %vm83_vm0, %v10962_v47  ;;  %12660 = vmatprep.mubr.msk.f32.mxu0 %vm14130_vm1, %v18644_v1 }
 0x184   :  { %18701 = vst [vmem:[#allocation55_spill] sm:$0xff] %v15768_v41  ;;  %v12327_v5 = vpop.f32.mrf.mxu0  ;;  %12709 = vmatprep.mubr.msk.f32.mxu1 %vm14130_vm1, %v18644_v1 }
 0x185   :  { %v12376_v37 = vpop.f32.mrf.mxu1  ;;  %v10964_v5 = vld [vmem:[%s18628_s0 + $0x3e0] sm:$0xff] }
 0x186   :  { %v15778_v3 = vpop.f32.mrf.mxu0  ;;  %12661 = vmatmul.mubr.msk.f32.gmra.mxu0 %vm83_vm0, %v15519_v61 }
 0x187   :  { %18702 = vst [vmem:[#allocation56_spill] sm:$0xff] %v15778_v3  ;;  %v15782_v32 = vpop.f32.mrf.mxu1  ;;  %12710 = vmatmul.mubr.msk.f32.gmra.mxu1 %vm83_vm0, %v10963_v60  ;;  %12663 = vmatprep.mubr.msk.f32.mxu0 %vm14130_vm1, %v18644_v1 }
 0x188   :  { %18703 = vst [vmem:[#allocation57_spill] sm:$0xff] %v15782_v32  ;;  %v12330_v47 = vpop.f32.mrf.mxu0  ;;  %12712 = vmatprep.mubr.msk.f32.mxu1 %vm14130_vm1, %v18644_v1 }
 0x189   :  { %v12379_v37 = vpop.f32.mrf.mxu1  ;;  %v10965_v47 = vld [vmem:[%s18628_s0 + $0x3e8] sm:$0xff] }
 0x18a   :  { %v15792_v41 = vpop.f32.mrf.mxu0  ;;  %12664 = vmatmul.mubr.msk.f32.gmra.mxu0 %vm83_vm0, %v15540_v31 }
 0x18b   :  { %18704 = vst [vmem:[#allocation58_spill] sm:$0xff] %v15792_v41  ;;  %v15796_v61 = vpop.f32.mrf.mxu1  ;;  %12713 = vmatmul.mubr.msk.f32.gmra.mxu1 %vm83_vm0, %v10964_v5  ;;  %12666 = vmatprep.mubr.msk.f32.mxu0 %vm14130_vm1, %v18644_v1 }
 0x18c   :  { %18705 = vst [vmem:[#allocation59_spill] sm:$0xff] %v15796_v61  ;;  %v12333_v60 = vpop.f32.mrf.mxu0  ;;  %12715 = vmatprep.mubr.msk.f32.mxu1 %vm14130_vm1, %v18644_v1 }
 0x18d   :  { %v12382_v37 = vpop.f32.mrf.mxu1  ;;  %v10966_v60 = vld [vmem:[%s18628_s0 + $0x3f0] sm:$0xff] }
 0x18e   :  { %v15806_v32 = vpop.f32.mrf.mxu0  ;;  %12667 = vmatmul.mubr.msk.f32.gmra.mxu0 %vm83_vm0, %v15557_v26 }
 0x18f   :  { %18706 = vst [vmem:[#allocation60_spill] sm:$0xff] %v15806_v32  ;;  %v15810_v31 = vpop.f32.mrf.mxu1  ;;  %12716 = vmatmul.mubr.msk.f32.gmra.mxu1 %vm83_vm0, %v10965_v47  ;;  %12669 = vmatprep.mubr.msk.f32.mxu0 %vm14130_vm1, %v18644_v1 }
 0x190   :  { %18707 = vst [vmem:[#allocation61_spill] sm:$0xff] %v15810_v31  ;;  %v12336_v5 = vpop.f32.mrf.mxu0  ;;  %12718 = vmatprep.mubr.msk.f32.mxu1 %vm14130_vm1, %v18644_v1 }
 0x191   :  { %v12385_v37 = vpop.f32.mrf.mxu1  ;;  %v10967_v5 = vld [vmem:[%s18628_s0 + $0x3f8] sm:$0xff] }
 0x192   :  { %v15820_v61 = vpop.f32.mrf.mxu0  ;;  %12670 = vmatmul.mubr.msk.f32.gmra.mxu0 %vm83_vm0, %v15574_v19 }
 0x193   :  { %18708 = vst [vmem:[#allocation62_spill] sm:$0xff] %v15820_v61  ;;  %v15824_v26 = vpop.f32.mrf.mxu1  ;;  %12719 = vmatmul.mubr.msk.f32.gmra.mxu1 %vm83_vm0, %v10966_v60  ;;  %12672 = vmatprep.mubr.msk.f32.mxu0 %vm14130_vm1, %v18644_v1 }
 0x194   :  { %18709 = vst [vmem:[#allocation63_spill] sm:$0xff] %v15824_v26  ;;  %v12339_v47 = vpop.f32.mrf.mxu0  ;;  %12721 = vmatprep.mubr.msk.f32.mxu1 %vm14130_vm1, %v18644_v1  ;;  %v14015_v26 = vld [vmem:[%s18628_s0 + $0x88] sm:$0xff] }
 0x195   :  { %v12435_v37 = vpop.f32.mrf.mxu1  ;;  %v10968_v47 = vld [vmem:[%s18628_s0 + $0x400] sm:$0xff] }
 0x196   :  { %v15834_v31 = vpop.f32.mrf.mxu0  ;;  %12673 = vmatmul.mubr.msk.f32.gmra.mxu0 %vm83_vm0, %v15591_v0 }
 0x197   :  { %18710 = vst [vmem:[#allocation64_spill] sm:$0xff] %v15834_v31  ;;  %v15838_v19 = vpop.f32.mrf.mxu1  ;;  %12722 = vmatmul.mubr.msk.f32.gmra.mxu1 %vm83_vm0, %v10967_v5  ;;  %12675 = vmatprep.mubr.msk.f32.mxu0 %vm14130_vm1, %v18644_v1 }
 0x198   :  { %18711 = vst [vmem:[#allocation65_spill] sm:$0xff] %v15838_v19  ;;  %v12342_v60 = vpop.f32.mrf.mxu0  ;;  %12724 = vmatprep.mubr.msk.f32.mxu1 %vm14130_vm1, %v18644_v1 }
 0x199   :  { %v12438_v37 = vpop.f32.mrf.mxu1  ;;  %v10969_v60 = vld [vmem:[%s18628_s0 + $0x408] sm:$0xf] }
 0x19a   :  { %v15848_v31 = vpop.f32.mrf.mxu0  ;;  %12676 = vmatmul.mubr.msk.f32.gmra.mxu0 %vm83_vm0, %v15608_v58 }
 0x19b   :  { %v15852_v0 = vpop.f32.mrf.mxu1  ;;  %12725 = vmatmul.mubr.msk.f32.gmra.mxu1 %vm83_vm0, %v10968_v47  ;;  %12678 = vmatprep.mubr.msk.f32.mxu0 %vm14130_vm1, %v18644_v1 }
 0x19c   :  { %18712 = vst [vmem:[#allocation66_spill] sm:$0xff] %v15852_v0  ;;  %v12392_v5 = vpop.f32.mrf.mxu0  ;;  %12727 = vmatprep.mubr.msk.f32.mxu1 %vm14130_vm1, %v18644_v1 }
 0x19d   :  { %v12441_v37 = vpop.f32.mrf.mxu1 }
 0x19e   :  { %v15862_v19 = vpop.f32.mrf.mxu0  ;;  %12679 = vmatmul.mubr.msk.f32.gmra.mxu0 %vm83_vm0, %v15625_v43  ;;  %v14011_v43 = vld [vmem:[%s18628_s0 + $0x68] sm:$0xff] }
 0x19f   :  { %v15866_v58 = vpop.f32.mrf.mxu1  ;;  %12728 = vmatmul.mubr.msk.f32.gmra.mxu1 %vm83_vm0, %v10969_v60  ;;  %12681 = vmatprep.mubr.msk.f32.mxu0 %vm14130_vm1, %v18644_v1 }
 0x1a0   :  { %18713 = vst [vmem:[#allocation67_spill] sm:$0xff] %v15866_v58  ;;  %v12395_v47 = vpop.f32.mrf.mxu0  ;;  %12777 = vmatprep.mubr.msk.f32.mxu1 %vm14130_vm1, %v18644_v1 }
 0x1a1   :  { %v12444_v5 = vpop.f32.mrf.mxu1 }
 0x1a2   :  { %v15873_v0 = vpop.f32.mrf.mxu0  ;;  %12682 = vmatmul.mubr.msk.f32.gmra.mxu0 %vm83_vm0, %v15642_v10 }
 0x1a3   :  { %v15877_v37 = vpop.f32.mrf.mxu1  ;;  %12778 = vmatmul.mubr.msk.f32.vlgmr.msra.gmra.mxu1 %vm83_vm0, %v14011_v43  ;;  %12684 = vmatprep.mubr.msk.f32.mxu0 %vm14130_vm1, %v18644_v1  ;;  %v14012_v43 = vld [vmem:[%s18628_s0 + $0x70] sm:$0xff] }
 0x1a4   :  { %18714 = vst [vmem:[#allocation68_spill] sm:$0xff] %v15877_v37  ;;  %v12398_v60 = vpop.f32.mrf.mxu0  ;;  %12780 = vmatprep.mubr.msk.f32.mxu1 %vm14130_vm1, %v18644_v1  ;;  %12860 = vmatpush3.msra.mxu1 %v15679_v42 }
 0x1a5   :  { %v12447_v47 = vpop.f32.mrf.mxu1  ;;  %12861 = vmatprep.subr.mxu1 %v18644_v1  ;;  %v51_v60 = vld [vmem:[%s18628_s0] sm:$0xff] }
 0x1a6   :  { %v15889_v10 = vpop.f32.mrf.mxu0  ;;  %12685 = vmatmul.mubr.msk.f32.gmra.mxu0 %vm83_vm0, %v15659_v25  ;;  %12862 = vmatpush3.msra.mxu1 %v15693_v30 }
 0x1a7   :  { %v15894_v5 = vpop.f32.mrf.mxu1  ;;  %12781 = vmatmul.mubr.msk.f32.gmra.mxu1 %vm83_vm0, %v14012_v43  ;;  %12734 = vmatprep.mubr.msk.f32.mxu0 %vm14130_vm1, %v18644_v1  ;;  %v14013_v43 = vld [vmem:[%s18628_s0 + $0x78] sm:$0xff] }
 0x1a8   :  { %18715 = vst [vmem:[#allocation69_spill] sm:$0xff] %v15894_v5  ;;  %v12401_v47 = vpop.f32.mrf.mxu0  ;;  %12783 = vmatprep.mubr.msk.f32.mxu1 %vm14130_vm1, %v18644_v1  ;;  %12945 = vmatprep.subr.mxu1 %v18644_v1 }
 0x1a9   :  { %v12450_v25 = vpop.f32.mrf.mxu1  ;;  %v52_v47 = vld [vmem:[%s18628_s0 + $0x8] sm:$0xff] }
 0x1aa   :  { %v15908_v5 = vpop.f32.mrf.mxu0  ;;  %12735 = vmatmul.mubr.msk.f32.vlgmr.msra.gmra.mxu0 %vm83_vm0, %v51_v60  ;;  %v18717_v25 = vmov 0.0  }
 0x1ab   :  { %v15911_v37 = vpop.f32.mrf.mxu1  ;;  %12784 = vmatmul.mubr.msk.f32.gmra.mxu1 %vm83_vm0, %v14013_v43  ;;  %12817 = vmatpush3.msra.mxu0 %v15679_v42 }
 0x1ac   :  { %18716 = vst [vmem:[#allocation70_spill] sm:$0xff] %v15911_v37  ;;  %v12404_v1 = vpop.f32.mrf.mxu0  ;;  %12737 = vmatprep.mubr.msk.f32.mxu0 %vm14130_vm1, %v18717_v25  ;;  %12786 = vmatprep.mubr.msk.f32.mxu1 %vm14130_vm1, %v18717_v25  ;;  %v14014_v37 = vld [vmem:[%s18628_s0 + $0x80] sm:$0xff] }
 0x1ad   :  { %v12453_v60 = vpop.f32.mrf.mxu1  ;;  %12818 = vmatprep.subr.mxu0 %v18717_v25  ;;  %v53_v1 = vld [vmem:[%s18628_s0 + $0x10] sm:$0xff] }
 0x1ae   :  { %v15926_v58 = vpop.f32.mrf.mxu0  ;;  %12738 = vmatmul.mubr.msk.f32.gmra.mxu0 %vm83_vm0, %v52_v47 }
 0x1af   :  { %v15929_v43 = vpop.f32.mrf.mxu1  ;;  %12787 = vmatmul.mubr.msk.f32.gmra.mxu1 %vm83_vm0, %v14014_v37  ;;  %12740 = vmatprep.mubr.msk.f32.mxu0 %vm14130_vm1, %v18717_v25 }
 0x1b0   :  { %18718 = vst [vmem:[#allocation71_spill] sm:$0xff] %v15929_v43  ;;  %v12407_v60 = vpop.f32.mrf.mxu0  ;;  %12789 = vmatprep.mubr.msk.f32.mxu1 %vm14130_vm1, %v18717_v25  ;;  %12819 = vmatpush3.msra.mxu0 %v15693_v30 }
 0x1b1   :  { %v12456_v47 = vpop.f32.mrf.mxu1  ;;  %12902 = vmatprep.subr.mxu0 %v18717_v25  ;;  %v54_v60 = vld [vmem:[%s18628_s0 + $0x18] sm:$0xff] }
 0x1b2   :  { %v15944_v43 = vpop.f32.mrf.mxu0  ;;  %12741 = vmatmul.mubr.msk.f32.gmra.mxu0 %vm83_vm0, %v53_v1 }
 0x1b3   :  { %v15947_v37 = vpop.f32.mrf.mxu1  ;;  %12790 = vmatmul.mubr.msk.f32.gmra.mxu1 %vm83_vm0, %v14015_v26  ;;  %12743 = vmatprep.mubr.msk.f32.mxu0 %vm14130_vm1, %v18717_v25  ;;  %v14016_v26 = vld [vmem:[%s18628_s0 + $0x90] sm:$0xff] }
 0x1b4   :  { %18719 = vst [vmem:[#allocation72_spill] sm:$0xff] %v15947_v37  ;;  %v12410_v47 = vpop.f32.mrf.mxu0  ;;  %12792 = vmatprep.mubr.msk.f32.mxu1 %vm14130_vm1, %v18717_v25 }
 0x1b5   :  { %v12459_v1 = vpop.f32.mrf.mxu1  ;;  %v55_v47 = vld [vmem:[%s18628_s0 + $0x20] sm:$0xff] }
 0x1b6   :  { %v15960_v61 = vpop.f32.mrf.mxu0  ;;  %12744 = vmatmul.mubr.msk.f32.gmra.mxu0 %vm83_vm0, %v54_v60 }
 0x1b7   :  { %v15963_v37 = vpop.f32.mrf.mxu1  ;;  %12793 = vmatmul.mubr.msk.f32.gmra.mxu1 %vm83_vm0, %v14016_v26  ;;  %12746 = vmatprep.mubr.msk.f32.mxu0 %vm14130_vm1, %v18717_v25  ;;  %v14017_v26 = vld [vmem:[%s18628_s0 + $0x98] sm:$0xff] }
 0x1b8   :  { %18720 = vst [vmem:[#allocation73_spill] sm:$0xff] %v15963_v37  ;;  %v12413_v1 = vpop.f32.mrf.mxu0  ;;  %12795 = vmatprep.mubr.msk.f32.mxu1 %vm14130_vm1, %v18717_v25 }
 0x1b9   :  { %v12462_v60 = vpop.f32.mrf.mxu1  ;;  %v56_v1 = vld [vmem:[%s18628_s0 + $0x28] sm:$0xff] }
 0x1ba   :  { %v15976_v32 = vpop.f32.mrf.mxu0  ;;  %12747 = vmatmul.mubr.msk.f32.gmra.mxu0 %vm83_vm0, %v55_v47 }
 0x1bb   :  { %18721 = vst [vmem:[#allocation74_spill] sm:$0xff] %v15976_v32  ;;  %v15979_v37 = vpop.f32.mrf.mxu1  ;;  %12796 = vmatmul.mubr.msk.f32.gmra.mxu1 %vm83_vm0, %v14017_v26  ;;  %12749 = vmatprep.mubr.msk.f32.mxu0 %vm14130_vm1, %v18717_v25  ;;  %v14018_v26 = vld [vmem:[%s18628_s0 + $0xa0] sm:$0xff] }
 0x1bc   :  { %18722 = vst [vmem:[#allocation75_spill] sm:$0xff] %v15979_v37  ;;  %v12416_v60 = vpop.f32.mrf.mxu0  ;;  %12798 = vmatprep.mubr.msk.f32.mxu1 %vm14130_vm1, %v18717_v25 }
 0x1bd   :  { %v12465_v47 = vpop.f32.mrf.mxu1  ;;  %v57_v60 = vld [vmem:[%s18628_s0 + $0x30] sm:$0xff] }
 0x1be   :  { %v15992_v41 = vpop.f32.mrf.mxu0  ;;  %12750 = vmatmul.mubr.msk.f32.gmra.mxu0 %vm83_vm0, %v56_v1 }
 0x1bf   :  { %18723 = vst [vmem:[#allocation76_spill] sm:$0xff] %v15992_v41  ;;  %v15995_v37 = vpop.f32.mrf.mxu1  ;;  %12799 = vmatmul.mubr.msk.f32.gmra.mxu1 %vm83_vm0, %v14018_v26  ;;  %12752 = vmatprep.mubr.msk.f32.mxu0 %vm14130_vm1, %v18717_v25  ;;  %v14019_v26 = vld [vmem:[%s18628_s0 + $0xa8] sm:$0xff] }
 0x1c0   :  { %18724 = vst [vmem:[#allocation77_spill] sm:$0xff] %v15995_v37  ;;  %v12419_v47 = vpop.f32.mrf.mxu0  ;;  %12801 = vmatprep.mubr.msk.f32.mxu1 %vm14130_vm1, %v18717_v25 }
 0x1c1   :  { %v12468_v1 = vpop.f32.mrf.mxu1  ;;  %v58_v47 = vld [vmem:[%s18628_s0 + $0x38] sm:$0xff] }
 0x1c2   :  { %v16008_v41 = vpop.f32.mrf.mxu0  ;;  %12753 = vmatmul.mubr.msk.f32.gmra.mxu0 %vm83_vm0, %v57_v60 }
 0x1c3   :  { %18725 = vst [vmem:[#allocation78_spill] sm:$0xff] %v16008_v41  ;;  %v16011_v37 = vpop.f32.mrf.mxu1  ;;  %12802 = vmatmul.mubr.msk.f32.gmra.mxu1 %vm83_vm0, %v14019_v26  ;;  %12755 = vmatprep.mubr.msk.f32.mxu0 %vm14130_vm1, %v18717_v25  ;;  %v14020_v26 = vld [vmem:[%s18628_s0 + $0xb0] sm:$0xff] }
 0x1c4   :  { %18726 = vst [vmem:[#allocation79_spill] sm:$0xff] %v16011_v37  ;;  %v12422_v1 = vpop.f32.mrf.mxu0  ;;  %12804 = vmatprep.mubr.msk.f32.mxu1 %vm14130_vm1, %v18717_v25 }
 0x1c5   :  { %v12471_v60 = vpop.f32.mrf.mxu1  ;;  %v59_v1 = vld [vmem:[%s18628_s0 + $0x40] sm:$0xff] }
 0x1c6   :  { %v16024_v41 = vpop.f32.mrf.mxu0  ;;  %12756 = vmatmul.mubr.msk.f32.gmra.mxu0 %vm83_vm0, %v58_v47 }
 0x1c7   :  { %18727 = vst [vmem:[#allocation80_spill] sm:$0xff] %v16024_v41  ;;  %v16027_v37 = vpop.f32.mrf.mxu1  ;;  %12805 = vmatmul.mubr.msk.f32.gmra.mxu1 %vm83_vm0, %v14020_v26  ;;  %12758 = vmatprep.mubr.msk.f32.mxu0 %vm14130_vm1, %v18717_v25  ;;  %v14021_v26 = vld [vmem:[%s18628_s0 + $0xb8] sm:$0xff] }
 0x1c8   :  { %18728 = vst [vmem:[#allocation81_spill] sm:$0xff] %v16027_v37  ;;  %v12425_v60 = vpop.f32.mrf.mxu0  ;;  %12807 = vmatprep.mubr.msk.f32.mxu1 %vm14130_vm1, %v18717_v25 }
 0x1c9   :  { %v12521_v47 = vpop.f32.mrf.mxu1  ;;  %v60_v60 = vld [vmem:[%s18628_s0 + $0x48] sm:$0xff] }
 0x1ca   :  { %v16040_v41 = vpop.f32.mrf.mxu0  ;;  %12759 = vmatmul.mubr.msk.f32.gmra.mxu0 %vm83_vm0, %v59_v1 }
 0x1cb   :  { %18729 = vst [vmem:[#allocation82_spill] sm:$0xff] %v16040_v41  ;;  %v16043_v37 = vpop.f32.mrf.mxu1  ;;  %12808 = vmatmul.mubr.msk.f32.gmra.mxu1 %vm83_vm0, %v14021_v26  ;;  %12761 = vmatprep.mubr.msk.f32.mxu0 %vm14130_vm1, %v18717_v25  ;;  %v14022_v26 = vld [vmem:[%s18628_s0 + $0xc0] sm:$0xff] }
 0x1cc   :  { %18730 = vst [vmem:[#allocation83_spill] sm:$0xff] %v16043_v37  ;;  %v12428_v47 = vpop.f32.mrf.mxu0  ;;  %12810 = vmatprep.mubr.msk.f32.mxu1 %vm14130_vm1, %v18717_v25 }
 0x1cd   :  { %v12524_v1 = vpop.f32.mrf.mxu1  ;;  %v61_v47 = vld [vmem:[%s18628_s0 + $0x50] sm:$0xff] }
 0x1ce   :  { %v16056_v41 = vpop.f32.mrf.mxu0  ;;  %12762 = vmatmul.mubr.msk.f32.gmra.mxu0 %vm83_vm0, %v60_v60 }
 0x1cf   :  { %18731 = vst [vmem:[#allocation84_spill] sm:$0xff] %v16056_v41  ;;  %v16059_v37 = vpop.f32.mrf.mxu1  ;;  %12811 = vmatmul.mubr.msk.f32.gmra.mxu1 %vm83_vm0, %v14022_v26  ;;  %12764 = vmatprep.mubr.msk.f32.mxu0 %vm14130_vm1, %v18717_v25  ;;  %v14023_v26 = vld [vmem:[%s18628_s0 + $0xc8] sm:$0xf] }
 0x1d0   :  { %18732 = vst [vmem:[#allocation85_spill] sm:$0xff] %v16059_v37  ;;  %v12478_v1 = vpop.f32.mrf.mxu0  ;;  %12813 = vmatprep.mubr.msk.f32.mxu1 %vm14130_vm1, %v18717_v25 }
 0x1d1   :  { %v12527_v60 = vpop.f32.mrf.mxu1  ;;  %v62_v1 = vld [vmem:[%s18628_s0 + $0x58] sm:$0xff] }
 0x1d2   :  { %v16072_v41 = vpop.f32.mrf.mxu0  ;;  %12765 = vmatmul.mubr.msk.f32.gmra.mxu0 %vm83_vm0, %v61_v47 }
 0x1d3   :  { %18733 = vst [vmem:[#allocation86_spill] sm:$0xff] %v16072_v41  ;;  %v16075_v37 = vpop.f32.mrf.mxu1  ;;  %12814 = vmatmul.mubr.msk.f32.gmra.mxu1 %vm83_vm0, %v14023_v26  ;;  %12767 = vmatprep.mubr.msk.f32.mxu0 %vm14130_vm1, %v18717_v25  ;;  %v14024_v26 = vld [vmem:[%s18628_s0 + $0x138] sm:$0xff] }
 0x1d4   :  { %18734 = vst [vmem:[#allocation87_spill] sm:$0xff] %v16075_v37  ;;  %v12481_v60 = vpop.f32.mrf.mxu0  ;;  %12863 = vmatprep.mubr.msk.f32.mxu1 %vm14130_vm1, %v18717_v25 }
 0x1d5   :  { %v12530_v47 = vpop.f32.mrf.mxu1  ;;  %v63_v60 = vld [vmem:[%s18628_s0 + $0x60] sm:$0xf] }
 0x1d6   :  { %v16088_v41 = vpop.f32.mrf.mxu0  ;;  %12768 = vmatmul.mubr.msk.f32.gmra.mxu0 %vm83_vm0, %v62_v1 }
 0x1d7   :  { %18735 = vst [vmem:[#allocation88_spill] sm:$0xff] %v16088_v41  ;;  %v16091_v37 = vpop.f32.mrf.mxu1  ;;  %12864 = vmatmul.mubr.msk.f32.vlgmr.msra.gmra.mxu1 %vm83_vm0, %v14024_v26  ;;  %12770 = vmatprep.mubr.msk.f32.mxu0 %vm14130_vm1, %v18717_v25 }
 0x1d8   :  { %18736 = vst [vmem:[#allocation89_spill] sm:$0xff] %v16091_v37  ;;  %v12484_v47 = vpop.f32.mrf.mxu0  ;;  %12866 = vmatprep.mubr.msk.f32.mxu1 %vm14130_vm1, %v18717_v25  ;;  %12946 = vmatpush3.msra.mxu1 %v15679_v42 }
 0x1d9   :  { %v12533_v1 = vpop.f32.mrf.mxu1  ;;  %12947 = vmatprep.subr.mxu1 %v18717_v25  ;;  %v14025_v47 = vld [vmem:[%s18628_s0 + $0x140] sm:$0xff] }
 0x1da   :  { %v16106_v37 = vpop.f32.mrf.mxu0  ;;  %12771 = vmatmul.mubr.msk.f32.gmra.mxu0 %vm83_vm0, %v63_v60  ;;  %12948 = vmatpush3.msra.mxu1 %v15693_v30 }
 0x1db   :  { %18737 = vst [vmem:[#allocation90_spill] sm:$0xff] %v16106_v37  ;;  %v16110_v26 = vpop.f32.mrf.mxu1  ;;  %12867 = vmatmul.mubr.msk.f32.gmra.mxu1 %vm83_vm0, %v14025_v47  ;;  %12820 = vmatprep.mubr.msk.f32.mxu0 %vm14130_vm1, %v18717_v25  ;;  %v14027_v47 = vld [vmem:[%s18628_s0 + $0x148] sm:$0xff] }
 0x1dc   :  { %18738 = vst [vmem:[#allocation91_spill] sm:$0xff] %v16110_v26  ;;  %v12487_v1 = vpop.f32.mrf.mxu0  ;;  %12869 = vmatprep.mubr.msk.f32.mxu1 %vm14130_vm1, %v18717_v25  ;;  %13031 = vmatprep.subr.mxu1 %v18717_v25  ;;  %v14026_v26 = vld [vmem:[%s18628_s0 + $0xd0] sm:$0xff] }
 0x1dd   :  { %v12536_v60 = vpop.f32.mrf.mxu1 }
 0x1de   :  { %v16121_v37 = vpop.f32.mrf.mxu0  ;;  %12821 = vmatmul.mubr.msk.f32.vlgmr.msra.gmra.mxu0 %vm83_vm0, %v14026_v26 }
 0x1df   :  { %18739 = vst [vmem:[#allocation92_spill] sm:$0xff] %v16121_v37  ;;  %v16127_v41 = vpop.f32.mrf.mxu1  ;;  %12870 = vmatmul.mubr.msk.f32.gmra.mxu1 %vm83_vm0, %v14027_v47  ;;  %12903 = vmatpush3.msra.mxu0 %v15679_v42 }
 0x1e0   :  { %18740 = vst [vmem:[#allocation93_spill] sm:$0xff] %v16127_v41  ;;  %v12490_v1 = vpop.f32.mrf.mxu0  ;;  %12823 = vmatprep.mubr.msk.f32.mxu0 %vm14130_vm1, %v18717_v25  ;;  %12872 = vmatprep.mubr.msk.f32.mxu1 %vm14130_vm1, %v18717_v25  ;;  %v14028_v41 = vld [vmem:[%s18628_s0 + $0xd8] sm:$0xff] }
 0x1e1   :  { %v12539_v60 = vpop.f32.mrf.mxu1  ;;  %12904 = vmatprep.subr.mxu0 %v18717_v25  ;;  %v14029_v1 = vld [vmem:[%s18628_s0 + $0x150] sm:$0xff] }
 0x1e2   :  { %v16139_v26 = vpop.f32.mrf.mxu0  ;;  %12824 = vmatmul.mubr.msk.f32.gmra.mxu0 %vm83_vm0, %v14028_v41 }
 0x1e3   :  { %18741 = vst [vmem:[#allocation94_spill] sm:$0xff] %v16139_v26  ;;  %v16145_v47 = vpop.f32.mrf.mxu1  ;;  %12873 = vmatmul.mubr.msk.f32.gmra.mxu1 %vm83_vm0, %v14029_v1  ;;  %12826 = vmatprep.mubr.msk.f32.mxu0 %vm14130_vm1, %v18717_v25 }
 0x1e4   :  { %18742 = vst [vmem:[#allocation95_spill] sm:$0xff] %v16145_v47  ;;  %v12493_v60 = vpop.f32.mrf.mxu0  ;;  %12875 = vmatprep.mubr.msk.f32.mxu1 %vm14130_vm1, %v18717_v25  ;;  %12905 = vmatpush3.msra.mxu0 %v15693_v30  ;;  %v14030_v47 = vld [vmem:[%s18628_s0 + $0xe0] sm:$0xff] }
 0x1e5   :  { %v12542_v26 = vpop.f32.mrf.mxu1  ;;  %12988 = vmatprep.subr.mxu0 %v18717_v25  ;;  %v14031_v60 = vld [vmem:[%s18628_s0 + $0x158] sm:$0xff] }
 0x1e6   :  { %v16157_v41 = vpop.f32.mrf.mxu0  ;;  %12827 = vmatmul.mubr.msk.f32.gmra.mxu0 %vm83_vm0, %v14030_v47  ;;  %v14032_v47 = vld [vmem:[%s18628_s0 + $0xe8] sm:$0xff] }
 0x1e7   :  { %18743 = vst [vmem:[#allocation96_spill] sm:$0xff] %v16157_v41  ;;  %v16163_v1 = vpop.f32.mrf.mxu1  ;;  %12876 = vmatmul.mubr.msk.f32.gmra.mxu1 %vm83_vm0, %v14031_v60  ;;  %12829 = vmatprep.mubr.msk.f32.mxu0 %vm14130_vm1, %v18717_v25  ;;  %v14033_v60 = vld [vmem:[%s18628_s0 + $0x160] sm:$0xff] }
 0x1e8   :  { %18744 = vst [vmem:[#allocation97_spill] sm:$0xff] %v16163_v1  ;;  %v12496_v26 = vpop.f32.mrf.mxu0  ;;  %12878 = vmatprep.mubr.msk.f32.mxu1 %vm14130_vm1, %v18717_v25 }
 0x1e9   :  { %v12545_v37 = vpop.f32.mrf.mxu1 }
 0x1ea   :  { %v16173_v41 = vpop.f32.mrf.mxu0  ;;  %12830 = vmatmul.mubr.msk.f32.gmra.mxu0 %vm83_vm0, %v14032_v47  ;;  %v14034_v47 = vld [vmem:[%s18628_s0 + $0xf0] sm:$0xff] }
 0x1eb   :  { %18745 = vst [vmem:[#allocation98_spill] sm:$0xff] %v16173_v41  ;;  %v16179_v1 = vpop.f32.mrf.mxu1  ;;  %12879 = vmatmul.mubr.msk.f32.gmra.mxu1 %vm83_vm0, %v14033_v60  ;;  %12832 = vmatprep.mubr.msk.f32.mxu0 %vm14130_vm1, %v18717_v25  ;;  %v14035_v60 = vld [vmem:[%s18628_s0 + $0x168] sm:$0xff] }
 0x1ec   :  { %18746 = vst [vmem:[#allocation99_spill] sm:$0xff] %v16179_v1  ;;  %v12499_v37 = vpop.f32.mrf.mxu0  ;;  %12881 = vmatprep.mubr.msk.f32.mxu1 %vm14130_vm1, %v18717_v25 }
 0x1ed   :  { %v12548_v26 = vpop.f32.mrf.mxu1 }
 0x1ee   :  { %v16189_v41 = vpop.f32.mrf.mxu0  ;;  %12833 = vmatmul.mubr.msk.f32.gmra.mxu0 %vm83_vm0, %v14034_v47  ;;  %v14036_v47 = vld [vmem:[%s18628_s0 + $0xf8] sm:$0xff] }
 0x1ef   :  { %18747 = vst [vmem:[#allocation100_spill] sm:$0xff] %v16189_v41  ;;  %v16195_v1 = vpop.f32.mrf.mxu1  ;;  %12882 = vmatmul.mubr.msk.f32.gmra.mxu1 %vm83_vm0, %v14035_v60  ;;  %12835 = vmatprep.mubr.msk.f32.mxu0 %vm14130_vm1, %v18717_v25  ;;  %v14037_v60 = vld [vmem:[%s18628_s0 + $0x170] sm:$0xff] }
 0x1f0   :  { %18748 = vst [vmem:[#allocation101_spill] sm:$0xff] %v16195_v1  ;;  %v12502_v37 = vpop.f32.mrf.mxu0  ;;  %12884 = vmatprep.mubr.msk.f32.mxu1 %vm14130_vm1, %v18717_v25 }
 0x1f1   :  { %v12551_v26 = vpop.f32.mrf.mxu1 }
 0x1f2   :  { %v16205_v41 = vpop.f32.mrf.mxu0  ;;  %12836 = vmatmul.mubr.msk.f32.gmra.mxu0 %vm83_vm0, %v14036_v47  ;;  %v14038_v47 = vld [vmem:[%s18628_s0 + $0x100] sm:$0xff] }
 0x1f3   :  { %18749 = vst [vmem:[#allocation102_spill] sm:$0xff] %v16205_v41  ;;  %v16211_v1 = vpop.f32.mrf.mxu1  ;;  %12885 = vmatmul.mubr.msk.f32.gmra.mxu1 %vm83_vm0, %v14037_v60  ;;  %12838 = vmatprep.mubr.msk.f32.mxu0 %vm14130_vm1, %v18717_v25  ;;  %v14039_v60 = vld [vmem:[%s18628_s0 + $0x178] sm:$0xff] }
 0x1f4   :  { %18750 = vst [vmem:[#allocation103_spill] sm:$0xff] %v16211_v1  ;;  %v12505_v37 = vpop.f32.mrf.mxu0  ;;  %12887 = vmatprep.mubr.msk.f32.mxu1 %vm14130_vm1, %v18717_v25 }
 0x1f5   :  { %v12554_v26 = vpop.f32.mrf.mxu1 }
 0x1f6   :  { %v16221_v41 = vpop.f32.mrf.mxu0  ;;  %12839 = vmatmul.mubr.msk.f32.gmra.mxu0 %vm83_vm0, %v14038_v47  ;;  %v14040_v47 = vld [vmem:[%s18628_s0 + $0x108] sm:$0xff] }
 0x1f7   :  { %18751 = vst [vmem:[#allocation104_spill] sm:$0xff] %v16221_v41  ;;  %v16227_v1 = vpop.f32.mrf.mxu1  ;;  %12888 = vmatmul.mubr.msk.f32.gmra.mxu1 %vm83_vm0, %v14039_v60  ;;  %12841 = vmatprep.mubr.msk.f32.mxu0 %vm14130_vm1, %v18717_v25  ;;  %v14041_v60 = vld [vmem:[%s18628_s0 + $0x180] sm:$0xff] }
 0x1f8   :  { %18752 = vst [vmem:[#allocation105_spill] sm:$0xff] %v16227_v1  ;;  %v12508_v37 = vpop.f32.mrf.mxu0  ;;  %12890 = vmatprep.mubr.msk.f32.mxu1 %vm14130_vm1, %v18717_v25 }
 0x1f9   :  { %v12557_v26 = vpop.f32.mrf.mxu1 }
 0x1fa   :  { %v16237_v41 = vpop.f32.mrf.mxu0  ;;  %12842 = vmatmul.mubr.msk.f32.gmra.mxu0 %vm83_vm0, %v14040_v47  ;;  %v14042_v47 = vld [vmem:[%s18628_s0 + $0x110] sm:$0xff] }
 0x1fb   :  { %18753 = vst [vmem:[#allocation106_spill] sm:$0xff] %v16237_v41  ;;  %v16243_v1 = vpop.f32.mrf.mxu1  ;;  %12891 = vmatmul.mubr.msk.f32.gmra.mxu1 %vm83_vm0, %v14041_v60  ;;  %12844 = vmatprep.mubr.msk.f32.mxu0 %vm14130_vm1, %v18717_v25  ;;  %v14043_v60 = vld [vmem:[%s18628_s0 + $0x188] sm:$0xff] }
 0x1fc   :  { %18754 = vst [vmem:[#allocation107_spill] sm:$0xff] %v16243_v1  ;;  %v12511_v37 = vpop.f32.mrf.mxu0  ;;  %12893 = vmatprep.mubr.msk.f32.mxu1 %vm14130_vm1, %v18717_v25 }
 0x1fd   :  { %v12607_v26 = vpop.f32.mrf.mxu1 }
 0x1fe   :  { %v16253_v41 = vpop.f32.mrf.mxu0  ;;  %12845 = vmatmul.mubr.msk.f32.gmra.mxu0 %vm83_vm0, %v14042_v47  ;;  %v14044_v47 = vld [vmem:[%s18628_s0 + $0x118] sm:$0xff] }
 0x1ff   :  { %18755 = vst [vmem:[#allocation108_spill] sm:$0xff] %v16253_v41  ;;  %v16259_v1 = vpop.f32.mrf.mxu1  ;;  %12894 = vmatmul.mubr.msk.f32.gmra.mxu1 %vm83_vm0, %v14043_v60  ;;  %12847 = vmatprep.mubr.msk.f32.mxu0 %vm14130_vm1, %v18717_v25  ;;  %v14045_v60 = vld [vmem:[%s18628_s0 + $0x190] sm:$0xff] }
 0x200   :  { %18756 = vst [vmem:[#allocation109_spill] sm:$0xff] %v16259_v1  ;;  %v12514_v37 = vpop.f32.mrf.mxu0  ;;  %12896 = vmatprep.mubr.msk.f32.mxu1 %vm14130_vm1, %v18717_v25 }
 0x201   :  { %v12610_v26 = vpop.f32.mrf.mxu1 }
 0x202   :  { %v16269_v41 = vpop.f32.mrf.mxu0  ;;  %12848 = vmatmul.mubr.msk.f32.gmra.mxu0 %vm83_vm0, %v14044_v47  ;;  %v14046_v47 = vld [vmem:[%s18628_s0 + $0x120] sm:$0xff] }
 0x203   :  { %18757 = vst [vmem:[#allocation110_spill] sm:$0xff] %v16269_v41  ;;  %v16275_v1 = vpop.f32.mrf.mxu1  ;;  %12897 = vmatmul.mubr.msk.f32.gmra.mxu1 %vm83_vm0, %v14045_v60  ;;  %12850 = vmatprep.mubr.msk.f32.mxu0 %vm14130_vm1, %v18717_v25  ;;  %v14047_v60 = vld [vmem:[%s18628_s0 + $0x198] sm:$0xf] }
 0x204   :  { %18758 = vst [vmem:[#allocation111_spill] sm:$0xff] %v16275_v1  ;;  %v12564_v37 = vpop.f32.mrf.mxu0  ;;  %12899 = vmatprep.mubr.msk.f32.mxu1 %vm14130_vm1, %v18717_v25 }
 0x205   :  { %v12613_v26 = vpop.f32.mrf.mxu1 }
 0x206   :  { %v16285_v41 = vpop.f32.mrf.mxu0  ;;  %12851 = vmatmul.mubr.msk.f32.gmra.mxu0 %vm83_vm0, %v14046_v47  ;;  %v14048_v47 = vld [vmem:[%s18628_s0 + $0x128] sm:$0xff] }
 0x207   :  { %18759 = vst [vmem:[#allocation112_spill] sm:$0xff] %v16285_v41  ;;  %v16291_v1 = vpop.f32.mrf.mxu1  ;;  %12900 = vmatmul.mubr.msk.f32.gmra.mxu1 %vm83_vm0, %v14047_v60  ;;  %12853 = vmatprep.mubr.msk.f32.mxu0 %vm14130_vm1, %v18717_v25  ;;  %v14049_v60 = vld [vmem:[%s18628_s0 + $0x208] sm:$0xff] }
 0x208   :  { %18760 = vst [vmem:[#allocation113_spill] sm:$0xff] %v16291_v1  ;;  %v12567_v37 = vpop.f32.mrf.mxu0  ;;  %12949 = vmatprep.mubr.msk.f32.mxu1 %vm14130_vm1, %v18717_v25 }
 0x209   :  { %v12616_v26 = vpop.f32.mrf.mxu1 }
 0x20a   :  { %v16301_v41 = vpop.f32.mrf.mxu0  ;;  %12854 = vmatmul.mubr.msk.f32.gmra.mxu0 %vm83_vm0, %v14048_v47 }
 0x20b   :  { %18761 = vst [vmem:[#allocation114_spill] sm:$0xff] %v16301_v41  ;;  %v16307_v1 = vpop.f32.mrf.mxu1  ;;  %12950 = vmatmul.mubr.msk.f32.vlgmr.msra.gmra.mxu1 %vm83_vm0, %v14049_v60  ;;  %12856 = vmatprep.mubr.msk.f32.mxu0 %vm14130_vm1, %v18717_v25 }
 0x20c   :  { %18762 = vst [vmem:[#allocation115_spill] sm:$0xff] %v16307_v1  ;;  %v12570_v37 = vpop.f32.mrf.mxu0  ;;  %12952 = vmatprep.mubr.msk.f32.mxu1 %vm14130_vm1, %v18717_v25  ;;  %13032 = vmatpush3.msra.mxu1 %v15679_v42  ;;  %v14050_v1 = vld [vmem:[%s18628_s0 + $0x130] sm:$0xf] }
 0x20d   :  { %v12619_v26 = vpop.f32.mrf.mxu1  ;;  %13033 = vmatprep.subr.mxu1 %v18717_v25  ;;  %v14051_v37 = vld [vmem:[%s18628_s0 + $0x210] sm:$0xff] }
 0x20e   :  { %v16319_v47 = vpop.f32.mrf.mxu0  ;;  %12857 = vmatmul.mubr.msk.f32.gmra.mxu0 %vm83_vm0, %v14050_v1  ;;  %13034 = vmatpush3.msra.mxu1 %v15693_v30  ;;  %v14052_v1 = vld [vmem:[%s18628_s0 + $0x1a0] sm:$0xff] }
 0x20f   :  { %18763 = vst [vmem:[#allocation116_spill] sm:$0xff] %v16319_v47  ;;  %v16326_v60 = vpop.f32.mrf.mxu1  ;;  %12953 = vmatmul.mubr.msk.f32.gmra.mxu1 %vm83_vm0, %v14051_v37  ;;  %12906 = vmatprep.mubr.msk.f32.mxu0 %vm14130_vm1, %v18717_v25  ;;  %v14053_v37 = vld [vmem:[%s18628_s0 + $0x218] sm:$0xff] }
 0x210   :  { %18764 = vst [vmem:[#allocation117_spill] sm:$0xff] %v16326_v60  ;;  %v12573_v26 = vpop.f32.mrf.mxu0  ;;  %12955 = vmatprep.mubr.msk.f32.mxu1 %vm14130_vm1, %v18717_v25 }
 0x211   :  { %v12622_v47 = vpop.f32.mrf.mxu1 }
 0x212   :  { %v16336_v41 = vpop.f32.mrf.mxu0  ;;  %12907 = vmatmul.mubr.msk.f32.vlgmr.msra.gmra.mxu0 %vm83_vm0, %v14052_v1 }
 0x213   :  { %18765 = vst [vmem:[#allocation118_spill] sm:$0xff] %v16336_v41  ;;  %v16342_v60 = vpop.f32.mrf.mxu1  ;;  %12956 = vmatmul.mubr.msk.f32.gmra.mxu1 %vm83_vm0, %v14053_v37  ;;  %12989 = vmatpush3.msra.mxu0 %v15679_v42  ;;  %v14055_v42 = vld [vmem:[%s18628_s0 + $0x220] sm:$0xff] }
 0x214   :  { %18766 = vst [vmem:[#allocation119_spill] sm:$0xff] %v16342_v60  ;;  %v12576_v26 = vpop.f32.mrf.mxu0  ;;  %12909 = vmatprep.mubr.msk.f32.mxu0 %vm14130_vm1, %v18717_v25  ;;  %12958 = vmatprep.mubr.msk.f32.mxu1 %vm14130_vm1, %v18717_v25  ;;  %v14054_v60 = vld [vmem:[%s18628_s0 + $0x1a8] sm:$0xff] }
 0x215   :  { %v12625_v47 = vpop.f32.mrf.mxu1  ;;  %12990 = vmatprep.subr.mxu0 %v18717_v25 }
 0x216   :  { %v16354_v1 = vpop.f32.mrf.mxu0  ;;  %12910 = vmatmul.mubr.msk.f32.gmra.mxu0 %vm83_vm0, %v14054_v60  ;;  %v14056_v60 = vld [vmem:[%s18628_s0 + $0x1b0] sm:$0xff] }
 0x217   :  { %18767 = vst [vmem:[#allocation120_spill] sm:$0xff] %v16354_v1  ;;  %v16360_v37 = vpop.f32.mrf.mxu1  ;;  %12959 = vmatmul.mubr.msk.f32.gmra.mxu1 %vm83_vm0, %v14055_v42  ;;  %12912 = vmatprep.mubr.msk.f32.mxu0 %vm14130_vm1, %v18717_v25  ;;  %v14057_v42 = vld [vmem:[%s18628_s0 + $0x228] sm:$0xff] }
 0x218   :  { %18768 = vst [vmem:[#allocation121_spill] sm:$0xff] %v16360_v37  ;;  %v12579_v26 = vpop.f32.mrf.mxu0  ;;  %12961 = vmatprep.mubr.msk.f32.mxu1 %vm14130_vm1, %v18717_v25  ;;  %12991 = vmatpush3.msra.mxu0 %v15693_v30 }
 0x219   :  { %v12628_v47 = vpop.f32.mrf.mxu1 }
 0x21a   :  { %v16371_v1 = vpop.f32.mrf.mxu0  ;;  %12913 = vmatmul.mubr.msk.f32.gmra.mxu0 %vm83_vm0, %v14056_v60  ;;  %v14058_v60 = vld [vmem:[%s18628_s0 + $0x1b8] sm:$0xff] }
 0x21b   :  { %18769 = vst [vmem:[#allocation122_spill] sm:$0xff] %v16371_v1  ;;  %v16377_v37 = vpop.f32.mrf.mxu1  ;;  %12962 = vmatmul.mubr.msk.f32.gmra.mxu1 %vm83_vm0, %v14057_v42  ;;  %12915 = vmatprep.mubr.msk.f32.mxu0 %vm14130_vm1, %v18717_v25  ;;  %v14059_v42 = vld [vmem:[%s18628_s0 + $0x230] sm:$0xff] }
 0x21c   :  { %18770 = vst [vmem:[#allocation123_spill] sm:$0xff] %v16377_v37  ;;  %v12582_v30 = vpop.f32.mrf.mxu0  ;;  %12964 = vmatprep.mubr.msk.f32.mxu1 %vm14130_vm1, %v18717_v25 }
 0x21d   :  { %v12631_v26 = vpop.f32.mrf.mxu1 }
 0x21e   :  { %v16387_v47 = vpop.f32.mrf.mxu0  ;;  %12916 = vmatmul.mubr.msk.f32.gmra.mxu0 %vm83_vm0, %v14058_v60  ;;  %v14060_v60 = vld [vmem:[%s18628_s0 + $0x1c0] sm:$0xff] }
 0x21f   :  { %18771 = vst [vmem:[#allocation124_spill] sm:$0xff] %v16387_v47  ;;  %v16393_v37 = vpop.f32.mrf.mxu1  ;;  %12965 = vmatmul.mubr.msk.f32.gmra.mxu1 %vm83_vm0, %v14059_v42  ;;  %12918 = vmatprep.mubr.msk.f32.mxu0 %vm14130_vm1, %v18717_v25  ;;  %v14061_v42 = vld [vmem:[%s18628_s0 + $0x238] sm:$0xff] }
 0x220   :  { %18772 = vst [vmem:[#allocation125_spill] sm:$0xff] %v16393_v37  ;;  %v12585_v30 = vpop.f32.mrf.mxu0  ;;  %12967 = vmatprep.mubr.msk.f32.mxu1 %vm14130_vm1, %v18717_v25 }
 0x221   :  { %v12634_v26 = vpop.f32.mrf.mxu1 }
 0x222   :  { %v16403_v47 = vpop.f32.mrf.mxu0  ;;  %12919 = vmatmul.mubr.msk.f32.gmra.mxu0 %vm83_vm0, %v14060_v60  ;;  %v14062_v60 = vld [vmem:[%s18628_s0 + $0x1c8] sm:$0xff] }
 0x223   :  { %18773 = vst [vmem:[#allocation126_spill] sm:$0xff] %v16403_v47  ;;  %v16409_v37 = vpop.f32.mrf.mxu1  ;;  %12968 = vmatmul.mubr.msk.f32.gmra.mxu1 %vm83_vm0, %v14061_v42  ;;  %12921 = vmatprep.mubr.msk.f32.mxu0 %vm14130_vm1, %v18717_v25  ;;  %v14063_v42 = vld [vmem:[%s18628_s0 + $0x240] sm:$0xff] }
 0x224   :  { %18774 = vst [vmem:[#allocation127_spill] sm:$0xff] %v16409_v37  ;;  %v12588_v30 = vpop.f32.mrf.mxu0  ;;  %12970 = vmatprep.mubr.msk.f32.mxu1 %vm14130_vm1, %v18717_v25 }
 0x225   :  { %v12637_v26 = vpop.f32.mrf.mxu1 }
 0x226   :  { %v16419_v41 = vpop.f32.mrf.mxu0  ;;  %12922 = vmatmul.mubr.msk.f32.gmra.mxu0 %vm83_vm0, %v14062_v60  ;;  %v14064_v60 = vld [vmem:[%s18628_s0 + $0x1d0] sm:$0xff] }
 0x227   :  { %18775 = vst [vmem:[#allocation128_spill] sm:$0xff] %v16419_v41  ;;  %v16425_v37 = vpop.f32.mrf.mxu1  ;;  %12971 = vmatmul.mubr.msk.f32.gmra.mxu1 %vm83_vm0, %v14063_v42  ;;  %12924 = vmatprep.mubr.msk.f32.mxu0 %vm14130_vm1, %v18717_v25  ;;  %v14065_v42 = vld [vmem:[%s18628_s0 + $0x248] sm:$0xff] }
 0x228   :  { %18776 = vst [vmem:[#allocation129_spill] sm:$0xff] %v16425_v37  ;;  %v12591_v30 = vpop.f32.mrf.mxu0  ;;  %12973 = vmatprep.mubr.msk.f32.mxu1 %vm14130_vm1, %v18717_v25 }
 0x229   :  { %v12640_v26 = vpop.f32.mrf.mxu1 }
 0x22a   :  { %v16435_v41 = vpop.f32.mrf.mxu0  ;;  %12925 = vmatmul.mubr.msk.f32.gmra.mxu0 %vm83_vm0, %v14064_v60  ;;  %v14066_v60 = vld [vmem:[%s18628_s0 + $0x1d8] sm:$0xff] }
 0x22b   :  { %18777 = vst [vmem:[#allocation130_spill] sm:$0xff] %v16435_v41  ;;  %v16441_v37 = vpop.f32.mrf.mxu1  ;;  %12974 = vmatmul.mubr.msk.f32.gmra.mxu1 %vm83_vm0, %v14065_v42  ;;  %12927 = vmatprep.mubr.msk.f32.mxu0 %vm14130_vm1, %v18717_v25  ;;  %v14067_v42 = vld [vmem:[%s18628_s0 + $0x250] sm:$0xff] }
 0x22c   :  { %18778 = vst [vmem:[#allocation131_spill] sm:$0xff] %v16441_v37  ;;  %v12594_v30 = vpop.f32.mrf.mxu0  ;;  %12976 = vmatprep.mubr.msk.f32.mxu1 %vm14130_vm1, %v18717_v25 }
 0x22d   :  { %v12643_v26 = vpop.f32.mrf.mxu1 }
 0x22e   :  { %v16451_v41 = vpop.f32.mrf.mxu0  ;;  %12928 = vmatmul.mubr.msk.f32.gmra.mxu0 %vm83_vm0, %v14066_v60  ;;  %v14068_v60 = vld [vmem:[%s18628_s0 + $0x1e0] sm:$0xff] }
 0x22f   :  { %18779 = vst [vmem:[#allocation132_spill] sm:$0xff] %v16451_v41  ;;  %v16457_v37 = vpop.f32.mrf.mxu1  ;;  %12977 = vmatmul.mubr.msk.f32.gmra.mxu1 %vm83_vm0, %v14067_v42  ;;  %12930 = vmatprep.mubr.msk.f32.mxu0 %vm14130_vm1, %v18717_v25  ;;  %v14069_v42 = vld [vmem:[%s18628_s0 + $0x258] sm:$0xff] }
 0x230   :  { %18780 = vst [vmem:[#allocation133_spill] sm:$0xff] %v16457_v37  ;;  %v12597_v30 = vpop.f32.mrf.mxu0  ;;  %12979 = vmatprep.mubr.msk.f32.mxu1 %vm14130_vm1, %v18717_v25 }
 0x231   :  { %v12693_v26 = vpop.f32.mrf.mxu1 }
 0x232   :  { %v16467_v41 = vpop.f32.mrf.mxu0  ;;  %12931 = vmatmul.mubr.msk.f32.gmra.mxu0 %vm83_vm0, %v14068_v60  ;;  %v14070_v60 = vld [vmem:[%s18628_s0 + $0x1e8] sm:$0xff] }
 0x233   :  { %18781 = vst [vmem:[#allocation134_spill] sm:$0xff] %v16467_v41  ;;  %v16473_v37 = vpop.f32.mrf.mxu1  ;;  %12980 = vmatmul.mubr.msk.f32.gmra.mxu1 %vm83_vm0, %v14069_v42  ;;  %12933 = vmatprep.mubr.msk.f32.mxu0 %vm14130_vm1, %v18717_v25  ;;  %v14071_v42 = vld [vmem:[%s18628_s0 + $0x260] sm:$0xff] }
 0x234   :  { %18782 = vst [vmem:[#allocation135_spill] sm:$0xff] %v16473_v37  ;;  %v12600_v30 = vpop.f32.mrf.mxu0  ;;  %12982 = vmatprep.mubr.msk.f32.mxu1 %vm14130_vm1, %v18717_v25 }
 0x235   :  { %v12696_v26 = vpop.f32.mrf.mxu1 }
 0x236   :  { %v16483_v41 = vpop.f32.mrf.mxu0  ;;  %12934 = vmatmul.mubr.msk.f32.gmra.mxu0 %vm83_vm0, %v14070_v60  ;;  %v14072_v60 = vld [vmem:[%s18628_s0 + $0x1f0] sm:$0xff] }
 0x237   :  { %18783 = vst [vmem:[#allocation136_spill] sm:$0xff] %v16483_v41  ;;  %v16489_v37 = vpop.f32.mrf.mxu1  ;;  %12983 = vmatmul.mubr.msk.f32.gmra.mxu1 %vm83_vm0, %v14071_v42  ;;  %12936 = vmatprep.mubr.msk.f32.mxu0 %vm14130_vm1, %v18717_v25  ;;  %v14073_v42 = vld [vmem:[%s18628_s0 + $0x268] sm:$0xf] }
 0x238   :  { %18784 = vst [vmem:[#allocation137_spill] sm:$0xff] %v16489_v37  ;;  %v12650_v30 = vpop.f32.mrf.mxu0  ;;  %12985 = vmatprep.mubr.msk.f32.mxu1 %vm14130_vm1, %v18717_v25 }
 0x239   :  { %v12699_v26 = vpop.f32.mrf.mxu1 }
 0x23a   :  { %v16499_v41 = vpop.f32.mrf.mxu0  ;;  %12937 = vmatmul.mubr.msk.f32.gmra.mxu0 %vm83_vm0, %v14072_v60  ;;  %v14074_v60 = vld [vmem:[%s18628_s0 + $0x1f8] sm:$0xff] }
 0x23b   :  { %18785 = vst [vmem:[#allocation138_spill] sm:$0xff] %v16499_v41  ;;  %v16505_v37 = vpop.f32.mrf.mxu1  ;;  %12986 = vmatmul.mubr.msk.f32.gmra.mxu1 %vm83_vm0, %v14073_v42  ;;  %12939 = vmatprep.mubr.msk.f32.mxu0 %vm14130_vm1, %v18717_v25  ;;  %v14075_v42 = vld [vmem:[%s18628_s0 + $0x2d8] sm:$0xff] }
 0x23c   :  { %18786 = vst [vmem:[#allocation139_spill] sm:$0xff] %v16505_v37  ;;  %v12653_v30 = vpop.f32.mrf.mxu0  ;;  %13035 = vmatprep.mubr.msk.f32.mxu1 %vm14130_vm1, %v18717_v25 }
 0x23d   :  { %v12702_v26 = vpop.f32.mrf.mxu1 }
 0x23e   :  { %v16515_v41 = vpop.f32.mrf.mxu0  ;;  %12940 = vmatmul.mubr.msk.f32.gmra.mxu0 %vm83_vm0, %v14074_v60  ;;  %v14076_v60 = vld [vmem:[%s18628_s0 + $0x200] sm:$0xf] }
 0x23f   :  { %18787 = vst [vmem:[#allocation140_spill] sm:$0xff] %v16515_v41  ;;  %v16521_v37 = vpop.f32.mrf.mxu1  ;;  %13036 = vmatmul.mubr.msk.f32.vlgmr.msra.gmra.mxu1 %vm83_vm0, %v14075_v42  ;;  %12942 = vmatprep.mubr.msk.f32.mxu0 %vm14130_vm1, %v18717_v25  ;;  %v14077_v42 = vld [vmem:[%s18628_s0 + $0x2e0] sm:$0xff] }
 0x240   :  { %18788 = vst [vmem:[#allocation141_spill] sm:$0xff] %v16521_v37  ;;  %v12656_v30 = vpop.f32.mrf.mxu0  ;;  %13038 = vmatprep.mubr.msk.f32.mxu1 %vm14130_vm1, %v18717_v25 }
 0x241   :  { %v12705_v26 = vpop.f32.mrf.mxu1 }
 0x242   :  { %v16531_v41 = vpop.f32.mrf.mxu0  ;;  %12943 = vmatmul.mubr.msk.f32.gmra.mxu0 %vm83_vm0, %v14076_v60  ;;  %v14078_v60 = vld [vmem:[%s18628_s0 + $0x270] sm:$0xff] }
 0x243   :  { %18789 = vst [vmem:[#allocation142_spill] sm:$0xff] %v16531_v41  ;;  %v16537_v37 = vpop.f32.mrf.mxu1  ;;  %13039 = vmatmul.mubr.msk.f32.gmra.mxu1 %vm83_vm0, %v14077_v42  ;;  %12992 = vmatprep.mubr.msk.f32.mxu0 %vm14130_vm1, %v18717_v25  ;;  %v14079_v42 = vld [vmem:[%s18628_s0 + $0x2e8] sm:$0xff] }
 0x244   :  { %18790 = vst [vmem:[#allocation143_spill] sm:$0xff] %v16537_v37  ;;  %v12659_v30 = vpop.f32.mrf.mxu0  ;;  %13041 = vmatprep.mubr.msk.f32.mxu1 %vm14130_vm1, %v18717_v25 }
 0x245   :  { %v12708_v26 = vpop.f32.mrf.mxu1 }
 0x246   :  { %v16547_v41 = vpop.f32.mrf.mxu0  ;;  %12993 = vmatmul.mubr.msk.f32.vlgmr.msra.gmra.mxu0 %vm83_vm0, %v14078_v60  ;;  %v14080_v60 = vld [vmem:[%s18628_s0 + $0x278] sm:$0xff] }
 0x247   :  { %18791 = vst [vmem:[#allocation144_spill] sm:$0xff] %v16547_v41  ;;  %v16553_v37 = vpop.f32.mrf.mxu1  ;;  %13042 = vmatmul.mubr.msk.f32.gmra.mxu1 %vm83_vm0, %v14079_v42  ;;  %12995 = vmatprep.mubr.msk.f32.mxu0 %vm14130_vm1, %v18717_v25  ;;  %v14081_v42 = vld [vmem:[%s18628_s0 + $0x2f0] sm:$0xff] }
 0x248   :  { %18792 = vst [vmem:[#allocation145_spill] sm:$0xff] %v16553_v37  ;;  %v12662_v30 = vpop.f32.mrf.mxu0  ;;  %13044 = vmatprep.mubr.msk.f32.mxu1 %vm14130_vm1, %v18717_v25 }
 0x249   :  { %v12711_v26 = vpop.f32.mrf.mxu1 }
 0x24a   :  { %v16563_v41 = vpop.f32.mrf.mxu0  ;;  %12996 = vmatmul.mubr.msk.f32.gmra.mxu0 %vm83_vm0, %v14080_v60  ;;  %v14082_v60 = vld [vmem:[%s18628_s0 + $0x280] sm:$0xff] }
 0x24b   :  { %18793 = vst [vmem:[#allocation146_spill] sm:$0xff] %v16563_v41  ;;  %v16569_v37 = vpop.f32.mrf.mxu1  ;;  %13045 = vmatmul.mubr.msk.f32.gmra.mxu1 %vm83_vm0, %v14081_v42  ;;  %12998 = vmatprep.mubr.msk.f32.mxu0 %vm14130_vm1, %v18717_v25  ;;  %v14083_v42 = vld [vmem:[%s18628_s0 + $0x2f8] sm:$0xff] }
 0x24c   :  { %18794 = vst [vmem:[#allocation147_spill] sm:$0xff] %v16569_v37  ;;  %v12665_v30 = vpop.f32.mrf.mxu0  ;;  %13047 = vmatprep.mubr.msk.f32.mxu1 %vm14130_vm1, %v18717_v25 }
 0x24d   :  { %v12714_v26 = vpop.f32.mrf.mxu1 }
 0x24e   :  { %v16579_v41 = vpop.f32.mrf.mxu0  ;;  %12999 = vmatmul.mubr.msk.f32.gmra.mxu0 %vm83_vm0, %v14082_v60  ;;  %v14084_v60 = vld [vmem:[%s18628_s0 + $0x288] sm:$0xff] }
 0x24f   :  { %18795 = vst [vmem:[#allocation148_spill] sm:$0xff] %v16579_v41  ;;  %v16585_v37 = vpop.f32.mrf.mxu1  ;;  %13048 = vmatmul.mubr.msk.f32.gmra.mxu1 %vm83_vm0, %v14083_v42  ;;  %13001 = vmatprep.mubr.msk.f32.mxu0 %vm14130_vm1, %v18717_v25  ;;  %v14085_v42 = vld [vmem:[%s18628_s0 + $0x300] sm:$0xff] }
 0x250   :  { %18796 = vst [vmem:[#allocation149_spill] sm:$0xff] %v16585_v37  ;;  %v12668_v30 = vpop.f32.mrf.mxu0  ;;  %13050 = vmatprep.mubr.msk.f32.mxu1 %vm14130_vm1, %v18717_v25 }
 0x251   :  { %v12717_v26 = vpop.f32.mrf.mxu1 }
 0x252   :  { %v16595_v41 = vpop.f32.mrf.mxu0  ;;  %13002 = vmatmul.mubr.msk.f32.gmra.mxu0 %vm83_vm0, %v14084_v60  ;;  %v14086_v60 = vld [vmem:[%s18628_s0 + $0x290] sm:$0xff] }
 0x253   :  { %18797 = vst [vmem:[#allocation150_spill] sm:$0xff] %v16595_v41  ;;  %v16601_v37 = vpop.f32.mrf.mxu1  ;;  %13051 = vmatmul.mubr.msk.f32.gmra.mxu1 %vm83_vm0, %v14085_v42  ;;  %13004 = vmatprep.mubr.msk.f32.mxu0 %vm14130_vm1, %v18717_v25  ;;  %v14087_v42 = vld [vmem:[%s18628_s0 + $0x308] sm:$0xff] }
 0x254   :  { %18798 = vst [vmem:[#allocation151_spill] sm:$0xff] %v16601_v37  ;;  %v12671_v30 = vpop.f32.mrf.mxu0  ;;  %13053 = vmatprep.mubr.msk.f32.mxu1 %vm14130_vm1, %v18717_v25 }
 0x255   :  { %v12720_v26 = vpop.f32.mrf.mxu1 }
 0x256   :  { %v16611_v41 = vpop.f32.mrf.mxu0  ;;  %13005 = vmatmul.mubr.msk.f32.gmra.mxu0 %vm83_vm0, %v14086_v60  ;;  %v14088_v60 = vld [vmem:[%s18628_s0 + $0x298] sm:$0xff] }
 0x257   :  { %18799 = vst [vmem:[#allocation152_spill] sm:$0xff] %v16611_v41  ;;  %v16617_v37 = vpop.f32.mrf.mxu1  ;;  %13054 = vmatmul.mubr.msk.f32.gmra.mxu1 %vm83_vm0, %v14087_v42  ;;  %13007 = vmatprep.mubr.msk.f32.mxu0 %vm14130_vm1, %v18717_v25  ;;  %v14089_v42 = vld [vmem:[%s18628_s0 + $0x310] sm:$0xff] }
 0x258   :  { %18800 = vst [vmem:[#allocation153_spill] sm:$0xff] %v16617_v37  ;;  %v12674_v30 = vpop.f32.mrf.mxu0  ;;  %13056 = vmatprep.mubr.msk.f32.mxu1 %vm14130_vm1, %v18717_v25 }
 0x259   :  { %v12723_v26 = vpop.f32.mrf.mxu1 }
 0x25a   :  { %v16627_v41 = vpop.f32.mrf.mxu0  ;;  %13008 = vmatmul.mubr.msk.f32.gmra.mxu0 %vm83_vm0, %v14088_v60  ;;  %v14090_v60 = vld [vmem:[%s18628_s0 + $0x2a0] sm:$0xff] }
 0x25b   :  { %18801 = vst [vmem:[#allocation154_spill] sm:$0xff] %v16627_v41  ;;  %v16633_v37 = vpop.f32.mrf.mxu1  ;;  %13057 = vmatmul.mubr.msk.f32.gmra.mxu1 %vm83_vm0, %v14089_v42  ;;  %13010 = vmatprep.mubr.msk.f32.mxu0 %vm14130_vm1, %v18717_v25  ;;  %v14091_v42 = vld [vmem:[%s18628_s0 + $0x318] sm:$0xff] }
 0x25c   :  { %18802 = vst [vmem:[#allocation155_spill] sm:$0xff] %v16633_v37  ;;  %v12677_v30 = vpop.f32.mrf.mxu0  ;;  %13059 = vmatprep.mubr.msk.f32.mxu1 %vm14130_vm1, %v18717_v25 }
 0x25d   :  { %v12726_v26 = vpop.f32.mrf.mxu1 }
 0x25e   :  { %v16643_v41 = vpop.f32.mrf.mxu0  ;;  %13011 = vmatmul.mubr.msk.f32.gmra.mxu0 %vm83_vm0, %v14090_v60  ;;  %v14092_v60 = vld [vmem:[%s18628_s0 + $0x2a8] sm:$0xff] }
 0x25f   :  { %18803 = vst [vmem:[#allocation156_spill] sm:$0xff] %v16643_v41  ;;  %v16649_v37 = vpop.f32.mrf.mxu1  ;;  %13060 = vmatmul.mubr.msk.f32.gmra.mxu1 %vm83_vm0, %v14091_v42  ;;  %13013 = vmatprep.mubr.msk.f32.mxu0 %vm14130_vm1, %v18717_v25  ;;  %v14093_v42 = vld [vmem:[%s18628_s0 + $0x320] sm:$0xff] }
 0x260   :  { %18804 = vst [vmem:[#allocation157_spill] sm:$0xff] %v16649_v37  ;;  %v12680_v30 = vpop.f32.mrf.mxu0  ;;  %13062 = vmatprep.mubr.msk.f32.mxu1 %vm14130_vm1, %v18717_v25 }
 0x261   :  { %v12729_v26 = vpop.f32.mrf.mxu1 }
 0x262   :  { %v16659_v41 = vpop.f32.mrf.mxu0  ;;  %13014 = vmatmul.mubr.msk.f32.gmra.mxu0 %vm83_vm0, %v14092_v60  ;;  %v14094_v60 = vld [vmem:[%s18628_s0 + $0x2b0] sm:$0xff] }
 0x263   :  { %18805 = vst [vmem:[#allocation158_spill] sm:$0xff] %v16659_v41  ;;  %v2878_v37 = vpop.f32.mrf.mxu1  ;;  %13063 = vmatmul.mubr.msk.f32.gmra.mxu1 %vm83_vm0, %v14093_v42  ;;  %13016 = vmatprep.mubr.msk.f32.mxu0 %vm14130_vm1, %v18717_v25  ;;  %v14095_v42 = vld [vmem:[%s18628_s0 + $0x328] sm:$0xff] }
 0x264   :  { %v12683_v30 = vpop.f32.mrf.mxu0  ;;  %13065 = vmatprep.mubr.msk.f32.mxu1 %vm14130_vm1, %v18717_v25 }
 0x265   :  { %v12779_v26 = vpop.f32.mrf.mxu1 }
 0x266   :  { %v16673_v41 = vpop.f32.mrf.mxu0  ;;  %13017 = vmatmul.mubr.msk.f32.gmra.mxu0 %vm83_vm0, %v14094_v60  ;;  %v2879_v26 = vadd.f32 %v2878_v37, %v15167_v36  ;;  %v14096_v60 = vld [vmem:[%s18628_s0 + $0x2b8] sm:$0xff] }
 0x267   :  { %18806 = vst [vmem:[#allocation159_spill] sm:$0xff] %v16673_v41  ;;  %v2883_v47 = vpop.f32.mrf.mxu1  ;;  %13066 = vmatmul.mubr.msk.f32.gmra.mxu1 %vm83_vm0, %v14095_v42  ;;  %13019 = vmatprep.mubr.msk.f32.mxu0 %vm14130_vm1, %v18717_v25 }
 0x268   :  { %v12686_v30 = vpop.f32.mrf.mxu0  ;;  %13068 = vmatprep.mubr.msk.f32.mxu1 %vm14130_vm1, %v18717_v25  ;;  %v2884_v37 = vadd.f32 %v2883_v47, %v14942_v8  ;;  %v14099_v8 = vld [vmem:[%s18628_s0 + $0x338] sm:$0xf] }
 0x269   :  { %v12782_v41 = vpop.f32.mrf.mxu1  ;;  %v14097_v30 = vld [vmem:[%s18628_s0 + $0x330] sm:$0xff] }
 0x26a   :  { %v2735_v1 = vpop.f32.mrf.mxu0  ;;  %13020 = vmatmul.mubr.msk.f32.gmra.mxu0 %vm83_vm0, %v14096_v60  ;;  %v16702_v41 = vadd.f32 %v2879_v26, %v15413_v63 }
 0x26b   :  { %v2736_v3 = vadd.f32 %v2735_v1, %v14938_v7  ;;  %v2888_v42 = vpop.f32.mrf.mxu1  ;;  %13069 = vmatmul.mubr.msk.f32.gmra.mxu1 %vm83_vm0, %v14097_v30  ;;  %13022 = vmatprep.mubr.msk.f32.mxu0 %vm14130_vm1, %v18717_v25  ;;  %v14098_v30 = vld [vmem:[%s18628_s0 + $0x2c0] sm:$0xff] }
 0x26c   :  { %v12736_v36 = vpop.f32.mrf.mxu0  ;;  %13071 = vmatprep.mubr.msk.f32.mxu1 %vm14130_vm1, %v18717_v25  ;;  %v2889_v47 = vadd.f32 %v2888_v42, %v14959_v13  ;;  %v16740_v13 = vld [vmem:[%s18632_s4 + $0x38] sm:$0xff] }
 0x26d   :  { %v16706_v7 = vadd.f32 %v2736_v3, %v15184_v46  ;;  %v12785_v1 = vpop.f32.mrf.mxu1  ;;  %v16722_v3 = vadd.f32 %v2884_v37, %v15430_v4  ;;  %13074 = vmatprep.subr.mxu0 %v16740_v13  ;;  %13085 = vmatprep.subr.mxu1 %v16740_v13 }
 0x26e   :  { %v2740_v60 = vpop.f32.mrf.mxu0  ;;  %13023 = vmatmul.mubr.msk.f32.gmra.mxu0 %vm83_vm0, %v14098_v30  ;;  %13086 = vmatpush3.msra.mxu1 %v16740_v13 }
 0x26f   :  { %v3813_v36 = vmax.f32 %v16706_v7, %v16702_v41  ;;  %v2741_v32 = vadd.f32 %v2740_v60, %v14955_v12  ;;  %v2893_v63 = vpop.f32.mrf.mxu1  ;;  %13072 = vmatmul.mubr.msk.f32.gmra.mxu1 %vm83_vm0, %v14099_v8  ;;  %13025 = vmatprep.mubr.msk.f32.mxu0 %vm14130_vm1, %v18717_v25  ;;  %v14100_v60 = vld [vmem:[%s18628_s0 + $0x2c8] sm:$0xff]  ;;  %v18826_v41 = vld [vmem:[#allocation28_spill] sm:$0xff] }
 0x270   :  { %v12739_v46 = vpop.f32.mrf.mxu0  ;;  %v2894_v42 = vadd.f32 %v2893_v63, %v14976_v18  ;;  %13075 = vmatpush3.msra.mxu0 %v16740_v13 }
 0x271   :  { %v16726_v26 = vadd.f32 %v2741_v32, %v15201_v56  ;;  %v12788_v12 = vpop.f32.mrf.mxu1  ;;  %v16745_v32 = vadd.f32 %v2889_v47, %v15447_v52 }
 0x272   :  { %v2745_v1 = vpop.f32.mrf.mxu0  ;;  %13026 = vmatmul.mubr.msk.f32.gmra.mxu0 %vm83_vm0, %v14100_v60  ;;  %v14101_v12 = vld [vmem:[%s18628_s0 + $0x2d0] sm:$0xf]  ;;  %v16761_v47 = vadd.f32 %v2894_v42, %v15466_v29 }
 0x273   :  { %v2746_v8 = vadd.f32 %v2745_v1, %v14972_v17  ;;  %v2898_v4 = vpop.f32.mrf.mxu1  ;;  %13028 = vmatprep.mubr.msk.f32.mxu0 %vm14130_vm1, %v18717_v25  ;;  %v18908_v25 = vld [vmem:[#allocation86_spill] sm:$0xff] }
 0x274   :  { %v12742_v56 = vpop.f32.mrf.mxu0  ;;  %v2899_v1 = vadd.f32 %v2898_v4, %v14993_v23  ;;  %v18824_v4 = vld [vmem:[#allocation11_spill] sm:$0xff] }
 0x275   :  { %v16749_v17 = vadd.f32 %v2746_v8, %v15218_v16  ;;  %v12791_v37 = vpop.f32.mrf.mxu1 }
 0x276   :  { %v2750_v46 = vpop.f32.mrf.mxu0  ;;  %13029 = vmatmul.mubr.msk.f32.gmra.mxu0 %vm83_vm0, %v14101_v12 }
 0x277   :  { %v2751_v18 = vadd.f32 %v2750_v46, %v14989_v22  ;;  %v2903_v63 = vpop.f32.mrf.mxu1  ;;  %v16771_v22 = vadd.f32 %v2899_v1, %v15485_v51 }
 0x278   :  { %v12745_v16 = vpop.f32.mrf.mxu0  ;;  %v2904_v29 = vadd.f32 %v2903_v63, %v15013_v28 }
 0x279   :  { %v16765_v60 = vadd.f32 %v2751_v18, %v15237_v33  ;;  %v12794_v8 = vpop.f32.mrf.mxu1 }
 0x27a   :  { %v2755_v56 = vpop.f32.mrf.mxu0 }
 0x27b   :  { %v3816_v37 = vmax.f32 %v16765_v60, %v16761_v47  ;;  %v2756_v12 = vadd.f32 %v2755_v56, %v15008_v27  ;;  %v2908_v52 = vpop.f32.mrf.mxu1  ;;  %v16781_v27 = vadd.f32 %v2904_v29, %v15504_v20  ;;  %v18836_v47 = vld [vmem:[#allocation31_spill] sm:$0xff] }
 0x27c   :  { %v12748_v30 = vpop.f32.mrf.mxu0  ;;  %v2909_v51 = vadd.f32 %v2908_v52, %v15031_v35 }
 0x27d   :  { %v16775_v42 = vadd.f32 %v2756_v12, %v15256_v15  ;;  %v12797_v23 = vpop.f32.mrf.mxu1 }
 0x27e   :  { %v2760_v33 = vpop.f32.mrf.mxu0  ;;  %v16798_v35 = vadd.f32 %v2909_v51, %v15525_v24 }
 0x27f   :  { %v2761_v46 = vadd.f32 %v2760_v33, %v15027_v34  ;;  %v2913_v18 = vpop.f32.mrf.mxu1  ;;  %v16793_v34 = vld [vmem:[%s18632_s4 + $0x30] sm:$0xff] }
 0x280   :  { %v12751_v16 = vpop.f32.mrf.mxu0  ;;  %13076 = vmatprep.subr.mxu0 %v16793_v34  ;;  %13087 = vmatprep.subr.mxu1 %v16793_v34 }
 0x281   :  { %v16785_v30 = vadd.f32 %v2761_v46, %v15275_v11  ;;  %v12800_v28 = vpop.f32.mrf.mxu1  ;;  %v2914_v11 = vadd.f32 %v2913_v18, %v15050_v40  ;;  %13077 = vmatpush3.msra.mxu0 %v16793_v34  ;;  %13088 = vmatpush3.msra.mxu1 %v16793_v34 }
 0x282   :  { %v2765_v15 = vpop.f32.mrf.mxu0 }
 0x283   :  { %v2766_v1 = vadd.f32 %v2765_v15, %v15046_v39  ;;  %v2918_v8 = vpop.f32.mrf.mxu1  ;;  %v16810_v24 = vadd.f32 %v2914_v11, %v15542_v62 }
 0x284   :  { %v12754_v20 = vpop.f32.mrf.mxu0  ;;  %v2919_v40 = vadd.f32 %v2918_v8, %v15069_v45 }
 0x285   :  { %v16802_v52 = vadd.f32 %v2766_v1, %v15294_v2  ;;  %v12803_v39 = vpop.f32.mrf.mxu1 }
 0x286   :  { %v2770_v56 = vpop.f32.mrf.mxu0 }
 0x287   :  { %v2771_v29 = vadd.f32 %v2770_v56, %v15065_v44  ;;  %v2923_v23 = vpop.f32.mrf.mxu1  ;;  %v16820_v44 = vadd.f32 %v2919_v40, %v15559_v14  ;;  %v18808_v40 = vld [vmem:[#allocation5_spill] sm:$0xff] }
 0x288   :  { %v12757_v33 = vpop.f32.mrf.mxu0  ;;  %v2924_v62 = vadd.f32 %v2923_v23, %v15086_v50 }
 0x289   :  { %v16814_v2 = vadd.f32 %v2771_v29, %v15311_v21  ;;  %v12806_v46 = vpop.f32.mrf.mxu1 }
 0x28a   :  { %v2775_v18 = vpop.f32.mrf.mxu0 }
 0x28b   :  { %v2776_v51 = vadd.f32 %v2775_v18, %v15082_v49  ;;  %v2928_v28 = vpop.f32.mrf.mxu1  ;;  %v16830_v49 = vadd.f32 %v2924_v62, %v15576_v6  ;;  %v18809_v18 = vld [vmem:[#allocation21_spill] sm:$0xff]  ;;  %v18810_v62 = vld [vmem:[#allocation6_spill] sm:$0xff] }
 0x28c   :  { %v12760_v15 = vpop.f32.mrf.mxu0  ;;  %v2929_v14 = vadd.f32 %v2928_v28, %v15103_v55  ;;  %v18807_v55 = vld [vmem:[#allocation37_spill] sm:$0xff] }
 0x28d   :  { %v16824_v1 = vadd.f32 %v2776_v51, %v15328_v48  ;;  %v12809_v45 = vpop.f32.mrf.mxu1 }
 0x28e   :  { %v2780_v21 = vpop.f32.mrf.mxu0 }
 0x28f   :  { %v2781_v20 = vadd.f32 %v2780_v21, %v15099_v54  ;;  %v2933_v11 = vpop.f32.mrf.mxu1  ;;  %v16842_v54 = vld [vmem:[%s18632_s4 + $0x28] sm:$0xff] }
 0x290   :  { %v12763_v39 = vpop.f32.mrf.mxu0  ;;  %13078 = vmatprep.subr.mxu0 %v16842_v54  ;;  %13089 = vmatprep.subr.mxu1 %v16842_v54  ;;  %v2934_v46 = vadd.f32 %v2933_v11, %v18808_v40  ;;  %v18812_v11 = vld [vmem:[#allocation7_spill] sm:$0xff] }
 0x291   :  { %v16834_v56 = vadd.f32 %v2781_v20, %v15345_v38  ;;  %v12812_v50 = vpop.f32.mrf.mxu1  ;;  %v16847_v38 = vadd.f32 %v2929_v14, %v18807_v55  ;;  %13079 = vmatpush3.msra.mxu0 %v16842_v54  ;;  %13090 = vmatpush3.msra.mxu1 %v16842_v54  ;;  %v18811_v39 = vld [vmem:[#allocation39_spill] sm:$0xff] }
 0x292   :  { %v2785_v48 = vpop.f32.mrf.mxu0  ;;  %v16859_v14 = vadd.f32 %v2934_v46, %v18811_v39  ;;  %v18817_v39 = vld [vmem:[#allocation25_spill] sm:$0xff] }
 0x293   :  { %v2786_v23 = vadd.f32 %v2785_v48, %v15116_v59  ;;  %v2938_v33 = vpop.f32.mrf.mxu1  ;;  %v18813_v48 = vld [vmem:[#allocation23_spill] sm:$0xff] }
 0x294   :  { %v12766_v6 = vpop.f32.mrf.mxu0  ;;  %v2939_v50 = vadd.f32 %v2938_v33, %v18812_v11  ;;  %v16878_v11 = vld [vmem:[%s18632_s4 + $0x20] sm:$0xff] }
 0x295   :  { %v16851_v51 = vadd.f32 %v2786_v23, %v18809_v18  ;;  %v12815_v59 = vpop.f32.mrf.mxu1  ;;  %v18814_v18 = vld [vmem:[#allocation8_spill] sm:$0xff]  ;;  %13080 = vmatprep.subr.mxu0 %v16878_v11  ;;  %13091 = vmatprep.subr.mxu1 %v16878_v11 }
 0x296   :  { %v2790_v28 = vpop.f32.mrf.mxu0  ;;  %13081 = vmatpush3.msra.mxu0 %v16878_v11  ;;  %13092 = vmatpush3.msra.mxu1 %v16878_v11 }
 0x297   :  { %v2791_v45 = vadd.f32 %v2790_v28, %v18810_v62  ;;  %v3164_v21 = vpop.f32.mrf.mxu1  ;;  %v18815_v28 = vld [vmem:[#allocation41_spill] sm:$0xff]  ;;  %13107 = vmatprep.subr.mxu1 %v16740_v13 }
 0x298   :  { %v12769_v20 = vpop.f32.mrf.mxu0  ;;  %v16869_v62 = vadd.f32 %v2939_v50, %v18815_v28  ;;  %v16890_v50 = vld [vmem:[%s18632_s4 + $0x58] sm:$0xff] }
 0x299   :  { %v16863_v23 = vadd.f32 %v2791_v45, %v18813_v48  ;;  %v12865_v6 = vpop.f32.mrf.mxu1  ;;  %v18816_v20 = vld [vmem:[#allocation24_spill] sm:$0xff]  ;;  %13096 = vmatprep.subr.mxu0 %v16890_v50 }
 0x29a   :  { %v2795_v55 = vpop.f32.mrf.mxu0  ;;  %v3165_v46 = vadd.f32 %v3164_v21, %v18816_v20  ;;  %v18818_v6 = vld [vmem:[#allocation9_spill] sm:$0xff]  ;;  %v18820_v20 = vld [vmem:[#allocation43_spill] sm:$0xff] }
 0x29b   :  { %v2796_v59 = vadd.f32 %v2795_v55, %v18814_v18  ;;  %v3169_v15 = vpop.f32.mrf.mxu1 }
 0x29c   :  { %v12772_v29 = vpop.f32.mrf.mxu0  ;;  %v3228_v18 = vadd.f32 %v3165_v46, %v15848_v31 }
 0x29d   :  { %v16873_v8 = vadd.f32 %v2796_v59, %v18817_v39  ;;  %v12868_v33 = vpop.f32.mrf.mxu1  ;;  %v18819_v59 = vld [vmem:[#allocation26_spill] sm:$0xff] }
 0x29e   :  { %v3021_v45 = vpop.f32.mrf.mxu0  ;;  %v3170_v28 = vadd.f32 %v3169_v15, %v18819_v59  ;;  %v18822_v15 = vld [vmem:[#allocation27_spill] sm:$0xff] }
 0x29f   :  { %v3022_v29 = vadd.f32 %v3021_v45, %v18818_v6  ;;  %v3174_v55 = vpop.f32.mrf.mxu1 }
 0x2a0   :  { %v12822_v21 = vpop.f32.mrf.mxu0  ;;  %v3229_v12 = vadd.f32 %v3170_v28, %v15862_v19  ;;  %v3175_v46 = vadd.f32 %v3174_v55, %v18822_v15  ;;  %v18825_v19 = vmax.f32 %v16726_v26, %v16722_v3  ;;  %v18828_v15 = vld [vmem:[#allocation12_spill] sm:$0xff]  ;;  %v18830_v3 = vld [vmem:[#allocation29_spill] sm:$0xff] }
 0x2a1   :  { %v3085_v39 = vadd.f32 %v3022_v29, %v18820_v20  ;;  %v12871_v33 = vpop.f32.mrf.mxu1  ;;  %v18821_v21 = vld [vmem:[#allocation10_spill] sm:$0xff]  ;;  %v18823_v29 = vld [vmem:[#allocation45_spill] sm:$0xff] }
 0x2a2   :  { %v3026_v45 = vpop.f32.mrf.mxu0 }
 0x2a3   :  { %v3826_v6 = vmax.f32 %v3085_v39, %v3228_v18  ;;  %v3027_v48 = vadd.f32 %v3026_v45, %v18821_v21  ;;  %v3179_v40 = vpop.f32.mrf.mxu1 }
 0x2a4   :  { %v12825_v16 = vpop.f32.mrf.mxu0  ;;  %v3180_v7 = vadd.f32 %v3179_v40, %v18826_v41 }
 0x2a5   :  { %v16902_v31 = vmax.f32 %v3813_v36, %v3826_v6  ;;  %v3086_v59 = vadd.f32 %v3027_v48, %v18823_v29  ;;  %v12874_v20 = vpop.f32.mrf.mxu1  ;;  %v3230_v16 = vadd.f32 %v3175_v46, %v15873_v0  ;;  %v18827_v36 = vld [vmem:[#allocation47_spill] sm:$0xff]  ;;  %v18829_v0 = vmax.f32 %v16749_v17, %v16745_v32  ;;  %v18833_v32 = vld [vmem:[#allocation30_spill] sm:$0xff] }
 0x2a6   :  { %v3031_v33 = vpop.f32.mrf.mxu0 }
 0x2a7   :  { %v3827_v63 = vmax.f32 %v3086_v59, %v3229_v12  ;;  %v3032_v18 = vadd.f32 %v3031_v33, %v18824_v4  ;;  %v3184_v39 = vpop.f32.mrf.mxu1  ;;  %v3231_v59 = vadd.f32 %v3180_v7, %v15889_v10 }
 0x2a8   :  { %v12828_v45 = vpop.f32.mrf.mxu0  ;;  %v3185_v26 = vadd.f32 %v3184_v39, %v18830_v3  ;;  %v18837_v3 = vld [vmem:[#allocation15_spill] sm:$0xff] }
 0x2a9   :  { %v16911_v28 = vmax.f32 %v18825_v19, %v3827_v63  ;;  %v3087_v55 = vadd.f32 %v3032_v18, %v18827_v36  ;;  %v12877_v6 = vpop.f32.mrf.mxu1  ;;  %v18831_v63 = vld [vmem:[#allocation49_spill] sm:$0xff] }
 0x2aa   :  { %v3036_v48 = vpop.f32.mrf.mxu0  ;;  %v18832_v45 = vld [vmem:[#allocation13_spill] sm:$0xff]  ;;  %v3232_v36 = vadd.f32 %v3185_v26, %v15908_v5  ;;  %v18835_v5 = vmax.f32 %v16775_v42, %v16771_v22  ;;  %v18839_v22 = vld [vmem:[#allocation32_spill] sm:$0xff] }
 0x2ab   :  { %v3828_v21 = vmax.f32 %v3087_v55, %v3230_v16  ;;  %v3037_v12 = vadd.f32 %v3036_v48, %v18828_v15  ;;  %v3189_v29 = vpop.f32.mrf.mxu1  ;;  %v18834_v48 = vld [vmem:[#allocation14_spill] sm:$0xff] }
 0x2ac   :  { %v12831_v4 = vpop.f32.mrf.mxu0  ;;  %v3190_v17 = vadd.f32 %v3189_v29, %v18833_v32 }
 0x2ad   :  { %v16920_v46 = vmax.f32 %v18829_v0, %v3828_v21  ;;  %v3088_v40 = vadd.f32 %v3037_v12, %v18831_v63  ;;  %v12880_v20 = vpop.f32.mrf.mxu1 }
 0x2ae   :  { %v3041_v33 = vpop.f32.mrf.mxu0  ;;  %v3233_v4 = vadd.f32 %v3190_v17, %v15926_v58  ;;  %v18838_v58 = vmax.f32 %v16785_v30, %v16781_v27  ;;  %v18843_v27 = vld [vmem:[#allocation33_spill] sm:$0xff] }
 0x2af   :  { %v3829_v18 = vmax.f32 %v3088_v40, %v3231_v59  ;;  %v3042_v16 = vadd.f32 %v3041_v33, %v18832_v45  ;;  %v3194_v19 = vpop.f32.mrf.mxu1 }
 0x2b0   :  { %v12834_v41 = vpop.f32.mrf.mxu0  ;;  %v3195_v60 = vadd.f32 %v3194_v19, %v18836_v47  ;;  %v18845_v47 = vld [vmem:[#allocation74_spill] sm:$0xff] }
 0x2b1   :  { %v16929_v10 = vmax.f32 %v3816_v37, %v3829_v18  ;;  %v3089_v39 = vadd.f32 %v3042_v16, %v15718_v53  ;;  %v12883_v7 = vpop.f32.mrf.mxu1  ;;  %v18840_v18 = vld [vmem:[#allocation53_spill] sm:$0xff]  ;;  %v18841_v41 = vld [vmem:[#allocation16_spill] sm:$0xff] }
 0x2b2   :  { %v3046_v55 = vpop.f32.mrf.mxu0  ;;  %v3234_v20 = vadd.f32 %v3195_v60, %v15944_v43  ;;  %v18842_v43 = vmax.f32 %v16802_v52, %v16798_v35  ;;  %v18847_v35 = vld [vmem:[#allocation34_spill] sm:$0xff] }
 0x2b3   :  { %v3830_v6 = vmax.f32 %v3089_v39, %v3232_v36  ;;  %v3047_v21 = vadd.f32 %v3046_v55, %v18834_v48  ;;  %v3199_v15 = vpop.f32.mrf.mxu1 }
 0x2b4   :  { %v12837_v12 = vpop.f32.mrf.mxu0  ;;  %v3200_v42 = vadd.f32 %v3199_v15, %v18839_v22  ;;  %v18844_v15 = vld [vmem:[#allocation17_spill] sm:$0xff] }
 0x2b5   :  { %v16938_v59 = vmax.f32 %v18835_v5, %v3830_v6  ;;  %v3090_v37 = vadd.f32 %v3047_v21, %v15734_v57  ;;  %v12886_v29 = vpop.f32.mrf.mxu1 }
 0x2b6   :  { %v3051_v53 = vpop.f32.mrf.mxu0  ;;  %v3235_v39 = vadd.f32 %v3200_v42, %v15960_v61  ;;  %v18846_v61 = vmax.f32 %v16814_v2, %v16810_v24  ;;  %v18848_v29 = vld [vmem:[#allocation56_spill] sm:$0xff]  ;;  %v18851_v42 = vmax.f32 %v16824_v1, %v16820_v44  ;;  %v18852_v24 = vld [vmem:[#allocation35_spill] sm:$0xff] }
 0x2b7   :  { %v3831_v0 = vmax.f32 %v3090_v37, %v3233_v4  ;;  %v3052_v26 = vadd.f32 %v3051_v53, %v18837_v3  ;;  %v3204_v63 = vpop.f32.mrf.mxu1  ;;  %v18857_v44 = vld [vmem:[#allocation36_spill] sm:$0xff] }
 0x2b8   :  { %v12840_v40 = vpop.f32.mrf.mxu0  ;;  %v3205_v30 = vadd.f32 %v3204_v63, %v18843_v27 }
 0x2b9   :  { %v16947_v33 = vmax.f32 %v18838_v58, %v3831_v0  ;;  %v3091_v45 = vadd.f32 %v3052_v26, %v18840_v18  ;;  %v12889_v16 = vpop.f32.mrf.mxu1  ;;  %v18849_v26 = vld [vmem:[#allocation18_spill] sm:$0xff]  ;;  %v18850_v58 = vld [vmem:[#allocation76_spill] sm:$0xff] }
 0x2ba   :  { %v3056_v57 = vpop.f32.mrf.mxu0  ;;  %v3236_v60 = vadd.f32 %v3205_v30, %v18845_v47  ;;  %v18856_v30 = vmax.f32 %v16834_v56, %v16830_v49  ;;  %v18862_v49 = vld [vmem:[#allocation38_spill] sm:$0xff] }
 0x2bb   :  { %v3832_v19 = vmax.f32 %v3091_v45, %v3234_v20  ;;  %v3057_v36 = vadd.f32 %v3056_v57, %v18841_v41  ;;  %v3209_v32 = vpop.f32.mrf.mxu1  ;;  %v18853_v45 = vld [vmem:[#allocation58_spill] sm:$0xff] }
 0x2bc   :  { %v12843_v17 = vpop.f32.mrf.mxu0  ;;  %v3210_v52 = vadd.f32 %v3209_v32, %v18847_v35 }
 0x2bd   :  { %v16956_v7 = vmax.f32 %v18842_v43, %v3832_v19  ;;  %v3092_v55 = vadd.f32 %v3057_v36, %v15764_v9  ;;  %v12892_v6 = vpop.f32.mrf.mxu1  ;;  %v18854_v36 = vld [vmem:[#allocation19_spill] sm:$0xff]  ;;  %v18855_v43 = vld [vmem:[#allocation78_spill] sm:$0xff] }
 0x2be   :  { %v3061_v48 = vpop.f32.mrf.mxu0  ;;  %v3237_v22 = vadd.f32 %v3210_v52, %v18850_v58  ;;  %v18858_v6 = vld [vmem:[#allocation60_spill] sm:$0xff]  ;;  %v18861_v52 = vmax.f32 %v16851_v51, %v16847_v38  ;;  %v18868_v51 = vld [vmem:[#allocation63_spill] sm:$0xff] }
 0x2bf   :  { %v3833_v21 = vmax.f32 %v3092_v55, %v3235_v39  ;;  %v3062_v12 = vadd.f32 %v3061_v48, %v18844_v15  ;;  %v3214_v4 = vpop.f32.mrf.mxu1 }
 0x2c0   :  { %v12846_v5 = vpop.f32.mrf.mxu0  ;;  %v3215_v2 = vadd.f32 %v3214_v4, %v18852_v24  ;;  %v18859_v4 = vld [vmem:[#allocation20_spill] sm:$0xff]  ;;  %v18866_v24 = vmax.f32 %v16863_v23, %v16859_v14  ;;  %v18872_v14 = vmax.f32 %v16873_v8, %v16869_v62 }
 0x2c1   :  { %v16965_v37 = vmax.f32 %v18846_v61, %v3833_v21  ;;  %v3093_v53 = vadd.f32 %v3062_v12, %v18848_v29  ;;  %v12895_v0 = vpop.f32.mrf.mxu1  ;;  %v18860_v61 = vld [vmem:[#allocation80_spill] sm:$0xff] }
 0x2c2   :  { %v3066_v9 = vpop.f32.mrf.mxu0  ;;  %v3238_v27 = vadd.f32 %v3215_v2, %v18855_v43  ;;  %v18871_v43 = vld [vmem:[#allocation110_spill] sm:$0xff] }
 0x2c3   :  { %v3834_v3 = vmax.f32 %v3093_v53, %v3236_v60  ;;  %v3067_v63 = vadd.f32 %v3066_v9, %v18849_v26  ;;  %v3219_v40 = vpop.f32.mrf.mxu1  ;;  %v18863_v53 = vld [vmem:[#allocation62_spill] sm:$0xff] }
 0x2c4   :  { %v12849_v20 = vpop.f32.mrf.mxu0  ;;  %v3220_v1 = vadd.f32 %v3219_v40, %v18857_v44 }
 0x2c5   :  { %v16974_v18 = vmax.f32 %v18851_v42, %v3834_v3  ;;  %v3094_v16 = vadd.f32 %v3067_v63, %v18853_v45  ;;  %v12898_v57 = vpop.f32.mrf.mxu1  ;;  %v18864_v63 = vld [vmem:[#allocation22_spill] sm:$0xff]  ;;  %v18869_v45 = vld [vmem:[#allocation64_spill] sm:$0xff] }
 0x2c6   :  { %v3071_v19 = vpop.f32.mrf.mxu0  ;;  %v3239_v35 = vadd.f32 %v3220_v1, %v18860_v61 }
 0x2c7   :  { %v3835_v41 = vmax.f32 %v3094_v16, %v3237_v22  ;;  %v3072_v32 = vadd.f32 %v3071_v19, %v18854_v36  ;;  %v3224_v17 = vpop.f32.mrf.mxu1  ;;  %v18865_v22 = vld [vmem:[#allocation82_spill] sm:$0xff]  ;;  %v18870_v36 = vld [vmem:[#allocation40_spill] sm:$0xff] }
 0x2c8   :  { %v12852_v39 = vpop.f32.mrf.mxu0  ;;  %v3225_v56 = vadd.f32 %v3224_v17, %v18862_v49 }
 0x2c9   :  { %v16983_v55 = vmax.f32 %v18856_v30, %v3835_v41  ;;  %v3095_v48 = vadd.f32 %v3072_v32, %v18858_v6  ;;  %v12901_v21 = vpop.f32.mrf.mxu1  ;;  %v18874_v30 = vld [vmem:[#allocation84_spill] sm:$0xff] }
 0x2ca   :  { %v3076_v15 = vpop.f32.mrf.mxu0  ;;  %v3240_v42 = vadd.f32 %v3225_v56, %v18865_v22  ;;  %v18876_v22 = vld [vmem:[#allocation51_spill] sm:$0xff] }
 0x2cb   :  { %v3836_v12 = vmax.f32 %v3095_v48, %v3238_v27  ;;  %v3077_v5 = vadd.f32 %v3076_v15, %v18859_v4  ;;  %v3450_v47 = vpop.f32.mrf.mxu1 }
 0x2cc   :  { %v12855_v60 = vpop.f32.mrf.mxu0  ;;  %v3451_v2 = vadd.f32 %v3450_v47, %v18868_v51 }
 0x2cd   :  { %v16992_v29 = vmax.f32 %v18861_v52, %v3836_v12  ;;  %v3096_v0 = vadd.f32 %v3077_v5, %v18863_v53  ;;  %v12951_v9 = vpop.f32.mrf.mxu1 }
 0x2ce   :  { %v3081_v3 = vpop.f32.mrf.mxu0  ;;  %v17011_v27 = vadd.f32 %v3451_v2, %v18871_v43  ;;  %v18877_v2 = vld [vmem:[#allocation122_spill] sm:$0xff]  ;;  %v18879_v43 = vld [vmem:[#allocation72_spill] sm:$0xff] }
 0x2cf   :  { %v3837_v26 = vmax.f32 %v3096_v0, %v3239_v35  ;;  %v3082_v40 = vadd.f32 %v3081_v3, %v18864_v63  ;;  %v16997_v20 = vpop.f32.mrf.mxu1 }
 0x2d0   :  { %v12858_v58 = vpop.f32.mrf.mxu0 }
 0x2d1   :  { %v17003_v38 = vmax.f32 %v18866_v24, %v3837_v26  ;;  %v3097_v16 = vadd.f32 %v3082_v40, %v18869_v45  ;;  %v12954_v57 = vpop.f32.mrf.mxu1  ;;  %v18875_v26 = vld [vmem:[#allocation70_spill] sm:$0xff] }
 0x2d2   :  { %v3307_v19 = vpop.f32.mrf.mxu0 }
 0x2d3   :  { %18867 = vst [vmem:[#allocation37_spill] sm:$0xff] %v17003_v38  ;;  %v3838_v41 = vmax.f32 %v3097_v16, %v3240_v42  ;;  %v3308_v32 = vadd.f32 %v3307_v19, %v18870_v36  ;;  %v17008_v17 = vpop.f32.mrf.mxu1  ;;  %v18878_v16 = vld [vmem:[#allocation96_spill] sm:$0xff]  ;;  %v18905_v36 = vld [vmem:[#allocation133_spill] sm:$0xff] }
 0x2d4   :  { %v12908_v39 = vpop.f32.mrf.mxu0  ;;  %v18911_v38 = vld [vmem:[#allocation112_spill] sm:$0xff] }
 0x2d5   :  { %v17016_v23 = vmax.f32 %v18872_v14, %v3838_v41  ;;  %v17019_v44 = vadd.f32 %v3308_v32, %v18874_v30  ;;  %v12957_v1 = vpop.f32.mrf.mxu1 }
 0x2d6   :  { %v17021_v6 = vpop.f32.mrf.mxu0 }
 0x2d7   :  { %18873 = vst [vmem:[#allocation5_spill] sm:$0xff] %v17016_v23  ;;  %v17025_v21 = vpop.f32.mrf.mxu1 }
 0x2d8   :  { %v12911_v15 = vpop.f32.mrf.mxu0 }
 0x2d9   :  { %v12960_v12 = vpop.f32.mrf.mxu1  ;;  %v18880_v15 = vld [vmem:[#allocation54_spill] sm:$0xff] }
 0x2da   :  { %v17027_v4 = vpop.f32.mrf.mxu0 }
 0x2db   :  { %v17029_v5 = vpop.f32.mrf.mxu1 }
 0x2dc   :  { %v12914_v8 = vpop.f32.mrf.mxu0 }
 0x2dd   :  { %v12963_v62 = vpop.f32.mrf.mxu1 }
 0x2de   :  { %v17031_v47 = vpop.f32.mrf.mxu0 }
 0x2df   :  { %v17033_v60 = vpop.f32.mrf.mxu1 }
 0x2e0   :  { %v12917_v61 = vpop.f32.mrf.mxu0 }
 0x2e1   :  { %v12966_v35 = vpop.f32.mrf.mxu1  ;;  %v18881_v61 = vld [vmem:[#allocation126_spill] sm:$0xff] }
 0x2e2   :  { %v17035_v52 = vpop.f32.mrf.mxu0 }
 0x2e3   :  { %v3480_v49 = vpop.f32.mrf.mxu1 }
 0x2e4   :  { %v12920_v56 = vpop.f32.mrf.mxu0  ;;  %v3481_v63 = vadd.f32 %v3480_v49, %v18875_v26  ;;  %v18882_v49 = vld [vmem:[#allocation73_spill] sm:$0xff] }
 0x2e5   :  { %v12969_v53 = vpop.f32.mrf.mxu1 }
 0x2e6   :  { %v17037_v0 = vpop.f32.mrf.mxu0  ;;  %v17044_v45 = vadd.f32 %v3481_v63, %v18877_v2  ;;  %v18883_v53 = vld [vmem:[#allocation100_spill] sm:$0xff] }
 0x2e7   :  { %v17039_v9 = vpop.f32.mrf.mxu1 }
 0x2e8   :  { %v12923_v3 = vpop.f32.mrf.mxu0 }
 0x2e9   :  { %v12972_v40 = vpop.f32.mrf.mxu1 }
 0x2ea   :  { %v3337_v58 = vpop.f32.mrf.mxu0 }
 0x2eb   :  { %v3338_v42 = vadd.f32 %v3337_v58, %v18876_v22  ;;  %v3490_v24 = vpop.f32.mrf.mxu1  ;;  %v18884_v58 = vld [vmem:[#allocation55_spill] sm:$0xff] }
 0x2ec   :  { %v12926_v51 = vpop.f32.mrf.mxu0  ;;  %v3491_v14 = vadd.f32 %v3490_v24, %v18879_v43 }
 0x2ed   :  { %v17047_v57 = vadd.f32 %v3338_v42, %v18878_v16  ;;  %v12975_v19 = vpop.f32.mrf.mxu1  ;;  %v18885_v51 = vld [vmem:[#allocation128_spill] sm:$0xff]  ;;  %v18886_v16 = vld [vmem:[#allocation75_spill] sm:$0xff] }
 0x2ee   :  { %v17049_v41 = vpop.f32.mrf.mxu0  ;;  %v17056_v35 = vadd.f32 %v3491_v14, %v18881_v61  ;;  %v18889_v61 = vld [vmem:[#allocation130_spill] sm:$0xff] }
 0x2ef   :  { %v3495_v32 = vpop.f32.mrf.mxu1 }
 0x2f0   :  { %v12929_v39 = vpop.f32.mrf.mxu0  ;;  %v3496_v56 = vadd.f32 %v3495_v32, %v18882_v49 }
 0x2f1   :  { %v12978_v30 = vpop.f32.mrf.mxu1  ;;  %v18887_v39 = vld [vmem:[#allocation102_spill] sm:$0xff] }
 0x2f2   :  { %v3347_v1 = vpop.f32.mrf.mxu0  ;;  %v17066_v2 = vadd.f32 %v3496_v56, %v18885_v51 }
 0x2f3   :  { %v3348_v12 = vadd.f32 %v3347_v1, %v18880_v15  ;;  %v3500_v8 = vpop.f32.mrf.mxu1  ;;  %v18888_v1 = vld [vmem:[#allocation57_spill] sm:$0xff] }
 0x2f4   :  { %v12932_v62 = vpop.f32.mrf.mxu0  ;;  %v3501_v19 = vadd.f32 %v3500_v8, %v18886_v16 }
 0x2f5   :  { %v17060_v3 = vadd.f32 %v3348_v12, %v18883_v53  ;;  %v12981_v26 = vpop.f32.mrf.mxu1  ;;  %v18890_v53 = vld [vmem:[#allocation77_spill] sm:$0xff] }
 0x2f6   :  { %v3352_v63 = vpop.f32.mrf.mxu0  ;;  %v17076_v49 = vadd.f32 %v3501_v19, %v18889_v61  ;;  %v18891_v26 = vld [vmem:[#allocation104_spill] sm:$0xff] }
 0x2f7   :  { %v3353_v22 = vadd.f32 %v3352_v63, %v18884_v58  ;;  %v3505_v42 = vpop.f32.mrf.mxu1 }
 0x2f8   :  { %v12935_v24 = vpop.f32.mrf.mxu0  ;;  %v3506_v56 = vadd.f32 %v3505_v42, %v18890_v53  ;;  %v18903_v53 = vld [vmem:[#allocation81_spill] sm:$0xff] }
 0x2f9   :  { %v17070_v43 = vadd.f32 %v3353_v22, %v18887_v39  ;;  %v12984_v32 = vpop.f32.mrf.mxu1  ;;  %v18892_v24 = vld [vmem:[#allocation59_spill] sm:$0xff] }
 0x2fa   :  { %v3357_v14 = vpop.f32.mrf.mxu0  ;;  %v18893_v32 = vld [vmem:[#allocation132_spill] sm:$0xff] }
 0x2fb   :  { %v3358_v15 = vadd.f32 %v3357_v14, %v18888_v1  ;;  %v3510_v12 = vpop.f32.mrf.mxu1  ;;  %v17086_v14 = vadd.f32 %v3506_v56, %v18893_v32  ;;  %v18894_v1 = vld [vmem:[#allocation79_spill] sm:$0xff]  ;;  %v18900_v32 = vld [vmem:[#allocation108_spill] sm:$0xff] }
 0x2fc   :  { %v12938_v62 = vpop.f32.mrf.mxu0  ;;  %v3511_v19 = vadd.f32 %v3510_v12, %v18894_v1 }
 0x2fd   :  { %v17080_v63 = vadd.f32 %v3358_v15, %v18891_v26  ;;  %v12987_v8 = vpop.f32.mrf.mxu1  ;;  %v18895_v62 = vld [vmem:[#allocation106_spill] sm:$0xff]  ;;  %v18896_v26 = vld [vmem:[#allocation61_spill] sm:$0xff] }
 0x2fe   :  { %v3362_v58 = vpop.f32.mrf.mxu0 }
 0x2ff   :  { %v3363_v51 = vadd.f32 %v3362_v58, %v18892_v24  ;;  %v3736_v16 = vpop.f32.mrf.mxu1  ;;  %v18897_v58 = vld [vmem:[#allocation134_spill] sm:$0xff] }
 0x300   :  { %v12941_v39 = vpop.f32.mrf.mxu0  ;;  %v17096_v24 = vadd.f32 %v3511_v19, %v18897_v58 }
 0x301   :  { %v17090_v61 = vadd.f32 %v3363_v51, %v18895_v62  ;;  %v13037_v42 = vpop.f32.mrf.mxu1  ;;  %v18899_v39 = vld [vmem:[#allocation107_spill] sm:$0xff]  ;;  %v18902_v51 = vld [vmem:[#allocation42_spill] sm:$0xff] }
 0x302   :  { %v3367_v15 = vpop.f32.mrf.mxu0  ;;  %18898 = vst [vmem:[#allocation21_spill] sm:$0xff] %v17096_v24  ;;  %v3737_v56 = vadd.f32 %v3736_v16, %v18899_v39  ;;  %v3313_v1 = vadd.f32 %v17021_v6, %v18902_v51  ;;  %v18906_v39 = vld [vmem:[#allocation109_spill] sm:$0xff]  ;;  %v18909_v51 = vld [vmem:[#allocation44_spill] sm:$0xff] }
 0x303   :  { %v3368_v8 = vadd.f32 %v3367_v15, %v18896_v26  ;;  %v3741_v22 = vpop.f32.mrf.mxu1  ;;  %v3318_v23 = vadd.f32 %v17027_v4, %v18909_v51  ;;  %v18916_v4 = vld [vmem:[#allocation138_spill] sm:$0xff] }
 0x304   :  { %v12944_v30 = vpop.f32.mrf.mxu0  ;;  %v3800_v16 = vadd.f32 %v3737_v56, %v18905_v36  ;;  %v3372_v6 = vadd.f32 %v3313_v1, %v18908_v25  ;;  %v18913_v56 = vld [vmem:[#allocation111_spill] sm:$0xff]  ;;  %v18915_v25 = vmax.f32 %v17019_v44, %v17011_v27  ;;  %v18919_v27 = vld [vmem:[#allocation85_spill] sm:$0xff] }
 0x305   :  { %v17100_v40 = vadd.f32 %v3368_v8, %v18900_v32  ;;  %v13040_v12 = vpop.f32.mrf.mxu1  ;;  %v18904_v30 = vld [vmem:[#allocation65_spill] sm:$0xff]  ;;  %v3742_v8 = vadd.f32 %v3741_v22, %v18906_v39  ;;  %v18907_v32 = vld [vmem:[#allocation136_spill] sm:$0xff] }
 0x306   :  { %v3593_v62 = vpop.f32.mrf.mxu0  ;;  %v3456_v19 = vadd.f32 %v16997_v20, %v18904_v30  ;;  %v18912_v30 = vld [vmem:[#allocation66_spill] sm:$0xff] }
 0x307   :  { %18901 = vst [vmem:[#allocation6_spill] sm:$0xff] %v17100_v40  ;;  %v3594_v15 = vadd.f32 %v3593_v62, %v18903_v53  ;;  %v3746_v26 = vpop.f32.mrf.mxu1  ;;  %v18910_v53 = vld [vmem:[#allocation83_spill] sm:$0xff]  ;;  %v3461_v36 = vadd.f32 %v17008_v17, %v18912_v30  ;;  %v18918_v17 = vld [vmem:[#allocation46_spill] sm:$0xff] }
 0x308   :  { %v12994_v58 = vpop.f32.mrf.mxu0  ;;  %v3515_v20 = vadd.f32 %v3456_v19, %v18911_v38  ;;  %v3747_v22 = vadd.f32 %v3746_v26, %v18913_v56  ;;  %v17129_v38 = vld [vmem:[%s18631_s3] ss:$0 sm:$0xff]  ;;  %v3323_v26 = vadd.f32 %v17031_v47, %v18918_v17  ;;  %v18927_v17 = vld [vmem:[#allocation87_spill] sm:$0xff] }
 0x309   :  { %v3657_v12 = vadd.f32 %v3594_v15, %v18907_v32  ;;  %v13043_v48 = vpop.f32.mrf.mxu1  ;;  %v18914_v15 = vld [vmem:[#allocation135_spill] sm:$0xff] }
 0x30a   :  { %v3598_v42 = vpop.f32.mrf.mxu0  ;;  %v3801_v48 = vadd.f32 %v3742_v8, %v18914_v15  ;;  %v3840_v32 = vmax.f32 %v3372_v6, %v3515_v20  ;;  %v18921_v6 = vld [vmem:[#allocation67_spill] sm:$0xff]  ;;  %v18922_v20 = vld [vmem:[#allocation137_spill] sm:$0xff] }
 0x30b   :  { %v3852_v24 = vmax.f32 %v3657_v12, %v3800_v16  ;;  %v3599_v62 = vadd.f32 %v3598_v42, %v18910_v53  ;;  %v3751_v40 = vpop.f32.mrf.mxu1  ;;  %v18917_v42 = vld [vmem:[#allocation88_spill] sm:$0xff]  ;;  %v18920_v53 = vld [vmem:[#allocation114_spill] sm:$0xff]  ;;  %v3802_v30 = vadd.f32 %v3747_v22, %v18922_v20  ;;  %v18923_v15 = vld [vmem:[#allocation113_spill] sm:$0xff] }
 0x30c   :  { %v12997_v58 = vpop.f32.mrf.mxu0  ;;  %v3373_v12 = vadd.f32 %v3318_v23, %v18917_v42  ;;  %v3466_v23 = vadd.f32 %v17025_v21, %v18921_v6  ;;  %v18926_v42 = vld [vmem:[#allocation90_spill] sm:$0xff]  ;;  %v18930_v6 = vld [vmem:[#allocation139_spill] sm:$0xff] }
 0x30d   :  { %v3878_v1 = vmax.f32 %v18915_v25, %v3852_v24  ;;  %v3658_v39 = vadd.f32 %v3599_v62, %v18916_v4  ;;  %v13046_v16 = vpop.f32.mrf.mxu1  ;;  %v3516_v62 = vadd.f32 %v3461_v36, %v18920_v53  ;;  %v3752_v25 = vadd.f32 %v3751_v40, %v18923_v15  ;;  %v18924_v4 = vld [vmem:[#allocation140_spill] sm:$0xff]  ;;  %v18931_v20 = vld [vmem:[#allocation115_spill] sm:$0xff] }
 0x30e   :  { %v3603_v51 = vpop.f32.mrf.mxu0  ;;  %v18928_v40 = vld [vmem:[#allocation116_spill] sm:$0xff] }
 0x30f   :  { %v3891_v19 = vmax.f32 %v16902_v31, %v3878_v1  ;;  %v3853_v8 = vmax.f32 %v3658_v39, %v3801_v48  ;;  %v3604_v44 = vadd.f32 %v3603_v51, %v18919_v27  ;;  %v3756_v24 = vpop.f32.mrf.mxu1  ;;  %v3841_v48 = vmax.f32 %v3373_v12, %v3516_v62  ;;  %v18925_v1 = vld [vmem:[#allocation48_spill] sm:$0xff] }
 0x310   :  { %v13000_v56 = vpop.f32.mrf.mxu0  ;;  %v3328_v39 = vadd.f32 %v17035_v52, %v18925_v1  ;;  %v3374_v51 = vadd.f32 %v3323_v26, %v18926_v42  ;;  %v3517_v27 = vadd.f32 %v3466_v23, %v18928_v40  ;;  %v3803_v12 = vadd.f32 %v3752_v25, %v18930_v6  ;;  %v18935_v25 = vld [vmem:[#allocation89_spill] sm:$0xff] }
 0x311   :  { %v3879_v58 = vmax.f32 %v3840_v32, %v3853_v8  ;;  %v3659_v16 = vadd.f32 %v3604_v44, %v18924_v4  ;;  %v13049_v47 = vpop.f32.mrf.mxu1  ;;  %v17142_v31 = vadd.f32 %v17129_v38, %v3891_v19  ;;  %v18929_v44 = vld [vmem:[#allocation68_spill] sm:$0xff]  ;;  %v3757_v52 = vadd.f32 %v3756_v24, %v18931_v20  ;;  %v18932_v56 = vld [vmem:[#allocation142_spill] sm:$0xff] }
 0x312   :  { %v3608_v36 = vpop.f32.mrf.mxu0  ;;  %v3471_v53 = vadd.f32 %v17029_v5, %v18929_v44  ;;  %v18933_v4 = vld [vmem:[#allocation92_spill] sm:$0xff]  ;;  %v3842_v47 = vmax.f32 %v3374_v51, %v3517_v27  ;;  %v18936_v24 = vld [vmem:[#allocation118_spill] sm:$0xff] }
 0x313   :  { %v3892_v21 = vmax.f32 %v16911_v28, %v3879_v58  ;;  %v3854_v22 = vmax.f32 %v3659_v16, %v3802_v30  ;;  %v3609_v32 = vadd.f32 %v3608_v36, %v18927_v17  ;;  %v3761_v8 = vpop.f32.mrf.mxu1  ;;  %v3375_v28 = vadd.f32 %v3328_v39, %v18933_v4  ;;  %v18934_v30 = vld [vmem:[#allocation50_spill] sm:$0xff]  ;;  %v18938_v39 = vld [vmem:[#allocation117_spill] sm:$0xff]  ;;  %v18943_v4 = vld [vmem:[#allocation120_spill] sm:$0xff] }
 0x314   :  { %v13003_v19 = vpop.f32.mrf.mxu0  ;;  %v3333_v58 = vadd.f32 %v17037_v0, %v18934_v30  ;;  %v3518_v42 = vadd.f32 %v3471_v53, %v18936_v24  ;;  %v18939_v0 = vld [vmem:[#allocation141_spill] sm:$0xff] }
 0x315   :  { %v3880_v62 = vmax.f32 %v3841_v48, %v3854_v22  ;;  %v3660_v15 = vadd.f32 %v3609_v32, %v18932_v56  ;;  %v13052_v26 = vpop.f32.mrf.mxu1  ;;  %v17159_v23 = vadd.f32 %v17129_v38, %v3892_v21  ;;  %v18937_v22 = vld [vmem:[#allocation69_spill] sm:$0xff]  ;;  %v3762_v32 = vadd.f32 %v3761_v8, %v18938_v39  ;;  %v18940_v21 = vld [vmem:[#allocation144_spill] sm:$0xff]  ;;  %v18942_v8 = vld [vmem:[#allocation91_spill] sm:$0xff] }
 0x316   :  { %v3613_v16 = vpop.f32.mrf.mxu0  ;;  %v3476_v17 = vadd.f32 %v17033_v60, %v18937_v22  ;;  %v3804_v44 = vadd.f32 %v3757_v52, %v18939_v0  ;;  %v3843_v27 = vmax.f32 %v3375_v28, %v3518_v42  ;;  %v18947_v39 = vld [vmem:[#allocation52_spill] sm:$0xff] }
 0x317   :  { %v3893_v5 = vmax.f32 %v16920_v46, %v3880_v62  ;;  %v3855_v1 = vmax.f32 %v3660_v15, %v3803_v12  ;;  %v3614_v48 = vadd.f32 %v3613_v16, %v18935_v25  ;;  %v3766_v36 = vpop.f32.mrf.mxu1  ;;  %v18941_v12 = vld [vmem:[#allocation94_spill] sm:$0xff]  ;;  %v3925_v53 = vmax.f32 %v17159_v23, 0.0  ;;  %v18944_v16 = vld [vmem:[#allocation143_spill] sm:$0xff] }
 0x318   :  { %v13006_v40 = vpop.f32.mrf.mxu0  ;;  %v3376_v62 = vadd.f32 %v3333_v58, %v18941_v12  ;;  %v3519_v30 = vadd.f32 %v3476_v17, %v18943_v4  ;;  %v18988_v23 = vmov 0.0  }
 0x319   :  { %v3881_v19 = vmax.f32 %v3842_v47, %v3855_v1  ;;  %v3661_v6 = vadd.f32 %v3614_v48, %v18940_v21  ;;  %v13055_v51 = vpop.f32.mrf.mxu1  ;;  %v3913_v46 = vadd.f32 %v17129_v38, %v3893_v5  ;;  %v3805_v47 = vadd.f32 %v3762_v32, %v18944_v16  ;;  %v18945_v1 = vld [vmem:[#allocation119_spill] sm:$0xff]  ;;  %v18946_v48 = vld [vmem:[#allocation146_spill] sm:$0xff] }
 0x31a   :  { %v3618_v20 = vpop.f32.mrf.mxu0  ;;  %v3767_v5 = vadd.f32 %v3766_v36, %v18945_v1  ;;  %v3844_v22 = vmax.f32 %v3376_v62, %v3519_v30  ;;  %v3343_v40 = vadd.f32 %v17049_v41, %v18947_v39  ;;  %v3949_v17 = vrot.slane %v3925_v53, 2  ;;  %v18949_v51 = vld [vmem:[#allocation71_spill] sm:$0xff]  ;;  %v18951_v62 = vld [vmem:[#allocation121_spill] sm:$0xff]  ;;  %v18953_v30 = vld [vmem:[#allocation98_spill] sm:$0xff] }
 0x31b   :  { %v3894_v60 = vmax.f32 %v16929_v10, %v3881_v19  ;;  %v3856_v56 = vmax.f32 %v3661_v6, %v3804_v44  ;;  %v3619_v15 = vadd.f32 %v3618_v20, %v18942_v8  ;;  %v3771_v26 = vpop.f32.mrf.mxu1  ;;  %v3926_v52 = vmax.f32 %v3913_v46, 0.0  ;;  %v18948_v19 = vld [vmem:[#allocation93_spill] sm:$0xff] }
 0x31c   :  { %v13009_v28 = vpop.f32.mrf.mxu0  ;;  %v3486_v46 = vadd.f32 %v17039_v9, %v18949_v51  ;;  %v3772_v20 = vadd.f32 %v3771_v26, %v18951_v62  ;;  %v17204_v9 = vld [vmem:[%s18632_s4 + $0x50] sm:$0xff]  ;;  %v3378_v16 = vadd.f32 %v3343_v40, %v18953_v30 }
 0x31d   :  { %v3914_v58 = vadd.f32 %v17129_v38, %v3894_v60  ;;  %v3882_v25 = vmax.f32 %v3843_v27, %v3856_v56  ;;  %v3662_v24 = vadd.f32 %v3619_v15, %v18946_v48  ;;  %v13058_v42 = vpop.f32.mrf.mxu1  ;;  %v17179_v10 = vrot.slane %v3926_v52, 2  ;;  %v18950_v27 = vld [vmem:[#allocation145_spill] sm:$0xff]  ;;  %v18956_v40 = vld [vmem:[#allocation147_spill] sm:$0xff] }
 0x31e   :  { %v3623_v0 = vpop.f32.mrf.mxu0  ;;  %v3806_v12 = vadd.f32 %v3767_v5, %v18950_v27  ;;  %v4034_v1 = vrot.slane %v3926_v52, 4  ;;  %v17218_v42 = vld [vmem:[%s18632_s4 + $0x48] sm:$0xff]  ;;  %v17238_v27 = vld [vmem:[%s18632_s4 + $0x40] sm:$0xff] }
 0x31f   :  { %v3927_v36 = vmax.f32 %v3914_v58, 0.0  ;;  %v3895_v32 = vmax.f32 %v16938_v59, %v3882_v25  ;;  %v3857_v44 = vmax.f32 %v3662_v24, %v3805_v47  ;;  %v3624_v21 = vadd.f32 %v3623_v0, %v18948_v19  ;;  %v3776_v6 = vpop.f32.mrf.mxu1  ;;  %v18952_v59 = vld [vmem:[#allocation148_spill] sm:$0xff]  ;;  %v18954_v25 = vld [vmem:[#allocation95_spill] sm:$0xff] }
 0x320   :  { %v13012_v41 = vpop.f32.mrf.mxu0  ;;  %v17193_v60 = vsel %vm3948_vm2, %v3949_v17, %v17179_v10  ;;  %v3807_v0 = vadd.f32 %v3772_v20, %v18956_v40  ;;  %v18957_v17 = vmax.f32 %v17047_v57, %v17044_v45 }
 0x321   :  { %v3915_v56 = vadd.f32 %v17129_v38, %v3895_v32  ;;  %v17196_v8 = vmax.f32 %v3844_v22, %v3857_v44  ;;  %v3663_v15 = vadd.f32 %v3624_v21, %v18952_v59  ;;  %v13061_v4 = vpop.f32.mrf.mxu1  ;;  %13082 = vmatprep.mubr.msk.f32.mxu0 %vm3952_vm3, %v17193_v60  ;;  %v17206_v26 = vrot.slane %v3927_v36, 4  ;;  %v18955_v22 = vld [vmem:[#allocation124_spill] sm:$0xff]  ;;  %v18958_v44 = vld [vmem:[#allocation123_spill] sm:$0xff]  ;;  %v18959_v21 = vld [vmem:[#allocation150_spill] sm:$0xff] }
 0x322   :  { %13083 = vmatmul.mubr.msk.f32.vlgmr.msra.gmra.mxu0 %vm3952_vm3, %v17179_v10  ;;  %v3628_v47 = vpop.f32.mrf.mxu0  ;;  %v3521_v39 = vadd.f32 %v3486_v46, %v18955_v22  ;;  %v3777_v19 = vadd.f32 %v3776_v6, %v18958_v44  ;;  %v4198_v57 = vrot.slane %v3927_v36, 6  ;;  %v18960_v41 = vld [vmem:[#allocation97_spill] sm:$0xff]  ;;  %v18967_v44 = vmax.f32 %v17060_v3, %v17056_v35 }
 0x323   :  { %v3928_v5 = vmax.f32 %v3915_v56, 0.0  ;;  %v3896_v28 = vmax.f32 %v16947_v33, %v17196_v8  ;;  %v3858_v58 = vmax.f32 %v3663_v15, %v3806_v12  ;;  %13097 = vmatpush3.msra.mxu0 %v16890_v50  ;;  %v3629_v48 = vadd.f32 %v3628_v47, %v18954_v25  ;;  %v3781_v24 = vpop.f32.mrf.mxu1  ;;  %v18961_v59 = vld [vmem:[#allocation125_spill] sm:$0xff]  ;;  %v18963_v47 = vld [vmem:[#allocation152_spill] sm:$0xff] }
 0x324   :  { %13098 = vmatprep.subr.mxu0 %v17204_v9  ;;  %v13015_v52 = vpop.f32.mrf.mxu0  ;;  %v17225_v33 = vsel %vm4033_vm4, %v4034_v1, %v17206_v26  ;;  %v3846_v62 = vmax.f32 %v3378_v16, %v3521_v39  ;;  %v3782_v15 = vadd.f32 %v3781_v24, %v18961_v59  ;;  %v18965_v39 = vld [vmem:[#allocation151_spill] sm:$0xff]  ;;  %v18969_v35 = vld [vmem:[#allocation101_spill] sm:$0xff]  ;;  %v18971_v59 = vmax.f32 %v17070_v43, %v17066_v2 }
 0x325   :  { %v3884_v32 = vmax.f32 %v18957_v17, %v3858_v58  ;;  %v3664_v51 = vadd.f32 %v3629_v48, %v18959_v21  ;;  %13099 = vmatpush3.msra.mxu0 %v17204_v9  ;;  %v13064_v46 = vpop.f32.mrf.mxu1  ;;  %13093 = vmatprep.mubr.msk.f32.mxu1 %vm3952_vm3, %v17225_v33  ;;  %v17240_v12 = vrot.slane %v3928_v5, 6  ;;  %v18964_v48 = vld [vmem:[#allocation99_spill] sm:$0xff]  ;;  %v18968_v21 = vld [vmem:[#allocation154_spill] sm:$0xff] }
 0x326   :  { %13100 = vmatprep.subr.mxu0 %v17218_v42  ;;  %13104 = vmatprep.mubr.msk.f32.mxu0 %vm3952_vm3, %v17225_v33  ;;  %v3633_v45 = vpop.f32.mrf.mxu0  ;;  %v3809_v40 = vadd.f32 %v3782_v15, %v18965_v39 }
 0x327   :  { %v3897_v6 = vmax.f32 %v16956_v7, %v3884_v32  ;;  %v3859_v20 = vmax.f32 %v3664_v51, %v3807_v0  ;;  %13094 = vmatmul.mubr.msk.f32.vlgmr.msra.gmra.mxu1 %vm3952_vm3, %v17206_v26  ;;  %13101 = vmatpush3.msra.mxu0 %v17218_v42  ;;  %v3634_v56 = vadd.f32 %v3633_v45, %v18960_v41  ;;  %v3786_v8 = vpop.f32.mrf.mxu1  ;;  %v18962_v7 = vld [vmem:[#allocation149_spill] sm:$0xff]  ;;  %v18966_v0 = vld [vmem:[#allocation127_spill] sm:$0xff] }
 0x328   :  { %13108 = vmatpush3.msra.mxu1 %v16740_v13  ;;  %13102 = vmatprep.subr.mxu0 %v17238_v27  ;;  %v13018_v4 = vpop.f32.mrf.mxu0  ;;  %v17255_v36 = vsel %vm4197_vm5, %v4198_v57, %v17240_v12  ;;  %v3808_v30 = vadd.f32 %v3777_v19, %v18962_v7  ;;  %v3787_v52 = vadd.f32 %v3786_v8, %v18966_v0  ;;  %v18970_v41 = vld [vmem:[#allocation153_spill] sm:$0xff] }
 0x329   :  { %v3885_v16 = vmax.f32 %v3846_v62, %v3859_v20  ;;  %v3665_v1 = vadd.f32 %v3634_v56, %v18963_v47  ;;  %13109 = vmatprep.subr.mxu1 %v16793_v34  ;;  %13103 = vmatpush3.msra.mxu0 %v17238_v27  ;;  %v13067_v5 = vpop.f32.mrf.mxu1  ;;  %v3917_v62 = vadd.f32 %v17129_v38, %v3897_v6  ;;  %v18972_v4 = vld [vmem:[#allocation129_spill] sm:$0xff] }
 0x32a   :  { %13110 = vmatpush3.msra.mxu1 %v16793_v34  ;;  %13105 = vmatmul.mubr.msk.f32.vlgmr.msra.gmra.mxu0 %vm3952_vm3, %v17206_v26  ;;  %v3638_v13 = vpop.f32.mrf.mxu0  ;;  %v3810_v56 = vadd.f32 %v3787_v52, %v18970_v41  ;;  %v18977_v52 = vmax.f32 %v17080_v63, %v17076_v49 }
 0x32b   :  { %v3898_v58 = vmax.f32 %v16965_v37, %v3885_v16  ;;  %v3860_v25 = vmax.f32 %v3665_v1, %v3808_v30  ;;  %13111 = vmatprep.subr.mxu1 %v16842_v54  ;;  %13115 = vmatprep.mubr.msk.f32.mxu1 %vm3952_vm3, %v17255_v36  ;;  %v3639_v24 = vadd.f32 %v3638_v13, %v18964_v48  ;;  %v3791_v22 = vpop.f32.mrf.mxu1  ;;  %v17307_v30 = vld [vmem:[%s18632_s4 + $0x38] sm:$0xff]  ;;  %v17315_v43 = vmax.f32 %v3917_v62, 0.0 }
 0x32c   :  { %13118 = vmatprep.subr.mxu0 %v16890_v50  ;;  %13112 = vmatpush3.msra.mxu1 %v16842_v54  ;;  %v13021_v17 = vpop.f32.mrf.mxu0  ;;  %v3916_v37 = vadd.f32 %v17129_v38, %v3896_v28  ;;  %v3792_v7 = vadd.f32 %v3791_v22, %v18972_v4  ;;  %v18973_v16 = vld [vmem:[#allocation156_spill] sm:$0xff]  ;;  %v18975_v48 = vld [vmem:[#allocation131_spill] sm:$0xff]  ;;  %v18984_v4 = vld [vmem:[#allocation6_spill] sm:$0xff] }
 0x32d   :  { %v17275_v32 = vadd.f32 %v17129_v38, %v3898_v58  ;;  %v3886_v19 = vmax.f32 %v18967_v44, %v3860_v25  ;;  %13119 = vmatpush3.msra.mxu0 %v16890_v50  ;;  %13126 = vmatprep.mubr.msk.f32.mxu0 %vm3952_vm3, %v17255_v36  ;;  %v3666_v51 = vadd.f32 %v3639_v24, %v18968_v21  ;;  %v13070_v46 = vpop.f32.mrf.mxu1  ;;  %v18974_v58 = vld [vmem:[#allocation103_spill] sm:$0xff]  ;;  %v18978_v17 = vld [vmem:[#allocation158_spill] sm:$0xff]  ;;  %v4512_v21 = vrot.slane %v17315_v43, 2 }
 0x32e   :  { %13113 = vmatprep.subr.mxu1 %v16878_v11  ;;  %13120 = vmatprep.subr.mxu0 %v17204_v9  ;;  %v3643_v28 = vpop.f32.mrf.mxu0  ;;  %v17295_v6 = vmax.f32 %v3916_v37, 0.0  ;;  %v17327_v22 = vld [vmem:[%s18632_s4 + $0x30] sm:$0xff] }
 0x32f   :  { %v3899_v45 = vmax.f32 %v16974_v18, %v3886_v19  ;;  %v3861_v57 = vmax.f32 %v3666_v51, %v3809_v40  ;;  %13114 = vmatpush3.msra.mxu1 %v16878_v11  ;;  %13121 = vmatpush3.msra.mxu0 %v17204_v9  ;;  %v3644_v3 = vadd.f32 %v3643_v28, %v18969_v35  ;;  %v3796_v20 = vpop.f32.mrf.mxu1  ;;  %v3931_v18 = vmax.f32 %v17275_v32, 0.0  ;;  %v18976_v40 = vld [vmem:[#allocation155_spill] sm:$0xff]  ;;  %v18979_v51 = vld [vmem:[#allocation105_spill] sm:$0xff] }
 0x330   :  { %13116 = vmatmul.mubr.msk.f32.vlgmr.msra.gmra.mxu1 %vm3952_vm3, %v17240_v12  ;;  %13122 = vmatprep.subr.mxu0 %v17218_v42  ;;  %v13024_v8 = vpop.f32.mrf.mxu0  ;;  %v3797_v24 = vadd.f32 %v3796_v20, %v18975_v48  ;;  %v3811_v0 = vadd.f32 %v3792_v7, %v18976_v40  ;;  %v18980_v28 = vld [vmem:[#allocation157_spill] sm:$0xff]  ;;  %v18981_v35 = vmax.f32 %v17090_v61, %v17086_v14 }
 0x331   :  { %v17301_v15 = vmax.f32 %v18971_v59, %v3861_v57  ;;  %13129 = vmatprep.subr.mxu1 %v17307_v30  ;;  %13123 = vmatpush3.msra.mxu0 %v17218_v42  ;;  %v3667_v47 = vadd.f32 %v3644_v3, %v18973_v16  ;;  %v13073_v1 = vpop.f32.mrf.mxu1  ;;  %v17342_v44 = vrot.slane %v3931_v18, 2  ;;  %v17354_v62 = vadd.f32 %v17129_v38, %v3899_v45  ;;  %v18982_v45 = vld [vmem:[#allocation159_spill] sm:$0xff]  ;;  %v18985_v7 = vld [vmem:[#allocation21_spill] sm:$0xff] }
 0x332   :  { %13130 = vmatpush3.msra.mxu1 %v17307_v30  ;;  %13137 = vmatprep.mubr.msk.f32.mxu1 %vm3952_vm3, %v17295_v6  ;;  %v3648_v2 = vpop.f32.mrf.mxu0  ;;  %v3812_v57 = vadd.f32 %v3797_v24, %v18980_v28  ;;  %v18986_v16 = vmax.f32 %v18984_v4, %v18985_v7  ;;  %v18987_v1 = vld [vmem:[#allocation5_spill] sm:$0xff] }
 0x333   :  { %v3900_v5 = vmax.f32 %v16983_v55, %v17301_v15  ;;  %v3862_v13 = vmax.f32 %v3667_v47, %v3810_v56  ;;  %13124 = vmatprep.subr.mxu0 %v17238_v27  ;;  %13131 = vmatprep.subr.mxu1 %v16793_v34  ;;  %v3649_v25 = vadd.f32 %v3648_v2, %v18974_v58  ;;  %v18983_v56 = vld [vmem:[#allocation37_spill] sm:$0xff]  ;;  %v3932_v61 = vmax.f32 %v17354_v62, 0.0 }
 0x334   :  { %13125 = vmatpush3.msra.mxu0 %v17238_v27  ;;  %13132 = vmatpush3.msra.mxu1 %v17327_v22  ;;  %v13027_v39 = vpop.f32.mrf.mxu0  ;;  %v17366_v20 = vsel %vm3948_vm2, %v4512_v21, %v17342_v44 }
 0x335   :  { %v17334_v34 = vmax.f32 %v18977_v52, %v3862_v13  ;;  %13127 = vmatmul.mubr.msk.f32.vlgmr.msra.gmra.mxu0 %vm3952_vm3, %v17240_v12  ;;  %13133 = vmatprep.subr.mxu1 %v16842_v54  ;;  %v3668_v37 = vadd.f32 %v3649_v25, %v18978_v17  ;;  %v17393_v13 = vld [vmem:[%s18632_s4 + $0x28] sm:$0xff]  ;;  %v17403_v25 = vrot.slane %v3932_v61, 4  ;;  %v3920_v24 = vadd.f32 %v17129_v38, %v3900_v5  ;;  %v14105_v5 = vld [vmem:[%s18632_s4 + $0x58] sm:$0xff]  ;;  %v14106_v52 = vld [vmem:[%s18632_s4 + $0x20] sm:$0xff] }
 0x336   :  { %13140 = vmatprep.subr.mxu0 %v16890_v50  ;;  %13134 = vmatpush3.msra.mxu1 %v16842_v54  ;;  %v3653_v19 = vpop.f32.mrf.mxu0  ;;  %v4670_v39 = vrot.slane %v3931_v18, 4 }
 0x337   :  { %v3901_v49 = vmax.f32 %v16992_v29, %v17334_v34  ;;  %13141 = vmatpush3.msra.mxu0 %v16890_v50  ;;  %13148 = vmatprep.mubr.msk.f32.mxu0 %vm3952_vm3, %v17295_v6  ;;  %v3863_v63 = vmax.f32 %v3668_v37, %v3811_v0  ;;  %v3654_v46 = vadd.f32 %v3653_v19, %v18979_v51  ;;  %v3933_v32 = vmax.f32 %v3920_v24, 0.0  ;;  %v17513_v29 = vld [vmem:[%s18632_s4 + $0x18] sm:$0xff] }
 0x338   :  { %13135 = vmatprep.subr.mxu1 %v16878_v11  ;;  %13142 = vmatprep.subr.mxu0 %v17204_v9  ;;  %v13030_v54 = vpop.f32.mrf.mxu0  ;;  %v17423_v55 = vsel %vm4033_vm4, %v4670_v39, %v17403_v25 }
 0x339   :  { %v3889_v3 = vmax.f32 %v18981_v35, %v3863_v63  ;;  %13136 = vmatpush3.msra.mxu1 %v16878_v11  ;;  %13143 = vmatpush3.msra.mxu0 %v17204_v9  ;;  %v3669_v41 = vadd.f32 %v3654_v46, %v18982_v45  ;;  %v17449_v0 = vrot.slane %v3933_v32, 6  ;;  %v3921_v37 = vadd.f32 %v17129_v38, %v3901_v49 }
 0x33a   :  { %13138 = vmatmul.mubr.msk.f32.vlgmr.msra.gmra.mxu1 %vm3952_vm3, %v17315_v43  ;;  %13144 = vmatprep.subr.mxu0 %v17218_v42 }
 0x33b   :  { %v3902_v8 = vmax.f32 %v18983_v56, %v3889_v3  ;;  %13151 = vmatprep.subr.mxu1 %v17307_v30  ;;  %13145 = vmatpush3.msra.mxu0 %v17218_v42  ;;  %v3864_v14 = vmax.f32 %v3669_v41, %v3812_v57  ;;  %v3934_v19 = vmax.f32 %v3921_v37, 0.0 }
 0x33c   :  { %13152 = vmatpush3.msra.mxu1 %v17307_v30  ;;  %13159 = vmatprep.mubr.msk.f32.mxu1 %vm3952_vm3, %v17366_v20 }
 0x33d   :  { %v3922_v59 = vadd.f32 %v17129_v38, %v3902_v8  ;;  %v3890_v47 = vmax.f32 %v18986_v16, %v3864_v14  ;;  %13146 = vmatprep.subr.mxu0 %v17238_v27  ;;  %13153 = vmatprep.subr.mxu1 %v17327_v22 }
 0x33e   :  { %13147 = vmatpush3.msra.mxu0 %v17238_v27  ;;  %13154 = vmatpush3.msra.mxu1 %v17327_v22 }
 0x33f   :  { %v3903_v2 = vmax.f32 %v18987_v1, %v3890_v47  ;;  %13149 = vmatmul.mubr.msk.f32.vlgmr.msra.gmra.mxu0 %vm3952_vm3, %v17315_v43  ;;  %13155 = vmatprep.subr.mxu1 %v17393_v13  ;;  %v17398_v58 = vmax.f32 %v3922_v59, 0.0 }
 0x340   :  { %13162 = vmatprep.subr.mxu0 %v16890_v50  ;;  %13156 = vmatpush3.msra.mxu1 %v17393_v13 }
 0x341   :  { %13163 = vmatpush3.msra.mxu0 %v16890_v50  ;;  %13170 = vmatprep.mubr.msk.f32.mxu0 %vm3952_vm3, %v17366_v20  ;;  %v3923_v48 = vadd.f32 %v17129_v38, %v3903_v2  ;;  %v3924_v38 = vmax.f32 %v17142_v31, 0.0  ;;  %v17545_v31 = vld [vmem:[%s18632_s4] sm:$0xff] }
 0x342   :  { %13157 = vmatprep.subr.mxu1 %v16878_v11  ;;  %13164 = vmatprep.subr.mxu0 %v17204_v9 }
 0x343   :  { %13158 = vmatpush3.msra.mxu1 %v16878_v11  ;;  %13165 = vmatpush3.msra.mxu0 %v17204_v9  ;;  %v3936_v40 = vmax.f32 %v3923_v48, 0.0  ;;  %v5142_v11 = vrot.slane %v17398_v58, 2 }
 0x344   :  { %13160 = vmatmul.mubr.msk.f32.vlgmr.msra.gmra.mxu1 %vm3952_vm3, %v17342_v44  ;;  %13166 = vmatprep.subr.mxu0 %v17218_v42 }
 0x345   :  { %13173 = vmatprep.subr.mxu1 %v17307_v30  ;;  %13167 = vmatpush3.msra.mxu0 %v17218_v42  ;;  %v17426_v15 = vrot.slane %v3936_v40, 2 }
 0x346   :  { %13174 = vmatpush3.msra.mxu1 %v17307_v30  ;;  %13181 = vmatprep.mubr.msk.f32.mxu1 %vm3952_vm3, %v17423_v55 }
 0x347   :  { %13168 = vmatprep.subr.mxu0 %v17238_v27  ;;  %13175 = vmatprep.subr.mxu1 %v17327_v22  ;;  %v17435_v18 = vsel %vm3948_vm2, %v5142_v11, %v17426_v15 }
 0x348   :  { %13169 = vmatpush3.msra.mxu0 %v17238_v27  ;;  %13176 = vmatpush3.msra.mxu1 %v17327_v22 }
 0x349   :  { %13171 = vmatmul.mubr.msk.f32.vlgmr.msra.gmra.mxu0 %vm3952_vm3, %v17342_v44  ;;  %13177 = vmatprep.subr.mxu1 %v17393_v13 }
 0x34a   :  { %13184 = vmatprep.subr.mxu0 %v16890_v50  ;;  %13178 = vmatpush3.msra.mxu1 %v17393_v13  ;;  %v4828_v50 = vrot.slane %v3932_v61, 6 }
 0x34b   :  { %13185 = vmatpush3.msra.mxu0 %v14105_v5  ;;  %13192 = vmatprep.mubr.msk.f32.mxu0 %vm3952_vm3, %v17423_v55 }
 0x34c   :  { %13179 = vmatprep.subr.mxu1 %v14106_v52  ;;  %13186 = vmatprep.subr.mxu0 %v17204_v9  ;;  %v17463_v17 = vsel %vm4197_vm5, %v4828_v50, %v17449_v0 }
 0x34d   :  { %13180 = vmatpush3.msra.mxu1 %v14106_v52  ;;  %13187 = vmatpush3.msra.mxu0 %v17204_v9 }
 0x34e   :  { %13182 = vmatmul.mubr.msk.f32.vlgmr.msra.gmra.mxu1 %vm3952_vm3, %v17403_v25  ;;  %13188 = vmatprep.subr.mxu0 %v17218_v42 }
 0x34f   :  { %13195 = vmatprep.subr.mxu1 %v17307_v30  ;;  %13189 = vmatpush3.msra.mxu0 %v17218_v42 }
 0x350   :  { %13196 = vmatpush3.msra.mxu1 %v17307_v30  ;;  %13203 = vmatprep.mubr.msk.f32.mxu1 %vm3952_vm3, %v17463_v17 }
 0x351   :  { %13190 = vmatprep.subr.mxu0 %v17238_v27  ;;  %13197 = vmatprep.subr.mxu1 %v17327_v22 }
 0x352   :  { %13191 = vmatpush3.msra.mxu0 %v17238_v27  ;;  %13198 = vmatpush3.msra.mxu1 %v17327_v22 }
 0x353   :  { %13193 = vmatmul.mubr.msk.f32.vlgmr.msra.gmra.mxu0 %vm3952_vm3, %v17403_v25  ;;  %13199 = vmatprep.subr.mxu1 %v17393_v13 }
 0x354   :  { %13206 = vmatprep.subr.mxu0 %v14105_v5  ;;  %13200 = vmatpush3.msra.mxu1 %v17393_v13 }
 0x355   :  { %13207 = vmatpush3.msra.mxu0 %v14105_v5  ;;  %13214 = vmatprep.mubr.msk.f32.mxu0 %vm3952_vm3, %v17463_v17 }
 0x356   :  { %13201 = vmatprep.subr.mxu1 %v14106_v52  ;;  %13208 = vmatprep.subr.mxu0 %v17204_v9 }
 0x357   :  { %13202 = vmatpush3.msra.mxu1 %v14106_v52  ;;  %13209 = vmatpush3.msra.mxu0 %v17204_v9 }
 0x358   :  { %13204 = vmatmul.mubr.msk.f32.vlgmr.msra.gmra.mxu1 %vm3952_vm3, %v17449_v0  ;;  %13210 = vmatprep.subr.mxu0 %v17218_v42 }
 0x359   :  { %13217 = vmatprep.subr.mxu1 %v17307_v30  ;;  %13211 = vmatpush3.msra.mxu0 %v17218_v42 }
 0x35a   :  { %13218 = vmatpush3.msra.mxu1 %v17307_v30  ;;  %13225 = vmatprep.mubr.msk.f32.mxu1 %vm3952_vm3, %v3934_v19  ;;  %v17524_v30 = vld [vmem:[%s18632_s4 + $0x10] sm:$0xff] }
 0x35b   :  { %13212 = vmatprep.subr.mxu0 %v17238_v27  ;;  %13219 = vmatprep.subr.mxu1 %v17327_v22 }
 0x35c   :  { %13213 = vmatpush3.msra.mxu0 %v17238_v27  ;;  %13220 = vmatpush3.msra.mxu1 %v17327_v22 }
 0x35d   :  { %13215 = vmatmul.mubr.msk.f32.vlgmr.msra.gmra.mxu0 %vm3952_vm3, %v17449_v0  ;;  %13221 = vmatprep.subr.mxu1 %v17393_v13 }
 0x35e   :  { %13228 = vmatprep.subr.mxu0 %v14105_v5  ;;  %13222 = vmatpush3.msra.mxu1 %v17393_v13 }
 0x35f   :  { %13229 = vmatpush3.msra.mxu0 %v14105_v5  ;;  %13236 = vmatprep.mubr.msk.f32.mxu0 %vm3952_vm3, %v3934_v19 }
 0x360   :  { %13223 = vmatprep.subr.mxu1 %v14106_v52  ;;  %13230 = vmatprep.subr.mxu0 %v17204_v9 }
 0x361   :  { %13224 = vmatpush3.msra.mxu1 %v14106_v52  ;;  %13231 = vmatpush3.msra.mxu0 %v17204_v9 }
 0x362   :  { %13226 = vmatmul.mubr.msk.f32.vlgmr.msra.gmra.mxu1 %vm3952_vm3, %v17398_v58  ;;  %13232 = vmatprep.subr.mxu0 %v17218_v42 }
 0x363   :  { %13239 = vmatprep.subr.mxu1 %v14105_v5  ;;  %13233 = vmatpush3.msra.mxu0 %v17218_v42 }
 0x364   :  { %13240 = vmatpush3.msra.mxu1 %v14105_v5  ;;  %13247 = vmatprep.mubr.msk.f32.mxu1 %vm3952_vm3, %v17435_v18 }
 0x365   :  { %13234 = vmatprep.subr.mxu0 %v17238_v27  ;;  %13241 = vmatprep.subr.mxu1 %v17204_v9 }
 0x366   :  { %13235 = vmatpush3.msra.mxu0 %v17238_v27  ;;  %13242 = vmatpush3.msra.mxu1 %v17204_v9  ;;  %v17533_v9 = vld [vmem:[%s18632_s4 + $0x8] sm:$0xff] }
 0x367   :  { %13237 = vmatmul.mubr.msk.f32.vlgmr.msra.gmra.mxu0 %vm3952_vm3, %v17398_v58  ;;  %13243 = vmatprep.subr.mxu1 %v17218_v42 }
 0x368   :  { %13250 = vmatprep.subr.mxu0 %v17513_v29  ;;  %13244 = vmatpush3.msra.mxu1 %v17218_v42  ;;  %v17678_v42 = vld [vmem:[%s18634_s6 + $0x38] sm:$0xff] }
 0x369   :  { %13251 = vmatpush3.msra.mxu0 %v17513_v29  ;;  %13258 = vmatprep.mubr.msk.f32.mxu0 %vm3952_vm3, %v3924_v38 }
 0x36a   :  { %13245 = vmatprep.subr.mxu1 %v17238_v27  ;;  %13252 = vmatprep.subr.mxu0 %v17524_v30 }
 0x36b   :  { %13246 = vmatpush3.msra.mxu1 %v17238_v27  ;;  %13253 = vmatpush3.msra.mxu0 %v17524_v30  ;;  %v17694_v27 = vld [vmem:[%s18634_s6 + $0x30] sm:$0xff] }
 0x36c   :  { %13248 = vmatmul.mubr.msk.f32.vlgmr.msra.gmra.mxu1 %vm3952_vm3, %v17426_v15  ;;  %13254 = vmatprep.subr.mxu0 %v17533_v9 }
 0x36d   :  { %13261 = vmatprep.subr.mxu1 %v17513_v29  ;;  %13255 = vmatpush3.msra.mxu0 %v17533_v9 }
 0x36e   :  { %13262 = vmatpush3.msra.mxu1 %v17513_v29  ;;  %13269 = vmatprep.mubr.msk.f32.mxu1 %vm3952_vm3, %v17193_v60  ;;  %v17663_v60 = vld [vmem:[%s18635_s7 + $0x8] sm:$0x7f] }
 0x36f   :  { %13256 = vmatprep.subr.mxu0 %v17545_v31  ;;  %13263 = vmatprep.subr.mxu1 %v17524_v30 }
 0x370   :  { %13257 = vmatpush3.msra.mxu0 %v17545_v31  ;;  %13264 = vmatpush3.msra.mxu1 %v17524_v30 }
 0x371   :  { %13259 = vmatmul.mubr.msk.f32.vlgmr.msra.gmra.mxu0 %vm3952_vm3, %v3925_v53  ;;  %13265 = vmatprep.subr.mxu1 %v17533_v9  ;;  %v17646_v53 = vld [vmem:[%s18635_s7] sm:$0x7f] }
 0x372   :  { %13272 = vmatprep.subr.mxu0 %v17513_v29  ;;  %13266 = vmatpush3.msra.mxu1 %v17533_v9 }
 0x373   :  { %13273 = vmatpush3.msra.mxu0 %v17513_v29  ;;  %13280 = vmatprep.mubr.msk.f32.mxu0 %vm3952_vm3, %v17225_v33  ;;  %v17689_v33 = vld [vmem:[%s18634_s6 + $0x10] sm:$0xff] }
 0x374   :  { %13267 = vmatprep.subr.mxu1 %v17545_v31  ;;  %13274 = vmatprep.subr.mxu0 %v17524_v30 }
 0x375   :  { %13268 = vmatpush3.msra.mxu1 %v17545_v31  ;;  %13275 = vmatpush3.msra.mxu0 %v17524_v30 }
 0x376   :  { %13270 = vmatmul.mubr.msk.f32.vlgmr.msra.gmra.mxu1 %vm3952_vm3, %v17179_v10  ;;  %13276 = vmatprep.subr.mxu0 %v17533_v9  ;;  %v17653_v10 = vld [vmem:[%s18629_s1] sm:$0x3] }
 0x377   :  { %13283 = vmatprep.subr.mxu1 %v17513_v29  ;;  %13277 = vmatpush3.msra.mxu0 %v17533_v9 }
 0x378   :  { %13284 = vmatpush3.msra.mxu1 %v17513_v29  ;;  %13291 = vmatprep.mubr.msk.f32.mxu1 %vm3952_vm3, %v17255_v36  ;;  %v17708_v36 = vld [vmem:[%s18634_s6 + $0x28] sm:$0xff] }
 0x379   :  { %13278 = vmatprep.subr.mxu0 %v17545_v31  ;;  %13285 = vmatprep.subr.mxu1 %v17524_v30 }
 0x37a   :  { %13279 = vmatpush3.msra.mxu0 %v17545_v31  ;;  %13286 = vmatpush3.msra.mxu1 %v17524_v30 }
 0x37b   :  { %13281 = vmatmul.mubr.msk.f32.vlgmr.msra.gmra.mxu0 %vm3952_vm3, %v17206_v26  ;;  %13287 = vmatprep.subr.mxu1 %v17533_v9  ;;  %v17673_v26 = vld [vmem:[%s18634_s6 + $0x18] sm:$0xff] }
 0x37c   :  { %13294 = vmatprep.subr.mxu0 %v17513_v29  ;;  %13288 = vmatpush3.msra.mxu1 %v17533_v9 }
 0x37d   :  { %13295 = vmatpush3.msra.mxu0 %v17513_v29  ;;  %13302 = vmatprep.mubr.msk.f32.mxu0 %vm3952_vm3, %v17295_v6  ;;  %v17717_v6 = vld [vmem:[%s18634_s6] sm:$0xff] }
 0x37e   :  { %13289 = vmatprep.subr.mxu1 %v17545_v31  ;;  %13296 = vmatprep.subr.mxu0 %v17524_v30 }
 0x37f   :  { %13290 = vmatpush3.msra.mxu1 %v17545_v31  ;;  %13297 = vmatpush3.msra.mxu0 %v17524_v30 }
 0x380   :  { %13292 = vmatmul.mubr.msk.f32.vlgmr.msra.gmra.mxu1 %vm3952_vm3, %v17240_v12  ;;  %13298 = vmatprep.subr.mxu0 %v17533_v9  ;;  %v17703_v12 = vld [vmem:[%s18634_s6 + $0x8] sm:$0xff] }
 0x381   :  { %13305 = vmatprep.subr.mxu1 %v17513_v29  ;;  %13299 = vmatpush3.msra.mxu0 %v17533_v9 }
 0x382   :  { %13306 = vmatpush3.msra.mxu1 %v17513_v29  ;;  %13313 = vmatprep.mubr.msk.f32.mxu1 %vm3952_vm3, %v17366_v20 }
 0x383   :  { %13300 = vmatprep.subr.mxu0 %v17545_v31  ;;  %13307 = vmatprep.subr.mxu1 %v17524_v30 }
 0x384   :  { %13301 = vmatpush3.msra.mxu0 %v17545_v31  ;;  %13308 = vmatpush3.msra.mxu1 %v17524_v30 }
 0x385   :  { %13303 = vmatmul.mubr.msk.f32.vlgmr.msra.gmra.mxu0 %vm3952_vm3, %v17315_v43  ;;  %13309 = vmatprep.subr.mxu1 %v17533_v9  ;;  %v17722_v43 = vld [vmem:[%s18634_s6 + $0x20] sm:$0xff] }
 0x386   :  { %13316 = vmatprep.subr.mxu0 %v17513_v29  ;;  %13310 = vmatpush3.msra.mxu1 %v17533_v9  ;;  %18989 = vst [vmem:[#allocation39_spill] sm:$0xff] %v17722_v43 }
 0x387   :  { %13317 = vmatpush3.msra.mxu0 %v17513_v29  ;;  %13324 = vmatprep.mubr.msk.f32.mxu0 %vm3952_vm3, %v17423_v55 }
 0x388   :  { %13311 = vmatprep.subr.mxu1 %v17545_v31  ;;  %13318 = vmatprep.subr.mxu0 %v17524_v30 }
 0x389   :  { %13312 = vmatpush3.msra.mxu1 %v17545_v31  ;;  %13319 = vmatpush3.msra.mxu0 %v17524_v30 }
 0x38a   :  { %13314 = vmatmul.mubr.msk.f32.vlgmr.msra.gmra.mxu1 %vm3952_vm3, %v17342_v44  ;;  %13320 = vmatprep.subr.mxu0 %v17533_v9 }
 0x38b   :  { %13327 = vmatprep.subr.mxu1 %v17513_v29  ;;  %13321 = vmatpush3.msra.mxu0 %v17533_v9 }
 0x38c   :  { %13328 = vmatpush3.msra.mxu1 %v17513_v29  ;;  %13335 = vmatprep.mubr.msk.f32.mxu1 %vm3952_vm3, %v17463_v17 }
 0x38d   :  { %13322 = vmatprep.subr.mxu0 %v17545_v31  ;;  %13329 = vmatprep.subr.mxu1 %v17524_v30 }
 0x38e   :  { %13323 = vmatpush3.msra.mxu0 %v17545_v31  ;;  %13330 = vmatpush3.msra.mxu1 %v17524_v30 }
 0x38f   :  { %13325 = vmatmul.mubr.msk.f32.vlgmr.msra.gmra.mxu0 %vm3952_vm3, %v17403_v25  ;;  %13331 = vmatprep.subr.mxu1 %v17533_v9 }
 0x390   :  { %13332 = vmatpush3.msra.mxu1 %v17533_v9  ;;  %13338 = vmatprep.subr.mxu0 %v18988_v23 }
 0x391   :  { %13333 = vmatprep.subr.mxu1 %v17545_v31  ;;  %13340 = vmatprep.mubr.msk.f32.mxu0 %vm14130_vm1, %v18988_v23 }
 0x392   :  { %13334 = vmatpush3.msra.mxu1 %v17545_v31  ;;  %13339 = vmatpush3.msk.msra.mxu0 %vm5880_vm6, %v17646_v53 }
 0x393   :  { %13336 = vmatmul.mubr.msk.f32.vlgmr.msra.gmra.mxu1 %vm3952_vm3, %v17449_v0  ;;  %13343 = vmatprep.subr.mxu1 %v18988_v23 }
 0x394   :  { %13351 = vmatprep.mubr.msk.f32.mxu1 %vm14130_vm1, %v18988_v23  ;;  %13341 = vmatmul.mubr.msk.f32.vlgmr.msra.gmra.mxu0 %vm5876_vm7, %v17653_v10 }
 0x395   :  { %13354 = vmatprep.subr.mxu0 %v18988_v23  ;;  %13356 = vmatprep.mubr.msk.f32.mxu0 %vm14130_vm1, %v18988_v23 }
 0x396   :  { %13355 = vmatpush3.msk.msra.mxu0 %vm5880_vm6, %v17663_v60  ;;  %13344 = vmatpush3.msra.mxu1 %v17673_v26 }
 0x397   :  { %13359 = vmatprep.subr.mxu0 %v18988_v23  ;;  %13345 = vmatprep.subr.mxu1 %v18988_v23 }
 0x398   :  { %13357 = vmatmul.mubr.msk.f32.vlgmr.msra.gmra.mxu0 %vm5876_vm7, %v17653_v10  ;;  %13346 = vmatpush3.msra.mxu1 %v17689_v33 }
 0x399   :  { %13367 = vmatprep.mubr.msk.f32.mxu0 %vm14130_vm1, %v18988_v23  ;;  %13360 = vmatpush3.msra.mxu0 %v17678_v42 }
 0x39a   :  { %13361 = vmatprep.subr.mxu0 %v18988_v23  ;;  %13347 = vmatprep.subr.mxu1 %v18988_v23 }
 0x39b   :  { %13362 = vmatpush3.msra.mxu0 %v17694_v27  ;;  %13348 = vmatpush3.msra.mxu1 %v17703_v12 }
 0x39c   :  { %13363 = vmatprep.subr.mxu0 %v18988_v23  ;;  %13349 = vmatprep.subr.mxu1 %v18988_v23 }
 0x39d   :  { %13364 = vmatpush3.msra.mxu0 %v17708_v36  ;;  %13350 = vmatpush3.msra.mxu1 %v17717_v6 }
 0x39e   :  { %13365 = vmatprep.subr.mxu0 %v18988_v23  ;;  %13370 = vmatprep.subr.mxu1 %v18988_v23 }
 0x39f   :  { %13366 = vmatpush3.msra.mxu0 %v17722_v43 }
 0x3a0   :  { %13386 = vmatprep.subr.mxu0 %v18988_v23 }
 0x3e2   :  { %v13084_v22 = vpop.f32.mrf.mxu0 }
 0x3e4   :  { %v17728_v34 = vpop.f32.mrf.mxu0 }
 0x3e7   :  { %v13095_v44 = vpop.f32.mrf.mxu1 }
 0x3e9   :  { %v4107_v63 = vpop.f32.mrf.mxu1 }
 0x3ea   :  { %v13106_v49 = vpop.f32.mrf.mxu0 }
 0x3ec   :  { %v17730_v21 = vpop.f32.mrf.mxu0 }
 0x3f0   :  { %v13117_v51 = vpop.f32.mrf.mxu1 }
 0x3f2   :  { %v4271_v62 = vpop.f32.mrf.mxu1 }
 0x3f5   :  { %v13128_v46 = vpop.f32.mrf.mxu0 }
 0x3f7   :  { %v17732_v28 = vpop.f32.mrf.mxu0 }
 0x3fa   :  { %v13139_v57 = vpop.f32.mrf.mxu1 }
 0x3fc   :  { %v4427_v35 = vpop.f32.mrf.mxu1 }
 0x3ff   :  { %v13150_v54 = vpop.f32.mrf.mxu0 }
 0x401   :  { %v4502_v3 = vpop.f32.mrf.mxu0 }
 0x404   :  { %v13161_v20 = vpop.f32.mrf.mxu1 }
 0x406   :  { %v4585_v41 = vpop.f32.mrf.mxu1 }
 0x409   :  { %v13172_v45 = vpop.f32.mrf.mxu0 }
 0x40b   :  { %v4660_v56 = vpop.f32.mrf.mxu0 }
 0x40e   :  { %v13183_v8 = vpop.f32.mrf.mxu1 }
 0x410   :  { %v4743_v61 = vpop.f32.mrf.mxu1 }
 0x413   :  { %v13194_v14 = vpop.f32.mrf.mxu0 }
 0x415   :  { %v4818_v59 = vpop.f32.mrf.mxu0 }
 0x418   :  { %v13205_v4 = vpop.f32.mrf.mxu1 }
 0x41a   :  { %v4901_v16 = vpop.f32.mrf.mxu1 }
 0x41d   :  { %v13216_v7 = vpop.f32.mrf.mxu0 }
 0x41f   :  { %v4976_v47 = vpop.f32.mrf.mxu0 }
 0x422   :  { %v13227_v1 = vpop.f32.mrf.mxu1 }
 0x424   :  { %v5057_v13 = vpop.f32.mrf.mxu1 }
 0x427   :  { %v13238_v2 = vpop.f32.mrf.mxu0 }
 0x429   :  { %v5132_v58 = vpop.f32.mrf.mxu0 }
 0x42c   :  { %v13249_v25 = vpop.f32.mrf.mxu1 }
 0x42e   :  { %v5215_v24 = vpop.f32.mrf.mxu1 }
 0x431   :  { %v13260_v48 = vpop.f32.mrf.mxu0 }
 0x432   :  { %v5301_v39 = vadd.f32 %v13260_v48, %v13084_v22 }
 0x433   :  { %v5295_v15 = vpop.f32.mrf.mxu0 }
 0x434   :  { %v5305_v11 = vadd.f32 %v13106_v49, %v5301_v39 }
 0x436   :  { %v13271_v40 = vpop.f32.mrf.mxu1 }
 0x437   :  { %v5378_v55 = vadd.f32 %v13271_v40, %v13095_v44 }
 0x438   :  { %v5372_v52 = vpop.f32.mrf.mxu1 }
 0x439   :  { %v5382_v32 = vadd.f32 %v13128_v46, %v5378_v55 }
 0x43b   :  { %v5846_v18 = vmax.f32 %v5305_v11, %v5382_v32  ;;  %v13282_v5 = vpop.f32.mrf.mxu0 }
 0x43c   :  { %v5455_v0 = vadd.f32 %v13282_v5, %v13117_v51 }
 0x43d   :  { %v5449_v19 = vpop.f32.mrf.mxu0 }
 0x43e   :  { %v5459_v50 = vadd.f32 %v13150_v54, %v5455_v0  ;;  %v5450_v54 = vadd.f32 %v5449_v19, %v4271_v62  ;;  %v5296_v0 = vadd.f32 %v5295_v15, %v17728_v34  ;;  %v17773_v19 = vld [vmem:[%s18634_s6 + $0x78] sm:$0xff] }
 0x440   :  { %v13293_v17 = vpop.f32.mrf.mxu1  ;;  %v5304_v62 = vadd.f32 %v5296_v0, %v17730_v21  ;;  %v18203_v0 = vld [vmem:[%s18636_s8 + $0x50] sm:$0xff] }
 0x441   :  { %v5532_v37 = vadd.f32 %v13293_v17, %v13139_v57  ;;  %v5373_v57 = vadd.f32 %v5372_v52, %v4107_v63 }
 0x442   :  { %v5526_v43 = vpop.f32.mrf.mxu1 }
 0x443   :  { %v5536_v29 = vadd.f32 %v13172_v45, %v5532_v37  ;;  %v5527_v46 = vadd.f32 %v5526_v43, %v4427_v35  ;;  %v5381_v43 = vadd.f32 %v5373_v57, %v17732_v28  ;;  %v11218_v57 = vld [vmem:[%s18629_s1 + $0x8] sm:$0x3] }
 0x445   :  { %v5848_v38 = vmax.f32 %v5459_v50, %v5536_v29  ;;  %v13304_v30 = vpop.f32.mrf.mxu0  ;;  %v5845_v34 = vmax.f32 %v5304_v62, %v5381_v43 }
 0x446   :  { %v5609_v9 = vadd.f32 %v13304_v30, %v13161_v20  ;;  %v5535_v20 = vadd.f32 %v5527_v46, %v4660_v56  ;;  %v17790_v30 = vld [vmem:[%s18634_s6 + $0x70] sm:$0xff] }
 0x447   :  { %v5854_v31 = vmax.f32 %v5846_v18, %v5848_v38  ;;  %v5603_v49 = vpop.f32.mrf.mxu0  ;;  %v17785_v38 = vld [vmem:[%s18634_s6 + $0x50] sm:$0xff] }
 0x448   :  { %v5613_v22 = vadd.f32 %v13194_v14, %v5609_v9  ;;  %v5604_v50 = vadd.f32 %v5603_v49, %v4585_v41  ;;  %v17804_v9 = vld [vmem:[%s18634_s6 + $0x68] sm:$0xff]  ;;  %v18990_v49 = vld [vmem:[#allocation39_spill] sm:$0xff] }
 0x44a   :  { %v13315_v48 = vpop.f32.mrf.mxu1  ;;  %v5612_v63 = vadd.f32 %v5604_v50, %v4818_v59  ;;  %v17747_v59 = vld [vmem:[%s18635_s7 + $0x10] sm:$0x7f]  ;;  %v18222_v50 = vld [vmem:[%s18636_s8 + $0x68] sm:$0xff] }
 0x44b   :  { %v5686_v44 = vadd.f32 %v13315_v48, %v13183_v8  ;;  %v5458_v8 = vadd.f32 %v5450_v54, %v4502_v3  ;;  %v11144_v3 = vld [vmem:[%s18633_s5] ss:$0 sm:$0xff]  ;;  %v11179_v48 = vld [vmem:[%s18629_s1 + $0x2] sm:$0x3]  ;;  %v11205_v54 = vld [vmem:[%s18629_s1 + $0x6] sm:$0x3] }
 0x44c   :  { %v5680_v55 = vpop.f32.mrf.mxu1 }
 0x44d   :  { %v5690_v39 = vadd.f32 %v13216_v7, %v5686_v44  ;;  %v5681_v5 = vadd.f32 %v5680_v55, %v4743_v61 }
 0x44f   :  { %v5850_v40 = vmax.f32 %v5613_v22, %v5690_v39  ;;  %v13326_v51 = vpop.f32.mrf.mxu0  ;;  %v5689_v35 = vadd.f32 %v5681_v5, %v4976_v47  ;;  %v17820_v22 = vld [vmem:[%s18634_s6 + $0x60] sm:$0xff]  ;;  %v18189_v5 = vld [vmem:[%s18636_s8 + $0x58] sm:$0xff] }
 0x450   :  { %v5763_v11 = vadd.f32 %v13326_v51, %v13205_v4  ;;  %v5847_v4 = vmax.f32 %v5458_v8, %v5535_v20  ;;  %v11192_v39 = vld [vmem:[%s18629_s1 + $0x4] sm:$0x3]  ;;  %v18208_v20 = vld [vmem:[%s18636_s8 + $0x70] sm:$0xff] }
 0x451   :  { %v5757_v32 = vpop.f32.mrf.mxu0  ;;  %v5849_v56 = vmax.f32 %v5612_v63, %v5689_v35 }
 0x452   :  { %v5767_v45 = vadd.f32 %v13238_v2, %v5763_v11  ;;  %v5758_v14 = vadd.f32 %v5757_v32, %v4901_v16  ;;  %v5853_v16 = vmax.f32 %v5845_v34, %v5847_v4 }
 0x453   :  { %v13337_v18 = vpop.f32.mrf.mxu1 }
 0x454   :  { %v5840_v17 = vadd.f32 %v13337_v18, %v13227_v1  ;;  %v5766_v61 = vadd.f32 %v5758_v14, %v5132_v58  ;;  %v17752_v58 = vld [vmem:[%s18635_s7 + $0x18] sm:$0x7f]  ;;  %v17933_v46 = vpop.f32.mrf.mxu0  ;;  %v18217_v18 = vld [vmem:[%s18636_s8 + $0x48] sm:$0xff]  ;;  %v18231_v14 = vld [vmem:[%s18636_s8 + $0x40] sm:$0xff] }
 0x455   :  { %v5834_v37 = vpop.f32.mrf.mxu1 }
 0x456   :  { %v5844_v7 = vadd.f32 %v13249_v25, %v5840_v17  ;;  %v5835_v29 = vadd.f32 %v5834_v37, %v5057_v13  ;;  %v13342_v55 = vpop.f32.mrf.mxu0  ;;  %v18238_v17 = vld [vmem:[%s18636_s8 + $0x60] sm:$0xff] }
 0x458   :  { %v5852_v2 = vmax.f32 %v5767_v45, %v5844_v7  ;;  %v5843_v52 = vadd.f32 %v5835_v29, %v5215_v24  ;;  %v17768_v24 = vld [vmem:[%s18634_s6 + $0x58] sm:$0xff]  ;;  %v17946_v51 = vpop.f32.mrf.mxu0 }
 0x459   :  { %v18194_v45 = vld [vmem:[%s18636_s8 + $0x78] sm:$0xff] }
 0x45a   :  { %v5856_v15 = vmax.f32 %v5850_v40, %v5852_v2  ;;  %v5851_v41 = vmax.f32 %v5766_v61, %v5843_v52  ;;  %v13358_v11 = vpop.f32.mrf.mxu0 }
 0x45c   :  { %v5858_v28 = vmax.f32 %v5854_v31, %v5856_v15  ;;  %v5855_v47 = vmax.f32 %v5849_v56, %v5851_v41  ;;  %v17813_v31 = vld [vmem:[%s18634_s6 + $0x40] sm:$0xff] }
 0x45e   :  { %v17740_v1 = vadd.f32 %v11144_v3, %v5858_v28  ;;  %v5857_v13 = vmax.f32 %v5853_v16, %v5855_v47 }
 0x460   :  { %v5866_v21 = vadd.f32 %v11144_v3, %v5857_v13 }
 0x462   :  { %v17742_v25 = vmax.f32 %v5866_v21, 0.0 }
 0x464   :  { %13352 = vmatmul.mubr.msk.f32.vlgmr.msra.gmra.mxu1 %vm3952_vm3, %v17742_v25  ;;  %13368 = vmatmul.mubr.msk.f32.vlgmr.msra.gmra.mxu0 %vm3952_vm3, %v17742_v25  ;;  %v6587_v44 = vrot.slane %v17742_v25, 2  ;;  %v7159_v40 = vrot.slane %v17742_v25, 4  ;;  %v7731_v32 = vrot.slane %v17742_v25, 6 }
 0x465   :  { %13371 = vmatpush3.msk.msra.mxu1 %vm5880_vm6, %v17747_v59  ;;  %13387 = vmatpush3.msk.msra.mxu0 %vm5880_vm6, %v17752_v58 }
 0x466   :  { %13372 = vmatprep.mubr.msk.f32.mxu1 %vm14130_vm1, %v18988_v23  ;;  %13375 = vmatprep.subr.mxu1 %v18988_v23 }
 0x467   :  { %13388 = vmatprep.mubr.msk.f32.mxu0 %vm14130_vm1, %v18988_v23  ;;  %13391 = vmatprep.subr.mxu0 %v18988_v23 }
 0x468   :  { %13373 = vmatmul.mubr.msk.f32.vlgmr.msra.gmra.mxu1 %vm5876_vm7, %v17653_v10  ;;  %13389 = vmatmul.mubr.msk.f32.vlgmr.msra.gmra.mxu0 %vm5876_vm7, %v17653_v10  ;;  %v17799_v10 = vld [vmem:[%s18634_s6 + $0x48] sm:$0xff] }
 0x469   :  { %13376 = vmatpush3.msra.mxu1 %v17768_v24  ;;  %13392 = vmatpush3.msra.mxu0 %v17773_v19 }
 0x46a   :  { %13377 = vmatprep.subr.mxu1 %v18988_v23  ;;  %13393 = vmatprep.subr.mxu0 %v18988_v23 }
 0x46b   :  { %13378 = vmatpush3.msra.mxu1 %v17785_v38  ;;  %13394 = vmatpush3.msra.mxu0 %v17790_v30 }
 0x46c   :  { %13379 = vmatprep.subr.mxu1 %v18988_v23  ;;  %13395 = vmatprep.subr.mxu0 %v18988_v23 }
 0x46d   :  { %13380 = vmatpush3.msra.mxu1 %v17799_v10  ;;  %13396 = vmatpush3.msra.mxu0 %v17804_v9 }
 0x46e   :  { %13381 = vmatprep.subr.mxu1 %v18988_v23  ;;  %13397 = vmatprep.subr.mxu0 %v18988_v23 }
 0x46f   :  { %13382 = vmatpush3.msra.mxu1 %v17813_v31  ;;  %13383 = vmatprep.mubr.msk.f32.mxu1 %vm14130_vm1, %v18988_v23 }
 0x470   :  { %13398 = vmatpush3.msra.mxu0 %v17820_v22  ;;  %13399 = vmatprep.mubr.msk.f32.mxu0 %vm14130_vm1, %v18988_v23 }
 0x471   :  { %13384 = vmatmul.mubr.msk.f32.vlgmr.msra.gmra.mxu1 %vm3952_vm3, %v17742_v25  ;;  %13400 = vmatmul.mubr.msk.f32.vlgmr.msra.gmra.mxu0 %vm3952_vm3, %v17742_v25 }
 0x472   :  { %13402 = vmatprep.subr.mxu1 %v18988_v23  ;;  %13418 = vmatprep.subr.mxu0 %v18988_v23 }
 0x473   :  { %13403 = vmatpush3.msk.msra.mxu1 %vm5880_vm6, %v17646_v53  ;;  %13419 = vmatpush3.msk.msra.mxu0 %vm5880_vm6, %v17663_v60 }
 0x474   :  { %13404 = vmatprep.mubr.msk.f32.mxu1 %vm14130_vm1, %v18988_v23  ;;  %13407 = vmatprep.subr.mxu1 %v18988_v23 }
 0x475   :  { %13420 = vmatprep.mubr.msk.f32.mxu0 %vm14130_vm1, %v18988_v23  ;;  %13423 = vmatprep.subr.mxu0 %v18988_v23 }
 0x476   :  { %13405 = vmatmul.mubr.msk.f32.vlgmr.msra.gmra.mxu1 %vm5876_vm7, %v11179_v48  ;;  %13421 = vmatmul.mubr.msk.f32.vlgmr.msra.gmra.mxu0 %vm5876_vm7, %v11179_v48 }
 0x477   :  { %13408 = vmatpush3.msra.mxu1 %v17673_v26  ;;  %13424 = vmatpush3.msra.mxu0 %v17678_v42 }
 0x478   :  { %13409 = vmatprep.subr.mxu1 %v18988_v23  ;;  %13425 = vmatprep.subr.mxu0 %v18988_v23 }
 0x479   :  { %13410 = vmatpush3.msra.mxu1 %v17689_v33  ;;  %13426 = vmatpush3.msra.mxu0 %v17694_v27 }
 0x47a   :  { %13411 = vmatprep.subr.mxu1 %v18988_v23  ;;  %13427 = vmatprep.subr.mxu0 %v18988_v23 }
 0x47b   :  { %13412 = vmatpush3.msra.mxu1 %v17703_v12  ;;  %13428 = vmatpush3.msra.mxu0 %v17708_v36 }
 0x47c   :  { %13413 = vmatprep.subr.mxu1 %v18988_v23  ;;  %13429 = vmatprep.subr.mxu0 %v18988_v23 }
 0x47d   :  { %13414 = vmatpush3.msra.mxu1 %v17717_v6  ;;  %13415 = vmatprep.mubr.msk.f32.mxu1 %vm14130_vm1, %v18988_v23 }
 0x47e   :  { %13430 = vmatpush3.msra.mxu0 %v18990_v49  ;;  %13431 = vmatprep.mubr.msk.f32.mxu0 %vm14130_vm1, %v18988_v23 }
 0x47f   :  { %13416 = vmatmul.mubr.msk.f32.vlgmr.msra.gmra.mxu1 %vm3952_vm3, %v6587_v44  ;;  %13432 = vmatmul.mubr.msk.f32.vlgmr.msra.gmra.mxu0 %vm3952_vm3, %v6587_v44 }
 0x480   :  { %13434 = vmatprep.subr.mxu1 %v18988_v23  ;;  %13450 = vmatprep.subr.mxu0 %v18988_v23 }
 0x481   :  { %13435 = vmatpush3.msk.msra.mxu1 %vm5880_vm6, %v17747_v59  ;;  %13451 = vmatpush3.msk.msra.mxu0 %vm5880_vm6, %v17752_v58 }
 0x482   :  { %13436 = vmatprep.mubr.msk.f32.mxu1 %vm14130_vm1, %v18988_v23  ;;  %13439 = vmatprep.subr.mxu1 %v18988_v23 }
 0x483   :  { %13452 = vmatprep.mubr.msk.f32.mxu0 %vm14130_vm1, %v18988_v23  ;;  %13455 = vmatprep.subr.mxu0 %v18988_v23 }
 0x484   :  { %13437 = vmatmul.mubr.msk.f32.vlgmr.msra.gmra.mxu1 %vm5876_vm7, %v11179_v48  ;;  %13453 = vmatmul.mubr.msk.f32.vlgmr.msra.gmra.mxu0 %vm5876_vm7, %v11179_v48 }
 0x485   :  { %13440 = vmatpush3.msra.mxu1 %v17768_v24  ;;  %13456 = vmatpush3.msra.mxu0 %v17773_v19 }
 0x486   :  { %13441 = vmatprep.subr.mxu1 %v18988_v23  ;;  %13457 = vmatprep.subr.mxu0 %v18988_v23 }
 0x487   :  { %13442 = vmatpush3.msra.mxu1 %v17785_v38  ;;  %13458 = vmatpush3.msra.mxu0 %v17790_v30 }
 0x488   :  { %13443 = vmatprep.subr.mxu1 %v18988_v23  ;;  %13459 = vmatprep.subr.mxu0 %v18988_v23 }
 0x489   :  { %13444 = vmatpush3.msra.mxu1 %v17799_v10  ;;  %13460 = vmatpush3.msra.mxu0 %v17804_v9 }
 0x48a   :  { %13445 = vmatprep.subr.mxu1 %v18988_v23  ;;  %13461 = vmatprep.subr.mxu0 %v18988_v23 }
 0x48b   :  { %13446 = vmatpush3.msra.mxu1 %v17813_v31  ;;  %13447 = vmatprep.mubr.msk.f32.mxu1 %vm14130_vm1, %v18988_v23 }
 0x48c   :  { %13462 = vmatpush3.msra.mxu0 %v17820_v22  ;;  %13463 = vmatprep.mubr.msk.f32.mxu0 %vm14130_vm1, %v18988_v23 }
 0x48d   :  { %13448 = vmatmul.mubr.msk.f32.vlgmr.msra.gmra.mxu1 %vm3952_vm3, %v6587_v44  ;;  %13464 = vmatmul.mubr.msk.f32.vlgmr.msra.gmra.mxu0 %vm3952_vm3, %v6587_v44 }
 0x48e   :  { %13466 = vmatprep.subr.mxu1 %v18988_v23  ;;  %13482 = vmatprep.subr.mxu0 %v18988_v23 }
 0x48f   :  { %13467 = vmatpush3.msk.msra.mxu1 %vm5880_vm6, %v17646_v53  ;;  %13483 = vmatpush3.msk.msra.mxu0 %vm5880_vm6, %v17663_v60 }
 0x490   :  { %13468 = vmatprep.mubr.msk.f32.mxu1 %vm14130_vm1, %v18988_v23  ;;  %13471 = vmatprep.subr.mxu1 %v18988_v23 }
 0x491   :  { %13484 = vmatprep.mubr.msk.f32.mxu0 %vm14130_vm1, %v18988_v23  ;;  %13487 = vmatprep.subr.mxu0 %v18988_v23 }
 0x492   :  { %13469 = vmatmul.mubr.msk.f32.vlgmr.msra.gmra.mxu1 %vm5876_vm7, %v11192_v39  ;;  %13485 = vmatmul.mubr.msk.f32.vlgmr.msra.gmra.mxu0 %vm5876_vm7, %v11192_v39 }
 0x493   :  { %13472 = vmatpush3.msra.mxu1 %v17673_v26  ;;  %13488 = vmatpush3.msra.mxu0 %v17678_v42 }
 0x494   :  { %13473 = vmatprep.subr.mxu1 %v18988_v23  ;;  %13489 = vmatprep.subr.mxu0 %v18988_v23 }
 0x495   :  { %13474 = vmatpush3.msra.mxu1 %v17689_v33  ;;  %13490 = vmatpush3.msra.mxu0 %v17694_v27 }
 0x496   :  { %13475 = vmatprep.subr.mxu1 %v18988_v23  ;;  %13491 = vmatprep.subr.mxu0 %v18988_v23 }
 0x497   :  { %13476 = vmatpush3.msra.mxu1 %v17703_v12  ;;  %13492 = vmatpush3.msra.mxu0 %v17708_v36 }
 0x498   :  { %13477 = vmatprep.subr.mxu1 %v18988_v23  ;;  %13493 = vmatprep.subr.mxu0 %v18988_v23 }
 0x499   :  { %13478 = vmatpush3.msra.mxu1 %v17717_v6  ;;  %13479 = vmatprep.mubr.msk.f32.mxu1 %vm14130_vm1, %v18988_v23 }
 0x49a   :  { %13494 = vmatpush3.msra.mxu0 %v18990_v49  ;;  %13495 = vmatprep.mubr.msk.f32.mxu0 %vm14130_vm1, %v18988_v23 }
 0x49b   :  { %13480 = vmatmul.mubr.msk.f32.vlgmr.msra.gmra.mxu1 %vm3952_vm3, %v7159_v40  ;;  %13496 = vmatmul.mubr.msk.f32.vlgmr.msra.gmra.mxu0 %vm3952_vm3, %v7159_v40 }
 0x49c   :  { %13498 = vmatprep.subr.mxu1 %v18988_v23  ;;  %13514 = vmatprep.subr.mxu0 %v18988_v23 }
 0x49d   :  { %13499 = vmatpush3.msk.msra.mxu1 %vm5880_vm6, %v17747_v59  ;;  %13515 = vmatpush3.msk.msra.mxu0 %vm5880_vm6, %v17752_v58 }
 0x49e   :  { %13500 = vmatprep.mubr.msk.f32.mxu1 %vm14130_vm1, %v18988_v23  ;;  %13503 = vmatprep.subr.mxu1 %v18988_v23 }
 0x49f   :  { %13516 = vmatprep.mubr.msk.f32.mxu0 %vm14130_vm1, %v18988_v23  ;;  %13519 = vmatprep.subr.mxu0 %v18988_v23 }
 0x4a0   :  { %13501 = vmatmul.mubr.msk.f32.vlgmr.msra.gmra.mxu1 %vm5876_vm7, %v11192_v39  ;;  %13517 = vmatmul.mubr.msk.f32.vlgmr.msra.gmra.mxu0 %vm5876_vm7, %v11192_v39 }
 0x4a1   :  { %13504 = vmatpush3.msra.mxu1 %v17768_v24  ;;  %13520 = vmatpush3.msra.mxu0 %v17773_v19 }
 0x4a2   :  { %13505 = vmatprep.subr.mxu1 %v18988_v23  ;;  %13521 = vmatprep.subr.mxu0 %v18988_v23 }
 0x4a3   :  { %13506 = vmatpush3.msra.mxu1 %v17785_v38  ;;  %13522 = vmatpush3.msra.mxu0 %v17790_v30 }
 0x4a4   :  { %13507 = vmatprep.subr.mxu1 %v18988_v23  ;;  %13523 = vmatprep.subr.mxu0 %v18988_v23 }
 0x4a5   :  { %13508 = vmatpush3.msra.mxu1 %v17799_v10  ;;  %13524 = vmatpush3.msra.mxu0 %v17804_v9 }
 0x4a6   :  { %13509 = vmatprep.subr.mxu1 %v18988_v23  ;;  %13525 = vmatprep.subr.mxu0 %v18988_v23 }
 0x4a7   :  { %13510 = vmatpush3.msra.mxu1 %v17813_v31  ;;  %13511 = vmatprep.mubr.msk.f32.mxu1 %vm14130_vm1, %v18988_v23 }
 0x4a8   :  { %13526 = vmatpush3.msra.mxu0 %v17820_v22  ;;  %13527 = vmatprep.mubr.msk.f32.mxu0 %vm14130_vm1, %v18988_v23 }
 0x4a9   :  { %13512 = vmatmul.mubr.msk.f32.vlgmr.msra.gmra.mxu1 %vm3952_vm3, %v7159_v40  ;;  %13528 = vmatmul.mubr.msk.f32.vlgmr.msra.gmra.mxu0 %vm3952_vm3, %v7159_v40 }
 0x4aa   :  { %13530 = vmatprep.subr.mxu1 %v18988_v23  ;;  %13546 = vmatprep.subr.mxu0 %v18988_v23 }
 0x4ab   :  { %13531 = vmatpush3.msk.msra.mxu1 %vm5880_vm6, %v17646_v53  ;;  %13547 = vmatpush3.msk.msra.mxu0 %vm5880_vm6, %v17663_v60 }
 0x4ac   :  { %13532 = vmatprep.mubr.msk.f32.mxu1 %vm14130_vm1, %v18988_v23  ;;  %13535 = vmatprep.subr.mxu1 %v18988_v23 }
 0x4ad   :  { %13548 = vmatprep.mubr.msk.f32.mxu0 %vm14130_vm1, %v18988_v23  ;;  %13551 = vmatprep.subr.mxu0 %v18988_v23 }
 0x4ae   :  { %13533 = vmatmul.mubr.msk.f32.vlgmr.msra.gmra.mxu1 %vm5876_vm7, %v11205_v54  ;;  %13549 = vmatmul.mubr.msk.f32.vlgmr.msra.gmra.mxu0 %vm5876_vm7, %v11205_v54 }
 0x4af   :  { %13536 = vmatpush3.msra.mxu1 %v17673_v26  ;;  %13552 = vmatpush3.msra.mxu0 %v17678_v42 }
 0x4b0   :  { %13537 = vmatprep.subr.mxu1 %v18988_v23  ;;  %13553 = vmatprep.subr.mxu0 %v18988_v23 }
 0x4b1   :  { %13538 = vmatpush3.msra.mxu1 %v17689_v33  ;;  %13554 = vmatpush3.msra.mxu0 %v17694_v27 }
 0x4b2   :  { %13539 = vmatprep.subr.mxu1 %v18988_v23  ;;  %13555 = vmatprep.subr.mxu0 %v18988_v23 }
 0x4b3   :  { %13540 = vmatpush3.msra.mxu1 %v17703_v12  ;;  %13556 = vmatpush3.msra.mxu0 %v17708_v36 }
 0x4b4   :  { %13541 = vmatprep.subr.mxu1 %v18988_v23  ;;  %13557 = vmatprep.subr.mxu0 %v18988_v23 }
 0x4b5   :  { %13542 = vmatpush3.msra.mxu1 %v17717_v6  ;;  %13543 = vmatprep.mubr.msk.f32.mxu1 %vm14130_vm1, %v18988_v23 }
 0x4b6   :  { %13558 = vmatpush3.msra.mxu0 %v18990_v49  ;;  %13559 = vmatprep.mubr.msk.f32.mxu0 %vm14130_vm1, %v18988_v23 }
 0x4b7   :  { %13544 = vmatmul.mubr.msk.f32.vlgmr.msra.gmra.mxu1 %vm3952_vm3, %v7731_v32  ;;  %13560 = vmatmul.mubr.msk.f32.vlgmr.msra.gmra.mxu0 %vm3952_vm3, %v7731_v32 }
 0x4b8   :  { %13562 = vmatprep.subr.mxu1 %v18988_v23  ;;  %13578 = vmatprep.subr.mxu0 %v18988_v23 }
 0x4b9   :  { %13563 = vmatpush3.msk.msra.mxu1 %vm5880_vm6, %v17747_v59  ;;  %13579 = vmatpush3.msk.msra.mxu0 %vm5880_vm6, %v17752_v58 }
 0x4ba   :  { %13564 = vmatprep.mubr.msk.f32.mxu1 %vm14130_vm1, %v18988_v23  ;;  %13567 = vmatprep.subr.mxu1 %v18988_v23 }
 0x4bb   :  { %13580 = vmatprep.mubr.msk.f32.mxu0 %vm14130_vm1, %v18988_v23  ;;  %13583 = vmatprep.subr.mxu0 %v18988_v23 }
 0x4bc   :  { %13565 = vmatmul.mubr.msk.f32.vlgmr.msra.gmra.mxu1 %vm5876_vm7, %v11205_v54  ;;  %13581 = vmatmul.mubr.msk.f32.vlgmr.msra.gmra.mxu0 %vm5876_vm7, %v11205_v54 }
 0x4bd   :  { %13568 = vmatpush3.msra.mxu1 %v17768_v24  ;;  %13584 = vmatpush3.msra.mxu0 %v17773_v19 }
 0x4be   :  { %13569 = vmatprep.subr.mxu1 %v18988_v23  ;;  %13585 = vmatprep.subr.mxu0 %v18988_v23 }
 0x4bf   :  { %13570 = vmatpush3.msra.mxu1 %v17785_v38  ;;  %13586 = vmatpush3.msra.mxu0 %v17790_v30 }
 0x4c0   :  { %13571 = vmatprep.subr.mxu1 %v18988_v23  ;;  %13587 = vmatprep.subr.mxu0 %v18988_v23 }
 0x4c1   :  { %13572 = vmatpush3.msra.mxu1 %v17799_v10  ;;  %13588 = vmatpush3.msra.mxu0 %v17804_v9 }
 0x4c2   :  { %13573 = vmatprep.subr.mxu1 %v18988_v23  ;;  %13589 = vmatprep.subr.mxu0 %v18988_v23 }
 0x4c3   :  { %13574 = vmatpush3.msra.mxu1 %v17813_v31  ;;  %13575 = vmatprep.mubr.msk.f32.mxu1 %vm14130_vm1, %v18988_v23 }
 0x4c4   :  { %13590 = vmatpush3.msra.mxu0 %v17820_v22  ;;  %13591 = vmatprep.mubr.msk.f32.mxu0 %vm14130_vm1, %v18988_v23 }
 0x4c5   :  { %13576 = vmatmul.mubr.msk.f32.vlgmr.msra.gmra.mxu1 %vm3952_vm3, %v7731_v32  ;;  %13592 = vmatmul.mubr.msk.f32.vlgmr.msra.gmra.mxu0 %vm3952_vm3, %v7731_v32 }
 0x4c6   :  { %13594 = vmatprep.subr.mxu1 %v18988_v23  ;;  %13610 = vmatprep.subr.mxu0 %v18988_v23 }
 0x4c7   :  { %13595 = vmatpush3.msk.msra.mxu1 %vm5880_vm6, %v17646_v53  ;;  %13611 = vmatpush3.msk.msra.mxu0 %vm5880_vm6, %v17663_v60  ;;  %v5869_v53 = vmax.f32 %v17740_v1, 0.0  ;;  %v18127_v60 = vld [vmem:[%s18636_s8 + $0x18] sm:$0xff] }
 0x4c8   :  { %13596 = vmatprep.mubr.msk.f32.mxu1 %vm14130_vm1, %v18988_v23  ;;  %13599 = vmatprep.subr.mxu1 %v18988_v23 }
 0x4c9   :  { %13612 = vmatprep.mubr.msk.f32.mxu0 %vm14130_vm1, %v18988_v23  ;;  %13615 = vmatprep.subr.mxu0 %v18988_v23 }
 0x4ca   :  { %13597 = vmatmul.mubr.msk.f32.vlgmr.msra.gmra.mxu1 %vm5876_vm7, %v11218_v57  ;;  %13613 = vmatmul.mubr.msk.f32.vlgmr.msra.gmra.mxu0 %vm5876_vm7, %v11218_v57 }
 0x4cb   :  { %13600 = vmatpush3.msra.mxu1 %v17673_v26  ;;  %13616 = vmatpush3.msra.mxu0 %v17678_v42  ;;  %v18132_v26 = vld [vmem:[%s18636_s8 + $0x38] sm:$0xff]  ;;  %v18141_v42 = vld [vmem:[%s18636_s8 + $0x10] sm:$0xff] }
 0x4cc   :  { %13601 = vmatprep.subr.mxu1 %v18988_v23  ;;  %13617 = vmatprep.subr.mxu0 %v18988_v23 }
 0x4cd   :  { %13602 = vmatpush3.msra.mxu1 %v17689_v33  ;;  %13618 = vmatpush3.msra.mxu0 %v17694_v27  ;;  %v18146_v33 = vld [vmem:[%s18636_s8 + $0x30] sm:$0xff]  ;;  %v18155_v27 = vld [vmem:[%s18636_s8 + $0x8] sm:$0xff] }
 0x4ce   :  { %13603 = vmatprep.subr.mxu1 %v18988_v23  ;;  %13619 = vmatprep.subr.mxu0 %v18988_v23 }
 0x4cf   :  { %13604 = vmatpush3.msra.mxu1 %v17703_v12  ;;  %13620 = vmatpush3.msra.mxu0 %v17708_v36  ;;  %v18160_v12 = vld [vmem:[%s18636_s8 + $0x28] sm:$0xff]  ;;  %v18169_v36 = vld [vmem:[%s18636_s8] sm:$0xff] }
 0x4d0   :  { %13605 = vmatprep.subr.mxu1 %v18988_v23  ;;  %13621 = vmatprep.subr.mxu0 %v18988_v23 }
 0x4d1   :  { %13606 = vmatpush3.msra.mxu1 %v17717_v6  ;;  %13607 = vmatprep.mubr.msk.f32.mxu1 %vm14130_vm1, %v18988_v23  ;;  %v18176_v6 = vld [vmem:[%s18636_s8 + $0x20] sm:$0xff] }
 0x4d2   :  { %13622 = vmatpush3.msra.mxu0 %v18990_v49  ;;  %13623 = vmatprep.mubr.msk.f32.mxu0 %vm14130_vm1, %v18988_v23 }
 0x4d3   :  { %13608 = vmatmul.mubr.msk.f32.vlgmr.msra.gmra.mxu1 %vm3952_vm3, %v5869_v53  ;;  %13624 = vmatmul.mubr.msk.f32.vlgmr.msra.gmra.mxu0 %vm3952_vm3, %v5869_v53 }
 0x4d4   :  { %13626 = vmatprep.subr.mxu1 %v18988_v23  ;;  %13642 = vmatprep.subr.mxu0 %v18988_v23 }
 0x4d5   :  { %13627 = vmatpush3.msk.msra.mxu1 %vm5880_vm6, %v17747_v59  ;;  %13643 = vmatpush3.msk.msra.mxu0 %vm5880_vm6, %v17752_v58 }
 0x4d6   :  { %13628 = vmatprep.mubr.msk.f32.mxu1 %vm14130_vm1, %v18988_v23  ;;  %13631 = vmatprep.subr.mxu1 %v18988_v23 }
 0x4d7   :  { %13644 = vmatprep.mubr.msk.f32.mxu0 %vm14130_vm1, %v18988_v23  ;;  %13647 = vmatprep.subr.mxu0 %v18988_v23 }
 0x4d8   :  { %13629 = vmatmul.mubr.msk.f32.vlgmr.msra.gmra.mxu1 %vm5876_vm7, %v11218_v57  ;;  %13645 = vmatmul.mubr.msk.f32.vlgmr.msra.gmra.mxu0 %vm5876_vm7, %v11218_v57 }
 0x4d9   :  { %13632 = vmatpush3.msra.mxu1 %v17768_v24  ;;  %13648 = vmatpush3.msra.mxu0 %v17773_v19 }
 0x4da   :  { %13633 = vmatprep.subr.mxu1 %v18988_v23  ;;  %13649 = vmatprep.subr.mxu0 %v18988_v23 }
 0x4db   :  { %13634 = vmatpush3.msra.mxu1 %v17785_v38  ;;  %13650 = vmatpush3.msra.mxu0 %v17790_v30 }
 0x4dc   :  { %13635 = vmatprep.subr.mxu1 %v18988_v23  ;;  %13651 = vmatprep.subr.mxu0 %v18988_v23 }
 0x4dd   :  { %13636 = vmatpush3.msra.mxu1 %v17799_v10  ;;  %13652 = vmatpush3.msra.mxu0 %v17804_v9 }
 0x4de   :  { %13637 = vmatprep.subr.mxu1 %v18988_v23  ;;  %13653 = vmatprep.subr.mxu0 %v18988_v23 }
 0x4df   :  { %13638 = vmatpush3.msra.mxu1 %v17813_v31  ;;  %13639 = vmatprep.mubr.msk.f32.mxu1 %vm14130_vm1, %v18988_v23 }
 0x4e0   :  { %13654 = vmatpush3.msra.mxu0 %v17820_v22  ;;  %13655 = vmatprep.mubr.msk.f32.mxu0 %vm14130_vm1, %v18988_v23 }
 0x4e1   :  { %13640 = vmatmul.mubr.msk.f32.vlgmr.msra.gmra.mxu1 %vm3952_vm3, %v5869_v53  ;;  %13656 = vmatmul.mubr.msk.f32.vlgmr.msra.gmra.mxu0 %vm3952_vm3, %v5869_v53 }
 0x4e2   :  { %13658 = vmatprep.subr.mxu1 %v18988_v23  ;;  %13669 = vmatprep.subr.mxu0 %v18988_v23 }
 0x4e3   :  { %13659 = vmatpush3.msra.mxu1 %v18127_v60  ;;  %13670 = vmatpush3.msra.mxu0 %v18132_v26 }
 0x4e4   :  { %13660 = vmatprep.subr.mxu1 %v18988_v23  ;;  %13671 = vmatprep.subr.mxu0 %v18988_v23 }
 0x4e5   :  { %13661 = vmatpush3.msra.mxu1 %v18141_v42  ;;  %13672 = vmatpush3.msra.mxu0 %v18146_v33 }
 0x4e6   :  { %13662 = vmatprep.subr.mxu1 %v18988_v23  ;;  %13673 = vmatprep.subr.mxu0 %v18988_v23 }
 0x4e7   :  { %13663 = vmatpush3.msra.mxu1 %v18155_v27  ;;  %13674 = vmatpush3.msra.mxu0 %v18160_v12 }
 0x4e8   :  { %13664 = vmatprep.subr.mxu1 %v18988_v23  ;;  %13675 = vmatprep.subr.mxu0 %v18988_v23 }
 0x4e9   :  { %13665 = vmatpush3.msra.mxu1 %v18169_v36  ;;  %13666 = vmatprep.mubr.msk.f32.mxu1 %vm14130_vm1, %v18988_v23 }
 0x4ea   :  { %13676 = vmatpush3.msra.mxu0 %v18176_v6  ;;  %13677 = vmatprep.mubr.msk.f32.mxu0 %vm14130_vm1, %v18988_v23 }
 0x4eb   :  { %13667 = vmatmul.mubr.f32.vlgmr.msra.gmra.mxu1 %v18988_v23  ;;  %13678 = vmatmul.mubr.f32.vlgmr.msra.gmra.mxu0 %v18988_v23 }
 0x4ec   :  { %13680 = vmatprep.subr.mxu1 %v18988_v23  ;;  %13691 = vmatprep.subr.mxu0 %v18988_v23 }
 0x4ed   :  { %13681 = vmatpush3.msra.mxu1 %v18189_v5  ;;  %13692 = vmatpush3.msra.mxu0 %v18194_v45 }
 0x4ee   :  { %13682 = vmatprep.subr.mxu1 %v18988_v23  ;;  %13693 = vmatprep.subr.mxu0 %v18988_v23 }
 0x4ef   :  { %13683 = vmatpush3.msra.mxu1 %v18203_v0  ;;  %13694 = vmatpush3.msra.mxu0 %v18208_v20 }
 0x4f0   :  { %13684 = vmatprep.subr.mxu1 %v18988_v23  ;;  %13695 = vmatprep.subr.mxu0 %v18988_v23 }
 0x4f1   :  { %13685 = vmatpush3.msra.mxu1 %v18217_v18  ;;  %13696 = vmatpush3.msra.mxu0 %v18222_v50 }
 0x4f2   :  { %13686 = vmatprep.subr.mxu1 %v18988_v23  ;;  %13697 = vmatprep.subr.mxu0 %v18988_v23 }
 0x4f3   :  { %13687 = vmatpush3.msra.mxu1 %v18231_v14  ;;  %13688 = vmatprep.mubr.msk.f32.mxu1 %vm14130_vm1, %v18988_v23 }
 0x4f4   :  { %13698 = vmatpush3.msra.mxu0 %v18238_v17  ;;  %13699 = vmatprep.mubr.msk.f32.mxu0 %vm14130_vm1, %v18988_v23 }
 0x4f5   :  { %13689 = vmatmul.mubr.f32.vlgmr.msra.gmra.mxu1 %v18988_v23  ;;  %13700 = vmatmul.mubr.f32.vlgmr.msra.gmra.mxu0 %v18988_v23 }
 0x4f6   :  { %13702 = vmatprep.subr.mxu1 %v18988_v23  ;;  %13713 = vmatprep.subr.mxu0 %v18988_v23 }
 0x4f7   :  { %13703 = vmatpush3.msra.mxu1 %v18127_v60  ;;  %13714 = vmatpush3.msra.mxu0 %v18132_v26 }
 0x4f8   :  { %13704 = vmatprep.subr.mxu1 %v18988_v23  ;;  %13715 = vmatprep.subr.mxu0 %v18988_v23 }
 0x4f9   :  { %13705 = vmatpush3.msra.mxu1 %v18141_v42  ;;  %13716 = vmatpush3.msra.mxu0 %v18146_v33 }
 0x4fa   :  { %13706 = vmatprep.subr.mxu1 %v18988_v23  ;;  %13717 = vmatprep.subr.mxu0 %v18988_v23 }
 0x4fb   :  { %13707 = vmatpush3.msra.mxu1 %v18155_v27  ;;  %13718 = vmatpush3.msra.mxu0 %v18160_v12 }
 0x4fc   :  { %13708 = vmatprep.subr.mxu1 %v18988_v23  ;;  %13719 = vmatprep.subr.mxu0 %v18988_v23 }
 0x4fd   :  { %13709 = vmatpush3.msra.mxu1 %v18169_v36  ;;  %13720 = vmatpush3.msra.mxu0 %v18176_v6 }
 0x4fe   :  { %13710 = vmatprep.mubr.msk.f32.mxu1 %vm14130_vm1, %v18988_v23  ;;  %13721 = vmatprep.mubr.msk.f32.mxu0 %vm14130_vm1, %v18988_v23 }
 0x4ff   :  { %13724 = vmatprep.subr.mxu1 %v18988_v23  ;;  %13735 = vmatprep.subr.mxu0 %v18988_v23 }
 0x524   :  { %v18272_v8 = vpop.f32.mrf.mxu1  ;;  %v18274_v37 = vpop.f32.mrf.mxu0 }
 0x526   :  { %v13353_v43 = vpop.f32.mrf.mxu1  ;;  %v13369_v35 = vpop.f32.mrf.mxu0 }
 0x528   :  { %v6270_v7 = vpop.f32.mrf.mxu1  ;;  %v6429_v29 = vpop.f32.mrf.mxu0 }
 0x52a   :  { %v13374_v62 = vpop.f32.mrf.mxu1  ;;  %v13390_v4 = vpop.f32.mrf.mxu0 }
 0x531   :  { %v6340_v63 = vpop.f32.mrf.mxu1  ;;  %v6499_v61 = vpop.f32.mrf.mxu0 }
 0x532   :  { %v18276_v2 = vadd.f32 %v6340_v63, %v6270_v7  ;;  %v18278_v52 = vadd.f32 %v6499_v61, %v6429_v29 }
 0x533   :  { %v13385_v34 = vpop.f32.mrf.mxu1  ;;  %v13401_v56 = vpop.f32.mrf.mxu0 }
 0x536   :  { %v6583_v15 = vpop.f32.mrf.mxu1  ;;  %v6727_v41 = vpop.f32.mrf.mxu0 }
 0x538   :  { %v13406_v3 = vpop.f32.mrf.mxu1  ;;  %v13422_v16 = vpop.f32.mrf.mxu0 }
 0x53f   :  { %v6656_v28 = vpop.f32.mrf.mxu1  ;;  %v6797_v47 = vpop.f32.mrf.mxu0 }
 0x540   :  { %v18280_v1 = vadd.f32 %v6656_v28, %v6583_v15  ;;  %v18282_v13 = vadd.f32 %v6797_v47, %v6727_v41 }
 0x541   :  { %v13417_v21 = vpop.f32.mrf.mxu1  ;;  %v13433_v25 = vpop.f32.mrf.mxu0 }
 0x544   :  { %v6868_v59 = vpop.f32.mrf.mxu1  ;;  %v7009_v58 = vpop.f32.mrf.mxu0 }
 0x546   :  { %v13438_v24 = vpop.f32.mrf.mxu1  ;;  %v13454_v19 = vpop.f32.mrf.mxu0 }
 0x54d   :  { %v6938_v38 = vpop.f32.mrf.mxu1  ;;  %v7079_v30 = vpop.f32.mrf.mxu0 }
 0x54e   :  { %v18284_v10 = vadd.f32 %v6938_v38, %v6868_v59  ;;  %v18286_v9 = vadd.f32 %v7079_v30, %v7009_v58 }
 0x54f   :  { %v13449_v31 = vpop.f32.mrf.mxu1  ;;  %v13465_v22 = vpop.f32.mrf.mxu0 }
 0x552   :  { %v7155_v48 = vpop.f32.mrf.mxu1  ;;  %v7299_v44 = vpop.f32.mrf.mxu0 }
 0x554   :  { %v13470_v49 = vpop.f32.mrf.mxu1  ;;  %v13486_v39 = vpop.f32.mrf.mxu0 }
 0x55b   :  { %v7228_v40 = vpop.f32.mrf.mxu1  ;;  %v7369_v55 = vpop.f32.mrf.mxu0 }
 0x55c   :  { %v18288_v11 = vadd.f32 %v7228_v40, %v7155_v48  ;;  %v18290_v54 = vadd.f32 %v7369_v55, %v7299_v44 }
 0x55d   :  { %v13481_v32 = vpop.f32.mrf.mxu1  ;;  %v13497_v57 = vpop.f32.mrf.mxu0 }
 0x560   :  { %v7440_v53 = vpop.f32.mrf.mxu1  ;;  %v7581_v43 = vpop.f32.mrf.mxu0 }
 0x562   :  { %v13502_v35 = vpop.f32.mrf.mxu1  ;;  %v13518_v7 = vpop.f32.mrf.mxu0 }
 0x569   :  { %v7510_v29 = vpop.f32.mrf.mxu1  ;;  %v7651_v62 = vpop.f32.mrf.mxu0 }
 0x56a   :  { %v18292_v4 = vadd.f32 %v7510_v29, %v7440_v53  ;;  %v18294_v63 = vadd.f32 %v7651_v62, %v7581_v43 }
 0x56b   :  { %v13513_v61 = vpop.f32.mrf.mxu1  ;;  %v13529_v34 = vpop.f32.mrf.mxu0 }
 0x56e   :  { %v7727_v56 = vpop.f32.mrf.mxu1  ;;  %v7871_v15 = vpop.f32.mrf.mxu0 }
 0x570   :  { %v13534_v41 = vpop.f32.mrf.mxu1  ;;  %v13550_v3 = vpop.f32.mrf.mxu0 }
 0x577   :  { %v7800_v16 = vpop.f32.mrf.mxu1  ;;  %v7941_v28 = vpop.f32.mrf.mxu0 }
 0x578   :  { %v18296_v47 = vadd.f32 %v7800_v16, %v7727_v56  ;;  %v18298_v21 = vadd.f32 %v7941_v28, %v7871_v15 }
 0x579   :  { %v13545_v25 = vpop.f32.mrf.mxu1  ;;  %v13561_v59 = vpop.f32.mrf.mxu0 }
 0x57a   :  { %v6024_v59 = vadd.f32 %v18272_v8, %v17933_v46 }
 0x57c   :  { %v8012_v58 = vpop.f32.mrf.mxu1  ;;  %v8153_v24 = vpop.f32.mrf.mxu0 }
 0x57e   :  { %v13566_v19 = vpop.f32.mrf.mxu1  ;;  %v13582_v38 = vpop.f32.mrf.mxu0 }
 0x57f   :  { %v18324_v19 = vld [vmem:[%s18637_s9 + $0x1] ss:$0 sm:$0xff] }
 0x585   :  { %v8082_v30 = vpop.f32.mrf.mxu1  ;;  %v8223_v31 = vpop.f32.mrf.mxu0 }
 0x586   :  { %v18300_v22 = vadd.f32 %v8082_v30, %v8012_v58  ;;  %v18302_v48 = vadd.f32 %v8223_v31, %v8153_v24  ;;  %v6182_v58 = vadd.f32 %v18274_v37, %v17946_v51  ;;  %v18319_v24 = vld [vmem:[%s18637_s9] ss:$0 sm:$0xff] }
 0x587   :  { %v13577_v44 = vpop.f32.mrf.mxu1  ;;  %v13593_v49 = vpop.f32.mrf.mxu0  ;;  %v6034_v38 = vadd.f32 %v18319_v24, %v6024_v59 }
 0x588   :  { %v6193_v30 = vadd.f32 %v18324_v19, %v6182_v58 }
 0x58a   :  { %v8299_v39 = vpop.f32.mrf.mxu1  ;;  %v8443_v40 = vpop.f32.mrf.mxu0 }
 0x58c   :  { %v13598_v55 = vpop.f32.mrf.mxu1  ;;  %v13614_v32 = vpop.f32.mrf.mxu0 }
 0x593   :  { %v8372_v57 = vpop.f32.mrf.mxu1  ;;  %v8513_v53 = vpop.f32.mrf.mxu0 }
 0x594   :  { %v18304_v43 = vadd.f32 %v8372_v57, %v8299_v39  ;;  %v18306_v35 = vadd.f32 %v8513_v53, %v8443_v40  ;;  %v18331_v40 = vld [vmem:[%s18637_s9 + $0x3] ss:$0 sm:$0xff]  ;;  %v18338_v53 = vld [vmem:[%s18637_s9 + $0x2] ss:$0 sm:$0xff] }
 0x595   :  { %v13609_v7 = vpop.f32.mrf.mxu1  ;;  %v13625_v29 = vpop.f32.mrf.mxu0  ;;  %v6511_v55 = vadd.f32 %v18331_v40, %v18278_v52 }
 0x598   :  { %v8584_v62 = vpop.f32.mrf.mxu1  ;;  %v8725_v61 = vpop.f32.mrf.mxu0 }
 0x59a   :  { %v13630_v34 = vpop.f32.mrf.mxu1  ;;  %v13646_v56 = vpop.f32.mrf.mxu0 }
 0x5a1   :  { %v8654_v15 = vpop.f32.mrf.mxu1  ;;  %v8795_v41 = vpop.f32.mrf.mxu0 }
 0x5a2   :  { %v18308_v3 = vadd.f32 %v8654_v15, %v8584_v62  ;;  %v18310_v16 = vadd.f32 %v8795_v41, %v8725_v61  ;;  %v6352_v61 = vadd.f32 %v18338_v53, %v18276_v2 }
 0x5a3   :  { %v13641_v28 = vpop.f32.mrf.mxu1  ;;  %v13657_v25 = vpop.f32.mrf.mxu0 }
 0x5ab   :  { %v8873_v31 = vpop.f32.mrf.mxu1  ;;  %v8949_v44 = vpop.f32.mrf.mxu0 }
 0x5ac   :  { %v8877_v46 = vadd.f32 %v8873_v31, %v6034_v38  ;;  %v8953_v8 = vadd.f32 %v8949_v44, %v6193_v30 }
 0x5ad   :  { %v13668_v49 = vpop.f32.mrf.mxu1  ;;  %v13679_v51 = vpop.f32.mrf.mxu0 }
 0x5ae   :  { %v11243_v37 = vmul.f32 -1.442695, %v8877_v46  ;;  %v11244_v39 = vmul.f32 -1.442695, %v8953_v8  ;;  %v6660_v51 = vadd.f32 %v18319_v24, %v18280_v1 }
 0x5b0   :  { %13926 = vpow2.f32 %v11243_v37  ;;  %v6801_v37 = vadd.f32 %v18324_v19, %v18282_v13  ;;  %v6942_v13 = vadd.f32 %v18338_v53, %v18284_v10 }
 0x5b1   :  { %13928 = vpow2.f32 %v11244_v39 }
 0x5b5   :  { %v9025_v32 = vpop.f32.mrf.mxu1  ;;  %v9101_v57 = vpop.f32.mrf.mxu0 }
 0x5b6   :  { %v9105_v7 = vadd.f32 %v9101_v57, %v6511_v55  ;;  %v9029_v56 = vadd.f32 %v9025_v32, %v6352_v61 }
 0x5b7   :  { %v13690_v29 = vpop.f32.mrf.mxu1  ;;  %v13701_v62 = vpop.f32.mrf.mxu0 }
 0x5b8   :  { %v11245_v34 = vmul.f32 -1.442695, %v9105_v7 }
 0x5ba   :  { %13930 = vpow2.f32 %v11245_v34 }
 0x5bb   :  { %13932 = vtanh.f32 %v9029_v56  ;;  %v7083_v56 = vadd.f32 %v18331_v40, %v18286_v9 }
 0x5bd   :  { %v13927_v15 = vpop.eup %13926 }
 0x5be   :  { %v13929_v41 = vpop.eup %13928  ;;  %v9109_v28 = vadd.f32 1.0, %v13927_v15 }
 0x5bf   :  { %v9115_v52 = vadd.f32 1.0, %v13929_v41 }
 0x5c0   :  { %13934 = vrcp.f32 %v9109_v28 }
 0x5c1   :  { %13936 = vrcp.f32 %v9115_v52 }
 0x5c7   :  { %v13931_v25 = vpop.eup %13930 }
 0x5c8   :  { %v13933_v59 = vpop.eup %13932  ;;  %v9122_v31 = vadd.f32 1.0, %v13931_v25 }
 0x5ca   :  { %13938 = vrcp.f32 %v9122_v31 }
 0x5cd   :  { %v13935_v58 = vpop.eup %13934 }
 0x5ce   :  { %v13937_v38 = vpop.eup %13936  ;;  %v9126_v30 = vmul.f32 %v13935_v58, %v13933_v59 }
 0x5cf   :  { %v9125_v44 = vmul.f32 0.0, %v13937_v38 }
 0x5d1   :  { %v18342_v46 = vadd.f32 %v9126_v30, %v9125_v44 }
 0x5d3   :  { %13940 = vtanh.f32 %v18342_v46 }
 0x5d7   :  { %v13939_v2 = vpop.eup %13938 }
 0x5e0   :  { %v13941_v8 = vpop.eup %13940 }
 0x5e1   :  { %v9129_v49 = vmul.f32 %v13941_v8, %v13939_v2 }
 0x5e3   :  { %13711 = vmatmul.mubr.msk.f32.vlgmr.msra.gmra.mxu1 %vm3952_vm3, %v9129_v49  ;;  %13722 = vmatmul.mubr.msk.f32.vlgmr.msra.gmra.mxu0 %vm3952_vm3, %v9129_v49 }
 0x5e4   :  { %13725 = vmatpush3.msra.mxu1 %v18189_v5  ;;  %13736 = vmatpush3.msra.mxu0 %v18194_v45 }
 0x5e5   :  { %13726 = vmatprep.subr.mxu1 %v18988_v23  ;;  %13737 = vmatprep.subr.mxu0 %v18988_v23 }
 0x5e6   :  { %13727 = vmatpush3.msra.mxu1 %v18203_v0  ;;  %13738 = vmatpush3.msra.mxu0 %v18208_v20 }
 0x5e7   :  { %13728 = vmatprep.subr.mxu1 %v18988_v23  ;;  %13739 = vmatprep.subr.mxu0 %v18988_v23 }
 0x5e8   :  { %13729 = vmatpush3.msra.mxu1 %v18217_v18  ;;  %13740 = vmatpush3.msra.mxu0 %v18222_v50 }
 0x5e9   :  { %13730 = vmatprep.subr.mxu1 %v18988_v23  ;;  %13741 = vmatprep.subr.mxu0 %v18988_v23 }
 0x5ea   :  { %13731 = vmatpush3.msra.mxu1 %v18231_v14  ;;  %13732 = vmatprep.mubr.msk.f32.mxu1 %vm14130_vm1, %v18988_v23 }
 0x5eb   :  { %13742 = vmatpush3.msra.mxu0 %v18238_v17  ;;  %13743 = vmatprep.mubr.msk.f32.mxu0 %vm14130_vm1, %v18988_v23 }
 0x5ec   :  { %13733 = vmatmul.mubr.msk.f32.vlgmr.msra.gmra.mxu1 %vm3952_vm3, %v9129_v49  ;;  %13744 = vmatmul.mubr.msk.f32.vlgmr.msra.gmra.mxu0 %vm3952_vm3, %v9129_v49 }
 0x5ed   :  { %13746 = vmatprep.subr.mxu1 %v18988_v23  ;;  %13757 = vmatprep.subr.mxu0 %v18988_v23 }
 0x5ee   :  { %13747 = vmatpush3.msra.mxu1 %v18127_v60  ;;  %13758 = vmatpush3.msra.mxu0 %v18132_v26 }
 0x5ef   :  { %13748 = vmatprep.subr.mxu1 %v18988_v23  ;;  %13759 = vmatprep.subr.mxu0 %v18988_v23 }
 0x5f0   :  { %13749 = vmatpush3.msra.mxu1 %v18141_v42  ;;  %13760 = vmatpush3.msra.mxu0 %v18146_v33 }
 0x5f1   :  { %13750 = vmatprep.subr.mxu1 %v18988_v23  ;;  %13761 = vmatprep.subr.mxu0 %v18988_v23 }
 0x5f2   :  { %13751 = vmatpush3.msra.mxu1 %v18155_v27  ;;  %13762 = vmatpush3.msra.mxu0 %v18160_v12 }
 0x5f3   :  { %13752 = vmatprep.subr.mxu1 %v18988_v23  ;;  %13763 = vmatprep.subr.mxu0 %v18988_v23 }
 0x5f4   :  { %13753 = vmatpush3.msra.mxu1 %v18169_v36  ;;  %13764 = vmatpush3.msra.mxu0 %v18176_v6 }
 0x5f5   :  { %13754 = vmatprep.mubr.msk.f32.mxu1 %vm14130_vm1, %v18988_v23  ;;  %13765 = vmatprep.mubr.msk.f32.mxu0 %vm14130_vm1, %v18988_v23 }
 0x5f6   :  { %13768 = vmatprep.subr.mxu1 %v18988_v23  ;;  %13779 = vmatprep.subr.mxu0 %v18988_v23 }
 0x6a3   :  { %v9199_v39 = vpop.f32.mrf.mxu1  ;;  %v9270_v55 = vpop.f32.mrf.mxu0 }
 0x6a4   :  { %v9203_v32 = vadd.f32 %v9199_v39, %v6660_v51  ;;  %v9274_v57 = vadd.f32 %v9270_v55, %v6801_v37 }
 0x6a5   :  { %v13712_v7 = vpop.f32.mrf.mxu1  ;;  %v13723_v29 = vpop.f32.mrf.mxu0 }
 0x6a6   :  { %v11250_v62 = vmul.f32 -1.442695, %v9203_v32  ;;  %v11251_v61 = vmul.f32 -1.442695, %v9274_v57  ;;  %v7373_v32 = vadd.f32 %v18324_v19, %v18290_v54  ;;  %v7514_v54 = vadd.f32 %v18338_v53, %v18292_v4 }
 0x6a8   :  { %13942 = vpow2.f32 %v11250_v62 }
 0x6a9   :  { %13944 = vpow2.f32 %v11251_v61 }
 0x6ac   :  { %v9341_v34 = vpop.f32.mrf.mxu1  ;;  %v9412_v15 = vpop.f32.mrf.mxu0 }
 0x6ad   :  { %v9416_v41 = vadd.f32 %v9412_v15, %v7083_v56  ;;  %v9345_v25 = vadd.f32 %v9341_v34, %v6942_v13 }
 0x6ae   :  { %v13734_v1 = vpop.f32.mrf.mxu1  ;;  %v13745_v28 = vpop.f32.mrf.mxu0 }
 0x6af   :  { %v11252_v52 = vmul.f32 -1.442695, %v9416_v41  ;;  %v7655_v1 = vadd.f32 %v18331_v40, %v18294_v63 }
 0x6b1   :  { %13946 = vpow2.f32 %v11252_v52 }
 0x6b2   :  { %13948 = vtanh.f32 %v9345_v25 }
 0x6b5   :  { %v13943_v59 = vpop.eup %13942 }
 0x6b6   :  { %v13945_v58 = vpop.eup %13944  ;;  %v9420_v38 = vadd.f32 1.0, %v13943_v59 }
 0x6b7   :  { %v9426_v30 = vadd.f32 1.0, %v13945_v58 }
 0x6b8   :  { %13950 = vrcp.f32 %v9420_v38 }
 0x6b9   :  { %13952 = vrcp.f32 %v9426_v30 }
 0x6be   :  { %v13947_v31 = vpop.eup %13946 }
 0x6bf   :  { %v13949_v44 = vpop.eup %13948  ;;  %v9433_v49 = vadd.f32 1.0, %v13947_v31 }
 0x6c1   :  { %13954 = vrcp.f32 %v9433_v49 }
 0x6c5   :  { %v13951_v9 = vpop.eup %13950 }
 0x6c6   :  { %v13953_v2 = vpop.eup %13952  ;;  %v9437_v8 = vmul.f32 %v13951_v9, %v13949_v44 }
 0x6c7   :  { %v9436_v51 = vmul.f32 %v13953_v2, %v18342_v46  ;;  %v7232_v46 = vadd.f32 %v18319_v24, %v18288_v11 }
 0x6c9   :  { %v18398_v37 = vadd.f32 %v9437_v8, %v9436_v51 }
 0x6cb   :  { %13956 = vtanh.f32 %v18398_v37 }
 0x6ce   :  { %v13955_v10 = vpop.eup %13954 }
 0x6d8   :  { %v13957_v39 = vpop.eup %13956 }
 0x6d9   :  { %v9440_v55 = vmul.f32 %v13957_v39, %v13955_v10 }
 0x6db   :  { %13755 = vmatmul.mubr.msk.f32.vlgmr.msra.gmra.mxu1 %vm3952_vm3, %v9440_v55  ;;  %13766 = vmatmul.mubr.msk.f32.vlgmr.msra.gmra.mxu0 %vm3952_vm3, %v9440_v55 }
 0x6dc   :  { %13769 = vmatpush3.msra.mxu1 %v18189_v5  ;;  %13780 = vmatpush3.msra.mxu0 %v18194_v45 }
 0x6dd   :  { %13770 = vmatprep.subr.mxu1 %v18988_v23  ;;  %13781 = vmatprep.subr.mxu0 %v18988_v23 }
 0x6de   :  { %13771 = vmatpush3.msra.mxu1 %v18203_v0  ;;  %13782 = vmatpush3.msra.mxu0 %v18208_v20 }
 0x6df   :  { %13772 = vmatprep.subr.mxu1 %v18988_v23  ;;  %13783 = vmatprep.subr.mxu0 %v18988_v23 }
 0x6e0   :  { %13773 = vmatpush3.msra.mxu1 %v18217_v18  ;;  %13784 = vmatpush3.msra.mxu0 %v18222_v50 }
 0x6e1   :  { %13774 = vmatprep.subr.mxu1 %v18988_v23  ;;  %13785 = vmatprep.subr.mxu0 %v18988_v23 }
 0x6e2   :  { %13775 = vmatpush3.msra.mxu1 %v18231_v14  ;;  %13776 = vmatprep.mubr.msk.f32.mxu1 %vm14130_vm1, %v18988_v23 }
 0x6e3   :  { %13786 = vmatpush3.msra.mxu0 %v18238_v17  ;;  %13787 = vmatprep.mubr.msk.f32.mxu0 %vm14130_vm1, %v18988_v23 }
 0x6e4   :  { %13777 = vmatmul.mubr.msk.f32.vlgmr.msra.gmra.mxu1 %vm3952_vm3, %v9440_v55  ;;  %13788 = vmatmul.mubr.msk.f32.vlgmr.msra.gmra.mxu0 %vm3952_vm3, %v9440_v55 }
 0x6e5   :  { %13790 = vmatprep.subr.mxu1 %v18988_v23  ;;  %13801 = vmatprep.subr.mxu0 %v18988_v23 }
 0x6e6   :  { %13791 = vmatpush3.msra.mxu1 %v18127_v60  ;;  %13802 = vmatpush3.msra.mxu0 %v18132_v26 }
 0x6e7   :  { %13792 = vmatprep.subr.mxu1 %v18988_v23  ;;  %13803 = vmatprep.subr.mxu0 %v18988_v23 }
 0x6e8   :  { %13793 = vmatpush3.msra.mxu1 %v18141_v42  ;;  %13804 = vmatpush3.msra.mxu0 %v18146_v33 }
 0x6e9   :  { %13794 = vmatprep.subr.mxu1 %v18988_v23  ;;  %13805 = vmatprep.subr.mxu0 %v18988_v23 }
 0x6ea   :  { %13795 = vmatpush3.msra.mxu1 %v18155_v27  ;;  %13806 = vmatpush3.msra.mxu0 %v18160_v12 }
 0x6eb   :  { %13796 = vmatprep.subr.mxu1 %v18988_v23  ;;  %13807 = vmatprep.subr.mxu0 %v18988_v23 }
 0x6ec   :  { %13797 = vmatpush3.msra.mxu1 %v18169_v36  ;;  %13808 = vmatpush3.msra.mxu0 %v18176_v6 }
 0x6ed   :  { %13798 = vmatprep.mubr.msk.f32.mxu1 %vm14130_vm1, %v18988_v23  ;;  %13809 = vmatprep.mubr.msk.f32.mxu0 %vm14130_vm1, %v18988_v23 }
 0x6ee   :  { %13812 = vmatprep.subr.mxu1 %v18988_v23  ;;  %13823 = vmatprep.subr.mxu0 %v18988_v23 }
 0x79b   :  { %v9510_v57 = vpop.f32.mrf.mxu1  ;;  %v9581_v7 = vpop.f32.mrf.mxu0 }
 0x79c   :  { %v9514_v29 = vadd.f32 %v9510_v57, %v7232_v46  ;;  %v9585_v62 = vadd.f32 %v9581_v7, %v7373_v32  ;;  %v8227_v57 = vadd.f32 %v18331_v40, %v18302_v48 }
 0x79d   :  { %v13756_v61 = vpop.f32.mrf.mxu1  ;;  %v13767_v34 = vpop.f32.mrf.mxu0 }
 0x79e   :  { %v11257_v56 = vmul.f32 -1.442695, %v9514_v29  ;;  %v11258_v15 = vmul.f32 -1.442695, %v9585_v62 }
 0x7a0   :  { %13958 = vpow2.f32 %v11257_v56 }
 0x7a1   :  { %13960 = vpow2.f32 %v11258_v15 }
 0x7a4   :  { %v9652_v41 = vpop.f32.mrf.mxu1  ;;  %v9723_v28 = vpop.f32.mrf.mxu0 }
 0x7a5   :  { %v9727_v13 = vadd.f32 %v9723_v28, %v7655_v1  ;;  %v9656_v59 = vadd.f32 %v9652_v41, %v7514_v54 }
 0x7a6   :  { %v13778_v11 = vpop.f32.mrf.mxu1  ;;  %v13789_v52 = vpop.f32.mrf.mxu0 }
 0x7a7   :  { %v11259_v25 = vmul.f32 -1.442695, %v9727_v13 }
 0x7a9   :  { %13962 = vpow2.f32 %v11259_v25 }
 0x7aa   :  { %13964 = vtanh.f32 %v9656_v59 }
 0x7ad   :  { %v13959_v58 = vpop.eup %13958 }
 0x7ae   :  { %v13961_v38 = vpop.eup %13960  ;;  %v9731_v30 = vadd.f32 1.0, %v13959_v58 }
 0x7af   :  { %v9737_v31 = vadd.f32 1.0, %v13961_v38 }
 0x7b0   :  { %13966 = vrcp.f32 %v9731_v30  ;;  %v8376_v30 = vadd.f32 %v18319_v24, %v18304_v43 }
 0x7b1   :  { %13968 = vrcp.f32 %v9737_v31  ;;  %v8517_v31 = vadd.f32 %v18324_v19, %v18306_v35  ;;  %v8658_v35 = vadd.f32 %v18338_v53, %v18308_v3 }
 0x7b6   :  { %v13963_v44 = vpop.eup %13962 }
 0x7b7   :  { %v13965_v9 = vpop.eup %13964  ;;  %v9744_v49 = vadd.f32 1.0, %v13963_v44 }
 0x7b9   :  { %13970 = vrcp.f32 %v9744_v49 }
 0x7bd   :  { %v13967_v63 = vpop.eup %13966 }
 0x7be   :  { %v13969_v2 = vpop.eup %13968  ;;  %v9748_v8 = vmul.f32 %v13967_v63, %v13965_v9 }
 0x7bf   :  { %v9747_v51 = vmul.f32 %v13969_v2, %v18398_v37 }
 0x7c1   :  { %v18454_v10 = vadd.f32 %v9748_v8, %v9747_v51 }
 0x7c3   :  { %13972 = vtanh.f32 %v18454_v10 }
 0x7c6   :  { %v13971_v4 = vpop.eup %13970 }
 0x7d0   :  { %v13973_v39 = vpop.eup %13972 }
 0x7d1   :  { %v9751_v55 = vmul.f32 %v13973_v39, %v13971_v4  ;;  %v8799_v39 = vadd.f32 %v18331_v40, %v18310_v16 }
 0x7d3   :  { %13799 = vmatmul.mubr.msk.f32.vlgmr.msra.gmra.mxu1 %vm3952_vm3, %v9751_v55  ;;  %13810 = vmatmul.mubr.msk.f32.vlgmr.msra.gmra.mxu0 %vm3952_vm3, %v9751_v55 }
 0x7d4   :  { %13813 = vmatpush3.msra.mxu1 %v18189_v5  ;;  %13824 = vmatpush3.msra.mxu0 %v18194_v45 }
 0x7d5   :  { %13814 = vmatprep.subr.mxu1 %v18988_v23  ;;  %13825 = vmatprep.subr.mxu0 %v18988_v23 }
 0x7d6   :  { %13815 = vmatpush3.msra.mxu1 %v18203_v0  ;;  %13826 = vmatpush3.msra.mxu0 %v18208_v20 }
 0x7d7   :  { %13816 = vmatprep.subr.mxu1 %v18988_v23  ;;  %13827 = vmatprep.subr.mxu0 %v18988_v23 }
 0x7d8   :  { %13817 = vmatpush3.msra.mxu1 %v18217_v18  ;;  %13828 = vmatpush3.msra.mxu0 %v18222_v50 }
 0x7d9   :  { %13818 = vmatprep.subr.mxu1 %v18988_v23  ;;  %13829 = vmatprep.subr.mxu0 %v18988_v23 }
 0x7da   :  { %13819 = vmatpush3.msra.mxu1 %v18231_v14  ;;  %13820 = vmatprep.mubr.msk.f32.mxu1 %vm14130_vm1, %v18988_v23 }
 0x7db   :  { %13830 = vmatpush3.msra.mxu0 %v18238_v17  ;;  %13831 = vmatprep.mubr.msk.f32.mxu0 %vm14130_vm1, %v18988_v23 }
 0x7dc   :  { %13821 = vmatmul.mubr.msk.f32.vlgmr.msra.gmra.mxu1 %vm3952_vm3, %v9751_v55  ;;  %13832 = vmatmul.mubr.msk.f32.vlgmr.msra.gmra.mxu0 %vm3952_vm3, %v9751_v55 }
 0x7dd   :  { %13834 = vmatprep.subr.mxu1 %v18988_v23  ;;  %13845 = vmatprep.subr.mxu0 %v18988_v23 }
 0x7de   :  { %13835 = vmatpush3.msra.mxu1 %v18127_v60  ;;  %13846 = vmatpush3.msra.mxu0 %v18132_v26  ;;  %v7804_v60 = vadd.f32 %v18319_v24, %v18296_v47  ;;  %v7945_v26 = vadd.f32 %v18324_v19, %v18298_v21  ;;  %v8086_v21 = vadd.f32 %v18338_v53, %v18300_v22 }
 0x7df   :  { %13836 = vmatprep.subr.mxu1 %v18988_v23  ;;  %13847 = vmatprep.subr.mxu0 %v18988_v23 }
 0x7e0   :  { %13837 = vmatpush3.msra.mxu1 %v18141_v42  ;;  %13848 = vmatpush3.msra.mxu0 %v18146_v33 }
 0x7e1   :  { %13838 = vmatprep.subr.mxu1 %v18988_v23  ;;  %13849 = vmatprep.subr.mxu0 %v18988_v23 }
 0x7e2   :  { %13839 = vmatpush3.msra.mxu1 %v18155_v27  ;;  %13850 = vmatpush3.msra.mxu0 %v18160_v12 }
 0x7e3   :  { %13840 = vmatprep.subr.mxu1 %v18988_v23  ;;  %13851 = vmatprep.subr.mxu0 %v18988_v23 }
 0x7e4   :  { %13841 = vmatpush3.msra.mxu1 %v18169_v36  ;;  %13852 = vmatpush3.msra.mxu0 %v18176_v6 }
 0x7e5   :  { %13842 = vmatprep.mubr.msk.f32.mxu1 %vm14130_vm1, %v18988_v23  ;;  %13853 = vmatprep.mubr.msk.f32.mxu0 %vm14130_vm1, %v18988_v23 }
 0x7e6   :  { %13856 = vmatprep.subr.mxu1 %v18988_v23  ;;  %13867 = vmatprep.subr.mxu0 %v18988_v23 }
 0x893   :  { %v9821_v42 = vpop.f32.mrf.mxu1  ;;  %v9892_v33 = vpop.f32.mrf.mxu0 }
 0x894   :  { %v9825_v27 = vadd.f32 %v9821_v42, %v7804_v60  ;;  %v9896_v12 = vadd.f32 %v9892_v33, %v7945_v26 }
 0x895   :  { %v13800_v36 = vpop.f32.mrf.mxu1  ;;  %v13811_v6 = vpop.f32.mrf.mxu0 }
 0x896   :  { %v11264_v37 = vmul.f32 -1.442695, %v9825_v27  ;;  %v11265_v46 = vmul.f32 -1.442695, %v9896_v12 }
 0x898   :  { %13974 = vpow2.f32 %v11264_v37 }
 0x899   :  { %13976 = vpow2.f32 %v11265_v46 }
 0x89c   :  { %v9963_v32 = vpop.f32.mrf.mxu1  ;;  %v10034_v7 = vpop.f32.mrf.mxu0 }
 0x89d   :  { %v10038_v29 = vadd.f32 %v10034_v7, %v8227_v57  ;;  %v9967_v34 = vadd.f32 %v9963_v32, %v8086_v21  ;;  %v10541_v21 = vld [vmem:[%s18641_s13 + $0x20] sm:$0xff] }
 0x89e   :  { %v13822_v47 = vpop.f32.mrf.mxu1  ;;  %v13833_v62 = vpop.f32.mrf.mxu0 }
 0x89f   :  { %v11266_v61 = vmul.f32 -1.442695, %v10038_v29  ;;  %v10544_v29 = vld [vmem:[%s18641_s13 + $0x38] sm:$0xff]  ;;  %v10543_v47 = vld [vmem:[%s18641_s13 + $0x30] sm:$0xff]  ;;  %v10542_v62 = vld [vmem:[%s18641_s13 + $0x28] sm:$0xff] }
 0x8a1   :  { %13978 = vpow2.f32 %v11266_v61  ;;  %v10540_v61 = vld [vmem:[%s18641_s13 + $0x18] sm:$0xff] }
 0x8a2   :  { %13980 = vtanh.f32 %v9967_v34  ;;  %v10539_v34 = vld [vmem:[%s18641_s13 + $0x10] sm:$0xff] }
 0x8a5   :  { %v13975_v56 = vpop.eup %13974 }
 0x8a6   :  { %v13977_v15 = vpop.eup %13976  ;;  %v10042_v41 = vadd.f32 1.0, %v13975_v56  ;;  %v10538_v56 = vld [vmem:[%s18641_s13 + $0x8] sm:$0xff] }
 0x8a7   :  { %v10048_v1 = vadd.f32 1.0, %v13977_v15  ;;  %v10537_v15 = vld [vmem:[%s18641_s13] sm:$0xff] }
 0x8a8   :  { %13982 = vrcp.f32 %v10042_v41 }
 0x8a9   :  { %13984 = vrcp.f32 %v10048_v1 }
 0x8ae   :  { %v13979_v28 = vpop.eup %13978 }
 0x8af   :  { %v13981_v13 = vpop.eup %13980  ;;  %v10055_v54 = vadd.f32 1.0, %v13979_v28 }
 0x8b1   :  { %13986 = vrcp.f32 %v10055_v54 }
 0x8b5   :  { %v13983_v48 = vpop.eup %13982 }
 0x8b6   :  { %v13985_v11 = vpop.eup %13984  ;;  %v10059_v52 = vmul.f32 %v13983_v48, %v13981_v13  ;;  %v11276_v13 = vld [vmem:[%s18640_s12] ss:$0 sm:$0xff]  ;;  %s14131_s12 = smov [#allocation2]  }
 0x8b7   :  { %v10058_v25 = vmul.f32 %v13985_v11, %v18454_v10  ;;  %s10646_s13 = sshll.u32 %s14131_s12, 4  ;;  %s10647_s13 = int_to_ptr.vmem [resolvable:$true] %s10646_s13 }
 0x8b8   :  { %p14112_p1 = scmp.lt.s32.totalorder %s10647_s13, %s10647_s13 }
 0x8b9   :  { %v18510_v59 = vadd.f32 %v10059_v52, %v10058_v25  ;;  %v11277_v25 = vld [vmem:[%s18642_s14] ss:$0 sm:$0xff]  ;;  %s14107_s14 = scalar_lea.vmem %s10647_s13, 32 }
 0x8ba   :  { %p14108_p0 = scmp.ne.s32.totalorder %s10647_s13, %s14107_s14  ;;  %p14113_p2 = scmp.lt.s32.totalorder %s14107_s14, %s14107_s14 }
 0x8bb   :  { %13988 = vtanh.f32 %v18510_v59 }
 0x8bc   :  { %p14114_p3 = por %p14113_p2, %p14112_p1 }
 0x8be   :  { %v13987_v22 = vpop.eup %13986  ;;  %p14115_p4 = pnand %p14114_p3, %p14108_p0 }
 0x8c8   :  { %v13989_v58 = vpop.eup %13988 }
 0x8c9   :  { %v10062_v38 = vmul.f32 %v13989_v58, %v13987_v22 }
 0x8cb   :  { %13843 = vmatmul.mubr.msk.f32.vlgmr.msra.gmra.mxu1 %vm3952_vm3, %v10062_v38  ;;  %13854 = vmatmul.mubr.msk.f32.vlgmr.msra.gmra.mxu0 %vm3952_vm3, %v10062_v38 }
 0x8cc   :  { %13857 = vmatpush3.msra.mxu1 %v18189_v5  ;;  %13868 = vmatpush3.msra.mxu0 %v18194_v45  ;;  %v10381_v5 = vld [vmem:[%s18639_s11 + $0x18] sm:$0xff]  ;;  %v10380_v45 = vld [vmem:[%s18639_s11 + $0x10] sm:$0xff] }
 0x8cd   :  { %13858 = vmatprep.subr.mxu1 %v18988_v23  ;;  %13869 = vmatprep.subr.mxu0 %v18988_v23 }
 0x8ce   :  { %13859 = vmatpush3.msra.mxu1 %v18203_v0  ;;  %13870 = vmatpush3.msra.mxu0 %v18208_v20  ;;  %v10379_v0 = vld [vmem:[%s18639_s11 + $0x8] sm:$0xff]  ;;  %v10378_v20 = vld [vmem:[%s18639_s11] sm:$0xff] }
 0x8cf   :  { %13860 = vmatprep.subr.mxu1 %v18988_v23  ;;  %13871 = vmatprep.subr.mxu0 %v18988_v23 }
 0x8d0   :  { %13861 = vmatpush3.msra.mxu1 %v18217_v18  ;;  %13872 = vmatpush3.msra.mxu0 %v18222_v50  ;;  %v10377_v18 = vld [vmem:[%s18638_s10 + $0x18] sm:$0xff]  ;;  %v10376_v50 = vld [vmem:[%s18638_s10 + $0x10] sm:$0xff] }
 0x8d1   :  { %13862 = vmatprep.subr.mxu1 %v18988_v23  ;;  %13873 = vmatprep.subr.mxu0 %v18988_v23 }
 0x8d2   :  { %13863 = vmatpush3.msra.mxu1 %v18231_v14  ;;  %13864 = vmatprep.mubr.msk.f32.mxu1 %vm14130_vm1, %v18988_v23  ;;  %v10375_v14 = vld [vmem:[%s18638_s10 + $0x8] sm:$0xff] }
 0x8d3   :  { %13874 = vmatpush3.msra.mxu0 %v18238_v17  ;;  %13875 = vmatprep.mubr.msk.f32.mxu0 %vm14130_vm1, %v18988_v23  ;;  %v10374_v17 = vld [vmem:[%s18638_s10] sm:$0xff] }
 0x8d4   :  { %13865 = vmatmul.mubr.msk.f32.vlgmr.msra.gmra.mxu1 %vm3952_vm3, %v10062_v38  ;;  %13876 = vmatmul.mubr.msk.f32.vlgmr.msra.gmra.mxu0 %vm3952_vm3, %v10062_v38 }
 0x8d5   :  { %13878 = vmatprep.subr.mxu1 %v18988_v23  ;;  %13886 = vmatprep.mubr.msk.f32.mxu1 %vm14130_vm1, %v18988_v23 }
 0x8d6   :  { %13889 = vmatprep.subr.mxu0 %v18988_v23  ;;  %13897 = vmatprep.mubr.msk.f32.mxu0 %vm14130_vm1, %v18988_v23 }
 0x8d7   :  { %13879 = vmatpush3.msra.mxu1 %v10381_v5  ;;  %13890 = vmatpush3.msra.mxu0 %v10377_v18 }
 0x8d8   :  { %13880 = vmatprep.subr.mxu1 %v18988_v23  ;;  %13891 = vmatprep.subr.mxu0 %v18988_v23 }
 0x8d9   :  { %13881 = vmatpush3.msra.mxu1 %v10380_v45  ;;  %13892 = vmatpush3.msra.mxu0 %v10376_v50 }
 0x8da   :  { %13882 = vmatprep.subr.mxu1 %v18988_v23  ;;  %13893 = vmatprep.subr.mxu0 %v18988_v23 }
 0x8db   :  { %13883 = vmatpush3.msra.mxu1 %v10379_v0  ;;  %13894 = vmatpush3.msra.mxu0 %v10375_v14 }
 0x8dc   :  { %13884 = vmatprep.subr.mxu1 %v18988_v23  ;;  %13895 = vmatprep.subr.mxu0 %v18988_v23 }
 0x8dd   :  { %13885 = vmatpush3.msra.mxu1 %v10378_v20  ;;  %13896 = vmatpush3.msra.mxu0 %v10374_v17 }
 0x8de   :  { %13900 = vmatprep.subr.mxu1 %v18988_v23 }
 0x98b   :  { %v10132_v44 = vpop.f32.mrf.mxu1  ;;  %v10203_v9 = vpop.f32.mrf.mxu0 }
 0x98c   :  { %v10136_v63 = vadd.f32 %v10132_v44, %v8376_v30  ;;  %v10207_v2 = vadd.f32 %v10203_v9, %v8517_v31 }
 0x98d   :  { %v13844_v8 = vpop.f32.mrf.mxu1  ;;  %v13855_v49 = vpop.f32.mrf.mxu0 }
 0x98e   :  { %v11271_v51 = vmul.f32 -1.442695, %v10136_v63  ;;  %v11272_v10 = vmul.f32 -1.442695, %v10207_v2 }
 0x990   :  { %13990 = vpow2.f32 %v11271_v51 }
 0x991   :  { %13992 = vpow2.f32 %v11272_v10 }
 0x994   :  { %v10274_v4 = vpop.f32.mrf.mxu1  ;;  %v10345_v55 = vpop.f32.mrf.mxu0 }
 0x995   :  { %v10349_v60 = vadd.f32 %v10345_v55, %v8799_v39  ;;  %v10278_v26 = vadd.f32 %v10274_v4, %v8658_v35 }
 0x996   :  { %v13866_v43 = vpop.f32.mrf.mxu1  ;;  %v13877_v24 = vpop.f32.mrf.mxu0 }
 0x997   :  { %v11273_v19 = vmul.f32 -1.442695, %v10349_v60 }
 0x999   :  { %13994 = vpow2.f32 %v11273_v19 }
 0x99a   :  { %13996 = vtanh.f32 %v10278_v26 }
 0x99d   :  { %v13991_v42 = vpop.eup %13990 }
 0x99e   :  { %v13993_v33 = vpop.eup %13992  ;;  %v10353_v27 = vadd.f32 1.0, %v13991_v42 }
 0x99f   :  { %v10359_v12 = vadd.f32 1.0, %v13993_v33 }
 0x9a0   :  { %13998 = vrcp.f32 %v10353_v27 }
 0x9a1   :  { %14000 = vrcp.f32 %v10359_v12 }
 0x9a6   :  { %v13995_v36 = vpop.eup %13994 }
 0x9a7   :  { %v13997_v6 = vpop.eup %13996  ;;  %v10366_v46 = vadd.f32 1.0, %v13995_v36 }
 0x9a9   :  { %14002 = vrcp.f32 %v10366_v46 }
 0x9ad   :  { %v13999_v16 = vpop.eup %13998 }
 0x9ae   :  { %v14001_v40 = vpop.eup %14000  ;;  %v10370_v37 = vmul.f32 %v13999_v16, %v13997_v6 }
 0x9af   :  { %v10369_v32 = vmul.f32 %v14001_v40, %v18510_v59 }
 0x9b1   :  { %v10371_v57 = vadd.f32 %v10370_v37, %v10369_v32 }
 0x9b3   :  { %14004 = vtanh.f32 %v10371_v57  ;;  %13887 = vmatmul.mubr.msk.f32.vlgmr.msra.gmra.mxu1 %vm3952_vm3, %v10371_v57 }
 0x9b4   :  { %13916 = vmatprep.mubr.msk.f32.mxu1 %vm14130_vm1, %v18988_v23  ;;  %13901 = vmatpush3.msra.mxu1 %v10544_v29 }
 0x9b5   :  { %13902 = vmatprep.subr.mxu1 %v18988_v23 }
 0x9b6   :  { %v14003_v3 = vpop.eup %14002  ;;  %13903 = vmatpush3.msra.mxu1 %v10543_v47 }
 0x9b7   :  { %13904 = vmatprep.subr.mxu1 %v18988_v23 }
 0x9b8   :  { %13905 = vmatpush3.msra.mxu1 %v10542_v62 }
 0x9b9   :  { %13906 = vmatprep.subr.mxu1 %v18988_v23 }
 0x9ba   :  { %13907 = vmatpush3.msra.mxu1 %v10541_v21 }
 0x9bb   :  { %13908 = vmatprep.subr.mxu1 %v18988_v23 }
 0x9bc   :  { %13909 = vmatpush3.msra.mxu1 %v10540_v61 }
 0x9bd   :  { %13910 = vmatprep.subr.mxu1 %v18988_v23 }
 0x9be   :  { %13911 = vmatpush3.msra.mxu1 %v10539_v34 }
 0x9bf   :  { %13912 = vmatprep.subr.mxu1 %v18988_v23 }
 0x9c0   :  { %v14005_v53 = vpop.eup %14004  ;;  %13913 = vmatpush3.msra.mxu1 %v10538_v56 }
 0x9c1   :  { %v10373_v7 = vmul.f32 %v14005_v53, %v14003_v3  ;;  %13914 = vmatprep.subr.mxu1 %v18988_v23 }
 0x9c2   :  { %13915 = vmatpush3.msra.mxu1 %v10537_v15 }
 0x9c3   :  { %13898 = vmatmul.mubr.msk.f32.vlgmr.msra.gmra.mxu0 %vm3952_vm3, %v10373_v7 }
 0xa73   :  { %v10451_v41 = vpop.f32.mrf.mxu1 }
 0xa75   :  { %v13888_v1 = vpop.f32.mrf.mxu1 }
 0xa83   :  { %v10524_v28 = vpop.f32.mrf.mxu0 }
 0xa84   :  { %v10525_v48 = vadd.f32 %v10524_v28, %v10451_v41 }
 0xa85   :  { %v13899_v11 = vpop.f32.mrf.mxu0 }
 0xa86   :  { %v10535_v52 = vadd.f32 %v11276_v13, %v10525_v48 }
 0xa88   :  { %v10536_v54 = vmax.f32 %v10535_v52, 0.0 }
 0xa8a   :  { %13917 = vmatmul.mubr.msk.f32.vlgmr.msra.gmra.mxu1 %vm10552_vm8, %v10536_v54 }
 0xb4a   :  { %v10622_v59 = vpop.f32.mrf.mxu1 }
 0xb4b   :  { %v10623_v23 = vadd.f32 %v11277_v25, %v10622_v59 }
 0xb4c   :  { %v13918_v22 = vpop.f32.mrf.mxu1 }
 0xb4d   :  { %v10627_v58 = vsel %vm10626_vm9, %v10623_v23, -inf }
 0xb4e   :  { %10628 = vmax.xlane.f32.xlu0 %v10627_v58 }
 0xbd7   :  { %v10629_v38 = vpop.xlane.xlu0 %10628 }
 0xbd8   :  { %v10630_v5 = vsub.f32 %v10623_v23, %v10629_v38 }
 0xbda   :  { %v10631_v45 = vmul.f32 1.442695, %v10630_v5 }
 0xbdc   :  { %14006 = vpow2.f32 %v10631_v45 }
 0xbe9   :  { %v14007_v0 = vpop.eup %14006 }
 0xbea   :  { %v10633_v20 = vsel %vm10626_vm9, %v14007_v0, 0.0 }
 0xbeb   :  { %10634 = vadd.xlane.f32.xlu0 %v10633_v20 }
 0xc74   :  { %v10635_v18 = vpop.xlane.xlu0 %10634 }
 0xc75   :  { %14008 = vlog2.f32 %v10635_v18 }
 0xc82   :  { %v14009_v50 = vpop.eup %14008 }
 0xc83   :  { %v10637_v14 = vmul.f32 0.6931472, %v14009_v50 }
 0xc85   :  { %v10638_v17 = vsub.f32 %v10630_v5, %v10637_v14 }
 0xc87   :  { %10639 = vst.msk [vmem:[#allocation2] sm:$0x3] %vm10626_vm9, %v10638_v17 }
 0xc88   :  { %14118 = shalt.err (!%p14115_p4)
}
 0xc89   :  { %10649 = dma.vmem_to_hbm [thread:$0]  %s10647_s13, 32, %s18643_s15, [#allocation3]  }
 0xc8a   :  { %14127 = dma.done.wait [#allocation3], 32  }
 0xc8b   :  { %14128 = vsyncadd [#allocation3], 4294967264 }
 0xc8c   :  { %10653 = vsyncpa [#allocation3], 1 }

</bundles_post_ra>
